<compile_context>
chip_gen: v5e
topology: v5e:2x2
jax: 0.10.0
libtpu: 0.0.40
codegen_flags: <defaults>
</compile_context>

<pallas_src>
import math

import jax
import jax.numpy as jnp
import numpy as np
from jax.experimental import pallas as pl
from jax.experimental.pallas import tpu as pltpu

_NEG_SLOPE = 0.01  # nn.LeakyReLU default negative_slope


def _make_kernel(n_hidden):
    def kernel(x_ref, gcodes_ref, *refs):
        deform_ref, attn_ref = refs[-2], refs[-1]
        wb = refs[:-2]  # interleaved: w0, b0, w1, b1, ..., Wqg, bqg

        # MLP hidden layers: bf16 MXU matmuls, f32 accumulation, f32 bias/activation.
        h = x_ref[...].astype(jnp.bfloat16)                      # (TN, 3)
        for l in range(n_hidden):
            w = wb[2 * l][...]                                   # (in, out) bf16
            b = wb[2 * l + 1][...]                               # (1, out) f32
            h = jnp.dot(h, w, preferred_element_type=jnp.float32) + b
            h = jnp.maximum(h, _NEG_SLOPE * h)                   # LeakyReLU (f32)
            h = h.astype(jnp.bfloat16)

        # Attention scores: last Linear folded with gcodes.T and 1/sqrt(d_k)
        # in the wrapper, so a single matmul produces the scores directly.
        wqg = wb[2 * n_hidden][...]                              # (H_last, G) bf16
        bqg = wb[2 * n_hidden + 1][...]                          # (1, G) f32
        s = jnp.dot(h, wqg, preferred_element_type=jnp.float32) + bqg

        # Row softmax in f32; divide goes through pl.reciprocal (EUP slot).
        m = jnp.max(s, axis=-1, keepdims=True)
        p = jnp.exp(s - m)
        inv = pl.reciprocal(jnp.sum(p, axis=-1, keepdims=True), approx=False)
        attn = p * inv
        attn_ref[...] = attn.astype(attn_ref.dtype)

        # attn @ gcodes kept f32 (tiny matmul) so the deformation stays accurate.
        deform_ref[...] = jnp.dot(attn, gcodes_ref[...],
                                  preferred_element_type=jnp.float32
                                  ).astype(deform_ref.dtype)

    return kernel


def init_deform_field_params(key, d_fcode, d_feature, d_hidden, *, d_in=3,
                             bn_eps=1e-5):
    """Params matching DeformField.__init__ (MLP(3+d_fcode, d_feature, d_hidden,
    act=LeakyReLU, bn=BatchNorm1d, zero_init=True)).  BN running stats are
    randomized (as-if trained) so the eval-mode fold is exercised."""
    n_hidden = len(d_hidden)
    dims = [d_in + d_fcode] + list(d_hidden)
    keys = jax.random.split(key, 6 * n_hidden + 2)
    ki = 0
    linears, bns = [], []
    for l in range(n_hidden):
        fan_in, fan_out = dims[l], dims[l + 1]
        bound = 1.0 / math.sqrt(fan_in)
        w = jax.random.uniform(keys[ki], (fan_out, fan_in), jnp.float32,
                               -bound, bound); ki += 1
        b = jax.random.uniform(keys[ki], (fan_out,), jnp.float32,
                               -bound, bound); ki += 1
        linears.append((w, b))
        gamma = 1.0 + 0.1 * jax.random.normal(keys[ki], (fan_out,), jnp.float32); ki += 1
        beta = 0.1 * jax.random.normal(keys[ki], (fan_out,), jnp.float32); ki += 1
        mean = 0.1 * jax.random.normal(keys[ki], (fan_out,), jnp.float32); ki += 1
        var = 0.5 + jax.random.uniform(keys[ki], (fan_out,), jnp.float32); ki += 1
        bns.append((gamma, beta, mean, var, bn_eps))
    # final linear with zero_init=True: weight ~ N(0, 1e-6), bias ~ N(0, 1e-5)
    w_last = 1e-6 * jax.random.normal(keys[ki], (d_feature, d_hidden[-1]),
                                      jnp.float32); ki += 1
    b_last = 1e-5 * jax.random.normal(keys[ki], (d_feature,), jnp.float32); ki += 1
    linears.append((w_last, b_last))
    return {"linears": linears, "bns": bns}


def deform_field_forward(x, fcode, gcodes, params, *, tile_n=4096):
    """x: (N, 3) f32, fcode: (1, d_fcode), gcodes: (G, d_feature).
    Returns (x, attn @ gcodes, attn) like DeformField.forward."""
    N, d_in = x.shape
    n_gcodes, d_feature = gcodes.shape
    linears = params["linears"]
    bns = params["bns"]
    n_hidden = len(bns)
    assert len(linears) == n_hidden + 1 and n_hidden >= 1

    # Large N-tiles amortize per-grid-step overhead and MXU weight pushes.
    # Working set is only a few KB per row, so 4096 stays well under the
    # 48 MiB scoped-VMEM limit set below (also safe on v7x's 64 MiB VMEM).
    tile_n = min(tile_n, N)
    assert N % tile_n == 0, "N must be a multiple of tile_n"

    d_k_scale = 1.0 / math.sqrt(d_feature)
    gcodes_f = jnp.asarray(gcodes, jnp.float32)              # (G, d_feature)

    # ---- wrapper-side constant algebra (glue, runs once in XLA) ----
    flat_wb = []
    for l in range(n_hidden):
        w, b = linears[l]
        w = jnp.asarray(w, jnp.float32)                      # (out, in) torch layout
        b = jnp.asarray(b, jnp.float32)                      # (out,)
        if l == 0:
            # cat([x, fcode]) @ W0.T + b0 == x @ W0[:, :3].T + (fcode @ W0[:, 3:].T + b0)
            fvec = jnp.asarray(fcode, jnp.float32).reshape(-1)
            b = b + w[:, d_in:] @ fvec
            w = w[:, :d_in]
        gamma, beta, mean, var, eps = bns[l]
        scale = jnp.asarray(gamma, jnp.float32) / jnp.sqrt(
            jnp.asarray(var, jnp.float32) + eps)             # eval-mode BN fold
        w = w * scale[:, None]
        b = (b - jnp.asarray(mean, jnp.float32)) * scale + jnp.asarray(beta, jnp.float32)
        flat_wb.append(w.T.astype(jnp.bfloat16))             # (in, out), bf16 MXU operand
        flat_wb.append(b.reshape(1, -1))                     # (1, out) f32 bias
    # Fold the final (zero-init) Linear + 1/sqrt(d_k) into the score matmul:
    #   s = (h @ W_last.T + b_last) @ gcodes.T / sqrt(d_k) = h @ Wqg + bqg
    w_last = jnp.asarray(linears[-1][0], jnp.float32)        # (d_feature, H_last)
    b_last = jnp.asarray(linears[-1][1], jnp.float32)        # (d_feature,)
    wqg = (w_last.T @ gcodes_f.T) * d_k_scale                # (H_last, G)
    bqg = (b_last @ gcodes_f.T) * d_k_scale                  # (G,)
    flat_wb.append(wqg.astype(jnp.bfloat16))
    flat_wb.append(bqg.reshape(1, -1))                       # f32

    kernel = _make_kernel(n_hidden)

    in_specs = [
        pl.BlockSpec((tile_n, d_in), lambda i: (i, 0)),          # x, tiled over N
        pl.BlockSpec((n_gcodes, d_feature), lambda i: (0, 0)),   # gcodes (f32, for attn@gcodes)
    ]
    for arr in flat_wb:                                          # full weight / bias tiles
        in_specs.append(pl.BlockSpec(arr.shape, lambda i: (0, 0)))

    out_shape = (
        jax.ShapeDtypeStruct((N, d_feature), jnp.float32),       # attn @ gcodes
        jax.ShapeDtypeStruct((N, n_gcodes), jnp.float32),        # attn
    )
    out_specs = (
        pl.BlockSpec((tile_n, d_feature), lambda i: (i, 0)),
        pl.BlockSpec((tile_n, n_gcodes), lambda i: (i, 0)),
    )

    # Cost estimate for the folded / bf16 kernel.
    flops = sum(2 * N * w.shape[0] * w.shape[1] for w in flat_wb[0::2])
    flops += 2 * N * n_gcodes * d_feature                        # attn @ gcodes
    weight_bytes = sum(int(a.size) * a.dtype.itemsize for a in flat_wb)
    cost = pl.CostEstimate(
        flops=int(flops),
        transcendentals=int(N * n_gcodes + N),                   # exp + reciprocal
        bytes_accessed=int(4 * x.size + 4 * gcodes_f.size + weight_bytes
                           + 4 * N * (d_feature + n_gcodes)),
    )

    deformed, attn = pl.pallas_call(
        kernel,
        out_shape=out_shape,
        grid=(N // tile_n,),
        in_specs=in_specs,
        out_specs=out_specs,
        compiler_params=pltpu.CompilerParams(
            dimension_semantics=("parallel",),
            vmem_limit_bytes=48 * 1024 * 1024),
        cost_estimate=cost,
    )(jnp.asarray(x, jnp.float32), gcodes_f, *flat_wb)

    return x, deformed, attn


def deform_field_ref(x, fcode, gcodes, params):
    """Pure-JAX reference mirroring DeformField.forward (eval-mode BN)."""
    linears = params["linears"]
    bns = params["bns"]
    n_hidden = len(bns)
    w = jnp.tile(jnp.asarray(fcode).reshape(1, -1), (x.shape[0], 1))
    h = jnp.concatenate([x, w], axis=-1)
    for l, (W, b) in enumerate(linears):
        h = h @ W.T + b
        if l < n_hidden:
            gamma, beta, mean, var, eps = bns[l]
            h = (h - mean) / jnp.sqrt(var + eps) * gamma + beta
            h = jnp.where(h > 0, h, _NEG_SLOPE * h)          # LeakyReLU
    d_k = h.shape[-1]
    s = h @ gcodes.T / math.sqrt(d_k)
    attn = jax.nn.softmax(s, axis=-1)
    return x, attn @ gcodes, attn


if __name__ == "__main__":
    # Small shapes consistent with the module: 3D points + a global frame code,
    # two hidden layers, a handful of global codes to attend over.
    d_fcode, d_feature, n_gcodes = 8, 32, 16
    d_hidden = (128, 128)
    N = 1024   # single grid step at this size (best for single-TC v5e/v6e)

    key = jax.random.PRNGKey(0)
    k_x, k_f, k_g, k_p = jax.random.split(key, 4)
    x = jax.random.normal(k_x, (N, 3), jnp.float32)
    fcode = jax.random.normal(k_f, (1, d_fcode), jnp.float32)
    gcodes = jax.random.normal(k_g, (n_gcodes, d_feature), jnp.float32)

    params = init_deform_field_params(k_p, d_fcode, d_feature, d_hidden)

    x_out, deformed, attn = deform_field_forward(x, fcode, gcodes, params)
    deformed = jax.block_until_ready(deformed)
    attn = jax.block_until_ready(attn)

    x_ref, deformed_ref, attn_ref = deform_field_ref(x, fcode, gcodes, params)
    # bf16 MXU operands (f32 accumulation) => slightly relaxed tolerance vs 1e-5;
    # softmax/attn@gcodes stay f32 so the outputs remain very close to the f32 ref.
    np.testing.assert_allclose(np.asarray(attn), np.asarray(attn_ref),
                               rtol=1e-4, atol=1e-4)
    np.testing.assert_allclose(np.asarray(deformed), np.asarray(deformed_ref),
                               rtol=1e-4, atol=1e-4)
    np.testing.assert_allclose(np.asarray(x_out), np.asarray(x_ref),
                               rtol=0, atol=0)

    print("KERNEL_OK")
</pallas_src>

<mosaic_0001>
module attributes {stable_mosaic.version = 11 : i64} {
  func.func @kernel(%arg0: i32, %arg1: memref<1024x3xf32, #tpu.memory_space<vmem>>, %arg2: memref<16x32xf32, #tpu.memory_space<vmem>>, %arg3: memref<3x128xbf16, #tpu.memory_space<vmem>>, %arg4: memref<1x128xf32, #tpu.memory_space<vmem>>, %arg5: memref<128x128xbf16, #tpu.memory_space<vmem>>, %arg6: memref<1x128xf32, #tpu.memory_space<vmem>>, %arg7: memref<128x16xbf16, #tpu.memory_space<vmem>>, %arg8: memref<1x16xf32, #tpu.memory_space<vmem>>, %arg9: memref<1024x32xf32, #tpu.memory_space<vmem>>, %arg10: memref<1024x16xf32, #tpu.memory_space<vmem>>) attributes {dimension_semantics = [#tpu.dimension_semantics<parallel>], iteration_bounds = array<i64: 1>, scalar_prefetch = 0 : i64, scratch_operands = 0 : i64, tpu.core_type = #tpu.core_type<tc>, window_params = [{transform_indices = @transform_0, window_bounds = array<i64: 1024, 3>}, {pipeline_mode = #tpu.pipeline_mode<synchronous>, transform_indices = @transform_1, window_bounds = array<i64: 16, 32>}, {pipeline_mode = #tpu.pipeline_mode<synchronous>, transform_indices = @transform_2, window_bounds = array<i64: 3, 128>}, {pipeline_mode = #tpu.pipeline_mode<synchronous>, transform_indices = @transform_3, window_bounds = array<i64: 1, 128>}, {pipeline_mode = #tpu.pipeline_mode<synchronous>, transform_indices = @transform_4, window_bounds = array<i64: 128, 128>}, {pipeline_mode = #tpu.pipeline_mode<synchronous>, transform_indices = @transform_5, window_bounds = array<i64: 1, 128>}, {pipeline_mode = #tpu.pipeline_mode<synchronous>, transform_indices = @transform_6, window_bounds = array<i64: 128, 16>}, {pipeline_mode = #tpu.pipeline_mode<synchronous>, transform_indices = @transform_7, window_bounds = array<i64: 1, 16>}, {transform_indices = @transform_8, window_bounds = array<i64: 1024, 32>}, {transform_indices = @transform_9, window_bounds = array<i64: 1024, 16>}]} {
    %c0 = arith.constant 0 : index
    %c0_0 = arith.constant 0 : index
    %0 = vector.load %arg1[%c0, %c0_0] : memref<1024x3xf32, #tpu.memory_space<vmem>>, vector<1024x3xf32>
    %1 = arith.truncf %0 : vector<1024x3xf32> to vector<1024x3xbf16>
    %c0_1 = arith.constant 0 : index
    %c0_2 = arith.constant 0 : index
    %2 = vector.load %arg3[%c0_1, %c0_2] : memref<3x128xbf16, #tpu.memory_space<vmem>>, vector<3x128xbf16>
    %c0_3 = arith.constant 0 : index
    %c0_4 = arith.constant 0 : index
    %3 = vector.load %arg4[%c0_3, %c0_4] : memref<1x128xf32, #tpu.memory_space<vmem>>, vector<1x128xf32>
    %cst = arith.constant dense<0.000000e+00> : vector<1024x128xf32>
    %4 = tpu.matmul %1, %2, %cst {dimension_numbers = #tpu.dot_dimension_numbers<[1], [0], [0], [1], [0, 0, 1, 1], [], []>} : vector<1024x3xbf16>, vector<3x128xbf16>, vector<1024x128xf32> -> vector<1024x128xf32>
    %5 = vector.broadcast %3 : vector<1x128xf32> to vector<1024x128xf32>
    %6 = arith.addf %4, %5 : vector<1024x128xf32>
    %cst_5 = arith.constant 0.00999999977 : f32
    %7 = vector.broadcast %cst_5 : f32 to vector<1024x128xf32>
    %8 = arith.mulf %7, %6 : vector<1024x128xf32>
    %9 = arith.maximumf %6, %8 : vector<1024x128xf32>
    %10 = arith.truncf %9 : vector<1024x128xf32> to vector<1024x128xbf16>
    %c0_6 = arith.constant 0 : index
    %c0_7 = arith.constant 0 : index
    %11 = vector.load %arg5[%c0_6, %c0_7] : memref<128x128xbf16, #tpu.memory_space<vmem>>, vector<128x128xbf16>
    %c0_8 = arith.constant 0 : index
    %c0_9 = arith.constant 0 : index
    %12 = vector.load %arg6[%c0_8, %c0_9] : memref<1x128xf32, #tpu.memory_space<vmem>>, vector<1x128xf32>
    %cst_10 = arith.constant dense<0.000000e+00> : vector<1024x128xf32>
    %13 = tpu.matmul %10, %11, %cst_10 {dimension_numbers = #tpu.dot_dimension_numbers<[1], [0], [0], [1], [0, 0, 1, 1], [], []>} : vector<1024x128xbf16>, vector<128x128xbf16>, vector<1024x128xf32> -> vector<1024x128xf32>
    %14 = vector.broadcast %12 : vector<1x128xf32> to vector<1024x128xf32>
    %15 = arith.addf %13, %14 : vector<1024x128xf32>
    %cst_11 = arith.constant 0.00999999977 : f32
    %16 = vector.broadcast %cst_11 : f32 to vector<1024x128xf32>
    %17 = arith.mulf %16, %15 : vector<1024x128xf32>
    %18 = arith.maximumf %15, %17 : vector<1024x128xf32>
    %19 = arith.truncf %18 : vector<1024x128xf32> to vector<1024x128xbf16>
    %c0_12 = arith.constant 0 : index
    %c0_13 = arith.constant 0 : index
    %20 = vector.load %arg7[%c0_12, %c0_13] : memref<128x16xbf16, #tpu.memory_space<vmem>>, vector<128x16xbf16>
    %c0_14 = arith.constant 0 : index
    %c0_15 = arith.constant 0 : index
    %21 = vector.load %arg8[%c0_14, %c0_15] : memref<1x16xf32, #tpu.memory_space<vmem>>, vector<1x16xf32>
    %cst_16 = arith.constant dense<0.000000e+00> : vector<1024x16xf32>
    %22 = tpu.matmul %19, %20, %cst_16 {dimension_numbers = #tpu.dot_dimension_numbers<[1], [0], [0], [1], [0, 0, 1, 1], [], []>} : vector<1024x128xbf16>, vector<128x16xbf16>, vector<1024x16xf32> -> vector<1024x16xf32>
    %23 = vector.broadcast %21 : vector<1x16xf32> to vector<1024x16xf32>
    %24 = arith.addf %22, %23 : vector<1024x16xf32>
    %cst_17 = arith.constant dense<0xFF800000> : vector<1024xf32>
    %25 = vector.multi_reduction <maximumf>, %24, %cst_17 [1] : vector<1024x16xf32> to vector<1024xf32>
    %26 = vector.shape_cast %25 : vector<1024xf32> to vector<1024x1xf32>
    %27 = vector.broadcast %26 : vector<1024x1xf32> to vector<1024x16xf32>
    %28 = arith.subf %24, %27 : vector<1024x16xf32>
    %29 = math.exp %28 : vector<1024x16xf32>
    %cst_18 = arith.constant dense<0.000000e+00> : vector<1024xf32>
    %30 = vector.multi_reduction <add>, %29, %cst_18 [1] : vector<1024x16xf32> to vector<1024xf32>
    %31 = vector.shape_cast %30 : vector<1024xf32> to vector<1024x1xf32>
    %32 = tpu.reciprocal %31 : vector<1024x1xf32> -> vector<1024x1xf32>
    %33 = vector.broadcast %32 : vector<1024x1xf32> to vector<1024x16xf32>
    %34 = arith.mulf %29, %33 : vector<1024x16xf32>
    %c0_19 = arith.constant 0 : index
    %c0_20 = arith.constant 0 : index
    %35 = vector.load %arg10[%c0_19, %c0_20] : memref<1024x16xf32, #tpu.memory_space<vmem>>, vector<1024x16xf32>
    tpu.vector_store %arg10[%c0_19, %c0_20], %34 {strides = array<i32>} : memref<1024x16xf32, #tpu.memory_space<vmem>>, vector<1024x16xf32>,
    %c0_21 = arith.constant 0 : index
    %c0_22 = arith.constant 0 : index
    %36 = vector.load %arg2[%c0_21, %c0_22] : memref<16x32xf32, #tpu.memory_space<vmem>>, vector<16x32xf32>
    %cst_23 = arith.constant dense<0.000000e+00> : vector<1024x32xf32>
    %37 = tpu.matmul %34, %36, %cst_23 {dimension_numbers = #tpu.dot_dimension_numbers<[1], [0], [0], [1], [0, 0, 1, 1], [], []>} : vector<1024x16xf32>, vector<16x32xf32>, vector<1024x32xf32> -> vector<1024x32xf32>
    %c0_24 = arith.constant 0 : index
    %c0_25 = arith.constant 0 : index
    %38 = vector.load %arg9[%c0_24, %c0_25] : memref<1024x32xf32, #tpu.memory_space<vmem>>, vector<1024x32xf32>
    tpu.vector_store %arg9[%c0_24, %c0_25], %37 {strides = array<i32>} : memref<1024x32xf32, #tpu.memory_space<vmem>>, vector<1024x32xf32>,
    return
  }
  func.func @transform_0(%arg0: i32) -> (i32, i32) {
    %c0_i32 = arith.constant 0 : i32
    %c0_i32_0 = arith.constant 0 : i32
    return %arg0, %c0_i32 : i32, i32
  }
  func.func @transform_1(%arg0: i32) -> (i32, i32) {
    %c0_i32 = arith.constant 0 : i32
    %c0_i32_0 = arith.constant 0 : i32
    %c0_i32_1 = arith.constant 0 : i32
    return %c0_i32, %c0_i32_0 : i32, i32
  }
  func.func @transform_2(%arg0: i32) -> (i32, i32) {
    %c0_i32 = arith.constant 0 : i32
    %c0_i32_0 = arith.constant 0 : i32
    %c0_i32_1 = arith.constant 0 : i32
    return %c0_i32, %c0_i32_0 : i32, i32
  }
  func.func @transform_3(%arg0: i32) -> (i32, i32) {
    %c0_i32 = arith.constant 0 : i32
    %c0_i32_0 = arith.constant 0 : i32
    %c0_i32_1 = arith.constant 0 : i32
    return %c0_i32, %c0_i32_0 : i32, i32
  }
  func.func @transform_4(%arg0: i32) -> (i32, i32) {
    %c0_i32 = arith.constant 0 : i32
    %c0_i32_0 = arith.constant 0 : i32
    %c0_i32_1 = arith.constant 0 : i32
    return %c0_i32, %c0_i32_0 : i32, i32
  }
  func.func @transform_5(%arg0: i32) -> (i32, i32) {
    %c0_i32 = arith.constant 0 : i32
    %c0_i32_0 = arith.constant 0 : i32
    %c0_i32_1 = arith.constant 0 : i32
    return %c0_i32, %c0_i32_0 : i32, i32
  }
  func.func @transform_6(%arg0: i32) -> (i32, i32) {
    %c0_i32 = arith.constant 0 : i32
    %c0_i32_0 = arith.constant 0 : i32
    %c0_i32_1 = arith.constant 0 : i32
    return %c0_i32, %c0_i32_0 : i32, i32
  }
  func.func @transform_7(%arg0: i32) -> (i32, i32) {
    %c0_i32 = arith.constant 0 : i32
    %c0_i32_0 = arith.constant 0 : i32
    %c0_i32_1 = arith.constant 0 : i32
    return %c0_i32, %c0_i32_0 : i32, i32
  }
  func.func @transform_8(%arg0: i32) -> (i32, i32) {
    %c0_i32 = arith.constant 0 : i32
    %c0_i32_0 = arith.constant 0 : i32
    return %arg0, %c0_i32 : i32, i32
  }
  func.func @transform_9(%arg0: i32) -> (i32, i32) {
    %c0_i32 = arith.constant 0 : i32
    %c0_i32_0 = arith.constant 0 : i32
    return %arg0, %c0_i32 : i32, i32
  }
}

</mosaic_0001>

<bundles_post_ra>
// kernel: tpu_custom_call.1
= control target key start
LH: loop header
LB: loop body
LE: loop exit
PB: predicated region body
PF: predicated region fallthrough
CT: control target
= control target key end

     0   :  { %vm422_vm0 = vcmask 1040384   ;;  %vm423_vm1 = vcmask 1041408   ;;  %v7126_v1 = vmov 65535   ;;  %vm229_vm2 = vcmask 23552   ;;  %s11483_s2 = inlined_call_operand.vmem [shape: bf16[3,128], index: 2, kind: input, shape index: {}]   ;;  %s11484_s0 = inlined_call_operand.vmem [shape: f32[1024,3], index: 0, kind: input, shape index: {}]   ;;  %s11485_s3 = inlined_call_operand.vmem [shape: f32[1,128], index: 3, kind: input, shape index: {}]   ;;  %s11486_s4 = inlined_call_operand.vmem [shape: bf16[128,128], index: 4, kind: input, shape index: {}]   ;;  %s11487_s5 = inlined_call_operand.vmem [shape: f32[1,128], index: 5, kind: input, shape index: {}]   ;;  %s11488_s6 = inlined_call_operand.vmem [shape: bf16[128,16], index: 6, kind: input, shape index: {}]   ;;  %s11489_s7 = inlined_call_operand.vmem [shape: f32[1,16], index: 7, kind: input, shape index: {}]   ;;  %s11490_s1 = inlined_call_operand.vmem [shape: f32[16,32], index: 1, kind: input, shape index: {}]   ;;  %s11491_s9 = inlined_call_operand.vmem [shape: f32[1024,16], index: 9, kind: output, shape index: {1}]   ;;  %s11492_s8 = inlined_call_operand.vmem [shape: f32[1024,32], index: 8, kind: output, shape index: {0}]  }
   0x1   :  { %v224_v0 = vld [vmem:[%s11483_s2] sm:$0x3]  ;;  %v424_v2 = vsel %vm422_vm0, 4294967295, %v7126_v1  ;;  %v33_v4 = vld [vmem:[%s11484_s0 + $0x8] sm:$0xff]  ;;  %v34_v8 = vld [vmem:[%s11484_s0 + $0x10] sm:$0xff]  ;;  %vm2192_vm3 = vcmask 130048  }
   0x2   :  { %v32_v3 = vld [vmem:[%s11484_s0] sm:$0xff]  ;;  %v425_v5 = vsel %vm423_vm1, %v424_v2, 0  ;;  %v35_v9 = vld [vmem:[%s11484_s0 + $0x18] sm:$0xff]  ;;  %v37_v12 = vld [vmem:[%s11484_s0 + $0x28] sm:$0xff] }
   0x3   :  { %v427_v6 = vand.u32 %v425_v5, %v224_v0  ;;  %v160_v7 = vpack.c.bf16 %v33_v4, %v32_v3  ;;  %v161_v10 = vpack.c.bf16 %v35_v9, %v34_v8  ;;  %v36_v11 = vld [vmem:[%s11484_s0 + $0x20] sm:$0xff]  ;;  %v6580_v14 = vld [vmem:[%s11486_s4 + $0x38] sm:$0xff]  ;;  %v6579_v15 = vld [vmem:[%s11486_s4 + $0x30] sm:$0xff] }
   0x4   :  { %v162_v13 = vpack.c.bf16 %v37_v12, %v36_v11  ;;  %1146 = vmatpush.bf16.msra.mxu1 %v6580_v14  ;;  %v6578_v16 = vld [vmem:[%s11486_s4 + $0x28] sm:$0xff]  ;;  %v38_v17 = vld [vmem:[%s11484_s0 + $0x30] sm:$0xff]  ;;  %v39_v18 = vld [vmem:[%s11484_s0 + $0x38] sm:$0xff] }
   0x5   :  { %436 = vmatpush.bf16.msra.mxu0 %v427_v6  ;;  %v6577_v19 = vld [vmem:[%s11486_s4 + $0x20] sm:$0xff]  ;;  %v163_v20 = vpack.c.bf16 %v39_v18, %v38_v17  ;;  %v41_v22 = vld [vmem:[%s11484_s0 + $0x48] sm:$0xff]  ;;  %v42_v24 = vld [vmem:[%s11484_s0 + $0x50] sm:$0xff] }
   0x6   :  { %v40_v21 = vld [vmem:[%s11484_s0 + $0x40] sm:$0xff]  ;;  %v43_v25 = vld [vmem:[%s11484_s0 + $0x58] sm:$0xff]  ;;  %v6575_v28 = vld [vmem:[%s11486_s4 + $0x10] sm:$0xff] }
   0x7   :  { %v164_v23 = vpack.c.bf16 %v41_v22, %v40_v21  ;;  %v165_v26 = vpack.c.bf16 %v43_v25, %v42_v24  ;;  %v6576_v27 = vld [vmem:[%s11486_s4 + $0x18] sm:$0xff]  ;;  %v6574_v29 = vld [vmem:[%s11486_s4 + $0x8] sm:$0xff]  ;;  %v6573_v30 = vld [vmem:[%s11486_s4] sm:$0xff] }
   0x8   :  { %6317 = vmatmul.msk.bf16.vlgmr.msra.gmra.mxu0 %vm229_vm2, %v160_v7  ;;  %1147 = vmatpush.bf16.msra.mxu1 %v6579_v15  ;;  %v44_v31 = vld [vmem:[%s11484_s0 + $0x60] sm:$0xff]  ;;  %v45_v32 = vld [vmem:[%s11484_s0 + $0x68] sm:$0xff]  ;;  %v46_v34 = vld [vmem:[%s11484_s0 + $0x70] sm:$0xff] }
   0x9   :  { %v166_v33 = vpack.c.bf16 %v45_v32, %v44_v31  ;;  %v47_v35 = vld [vmem:[%s11484_s0 + $0x78] sm:$0xff]  ;;  %v7263_v38 = vld [vmem:[%s11485_s3] ss:$0 sm:$0xff]  ;;  %v49_v63 = vld [vmem:[%s11484_s0 + $0x88] sm:$0xff] }
   0xa   :  { %v167_v36 = vpack.c.bf16 %v47_v35, %v46_v34  ;;  %v48_v62 = vld [vmem:[%s11484_s0 + $0x80] sm:$0xff]  ;;  %v6588_v6 = vld [vmem:[%s11488_s6 + $0x38] sm:$0xff]  ;;  %v6587_v11 = vld [vmem:[%s11488_s6 + $0x30] sm:$0xff] }
   0xb   :  { %v168_v0 = vpack.c.bf16 %v49_v63, %v48_v62  ;;  %1863 = vmatpush.bf16.msra.mxu2 %v6588_v6  ;;  %v50_v12 = vld [vmem:[%s11484_s0 + $0x90] sm:$0xff]  ;;  %v6586_v17 = vld [vmem:[%s11488_s6 + $0x28] sm:$0xff] }
   0xc   :  { %1148 = vmatpush.bf16.msra.mxu1 %v6578_v16 }
   0xf   :  { %1864 = vmatpush.bf16.msra.mxu2 %v6587_v11 }
  0x10   :  { %1149 = vmatpush.bf16.msra.mxu1 %v6577_v19 }
  0x13   :  { %1865 = vmatpush.bf16.msra.mxu2 %v6586_v17 }
  0x14   :  { %1150 = vmatpush.bf16.msra.mxu1 %v6576_v27 }
  0x18   :  { %6318 = vmatmul.msk.bf16.gmra.mxu0 %vm229_vm2, %v161_v10  ;;  %1151 = vmatpush.bf16.msra.mxu1 %v6575_v28 }
  0x1c   :  { %1152 = vmatpush.bf16.msra.mxu1 %v6574_v29  ;;  %v6585_v29 = vld [vmem:[%s11488_s6 + $0x20] sm:$0xff] }
  0x1d   :  { %1866 = vmatpush.bf16.msra.mxu2 %v6585_v29 }
  0x20   :  { %1153 = vmatpush.bf16.msra.mxu1 %v6573_v30 }
  0x28   :  { %6319 = vmatmul.msk.bf16.gmra.mxu0 %vm229_vm2, %v162_v13  ;;  %v51_v13 = vld [vmem:[%s11484_s0 + $0x98] sm:$0xff] }
  0x29   :  { %v169_v14 = vpack.c.bf16 %v51_v13, %v50_v12 }
  0x38   :  { %6320 = vmatmul.msk.bf16.gmra.mxu0 %vm229_vm2, %v163_v20 }
  0x48   :  { %6321 = vmatmul.msk.bf16.gmra.mxu0 %vm229_vm2, %v164_v23 }
  0x58   :  { %6322 = vmatmul.msk.bf16.gmra.mxu0 %vm229_vm2, %v165_v26 }
  0x68   :  { %6323 = vmatmul.msk.bf16.gmra.mxu0 %vm229_vm2, %v166_v33 }
  0x78   :  { %6324 = vmatmul.msk.bf16.gmra.mxu0 %vm229_vm2, %v167_v36 }
  0x85   :  { %v438_v37 = vpop.f32.mrf.mxu0 }
  0x86   :  { %v439_v39 = vadd.f32 %v7263_v38, %v438_v37 }
  0x88   :  { %v758_v41 = vmul.f32 0.01, %v439_v39  ;;  %6325 = vmatmul.msk.bf16.gmra.mxu0 %vm229_vm2, %v168_v0 }
  0x8a   :  { %v886_v44 = vmax.f32 %v439_v39, %v758_v41 }
  0x8d   :  { %v440_v40 = vpop.f32.mrf.mxu0 }
  0x8e   :  { %v441_v42 = vadd.f32 %v7263_v38, %v440_v40  ;;  %v6584_v40 = vld [vmem:[%s11488_s6 + $0x18] sm:$0xff] }
  0x8f   :  { %1867 = vmatpush.bf16.msra.mxu2 %v6584_v40 }
  0x90   :  { %v759_v43 = vmul.f32 0.01, %v441_v42 }
  0x92   :  { %v887_v45 = vmax.f32 %v441_v42, %v759_v43  ;;  %v6583_v42 = vld [vmem:[%s11488_s6 + $0x10] sm:$0xff] }
  0x93   :  { %1868 = vmatpush.bf16.msra.mxu2 %v6583_v42 }
  0x94   :  { %v1014_v46 = vpack.c.bf16 %v887_v45, %v886_v44 }
  0x95   :  { %v443_v47 = vpop.f32.mrf.mxu0 }
  0x96   :  { %1154 = vmatmul.bf16.vlgmr.msra.gmra.mxu1 %v1014_v46  ;;  %v444_v48 = vadd.f32 %v7263_v38, %v443_v47  ;;  %v52_v46 = vld [vmem:[%s11484_s0 + $0xa0] sm:$0xff]  ;;  %v53_v47 = vld [vmem:[%s11484_s0 + $0xa8] sm:$0xff] }
  0x98   :  { %v760_v50 = vmul.f32 0.01, %v444_v48  ;;  %6326 = vmatmul.msk.bf16.gmra.mxu0 %vm229_vm2, %v169_v14 }
  0x9a   :  { %v888_v53 = vmax.f32 %v444_v48, %v760_v50  ;;  %v170_v48 = vpack.c.bf16 %v53_v47, %v52_v46  ;;  %v6582_v50 = vld [vmem:[%s11488_s6 + $0x8] sm:$0xff]  ;;  %v58_v46 = vld [vmem:[%s11484_s0 + $0xd0] sm:$0xff]  ;;  %v59_v47 = vld [vmem:[%s11484_s0 + $0xd8] sm:$0xff] }
  0x9b   :  { %1869 = vmatpush.bf16.msra.mxu2 %v6582_v50 }
  0x9d   :  { %v445_v49 = vpop.f32.mrf.mxu0 }
  0x9e   :  { %v446_v51 = vadd.f32 %v7263_v38, %v445_v49 }
  0xa0   :  { %v761_v52 = vmul.f32 0.01, %v446_v51 }
  0xa2   :  { %v889_v54 = vmax.f32 %v446_v51, %v761_v52  ;;  %v6581_v52 = vld [vmem:[%s11488_s6] sm:$0xff] }
  0xa3   :  { %1870 = vmatpush.bf16.msra.mxu2 %v6581_v52 }
  0xa4   :  { %v1015_v55 = vpack.c.bf16 %v889_v54, %v888_v53 }
  0xa5   :  { %v448_v56 = vpop.f32.mrf.mxu0 }
  0xa6   :  { %1159 = vmatmul.bf16.gmra.mxu1 %v1015_v55  ;;  %v449_v57 = vadd.f32 %v7263_v38, %v448_v56 }
  0xa8   :  { %v762_v59 = vmul.f32 0.01, %v449_v57  ;;  %6327 = vmatmul.msk.bf16.gmra.mxu0 %vm229_vm2, %v170_v48 }
  0xaa   :  { %v890_v1 = vmax.f32 %v449_v57, %v762_v59 }
  0xad   :  { %v450_v58 = vpop.f32.mrf.mxu0 }
  0xae   :  { %v451_v60 = vadd.f32 %v7263_v38, %v450_v58 }
  0xb0   :  { %v763_v61 = vmul.f32 0.01, %v451_v60 }
  0xb2   :  { %v891_v2 = vmax.f32 %v451_v60, %v763_v61  ;;  %v54_v60 = vld [vmem:[%s11484_s0 + $0xb0] sm:$0xff]  ;;  %v55_v61 = vld [vmem:[%s11484_s0 + $0xb8] sm:$0xff] }
  0xb3   :  { %v171_v62 = vpack.c.bf16 %v55_v61, %v54_v60 }
  0xb4   :  { %v1016_v3 = vpack.c.bf16 %v891_v2, %v890_v1 }
  0xb5   :  { %v453_v4 = vpop.f32.mrf.mxu0 }
  0xb6   :  { %1164 = vmatmul.bf16.gmra.mxu1 %v1016_v3  ;;  %v454_v5 = vadd.f32 %v7263_v38, %v453_v4  ;;  %v7336_v4 = vld [vmem:[%s11487_s5] ss:$0 sm:$0xff] }
  0xb8   :  { %v764_v8 = vmul.f32 0.01, %v454_v5  ;;  %6328 = vmatmul.msk.bf16.gmra.mxu0 %vm229_vm2, %v171_v62 }
  0xba   :  { %v892_v15 = vmax.f32 %v454_v5, %v764_v8 }
  0xbd   :  { %v455_v7 = vpop.f32.mrf.mxu0 }
  0xbe   :  { %v456_v9 = vadd.f32 %v7263_v38, %v455_v7 }
  0xc0   :  { %v765_v10 = vmul.f32 0.01, %v456_v9 }
  0xc2   :  { %v893_v16 = vmax.f32 %v456_v9, %v765_v10 }
  0xc4   :  { %v1017_v18 = vpack.c.bf16 %v893_v16, %v892_v15 }
  0xc5   :  { %v458_v19 = vpop.f32.mrf.mxu0 }
  0xc6   :  { %1169 = vmatmul.bf16.gmra.mxu1 %v1017_v18  ;;  %v459_v20 = vadd.f32 %v7263_v38, %v458_v19 }
  0xc8   :  { %v766_v21 = vmul.f32 0.01, %v459_v20 }
  0xca   :  { %v894_v24 = vmax.f32 %v459_v20, %v766_v21 }
  0xcd   :  { %v460_v22 = vpop.f32.mrf.mxu0 }
  0xce   :  { %v461_v23 = vadd.f32 %v7263_v38, %v460_v22 }
  0xd0   :  { %v767_v25 = vmul.f32 0.01, %v461_v23 }
  0xd2   :  { %v895_v26 = vmax.f32 %v461_v23, %v767_v25 }
  0xd4   :  { %v1018_v27 = vpack.c.bf16 %v895_v26, %v894_v24  ;;  %v56_v26 = vld [vmem:[%s11484_s0 + $0xc0] sm:$0xff] }
  0xd5   :  { %v463_v28 = vpop.f32.mrf.mxu0 }
  0xd6   :  { %1174 = vmatmul.bf16.gmra.mxu1 %v1018_v27  ;;  %v464_v30 = vadd.f32 %v7263_v38, %v463_v28  ;;  %v57_v27 = vld [vmem:[%s11484_s0 + $0xc8] sm:$0xff] }
  0xd7   :  { %v172_v28 = vpack.c.bf16 %v57_v27, %v56_v26 }
  0xd8   :  { %v768_v31 = vmul.f32 0.01, %v464_v30 }
  0xd9   :  { %6329 = vmatmul.msk.bf16.gmra.mxu0 %vm229_vm2, %v172_v28 }
  0xda   :  { %v896_v34 = vmax.f32 %v464_v30, %v768_v31 }
  0xdd   :  { %v465_v32 = vpop.f32.mrf.mxu0 }
  0xde   :  { %v466_v33 = vadd.f32 %v7263_v38, %v465_v32 }
  0xe0   :  { %v769_v35 = vmul.f32 0.01, %v466_v33 }
  0xe2   :  { %v897_v36 = vmax.f32 %v466_v33, %v769_v35 }
  0xe4   :  { %v1019_v37 = vpack.c.bf16 %v897_v36, %v896_v34 }
  0xe5   :  { %v468_v39 = vpop.f32.mrf.mxu0 }
  0xe6   :  { %1179 = vmatmul.bf16.gmra.mxu1 %v1019_v37  ;;  %v469_v41 = vadd.f32 %v7263_v38, %v468_v39 }
  0xe8   :  { %v770_v43 = vmul.f32 0.01, %v469_v41 }
  0xea   :  { %v898_v51 = vmax.f32 %v469_v41, %v770_v43 }
  0xed   :  { %v470_v44 = vpop.f32.mrf.mxu0 }
  0xee   :  { %v471_v45 = vadd.f32 %v7263_v38, %v470_v44 }
  0xf0   :  { %v771_v49 = vmul.f32 0.01, %v471_v45 }
  0xf2   :  { %v899_v53 = vmax.f32 %v471_v45, %v771_v49  ;;  %v173_v49 = vpack.c.bf16 %v59_v47, %v58_v46  ;;  %v62_v47 = vld [vmem:[%s11484_s0 + $0xf0] sm:$0xff] }
  0xf4   :  { %v1020_v55 = vpack.c.bf16 %v899_v53, %v898_v51  ;;  %6330 = vmatmul.msk.bf16.gmra.mxu0 %vm229_vm2, %v173_v49 }
  0xf5   :  { %v473_v54 = vpop.f32.mrf.mxu0 }
  0xf6   :  { %1184 = vmatmul.bf16.gmra.mxu1 %v1020_v55  ;;  %v474_v56 = vadd.f32 %v7263_v38, %v473_v54 }
  0xf8   :  { %v772_v57 = vmul.f32 0.01, %v474_v56 }
  0xfa   :  { %v900_v0 = vmax.f32 %v474_v56, %v772_v57 }
  0xfd   :  { %v475_v58 = vpop.f32.mrf.mxu0 }
  0xfe   :  { %v476_v59 = vadd.f32 %v7263_v38, %v475_v58 }
 0x100   :  { %v773_v63 = vmul.f32 0.01, %v476_v59 }
 0x102   :  { %v901_v1 = vmax.f32 %v476_v59, %v773_v63 }
 0x104   :  { %v1021_v2 = vpack.c.bf16 %v901_v1, %v900_v0 }
 0x105   :  { %v478_v23 = vpop.f32.mrf.mxu0 }
 0x106   :  { %1189 = vmatmul.bf16.gmra.mxu1 %v1021_v2  ;;  %v479_v24 = vadd.f32 %v7263_v38, %v478_v23 }
 0x108   :  { %v774_v30 = vmul.f32 0.01, %v479_v24 }
 0x10a   :  { %v902_v36 = vmax.f32 %v479_v24, %v774_v30 }
 0x10d   :  { %v480_v33 = vpop.f32.mrf.mxu0 }
 0x10e   :  { %v481_v34 = vadd.f32 %v7263_v38, %v480_v33 }
 0x110   :  { %v775_v37 = vmul.f32 0.01, %v481_v34 }
 0x112   :  { %v903_v41 = vmax.f32 %v481_v34, %v775_v37 }
 0x113   :  { %v1155_v3 = vpop.f32.mrf.mxu1 }
 0x114   :  { %v1156_v5 = vadd.f32 %v7336_v4, %v1155_v3  ;;  %v1022_v44 = vpack.c.bf16 %v903_v41, %v902_v36 }
 0x115   :  { %v483_v48 = vpop.f32.mrf.mxu0 }
 0x116   :  { %v1475_v7 = vmul.f32 0.01, %v1156_v5  ;;  %1194 = vmatmul.bf16.gmra.mxu1 %v1022_v44  ;;  %v484_v59 = vadd.f32 %v7263_v38, %v483_v48  ;;  %v63_v48 = vld [vmem:[%s11484_s0 + $0xf8] sm:$0xff] }
 0x118   :  { %v1603_v10 = vmax.f32 %v1156_v5, %v1475_v7  ;;  %v776_v62 = vmul.f32 0.01, %v484_v59 }
 0x11a   :  { %v904_v3 = vmax.f32 %v484_v59, %v776_v62 }
 0x11b   :  { %v1157_v6 = vpop.f32.mrf.mxu1 }
 0x11c   :  { %v1158_v8 = vadd.f32 %v7336_v4, %v1157_v6 }
 0x11d   :  { %v485_v58 = vpop.f32.mrf.mxu0 }
 0x11e   :  { %v1476_v9 = vmul.f32 0.01, %v1158_v8  ;;  %v486_v61 = vadd.f32 %v7263_v38, %v485_v58 }
 0x120   :  { %v1604_v11 = vmax.f32 %v1158_v8, %v1476_v9  ;;  %v777_v0 = vmul.f32 0.01, %v486_v61 }
 0x122   :  { %v1731_v12 = vpack.c.bf16 %v1604_v11, %v1603_v10  ;;  %v905_v7 = vmax.f32 %v486_v61, %v777_v0 }
 0x123   :  { %v1160_v13 = vpop.f32.mrf.mxu1 }
 0x124   :  { %1871 = vmatmul.bf16.vlgmr.msra.gmra.mxu2 %v1731_v12  ;;  %v1161_v14 = vadd.f32 %v7336_v4, %v1160_v13  ;;  %v1023_v9 = vpack.c.bf16 %v905_v7, %v904_v3  ;;  %v60_v12 = vld [vmem:[%s11484_s0 + $0xe0] sm:$0xff]  ;;  %v61_v13 = vld [vmem:[%s11484_s0 + $0xe8] sm:$0xff] }
 0x125   :  { %v488_v23 = vpop.f32.mrf.mxu0 }
 0x126   :  { %v1477_v16 = vmul.f32 0.01, %v1161_v14  ;;  %1199 = vmatmul.bf16.gmra.mxu1 %v1023_v9  ;;  %v489_v24 = vadd.f32 %v7263_v38, %v488_v23 }
 0x128   :  { %v1605_v19 = vmax.f32 %v1161_v14, %v1477_v16  ;;  %v174_v14 = vpack.c.bf16 %v61_v13, %v60_v12  ;;  %v778_v26 = vmul.f32 0.01, %v489_v24 }
 0x12a   :  { %6331 = vmatmul.msk.bf16.gmra.mxu0 %vm229_vm2, %v174_v14  ;;  %v906_v30 = vmax.f32 %v489_v24, %v778_v26 }
 0x12b   :  { %v1162_v15 = vpop.f32.mrf.mxu1 }
 0x12c   :  { %v1163_v17 = vadd.f32 %v7336_v4, %v1162_v15 }
 0x12d   :  { %v490_v27 = vpop.f32.mrf.mxu0 }
 0x12e   :  { %v1478_v18 = vmul.f32 0.01, %v1163_v17 }
 0x130   :  { %v1606_v20 = vmax.f32 %v1163_v17, %v1478_v18 }
 0x132   :  { %v1732_v21 = vpack.c.bf16 %v1606_v20, %v1605_v19 }
 0x133   :  { %v1165_v22 = vpop.f32.mrf.mxu1 }
 0x134   :  { %1876 = vmatmul.bf16.gmra.mxu2 %v1732_v21  ;;  %v1166_v25 = vadd.f32 %v7336_v4, %v1165_v22 }
 0x135   :  { %v493_v37 = vpop.f32.mrf.mxu0 }
 0x136   :  { %v1479_v31 = vmul.f32 0.01, %v1166_v25  ;;  %v494_v41 = vadd.f32 %v7263_v38, %v493_v37  ;;  %v66_v37 = vld [vmem:[%s11484_s0 + $0x110] sm:$0xff] }
 0x138   :  { %v1607_v39 = vmax.f32 %v1166_v25, %v1479_v31 }
 0x13b   :  { %v1167_v29 = vpop.f32.mrf.mxu1 }
 0x13c   :  { %v1168_v32 = vadd.f32 %v7336_v4, %v1167_v29  ;;  %v491_v29 = vadd.f32 %v7263_v38, %v490_v27 }
 0x13d   :  { %v495_v46 = vpop.f32.mrf.mxu0 }
 0x13e   :  { %v1480_v35 = vmul.f32 0.01, %v1168_v32  ;;  %v779_v31 = vmul.f32 0.01, %v491_v29 }
 0x140   :  { %v1608_v40 = vmax.f32 %v1168_v32, %v1480_v35  ;;  %v907_v33 = vmax.f32 %v491_v29, %v779_v31 }
 0x142   :  { %v1733_v42 = vpack.c.bf16 %v1608_v40, %v1607_v39  ;;  %v1024_v36 = vpack.c.bf16 %v907_v33, %v906_v30 }
 0x143   :  { %v1170_v43 = vpop.f32.mrf.mxu1 }
 0x144   :  { %1881 = vmatmul.bf16.gmra.mxu2 %v1733_v42  ;;  %v1171_v45 = vadd.f32 %v7336_v4, %v1170_v43  ;;  %1204 = vmatmul.bf16.gmra.mxu1 %v1024_v36 }
 0x146   :  { %v1481_v51 = vmul.f32 0.01, %v1171_v45 }
 0x148   :  { %v1609_v54 = vmax.f32 %v1171_v45, %v1481_v51  ;;  %v780_v45 = vmul.f32 0.01, %v494_v41  ;;  %v175_v51 = vpack.c.bf16 %v63_v48, %v62_v47 }
 0x14a   :  { %6332 = vmatmul.msk.bf16.gmra.mxu0 %vm229_vm2, %v175_v51 }
 0x14b   :  { %v1172_v50 = vpop.f32.mrf.mxu1 }
 0x14c   :  { %v1173_v52 = vadd.f32 %v7336_v4, %v1172_v50  ;;  %v496_v50 = vadd.f32 %v7263_v38, %v495_v46 }
 0x14e   :  { %v1482_v53 = vmul.f32 0.01, %v1173_v52 }
 0x150   :  { %v1610_v55 = vmax.f32 %v1173_v52, %v1482_v53  ;;  %v908_v52 = vmax.f32 %v494_v41, %v780_v45  ;;  %v781_v53 = vmul.f32 0.01, %v496_v50 }
 0x152   :  { %v1734_v56 = vpack.c.bf16 %v1610_v55, %v1609_v54  ;;  %v909_v55 = vmax.f32 %v496_v50, %v781_v53 }
 0x153   :  { %v1175_v57 = vpop.f32.mrf.mxu1 }
 0x154   :  { %1886 = vmatmul.bf16.gmra.mxu2 %v1734_v56  ;;  %v1176_v60 = vadd.f32 %v7336_v4, %v1175_v57  ;;  %v1025_v58 = vpack.c.bf16 %v909_v55, %v908_v52 }
 0x156   :  { %v1483_v63 = vmul.f32 0.01, %v1176_v60  ;;  %1209 = vmatmul.bf16.gmra.mxu1 %v1025_v58  ;;  %v498_v13 = vpop.f32.mrf.mxu0 }
 0x158   :  { %v1611_v5 = vmax.f32 %v1176_v60, %v1483_v63  ;;  %v7393_v63 = vld [vmem:[%s11489_s7] ss:$0 sm:$0xff] }
 0x15b   :  { %v1177_v1 = vpop.f32.mrf.mxu1 }
 0x15c   :  { %v1178_v2 = vadd.f32 %v7336_v4, %v1177_v1 }
 0x15e   :  { %v1484_v6 = vmul.f32 0.01, %v1178_v2 }
 0x160   :  { %v1612_v8 = vmax.f32 %v1178_v2, %v1484_v6 }
 0x162   :  { %v1735_v10 = vpack.c.bf16 %v1612_v8, %v1611_v5 }
 0x163   :  { %v1180_v11 = vpop.f32.mrf.mxu1 }
 0x164   :  { %1891 = vmatmul.bf16.gmra.mxu2 %v1735_v10  ;;  %v1181_v15 = vadd.f32 %v7336_v4, %v1180_v11 }
 0x166   :  { %v1485_v16 = vmul.f32 0.01, %v1181_v15 }
 0x168   :  { %v1613_v19 = vmax.f32 %v1181_v15, %v1485_v16  ;;  %v64_v15 = vld [vmem:[%s11484_s0 + $0x100] sm:$0xff]  ;;  %v65_v16 = vld [vmem:[%s11484_s0 + $0x108] sm:$0xff] }
 0x16b   :  { %v1182_v17 = vpop.f32.mrf.mxu1 }
 0x16c   :  { %v1183_v18 = vadd.f32 %v7336_v4, %v1182_v17  ;;  %v176_v17 = vpack.c.bf16 %v65_v16, %v64_v15  ;;  %v68_v15 = vld [vmem:[%s11484_s0 + $0x120] sm:$0xff]  ;;  %v69_v16 = vld [vmem:[%s11484_s0 + $0x128] sm:$0xff] }
 0x16e   :  { %v1486_v20 = vmul.f32 0.01, %v1183_v18  ;;  %6333 = vmatmul.msk.bf16.gmra.mxu0 %vm229_vm2, %v176_v17 }
 0x170   :  { %v1614_v21 = vmax.f32 %v1183_v18, %v1486_v20  ;;  %v499_v18 = vadd.f32 %v7263_v38, %v498_v13 }
 0x172   :  { %v1736_v22 = vpack.c.bf16 %v1614_v21, %v1613_v19  ;;  %v782_v23 = vmul.f32 0.01, %v499_v18 }
 0x173   :  { %v1185_v25 = vpop.f32.mrf.mxu1 }
 0x174   :  { %1896 = vmatmul.bf16.gmra.mxu2 %v1736_v22  ;;  %v1186_v28 = vadd.f32 %v7336_v4, %v1185_v25  ;;  %v500_v25 = vpop.f32.mrf.mxu0  ;;  %v910_v29 = vmax.f32 %v499_v18, %v782_v23  ;;  %v178_v18 = vpack.c.bf16 %v69_v16, %v68_v15 }
 0x175   :  { %v501_v27 = vadd.f32 %v7263_v38, %v500_v25 }
 0x176   :  { %v1487_v32 = vmul.f32 0.01, %v1186_v28 }
 0x177   :  { %v783_v31 = vmul.f32 0.01, %v501_v27 }
 0x178   :  { %v1615_v39 = vmax.f32 %v1186_v28, %v1487_v32 }
 0x17b   :  { %v1187_v34 = vpop.f32.mrf.mxu1 }
 0x17c   :  { %v1188_v35 = vadd.f32 %v7336_v4, %v1187_v34  ;;  %v503_v50 = vpop.f32.mrf.mxu0 }
 0x17d   :  { %v504_v52 = vadd.f32 %v7263_v38, %v503_v50 }
 0x17e   :  { %v1488_v40 = vmul.f32 0.01, %v1188_v35 }
 0x17f   :  { %v784_v55 = vmul.f32 0.01, %v504_v52 }
 0x180   :  { %v1616_v42 = vmax.f32 %v1188_v35, %v1488_v40  ;;  %v911_v35 = vmax.f32 %v501_v27, %v783_v31 }
 0x181   :  { %v912_v58 = vmax.f32 %v504_v52, %v784_v55 }
 0x182   :  { %v1737_v43 = vpack.c.bf16 %v1616_v42, %v1615_v39  ;;  %v67_v39 = vld [vmem:[%s11484_s0 + $0x118] sm:$0xff]  ;;  %v1026_v41 = vpack.c.bf16 %v911_v35, %v910_v29 }
 0x183   :  { %v1190_v44 = vpop.f32.mrf.mxu1 }
 0x184   :  { %1901 = vmatmul.bf16.gmra.mxu2 %v1737_v43  ;;  %v1191_v49 = vadd.f32 %v7336_v4, %v1190_v44  ;;  %v177_v43 = vpack.c.bf16 %v67_v39, %v66_v37  ;;  %1214 = vmatmul.bf16.gmra.mxu1 %v1026_v41  ;;  %v505_v51 = vpop.f32.mrf.mxu0  ;;  %v70_v39 = vld [vmem:[%s11484_s0 + $0x130] sm:$0xff] }
 0x185   :  { %v506_v53 = vadd.f32 %v7263_v38, %v505_v51 }
 0x186   :  { %v1489_v54 = vmul.f32 0.01, %v1191_v49  ;;  %6334 = vmatmul.msk.bf16.gmra.mxu0 %vm229_vm2, %v177_v43 }
 0x188   :  { %v1617_v59 = vmax.f32 %v1191_v49, %v1489_v54 }
 0x18b   :  { %v1192_v56 = vpop.f32.mrf.mxu1 }
 0x18c   :  { %v1193_v57 = vadd.f32 %v7336_v4, %v1192_v56  ;;  %v785_v56 = vmul.f32 0.01, %v506_v53 }
 0x18e   :  { %v1490_v60 = vmul.f32 0.01, %v1193_v57 }
 0x190   :  { %v1618_v61 = vmax.f32 %v1193_v57, %v1490_v60 }
 0x192   :  { %v1738_v62 = vpack.c.bf16 %v1618_v61, %v1617_v59  ;;  %v913_v59 = vmax.f32 %v506_v53, %v785_v56 }
 0x193   :  { %v1195_v14 = vpop.f32.mrf.mxu1 }
 0x194   :  { %1906 = vmatmul.bf16.gmra.mxu2 %v1738_v62  ;;  %v1196_v19 = vadd.f32 %v7336_v4, %v1195_v14 }
 0x196   :  { %v1491_v24 = vmul.f32 0.01, %v1196_v19  ;;  %6335 = vmatmul.msk.bf16.gmra.mxu0 %vm229_vm2, %v178_v18 }
 0x198   :  { %v1619_v30 = vmax.f32 %v1196_v19, %v1491_v24 }
 0x19b   :  { %v1197_v26 = vpop.f32.mrf.mxu1 }
 0x19c   :  { %v1198_v28 = vadd.f32 %v7336_v4, %v1197_v26 }
 0x19e   :  { %v1492_v32 = vmul.f32 0.01, %v1198_v28 }
 0x1a0   :  { %v1620_v36 = vmax.f32 %v1198_v28, %v1492_v32 }
 0x1a2   :  { %v1739_v42 = vpack.c.bf16 %v1620_v36, %v1619_v30 }
 0x1a3   :  { %v1200_v54 = vpop.f32.mrf.mxu1 }
 0x1a4   :  { %1911 = vmatmul.bf16.gmra.mxu2 %v1739_v42  ;;  %v1201_v57 = vadd.f32 %v7336_v4, %v1200_v54 }
 0x1a6   :  { %v1493_v60 = vmul.f32 0.01, %v1201_v57 }
 0x1a7   :  { %v1872_v0 = vpop.f32.mrf.mxu2 }
 0x1a8   :  { %v7396_v1 = vadd.f32 %v7393_v63, %v1872_v0  ;;  %v1027_v0 = vpack.c.bf16 %v913_v59, %v912_v58 }
 0x1aa   :  { %v2193_v2 = vsel %vm2192_vm3, %v7396_v1, -inf  ;;  %1219 = vmatmul.bf16.gmra.mxu1 %v1027_v0 }
 0x1ab   :  { %2194 = vmax.xlane.f32.xlu0 %v2193_v2  ;;  %v1202_v61 = vpop.f32.mrf.mxu1  ;;  %v508_v2 = vpop.f32.mrf.mxu0 }
 0x1ac   :  { %v1203_v62 = vadd.f32 %v7336_v4, %v1202_v61 }
 0x1af   :  { %v1874_v3 = vpop.f32.mrf.mxu2 }
 0x1b0   :  { %v7401_v5 = vadd.f32 %v7393_v63, %v1874_v3  ;;  %v1621_v3 = vmax.f32 %v1201_v57, %v1493_v60 }
 0x1b2   :  { %v2196_v6 = vsel %vm2192_vm3, %v7401_v5, -inf }
 0x1b3   :  { %2197 = vmax.xlane.f32.xlu0 %v2196_v6  ;;  %v1494_v6 = vmul.f32 0.01, %v1203_v62  ;;  %v510_v14 = vpop.f32.mrf.mxu0 }
 0x1b4   :  { %v511_v17 = vadd.f32 %v7263_v38, %v510_v14 }
 0x1b7   :  { %v1877_v7 = vpop.f32.mrf.mxu2 }
 0x1b8   :  { %v7406_v8 = vadd.f32 %v7393_v63, %v1877_v7  ;;  %v509_v7 = vadd.f32 %v7263_v38, %v508_v2 }
 0x1ba   :  { %v2199_v9 = vsel %vm2192_vm3, %v7406_v8, -inf  ;;  %v786_v13 = vmul.f32 0.01, %v509_v7 }
 0x1bb   :  { %2200 = vmax.xlane.f32.xlu1 %v2199_v9  ;;  %v1622_v9 = vmax.f32 %v1203_v62, %v1494_v6 }
 0x1bf   :  { %v1879_v10 = vpop.f32.mrf.mxu2 }
 0x1c0   :  { %v7411_v11 = vadd.f32 %v7393_v63, %v1879_v10  ;;  %v1740_v10 = vpack.c.bf16 %v1622_v9, %v1621_v3 }
 0x1c2   :  { %v2202_v12 = vsel %vm2192_vm3, %v7411_v11, -inf  ;;  %1916 = vmatmul.bf16.gmra.mxu2 %v1740_v10 }
 0x1c3   :  { %2203 = vmax.xlane.f32.xlu1 %v2202_v12  ;;  %v1205_v12 = vpop.f32.mrf.mxu1 }
 0x1c4   :  { %v1206_v19 = vadd.f32 %v7336_v4, %v1205_v12 }
 0x1c6   :  { %v1495_v23 = vmul.f32 0.01, %v1206_v19 }
 0x1c7   :  { %v1882_v20 = vpop.f32.mrf.mxu2  ;;  %v513_v28 = vpop.f32.mrf.mxu0 }
 0x1c8   :  { %v7425_v21 = vadd.f32 %v7393_v63, %v1882_v20  ;;  %v914_v20 = vmax.f32 %v509_v7, %v786_v13  ;;  %v1623_v29 = vmax.f32 %v1206_v19, %v1495_v23  ;;  %v514_v31 = vadd.f32 %v7263_v38, %v513_v28 }
 0x1ca   :  { %v2205_v22 = vsel %vm2192_vm3, %v7425_v21, -inf  ;;  %v788_v36 = vmul.f32 0.01, %v514_v31 }
 0x1cb   :  { %2206 = vmax.xlane.f32.xlu2 %v2205_v22  ;;  %v787_v22 = vmul.f32 0.01, %v511_v17  ;;  %v1207_v25 = vpop.f32.mrf.mxu1 }
 0x1cc   :  { %v1208_v26 = vadd.f32 %v7336_v4, %v1207_v25 }
 0x1cd   :  { %v915_v24 = vmax.f32 %v511_v17, %v787_v22 }
 0x1ce   :  { %v1496_v30 = vmul.f32 0.01, %v1208_v26 }
 0x1cf   :  { %v1884_v33 = vpop.f32.mrf.mxu2  ;;  %v1028_v27 = vpack.c.bf16 %v915_v24, %v914_v20  ;;  %v515_v37 = vpop.f32.mrf.mxu0 }
 0x1d0   :  { %v7432_v34 = vadd.f32 %v7393_v63, %v1884_v33  ;;  %v1624_v32 = vmax.f32 %v1208_v26, %v1496_v30  ;;  %v516_v41 = vadd.f32 %v7263_v38, %v515_v37 }
 0x1d1   :  { %1224 = vmatmul.bf16.gmra.mxu1 %v1028_v27 }
 0x1d2   :  { %v2208_v40 = vsel %vm2192_vm3, %v7432_v34, -inf  ;;  %v1741_v33 = vpack.c.bf16 %v1624_v32, %v1623_v29 }
 0x1d3   :  { %2209 = vmax.xlane.f32.xlu2 %v2208_v40  ;;  %v1210_v35 = vpop.f32.mrf.mxu1  ;;  %v71_v40 = vld [vmem:[%s11484_s0 + $0x138] sm:$0xff] }
 0x1d4   :  { %1921 = vmatmul.bf16.gmra.mxu2 %v1741_v33  ;;  %v179_v42 = vpack.c.bf16 %v71_v40, %v70_v39  ;;  %v1211_v43 = vadd.f32 %v7336_v4, %v1210_v35  ;;  %v72_v39 = vld [vmem:[%s11484_s0 + $0x140] sm:$0xff] }
 0x1d6   :  { %6336 = vmatmul.msk.bf16.gmra.mxu0 %vm229_vm2, %v179_v42  ;;  %v1497_v50 = vmul.f32 0.01, %v1211_v43 }
 0x1d7   :  { %v1887_v44 = vpop.f32.mrf.mxu2 }
 0x1d8   :  { %v7444_v45 = vadd.f32 %v7393_v63, %v1887_v44  ;;  %v916_v44 = vmax.f32 %v514_v31, %v788_v36  ;;  %v1625_v57 = vmax.f32 %v1211_v43, %v1497_v50 }
 0x1da   :  { %v2211_v46 = vsel %vm2192_vm3, %v7444_v45, -inf }
 0x1db   :  { %2212 = vmax.xlane.f32.xlu0 %v2211_v46  ;;  %v789_v46 = vmul.f32 0.01, %v516_v41  ;;  %v1212_v53 = vpop.f32.mrf.mxu1 }
 0x1dc   :  { %v1213_v54 = vadd.f32 %v7336_v4, %v1212_v53 }
 0x1dd   :  { %v917_v51 = vmax.f32 %v516_v41, %v789_v46 }
 0x1de   :  { %v1498_v58 = vmul.f32 0.01, %v1213_v54 }
 0x1df   :  { %v1889_v47 = vpop.f32.mrf.mxu2  ;;  %v1029_v55 = vpack.c.bf16 %v917_v51, %v916_v44 }
 0x1e0   :  { %v7449_v48 = vadd.f32 %v7393_v63, %v1889_v47  ;;  %v1626_v59 = vmax.f32 %v1213_v54, %v1498_v58 }
 0x1e1   :  { %1229 = vmatmul.bf16.gmra.mxu1 %v1029_v55 }
 0x1e2   :  { %v2214_v49 = vsel %vm2192_vm3, %v7449_v48, -inf  ;;  %v1742_v61 = vpack.c.bf16 %v1626_v59, %v1625_v57 }
 0x1e3   :  { %2215 = vmax.xlane.f32.xlu2 %v2214_v49 }
 0x1e4   :  { %1926 = vmatmul.bf16.gmra.mxu2 %v1742_v61 }
 0x1e7   :  { %v1892_v47 = vpop.f32.mrf.mxu2 }
 0x1e8   :  { %v7486_v6 = vadd.f32 %v7393_v63, %v1892_v47 }
 0x1eb   :  { %v518_v37 = vpop.f32.mrf.mxu0 }
 0x1ec   :  { %v519_v43 = vadd.f32 %v7263_v38, %v518_v37 }
 0x1ef   :  { %v1894_v62 = vpop.f32.mrf.mxu2 }
 0x1f0   :  { %v7496_v15 = vadd.f32 %v7393_v63, %v1894_v62 }
 0x1f2   :  { %v2220_v20 = vsel %vm2192_vm3, %v7496_v15, -inf }
 0x1f3   :  { %v520_v53 = vpop.f32.mrf.mxu0 }
 0x1f4   :  { %v521_v54 = vadd.f32 %v7263_v38, %v520_v53 }
 0x1f6   :  { %v791_v57 = vmul.f32 0.01, %v521_v54 }
 0x1f7   :  { %v1897_v12 = vpop.f32.mrf.mxu2 }
 0x1f8   :  { %v7506_v23 = vadd.f32 %v7393_v63, %v1897_v12  ;;  %v919_v59 = vmax.f32 %v521_v54, %v791_v57 }
 0x1fa   :  { %v2223_v27 = vsel %vm2192_vm3, %v7506_v23, -inf }
 0x1ff   :  { %v1899_v22 = vpop.f32.mrf.mxu2 }
 0x200   :  { %v7516_v30 = vadd.f32 %v7393_v63, %v1899_v22 }
 0x202   :  { %v2226_v35 = vsel %vm2192_vm3, %v7516_v30, -inf }
 0x207   :  { %v1902_v29 = vpop.f32.mrf.mxu2 }
 0x208   :  { %v7532_v41 = vadd.f32 %v7393_v63, %v1902_v29 }
 0x20a   :  { %v2229_v51 = vsel %vm2192_vm3, %v7532_v41, -inf }
 0x20f   :  { %v1904_v44 = vpop.f32.mrf.mxu2 }
 0x210   :  { %v7545_v55 = vadd.f32 %v7393_v63, %v1904_v44 }
 0x217   :  { %v1907_v61 = vpop.f32.mrf.mxu2 }
 0x21e   :  { %v2195_v49 = vpop.xlane.xlu0 %2194 }
 0x21f   :  { %v2577_v52 = vsub.f32 %v7396_v1, %v2195_v49 }
 0x221   :  { %v2705_v56 = vmul.f32 1.442695, %v2577_v52  ;;  %v790_v52 = vmul.f32 0.01, %v519_v43 }
 0x223   :  { %6593 = vpow2.f32 %v2705_v56  ;;  %v918_v56 = vmax.f32 %v519_v43, %v790_v52 }
 0x226   :  { %v2198_v60 = vpop.xlane.xlu0 %2197 }
 0x227   :  { %v2578_v0 = vsub.f32 %v7401_v5, %v2198_v60  ;;  %v2217_v5 = vsel %vm2192_vm3, %v7486_v6, -inf }
 0x229   :  { %v7481_v2 = vpop.eup %6593  ;;  %v2707_v3 = vmul.f32 1.442695, %v2578_v0  ;;  %v2232_v0 = vsel %vm2192_vm3, %v7545_v55, -inf }
 0x22a   :  { %v2961_v1 = vsel %vm2192_vm3, %v7481_v2, 0.0 }
 0x22b   :  { %6595 = vpow2.f32 %v2707_v3  ;;  %2962 = vadd.xlane.f32.xlu1 %v2961_v1  ;;  %v1030_v1 = vpack.c.bf16 %v919_v59, %v918_v56  ;;  %v7587_v56 = vld [vmem:[%s11485_s3] ss:$0 sm:$0xff] }
 0x22d   :  { %1234 = vmatmul.bf16.gmra.mxu1 %v1030_v1 }
 0x22e   :  { %v2201_v7 = vpop.xlane.xlu1 %2200 }
 0x22f   :  { %v2579_v9 = vsub.f32 %v7406_v8, %v2201_v7  ;;  %v7555_v7 = vadd.f32 %v7393_v63, %v1907_v61  ;;  %v76_v61 = vld [vmem:[%s11484_s0 + $0x160] sm:$0xff] }
 0x231   :  { %v7489_v10 = vpop.eup %6595  ;;  %v2709_v13 = vmul.f32 1.442695, %v2579_v9  ;;  %v2235_v12 = vsel %vm2192_vm3, %v7555_v7, -inf }
 0x232   :  { %v2964_v14 = vsel %vm2192_vm3, %v7489_v10, 0.0 }
 0x233   :  { %6597 = vpow2.f32 %v2709_v13  ;;  %2218 = vmax.xlane.f32.xlu1 %v2217_v5  ;;  %2965 = vadd.xlane.f32.xlu0 %v2964_v14  ;;  %v1909_v13 = vpop.f32.mrf.mxu2  ;;  %v1215_v5 = vpop.f32.mrf.mxu1 }
 0x234   :  { %v7564_v14 = vadd.f32 %v7393_v63, %v1909_v13 }
 0x236   :  { %v2204_v16 = vpop.xlane.xlu1 %2203 }
 0x237   :  { %v2580_v17 = vsub.f32 %v7411_v11, %v2204_v16  ;;  %v2238_v16 = vsel %vm2192_vm3, %v7564_v14, -inf }
 0x239   :  { %v7499_v8 = vpop.eup %6597  ;;  %v2711_v18 = vmul.f32 1.442695, %v2580_v17 }
 0x23a   :  { %v2967_v19 = vsel %vm2192_vm3, %v7499_v8, 0.0 }
 0x23b   :  { %6599 = vpow2.f32 %v2711_v18  ;;  %2968 = vadd.xlane.f32.xlu2 %v2967_v19  ;;  %2221 = vmax.xlane.f32.xlu0 %v2220_v20  ;;  %v1217_v17 = vpop.f32.mrf.mxu1  ;;  %v1216_v18 = vadd.f32 %v7336_v4, %v1215_v5 }
 0x23c   :  { %v1218_v19 = vadd.f32 %v7336_v4, %v1217_v17 }
 0x23d   :  { %v1499_v20 = vmul.f32 0.01, %v1216_v18 }
 0x23e   :  { %v2207_v24 = vpop.xlane.xlu2 %2206  ;;  %v1500_v22 = vmul.f32 0.01, %v1218_v19 }
 0x23f   :  { %v2581_v25 = vsub.f32 %v7425_v21, %v2207_v24  ;;  %v523_v24 = vpop.f32.mrf.mxu0 }
 0x241   :  { %v7509_v11 = vpop.eup %6599  ;;  %v2713_v26 = vmul.f32 1.442695, %v2581_v25  ;;  %v1627_v25 = vmax.f32 %v1216_v18, %v1499_v20 }
 0x242   :  { %v2970_v28 = vsel %vm2192_vm3, %v7509_v11, 0.0 }
 0x243   :  { %6601 = vpow2.f32 %v2713_v26  ;;  %2224 = vmax.xlane.f32.xlu2 %v2223_v27  ;;  %2971 = vadd.xlane.f32.xlu1 %v2970_v28  ;;  %v1628_v26 = vmax.f32 %v1218_v19, %v1500_v22  ;;  %v524_v27 = vadd.f32 %v7263_v38, %v523_v24  ;;  %v1220_v29 = vpop.f32.mrf.mxu1 }
 0x244   :  { %v1221_v43 = vadd.f32 %v7336_v4, %v1220_v29 }
 0x245   :  { %v1743_v28 = vpack.c.bf16 %v1628_v26, %v1627_v25 }
 0x246   :  { %v2210_v31 = vpop.xlane.xlu2 %2209 }
 0x247   :  { %v2582_v32 = vsub.f32 %v7432_v34, %v2210_v31  ;;  %v73_v34 = vld [vmem:[%s11484_s0 + $0x148] sm:$0xff]  ;;  %v792_v31 = vmul.f32 0.01, %v524_v27  ;;  %1931 = vmatmul.bf16.gmra.mxu2 %v1743_v28 }
 0x248   :  { %v180_v40 = vpack.c.bf16 %v73_v34, %v72_v39 }
 0x249   :  { %v7519_v21 = vpop.eup %6601  ;;  %v2715_v33 = vmul.f32 1.442695, %v2582_v32  ;;  %v525_v32 = vpop.f32.mrf.mxu0  ;;  %v920_v39 = vmax.f32 %v524_v27, %v792_v31 }
 0x24a   :  { %v2973_v36 = vsel %vm2192_vm3, %v7519_v21, 0.0  ;;  %6337 = vmatmul.msk.bf16.gmra.mxu0 %vm229_vm2, %v180_v40 }
 0x24b   :  { %6603 = vpow2.f32 %v2715_v33  ;;  %2227 = vmax.xlane.f32.xlu1 %v2226_v35  ;;  %2974 = vadd.xlane.f32.xlu0 %v2973_v36  ;;  %v74_v33 = vld [vmem:[%s11484_s0 + $0x150] sm:$0xff]  ;;  %v75_v35 = vld [vmem:[%s11484_s0 + $0x158] sm:$0xff]  ;;  %v526_v36 = vadd.f32 %v7263_v38, %v525_v32  ;;  %v5394_v38 = vld [vmem:[%s11490_s1 + $0x8] sm:$0xff] }
 0x24c   :  { %v181_v37 = vpack.c.bf16 %v75_v35, %v74_v33  ;;  %5793 = vmatpush.msra.mxu3 %v5394_v38  ;;  %v78_v33 = vld [vmem:[%s11484_s0 + $0x170] sm:$0xff]  ;;  %v79_v35 = vld [vmem:[%s11484_s0 + $0x178] sm:$0xff] }
 0x24d   :  { %v793_v34 = vmul.f32 0.01, %v526_v36 }
 0x24e   :  { %v2213_v42 = vpop.xlane.xlu0 %2212 }
 0x24f   :  { %v2583_v46 = vsub.f32 %v7444_v45, %v2213_v42  ;;  %v921_v40 = vmax.f32 %v526_v36, %v793_v34  ;;  %v1222_v42 = vpop.f32.mrf.mxu1  ;;  %v1912_v34 = vpop.f32.mrf.mxu2 }
 0x250   :  { %v1223_v44 = vadd.f32 %v7336_v4, %v1222_v42 }
 0x251   :  { %v7537_v47 = vpop.eup %6603  ;;  %v2717_v49 = vmul.f32 1.442695, %v2583_v46  ;;  %v1031_v46 = vpack.c.bf16 %v921_v40, %v920_v39 }
 0x252   :  { %v2976_v50 = vsel %vm2192_vm3, %v7537_v47, 0.0 }
 0x253   :  { %6605 = vpow2.f32 %v2717_v49  ;;  %2977 = vadd.xlane.f32.xlu2 %v2976_v50  ;;  %2230 = vmax.xlane.f32.xlu0 %v2229_v51  ;;  %v528_v49 = vpop.f32.mrf.mxu0  ;;  %v1501_v50 = vmul.f32 0.01, %v1221_v43  ;;  %v1502_v51 = vmul.f32 0.01, %v1223_v44 }
 0x254   :  { %1239 = vmatmul.bf16.gmra.mxu1 %v1031_v46  ;;  %v529_v57 = vadd.f32 %v7587_v56, %v528_v49 }
 0x255   :  { %v1629_v52 = vmax.f32 %v1221_v43, %v1501_v50  ;;  %v1630_v53 = vmax.f32 %v1223_v44, %v1502_v51 }
 0x256   :  { %v2216_v45 = vpop.xlane.xlu2 %2215 }
 0x257   :  { %v2584_v58 = vsub.f32 %v7449_v48, %v2216_v45  ;;  %v1744_v54 = vpack.c.bf16 %v1630_v53, %v1629_v52  ;;  %v1225_v45 = vpop.f32.mrf.mxu1 }
 0x259   :  { %v7548_v60 = vpop.eup %6605  ;;  %v2719_v62 = vmul.f32 1.442695, %v2584_v58  ;;  %1936 = vmatmul.bf16.gmra.mxu2 %v1744_v54  ;;  %v5393_v58 = vld [vmem:[%s11490_s1] sm:$0xff] }
 0x25a   :  { %v2979_v3 = vsel %vm2192_vm3, %v7548_v60, 0.0  ;;  %6338 = vmatmul.msk.bf16.gmra.mxu0 %vm229_vm2, %v181_v37  ;;  %5794 = vmatpush.msra.mxu3 %v5393_v58  ;;  %v183_v37 = vpack.c.bf16 %v79_v35, %v78_v33 }
 0x25b   :  { %6607 = vpow2.f32 %v2719_v62  ;;  %2233 = vmax.xlane.f32.xlu2 %v2232_v0  ;;  %2980 = vadd.xlane.f32.xlu1 %v2979_v3  ;;  %v530_v59 = vpop.f32.mrf.mxu0  ;;  %v77_v62 = vld [vmem:[%s11484_s0 + $0x168] sm:$0xff]  ;;  %v794_v0 = vmul.f32 0.01, %v529_v57 }
 0x25c   :  { %v531_v3 = vadd.f32 %v7587_v56, %v530_v59  ;;  %v182_v1 = vpack.c.bf16 %v77_v62, %v76_v61 }
 0x25f   :  { %v1227_v5 = vpop.f32.mrf.mxu1 }
 0x260   :  { %v1228_v17 = vadd.f32 %v7336_v4, %v1227_v5 }
 0x261   :  { %v7557_v48 = vpop.eup %6607 }
 0x262   :  { %v2982_v9 = vsel %vm2192_vm3, %v7557_v48, 0.0  ;;  %v1504_v22 = vmul.f32 0.01, %v1228_v17 }
 0x263   :  { %2983 = vadd.xlane.f32.xlu0 %v2982_v9  ;;  %2236 = vmax.xlane.f32.xlu1 %v2235_v12  ;;  %v922_v9 = vmax.f32 %v529_v57, %v794_v0  ;;  %v795_v12 = vmul.f32 0.01, %v531_v3  ;;  %v533_v19 = vpop.f32.mrf.mxu0 }
 0x264   :  { %v1632_v25 = vmax.f32 %v1228_v17, %v1504_v22  ;;  %v534_v27 = vadd.f32 %v7587_v56, %v533_v19 }
 0x265   :  { %v923_v13 = vmax.f32 %v531_v3, %v795_v12 }
 0x266   :  { %v796_v31 = vmul.f32 0.01, %v534_v27 }
 0x267   :  { %v1032_v18 = vpack.c.bf16 %v923_v13, %v922_v9  ;;  %v1230_v28 = vpop.f32.mrf.mxu1 }
 0x268   :  { %v924_v46 = vmax.f32 %v534_v27, %v796_v31  ;;  %v1231_v51 = vadd.f32 %v7336_v4, %v1230_v28  ;;  %v7630_v31 = vadd.f32 %v7393_v63, %v1912_v34 }
 0x269   :  { %1244 = vmatmul.bf16.gmra.mxu1 %v1032_v18 }
 0x26a   :  { %6339 = vmatmul.msk.bf16.gmra.mxu0 %vm229_vm2, %v182_v1  ;;  %v1505_v59 = vmul.f32 0.01, %v1231_v51 }
 0x26b   :  { %2239 = vmax.xlane.f32.xlu0 %v2238_v16  ;;  %v1226_v16 = vadd.f32 %v7336_v4, %v1225_v45  ;;  %v535_v32 = vpop.f32.mrf.mxu0 }
 0x26c   :  { %v536_v36 = vadd.f32 %v7587_v56, %v535_v32  ;;  %v1633_v1 = vmax.f32 %v1231_v51, %v1505_v59 }
 0x26d   :  { %v1503_v20 = vmul.f32 0.01, %v1226_v16 }
 0x26e   :  { %v797_v40 = vmul.f32 0.01, %v536_v36 }
 0x26f   :  { %v1631_v24 = vmax.f32 %v1226_v16, %v1503_v20  ;;  %v1232_v53 = vpop.f32.mrf.mxu1 }
 0x270   :  { %v925_v52 = vmax.f32 %v536_v36, %v797_v40  ;;  %v1233_v57 = vadd.f32 %v7336_v4, %v1232_v53  ;;  %v1914_v4 = vpop.f32.mrf.mxu2 }
 0x271   :  { %v1745_v29 = vpack.c.bf16 %v1632_v25, %v1631_v24 }
 0x272   :  { %v1033_v61 = vpack.c.bf16 %v925_v52, %v924_v46  ;;  %v1506_v62 = vmul.f32 0.01, %v1233_v57 }
 0x273   :  { %1941 = vmatmul.bf16.gmra.mxu2 %v1745_v29 }
 0x274   :  { %v1634_v9 = vmax.f32 %v1233_v57, %v1506_v62 }
 0x278   :  { %v1917_v34 = vpop.f32.mrf.mxu2 }
 0x279   :  { %1249 = vmatmul.bf16.gmra.mxu1 %v1033_v61 }
 0x27a   :  { %6340 = vmatmul.msk.bf16.gmra.mxu0 %vm229_vm2, %v183_v37 }
 0x29e   :  { %v2963_v26 = vpop.xlane.xlu1 %2962 }
 0x29f   :  { %6609 = vrcp.f32 %v2963_v26  ;;  %v3354_v54 = vand.u32 2147483647, %v2963_v26  ;;  %v3356_v45 = vand.u32 2147483648, %v2963_v26  ;;  %vm3350_vm5 = vweird.f32 %v2963_v26 }
 0x2a1   :  { %v3357_v3 = vor.u32 1.1754944e-38, %v3356_v45  ;;  %vm3355_vm7 = vcmp.eq.f32.partialorder %v3354_v54, 8.507059e+37 }
 0x2a5   :  { %v6610_v39 = vpop.eup %6609 }
 0x2a6   :  { %v3346_v42 = vmul.f32 %v6610_v39, %v2963_v26  ;;  %v2219_v43 = vpop.xlane.xlu1 %2218  ;;  %v2966_v44 = vpop.xlane.xlu0 %2965  ;;  %vm3351_vm4 = vweird.f32 %v6610_v39  ;;  %v1746_v26 = vpack.c.bf16 %v1634_v9, %v1633_v1 }
 0x2a7   :  { %v2585_v49 = vsub.f32 %v7486_v6, %v2219_v43  ;;  %6611 = vrcp.f32 %v2966_v44  ;;  %vm3352_vm6 = vmor %vm3350_vm5, %vm3351_vm4  ;;  %v3370_v25 = vand.u32 2147483648, %v2966_v44  ;;  %v3368_v28 = vand.u32 2147483647, %v2966_v44 }
 0x2a8   :  { %v3347_v50 = vsub.f32 1.0, %v3346_v42  ;;  %1946 = vmatmul.bf16.gmra.mxu2 %v1746_v26  ;;  %vm3364_vm9 = vweird.f32 %v2966_v44 }
 0x2a9   :  { %v2721_v38 = vmul.f32 1.442695, %v2585_v49  ;;  %v3371_v32 = vor.u32 1.1754944e-38, %v3370_v25  ;;  %vm3369_vm11 = vcmp.eq.f32.partialorder %v3368_v28, 8.507059e+37  ;;  %v2241_v49 = vsel %vm2192_vm3, %v7630_v31, -inf }
 0x2aa   :  { %v3348_v58 = vmul.f32 %v6610_v39, %v3347_v50 }
 0x2ab   :  { %6613 = vpow2.f32 %v2721_v38  ;;  %v7653_v38 = vadd.f32 %v7393_v63, %v1914_v4 }
 0x2ac   :  { %v3349_v0 = vadd.f32 %v6610_v39, %v3348_v58 }
 0x2ad   :  { %v6612_v6 = vpop.eup %6611  ;;  %v2244_v9 = vsel %vm2192_vm3, %v7653_v38, -inf }
 0x2ae   :  { %v3360_v12 = vmul.f32 %v6612_v6, %v2966_v44  ;;  %v7615_v13 = vpop.xlane.xlu2 %2968  ;;  %v2222_v5 = vpop.xlane.xlu0 %2221  ;;  %v3353_v16 = vsel %vm3352_vm6, %v6610_v39, %v3349_v0  ;;  %vm3365_vm8 = vweird.f32 %v6612_v6 }
 0x2af   :  { %6615 = vrcp.f32 %v7615_v13  ;;  %v2586_v17 = vsub.f32 %v7496_v15, %v2222_v5  ;;  %v3358_v18 = vsel %vm3355_vm7, %v3357_v3, %v3353_v16  ;;  %vm3366_vm10 = vmor %vm3364_vm9, %vm3365_vm8  ;;  %v3384_v50 = vand.u32 2147483648, %v7615_v13  ;;  %v1919_v5 = vpop.f32.mrf.mxu2 }
 0x2b0   :  { %v3361_v19 = vsub.f32 1.0, %v3360_v12  ;;  %v5137_v20 = vmul.f32 %v7481_v2, %v3358_v18  ;;  %v3382_v51 = vand.u32 2147483647, %v7615_v13  ;;  %vm3378_vm13 = vweird.f32 %v7615_v13 }
 0x2b1   :  { %v7620_v22 = vpop.eup %6613  ;;  %v2723_v24 = vmul.f32 1.442695, %v2586_v17  ;;  %v3385_v54 = vor.u32 1.1754944e-38, %v3384_v50  ;;  %v7676_v17 = vadd.f32 %v7393_v63, %v1917_v34 }
 0x2b2   :  { %5265 = vst.msk [vmem:[%s11491_s9] sm:$0xff] %vm2192_vm3, %v5137_v20  ;;  %6445 = vmatmul.msk.f32.vlgmr.msra.gmra.mxu3 %vm2192_vm3, %v5137_v20  ;;  %v2985_v27 = vsel %vm2192_vm3, %v7620_v22, 0.0  ;;  %v3362_v15 = vmul.f32 %v6612_v6, %v3361_v19  ;;  %vm3383_vm15 = vcmp.eq.f32.partialorder %v3382_v51, 8.507059e+37 }
 0x2b3   :  { %6617 = vpow2.f32 %v2723_v24  ;;  %2986 = vadd.xlane.f32.xlu2 %v2985_v27 }
 0x2b4   :  { %v3363_v2 = vadd.f32 %v6612_v6, %v3362_v15 }
 0x2b5   :  { %v6616_v29 = vpop.eup %6615 }
 0x2b6   :  { %v3374_v33 = vmul.f32 %v6616_v29, %v7615_v13  ;;  %v2225_v35 = vpop.xlane.xlu2 %2224  ;;  %v7633_v36 = vpop.xlane.xlu1 %2971  ;;  %v3367_v37 = vsel %vm3366_vm10, %v6612_v6, %v3363_v2  ;;  %vm3379_vm12 = vweird.f32 %v6616_v29 }
 0x2b7   :  { %v2587_v39 = vsub.f32 %v7506_v23, %v2225_v35  ;;  %6619 = vrcp.f32 %v7633_v36  ;;  %v3372_v40 = vsel %vm3369_vm11, %v3371_v32, %v3367_v37  ;;  %vm3380_vm14 = vmor %vm3378_vm13, %vm3379_vm12  ;;  %v3398_v12 = vand.u32 2147483648, %v7633_v36 }
 0x2b8   :  { %v3375_v42 = vsub.f32 1.0, %v3374_v33  ;;  %v5138_v43 = vmul.f32 %v7489_v10, %v3372_v40  ;;  %vm3392_vm1 = vweird.f32 %v7633_v36  ;;  %v2247_v32 = vsel %vm2192_vm3, %v7676_v17, -inf  ;;  %v1922_v40 = vpop.f32.mrf.mxu2 }
 0x2b9   :  { %v7638_v44 = vpop.eup %6617  ;;  %v2725_v46 = vmul.f32 1.442695, %v2587_v39  ;;  %v3399_v18 = vor.u32 1.1754944e-38, %v3398_v12  ;;  %v7699_v39 = vadd.f32 %v7393_v63, %v1919_v5 }
 0x2ba   :  { %5266 = vst.msk [vmem:[%s11491_s9 + $0x8] sm:$0xff] %vm2192_vm3, %v5138_v43  ;;  %6446 = vmatmul.msk.f32.gmra.mxu3 %vm2192_vm3, %v5138_v43  ;;  %v2988_v23 = vsel %vm2192_vm3, %v7638_v44, 0.0  ;;  %v3376_v10 = vmul.f32 %v6616_v29, %v3375_v42 }
 0x2bb   :  { %6621 = vpow2.f32 %v2725_v46  ;;  %2242 = vmax.xlane.f32.xlu2 %v2241_v49  ;;  %2989 = vadd.xlane.f32.xlu1 %v2988_v23 }
 0x2bc   :  { %v3377_v52 = vadd.f32 %v6616_v29, %v3376_v10 }
 0x2bd   :  { %v6620_v53 = vpop.eup %6619 }
 0x2be   :  { %v3388_v45 = vmul.f32 %v6620_v53, %v7633_v36  ;;  %v2228_v57 = vpop.xlane.xlu1 %2227  ;;  %v7656_v58 = vpop.xlane.xlu0 %2974  ;;  %v3381_v59 = vsel %vm3380_vm14, %v6616_v29, %v3377_v52  ;;  %vm3393_vm0 = vweird.f32 %v6620_v53 }
 0x2bf   :  { %v2588_v61 = vsub.f32 %v7516_v30, %v2228_v57  ;;  %6623 = vrcp.f32 %v7656_v58  ;;  %v3386_v62 = vsel %vm3383_vm15, %v3385_v54, %v3381_v59  ;;  %vm3394_vm4 = vmor %vm3392_vm1, %vm3393_vm0  ;;  %v3412_v33 = vand.u32 2147483648, %v7656_v58  ;;  %v80_v59 = vld [vmem:[%s11484_s0 + $0x180] sm:$0xff] }
 0x2c0   :  { %v3389_v0 = vsub.f32 1.0, %v3388_v45  ;;  %v5139_v6 = vmul.f32 %v7499_v8, %v3386_v62  ;;  %v3396_v8 = vand.u32 2147483647, %v7633_v36  ;;  %vm3406_vm7 = vweird.f32 %v7656_v58  ;;  %v1924_v5 = vpop.f32.mrf.mxu2 }
 0x2c1   :  { %v7661_v3 = vpop.eup %6621  ;;  %v2727_v1 = vmul.f32 1.442695, %v2588_v61  ;;  %v3413_v42 = vor.u32 1.1754944e-38, %v3412_v33  ;;  %v2250_v54 = vsel %vm2192_vm3, %v7699_v39, -inf  ;;  %v81_v61 = vld [vmem:[%s11484_s0 + $0x188] sm:$0xff] }
 0x2c2   :  { %5267 = vst.msk [vmem:[%s11491_s9 + $0x10] sm:$0xff] %vm2192_vm3, %v5139_v6  ;;  %6447 = vmatmul.msk.f32.gmra.mxu3 %vm2192_vm3, %v5139_v6  ;;  %v2991_v30 = vsel %vm2192_vm3, %v7661_v3, 0.0  ;;  %v3390_v13 = vmul.f32 %v6620_v53, %v3389_v0  ;;  %vm3397_vm5 = vcmp.eq.f32.partialorder %v3396_v8, 8.507059e+37  ;;  %v184_v0 = vpack.c.bf16 %v81_v61, %v80_v59 }
 0x2c3   :  { %6625 = vpow2.f32 %v2727_v1  ;;  %2992 = vadd.xlane.f32.xlu0 %v2991_v30  ;;  %2245 = vmax.xlane.f32.xlu1 %v2244_v9  ;;  %v7728_v1 = vadd.f32 %v7393_v63, %v1922_v40 }
 0x2c4   :  { %v3391_v16 = vadd.f32 %v6620_v53, %v3390_v13  ;;  %6341 = vmatmul.msk.bf16.gmra.mxu0 %vm229_vm2, %v184_v0 }
 0x2c5   :  { %v6624_v4 = vpop.eup %6623 }
 0x2c6   :  { %v3402_v19 = vmul.f32 %v6624_v4, %v7656_v58  ;;  %v7679_v20 = vpop.xlane.xlu2 %2977  ;;  %v2231_v24 = vpop.xlane.xlu0 %2230  ;;  %v3395_v25 = vsel %vm3394_vm4, %v6620_v53, %v3391_v16  ;;  %vm3407_vm6 = vweird.f32 %v6624_v4 }
 0x2c7   :  { %6627 = vrcp.f32 %v7679_v20  ;;  %v2589_v26 = vsub.f32 %v7532_v41, %v2231_v24  ;;  %v3400_v27 = vsel %vm3397_vm5, %v3399_v18, %v3395_v25  ;;  %vm3408_vm8 = vmor %vm3406_vm7, %vm3407_vm6  ;;  %v3426_v45 = vand.u32 2147483648, %v7679_v20 }
 0x2c8   :  { %v3403_v15 = vsub.f32 1.0, %v3402_v19  ;;  %v5140_v28 = vmul.f32 %v7509_v11, %v3400_v27  ;;  %v3410_v11 = vand.u32 2147483647, %v7656_v58  ;;  %v538_v58 = vpop.f32.mrf.mxu0  ;;  %vm3420_vm11 = vweird.f32 %v7679_v20 }
 0x2c9   :  { %v7684_v2 = vpop.eup %6625  ;;  %v2729_v29 = vmul.f32 1.442695, %v2589_v26  ;;  %v3427_v9 = vor.u32 1.1754944e-38, %v3426_v45  ;;  %v2253_v24 = vsel %vm2192_vm3, %v7728_v1, -inf  ;;  %v539_v26 = vadd.f32 %v7587_v56, %v538_v58 }
 0x2ca   :  { %5268 = vst.msk [vmem:[%s11491_s9 + $0x18] sm:$0xff] %vm2192_vm3, %v5140_v28  ;;  %6448 = vmatmul.msk.f32.gmra.mxu3 %vm2192_vm3, %v5140_v28  ;;  %v2994_v41 = vsel %vm2192_vm3, %v7684_v2, 0.0  ;;  %v3404_v35 = vmul.f32 %v6624_v4, %v3403_v15  ;;  %vm3411_vm9 = vcmp.eq.f32.partialorder %v3410_v11, 8.507059e+37  ;;  %v7754_v28 = vld [vmem:[%s11489_s7] ss:$0 sm:$0xff] }
 0x2cb   :  { %6629 = vpow2.f32 %v2729_v29  ;;  %2995 = vadd.xlane.f32.xlu2 %v2994_v41  ;;  %2248 = vmax.xlane.f32.xlu0 %v2247_v32  ;;  %v7757_v29 = vadd.f32 %v7754_v28, %v1924_v5  ;;  %v798_v11 = vmul.f32 0.01, %v539_v26 }
 0x2cc   :  { %v3405_v36 = vadd.f32 %v6624_v4, %v3404_v35 }
 0x2cd   :  { %v6628_v37 = vpop.eup %6627  ;;  %v926_v45 = vmax.f32 %v539_v26, %v798_v11 }
 0x2ce   :  { %v3416_v43 = vmul.f32 %v6628_v37, %v7679_v20  ;;  %v2234_v34 = vpop.xlane.xlu2 %2233  ;;  %v7702_v46 = vpop.xlane.xlu1 %2980  ;;  %v3409_v49 = vsel %vm3408_vm8, %v6624_v4, %v3405_v36  ;;  %vm3421_vm10 = vweird.f32 %v6628_v37 }
 0x2cf   :  { %v2590_v50 = vsub.f32 %v7545_v55, %v2234_v34  ;;  %6631 = vrcp.f32 %v7702_v46  ;;  %v3414_v23 = vsel %vm3411_vm9, %v3413_v42, %v3409_v49  ;;  %vm3422_vm12 = vmor %vm3420_vm11, %vm3421_vm10  ;;  %v3440_v25 = vand.u32 2147483648, %v7702_v46 }
 0x2d0   :  { %v3417_v10 = vsub.f32 1.0, %v3416_v43  ;;  %v5141_v51 = vmul.f32 %v7519_v21, %v3414_v23  ;;  %v3424_v21 = vand.u32 2147483647, %v7679_v20  ;;  %v3438_v27 = vand.u32 2147483647, %v7702_v46  ;;  %v540_v15 = vpop.f32.mrf.mxu0 }
 0x2d1   :  { %v7707_v52 = vpop.eup %6629  ;;  %v2731_v53 = vmul.f32 1.442695, %v2590_v50  ;;  %vm3434_vm15 = vweird.f32 %v7702_v46  ;;  %v541_v33 = vadd.f32 %v7587_v56, %v540_v15  ;;  %v3441_v35 = vor.u32 1.1754944e-38, %v3440_v25 }
 0x2d2   :  { %5269 = vst.msk [vmem:[%s11491_s9 + $0x20] sm:$0xff] %vm2192_vm3, %v5141_v51  ;;  %6449 = vmatmul.msk.f32.gmra.mxu3 %vm2192_vm3, %v5141_v51  ;;  %v2997_v55 = vsel %vm2192_vm3, %v7707_v52, 0.0  ;;  %v3418_v57 = vmul.f32 %v6628_v37, %v3417_v10  ;;  %vm3425_vm13 = vcmp.eq.f32.partialorder %v3424_v21, 8.507059e+37  ;;  %vm3439_vm1 = vcmp.eq.f32.partialorder %v3438_v27, 8.507059e+37  ;;  %v1927_v10 = vpop.f32.mrf.mxu2 }
 0x2d3   :  { %6633 = vpow2.f32 %v2731_v53  ;;  %2251 = vmax.xlane.f32.xlu2 %v2250_v54  ;;  %2998 = vadd.xlane.f32.xlu1 %v2997_v55  ;;  %v799_v42 = vmul.f32 0.01, %v541_v33  ;;  %v7779_v58 = vadd.f32 %v7754_v28, %v1927_v10  ;;  %vm6180_vm9 = vcmask 261120  }
 0x2d4   :  { %v3419_v62 = vadd.f32 %v6628_v37, %v3418_v57 }
 0x2d5   :  { %v6632_v6 = vpop.eup %6631  ;;  %v927_v55 = vmax.f32 %v541_v33, %v799_v42  ;;  %v82_v33 = vld [vmem:[%s11484_s0 + $0x190] sm:$0xff] }
 0x2d6   :  { %v3430_v12 = vmul.f32 %v6632_v6, %v7702_v46  ;;  %v2237_v30 = vpop.xlane.xlu1 %2236  ;;  %v7731_v13 = vpop.xlane.xlu0 %2983  ;;  %v3423_v8 = vsel %vm3422_vm12, %v6628_v37, %v3419_v62  ;;  %vm3435_vm14 = vweird.f32 %v6632_v6  ;;  %v2256_v46 = vsel %vm2192_vm3, %v7757_v29, -inf }
 0x2d7   :  { %v2591_v16 = vsub.f32 %v7555_v7, %v2237_v30  ;;  %6635 = vrcp.f32 %v7731_v13  ;;  %v3428_v4 = vsel %vm3425_vm13, %v3427_v9, %v3423_v8  ;;  %vm3436_vm0 = vmor %vm3434_vm15, %vm3435_vm14  ;;  %v3452_v53 = vand.u32 2147483647, %v7731_v13 }
 0x2d8   :  { %v3431_v18 = vsub.f32 1.0, %v3430_v12  ;;  %v5142_v63 = vmul.f32 %v7537_v47, %v3428_v4  ;;  %v3454_v54 = vand.u32 2147483648, %v7731_v13  ;;  %vm3448_vm5 = vweird.f32 %v7731_v13 }
 0x2d9   :  { %v7737_v19 = vpop.eup %6633  ;;  %v2733_v20 = vmul.f32 1.442695, %v2591_v16  ;;  %vm3453_vm7 = vcmp.eq.f32.partialorder %v3452_v53, 8.507059e+37  ;;  %v1034_v61 = vpack.c.bf16 %v927_v55, %v926_v45  ;;  %v2259_v9 = vsel %vm2192_vm3, %v7779_v58, -inf  ;;  %v7801_v16 = vld [vmem:[%s11487_s5] ss:$0 sm:$0xff] }
 0x2da   :  { %5270 = vst.msk [vmem:[%s11491_s9 + $0x28] sm:$0xff] %vm2192_vm3, %v5142_v63  ;;  %6450 = vmatmul.msk.f32.gmra.mxu3 %vm2192_vm3, %v5142_v63  ;;  %v3000_v47 = vsel %vm2192_vm3, %v7737_v19, 0.0  ;;  %v3432_v7 = vmul.f32 %v6632_v6, %v3431_v18  ;;  %v3455_v21 = vor.u32 1.1754944e-38, %v3454_v54  ;;  %v1929_v30 = vpop.f32.mrf.mxu2 }
 0x2db   :  { %6637 = vpow2.f32 %v2733_v20  ;;  %3001 = vadd.xlane.f32.xlu0 %v3000_v47  ;;  %2254 = vmax.xlane.f32.xlu1 %v2253_v24  ;;  %v543_v24 = vpop.f32.mrf.mxu0 }
 0x2dc   :  { %v3433_v32 = vadd.f32 %v6632_v6, %v3432_v7  ;;  %1254 = vmatmul.bf16.gmra.mxu1 %v1034_v61  ;;  %v544_v47 = vadd.f32 %v7587_v56, %v543_v24 }
 0x2dd   :  { %v6636_v41 = vpop.eup %6635 }
 0x2de   :  { %v3444_v36 = vmul.f32 %v6636_v41, %v7731_v13  ;;  %v2240_v37 = vpop.xlane.xlu0 %2239  ;;  %v3437_v40 = vsel %vm3436_vm0, %v6632_v6, %v3433_v32  ;;  %vm3449_vm4 = vweird.f32 %v6636_v41  ;;  %v1235_v13 = vpop.f32.mrf.mxu1  ;;  %v800_v15 = vmul.f32 0.01, %v544_v47 }
 0x2df   :  { %v2592_v43 = vsub.f32 %v7564_v14, %v2240_v37  ;;  %v3442_v34 = vsel %vm3439_vm1, %v3441_v35, %v3437_v40  ;;  %vm3450_vm6 = vmor %vm3448_vm5, %vm3449_vm4  ;;  %v1236_v4 = vadd.f32 %v7801_v16, %v1235_v13 }
 0x2e0   :  { %v3445_v49 = vsub.f32 1.0, %v3444_v36  ;;  %v5143_v50 = vmul.f32 %v7548_v60, %v3442_v34  ;;  %v928_v36 = vmax.f32 %v544_v47, %v800_v15  ;;  %v87_v15 = vld [vmem:[%s11484_s0 + $0x1b8] sm:$0xff] }
 0x2e1   :  { %v7766_v23 = vpop.eup %6637  ;;  %v2735_v51 = vmul.f32 1.442695, %v2592_v43  ;;  %v1507_v63 = vmul.f32 0.01, %v1236_v4 }
 0x2e2   :  { %5271 = vst.msk [vmem:[%s11491_s9 + $0x30] sm:$0xff] %vm2192_vm3, %v5143_v50  ;;  %6451 = vmatmul.msk.f32.gmra.mxu3 %vm2192_vm3, %v5143_v50  ;;  %v3003_v60 = vsel %vm2192_vm3, %v7766_v23, 0.0  ;;  %v3446_v14 = vmul.f32 %v6636_v41, %v3445_v49 }
 0x2e3   :  { %6639 = vpow2.f32 %v2735_v51  ;;  %2257 = vmax.xlane.f32.xlu0 %v2256_v46  ;;  %3004 = vadd.xlane.f32.xlu2 %v3003_v60  ;;  %v1635_v25 = vmax.f32 %v1236_v4, %v1507_v63  ;;  %v545_v32 = vpop.f32.mrf.mxu0 }
 0x2e4   :  { %v3447_v57 = vadd.f32 %v6636_v41, %v3446_v14  ;;  %v546_v35 = vadd.f32 %v7587_v56, %v545_v32 }
 0x2e6   :  { %v3451_v59 = vsel %vm3450_vm6, %v6636_v41, %v3447_v57  ;;  %v1237_v5 = vpop.f32.mrf.mxu1  ;;  %v83_v41 = vld [vmem:[%s11484_s0 + $0x198] sm:$0xff]  ;;  %v801_v37 = vmul.f32 0.01, %v546_v35  ;;  %v84_v57 = vld [vmem:[%s11484_s0 + $0x1a0] sm:$0xff] }
 0x2e7   :  { %v3456_v62 = vsel %vm3453_vm7, %v3455_v21, %v3451_v59  ;;  %v1238_v18 = vadd.f32 %v7801_v16, %v1237_v5  ;;  %v185_v11 = vpack.c.bf16 %v83_v41, %v82_v33  ;;  %v85_v21 = vld [vmem:[%s11484_s0 + $0x1a8] sm:$0xff] }
 0x2e8   :  { %v5144_v0 = vmul.f32 %v7557_v48, %v3456_v62  ;;  %v7794_v48 = vadd.f32 %v7754_v28, %v1929_v30  ;;  %v929_v40 = vmax.f32 %v546_v35, %v801_v37  ;;  %v186_v61 = vpack.c.bf16 %v85_v21, %v84_v57 }
 0x2e9   :  { %v7782_v6 = vpop.eup %6639  ;;  %v1508_v20 = vmul.f32 0.01, %v1238_v18  ;;  %6342 = vmatmul.msk.bf16.gmra.mxu0 %vm229_vm2, %v185_v11  ;;  %v1932_v11 = vpop.f32.mrf.mxu2 }
 0x2ea   :  { %5272 = vst.msk [vmem:[%s11491_s9 + $0x38] sm:$0xff] %vm2192_vm3, %v5144_v0  ;;  %6452 = vmatmul.msk.f32.gmra.mxu3 %vm2192_vm3, %v5144_v0  ;;  %v3006_v12 = vsel %vm2192_vm3, %v7782_v6, 0.0  ;;  %v2262_v8 = vsel %vm2192_vm3, %v7794_v48, -inf  ;;  %v1035_v49 = vpack.c.bf16 %v929_v40, %v928_v36 }
 0x2eb   :  { %2260 = vmax.xlane.f32.xlu2 %v2259_v9  ;;  %3007 = vadd.xlane.f32.xlu1 %v3006_v12  ;;  %v1636_v26 = vmax.f32 %v1238_v18, %v1508_v20  ;;  %v548_v46 = vpop.f32.mrf.mxu0 }
 0x2ec   :  { %1259 = vmatmul.bf16.gmra.mxu1 %v1035_v49  ;;  %v549_v45 = vadd.f32 %v7587_v56, %v548_v46 }
 0x2ed   :  { %v1747_v7 = vpack.c.bf16 %v1636_v26, %v1635_v25 }
 0x2ee   :  { %v1240_v27 = vpop.f32.mrf.mxu1  ;;  %v802_v14 = vmul.f32 0.01, %v549_v45 }
 0x2ef   :  { %1951 = vmatmul.bf16.gmra.mxu2 %v1747_v7  ;;  %v1241_v42 = vadd.f32 %v7801_v16, %v1240_v27  ;;  %v86_v27 = vld [vmem:[%s11484_s0 + $0x1b0] sm:$0xff] }
 0x2f0   :  { %v930_v62 = vmax.f32 %v549_v45, %v802_v14  ;;  %v187_v41 = vpack.c.bf16 %v87_v15, %v86_v27  ;;  %v7865_v27 = vadd.f32 %v7754_v28, %v1932_v11 }
 0x2f1   :  { %v1509_v50 = vmul.f32 0.01, %v1241_v42 }
 0x2f3   :  { %2263 = vmax.xlane.f32.xlu1 %v2262_v8  ;;  %v1637_v51 = vmax.f32 %v1241_v42, %v1509_v50  ;;  %v550_v55 = vpop.f32.mrf.mxu0 }
 0x2f4   :  { %v551_v59 = vadd.f32 %v7587_v56, %v550_v55 }
 0x2f6   :  { %v1242_v43 = vpop.f32.mrf.mxu1  ;;  %v803_v0 = vmul.f32 0.01, %v551_v59 }
 0x2f7   :  { %v1243_v34 = vadd.f32 %v7801_v16, %v1242_v43 }
 0x2f8   :  { %v931_v9 = vmax.f32 %v551_v59, %v803_v0 }
 0x2f9   :  { %v1510_v10 = vmul.f32 0.01, %v1243_v34  ;;  %6343 = vmatmul.msk.bf16.gmra.mxu0 %vm229_vm2, %v186_v61 }
 0x2fa   :  { %v1036_v8 = vpack.c.bf16 %v931_v9, %v930_v62 }
 0x2fb   :  { %v1638_v53 = vmax.f32 %v1243_v34, %v1510_v10  ;;  %v553_v4 = vpop.f32.mrf.mxu0 }
 0x2fc   :  { %1264 = vmatmul.bf16.gmra.mxu1 %v1036_v8  ;;  %v554_v25 = vadd.f32 %v7587_v56, %v553_v4 }
 0x2fd   :  { %v1748_v54 = vpack.c.bf16 %v1638_v53, %v1637_v51 }
 0x2fe   :  { %v1245_v60 = vpop.f32.mrf.mxu1  ;;  %v804_v32 = vmul.f32 0.01, %v554_v25 }
 0x2ff   :  { %1956 = vmatmul.bf16.gmra.mxu2 %v1748_v54  ;;  %v1246_v12 = vadd.f32 %v7801_v16, %v1245_v60 }
 0x300   :  { %v932_v34 = vmax.f32 %v554_v25, %v804_v32 }
 0x301   :  { %v1511_v5 = vmul.f32 0.01, %v1246_v12 }
 0x303   :  { %v1639_v63 = vmax.f32 %v1246_v12, %v1511_v5  ;;  %v555_v7 = vpop.f32.mrf.mxu0 }
 0x304   :  { %v556_v33 = vadd.f32 %v7587_v56, %v555_v7 }
 0x306   :  { %v1247_v30 = vpop.f32.mrf.mxu1  ;;  %v805_v36 = vmul.f32 0.01, %v556_v33 }
 0x307   :  { %v1248_v13 = vadd.f32 %v7801_v16, %v1247_v30 }
 0x308   :  { %v933_v46 = vmax.f32 %v556_v33, %v805_v36 }
 0x309   :  { %v1512_v18 = vmul.f32 0.01, %v1248_v13  ;;  %6344 = vmatmul.msk.bf16.gmra.mxu0 %vm229_vm2, %v187_v41 }
 0x30a   :  { %v1037_v14 = vpack.c.bf16 %v933_v46, %v932_v34 }
 0x30b   :  { %v1640_v20 = vmax.f32 %v1248_v13, %v1512_v18  ;;  %v1934_v13 = vpop.f32.mrf.mxu2 }
 0x30c   :  { %1269 = vmatmul.bf16.gmra.mxu1 %v1037_v14 }
 0x30d   :  { %v1749_v26 = vpack.c.bf16 %v1640_v20, %v1639_v63 }
 0x30e   :  { %v1250_v47 = vpop.f32.mrf.mxu1 }
 0x30f   :  { %1961 = vmatmul.bf16.gmra.mxu2 %v1749_v26  ;;  %v1251_v50 = vadd.f32 %v7801_v16, %v1250_v47 }
 0x311   :  { %v1513_v45 = vmul.f32 0.01, %v1251_v50 }
 0x313   :  { %v1641_v61 = vmax.f32 %v1251_v50, %v1513_v45  ;;  %v1937_v34 = vpop.f32.mrf.mxu2  ;;  %v2265_v50 = vsel %vm2192_vm3, %v7865_v27, -inf }
 0x316   :  { %v1252_v53 = vpop.f32.mrf.mxu1 }
 0x317   :  { %v1253_v60 = vadd.f32 %v7801_v16, %v1252_v53  ;;  %v7892_v53 = vadd.f32 %v7754_v28, %v1934_v13 }
 0x319   :  { %v1514_v55 = vmul.f32 0.01, %v1253_v60 }
 0x31b   :  { %v1642_v30 = vmax.f32 %v1253_v60, %v1514_v55  ;;  %v1939_v13 = vpop.f32.mrf.mxu2 }
 0x31d   :  { %v1750_v25 = vpack.c.bf16 %v1642_v30, %v1641_v61 }
 0x31f   :  { %1966 = vmatmul.bf16.gmra.mxu2 %v1750_v25 }
 0x326   :  { %v2987_v24 = vpop.xlane.xlu2 %2986 }
 0x327   :  { %6641 = vrcp.f32 %v2987_v24  ;;  %v3466_v10 = vand.u32 2147483647, %v2987_v24  ;;  %v3468_v51 = vand.u32 2147483648, %v2987_v24  ;;  %vm3462_vm10 = vweird.f32 %v2987_v24 }
 0x329   :  { %v3469_v59 = vor.u32 1.1754944e-38, %v3468_v51  ;;  %vm3467_vm12 = vcmp.eq.f32.partialorder %v3466_v10, 8.507059e+37 }
 0x32d   :  { %v6642_v35 = vpop.eup %6641 }
 0x32e   :  { %v3458_v37 = vmul.f32 %v6642_v35, %v2987_v24  ;;  %v2243_v40 = vpop.xlane.xlu2 %2242  ;;  %v7836_v42 = vpop.xlane.xlu1 %2989  ;;  %vm3463_vm8 = vweird.f32 %v6642_v35 }
 0x32f   :  { %v2593_v43 = vsub.f32 %v7630_v31, %v2243_v40  ;;  %6643 = vrcp.f32 %v7836_v42  ;;  %vm3464_vm11 = vmor %vm3462_vm10, %vm3463_vm8  ;;  %v3482_v24 = vand.u32 2147483648, %v7836_v42  ;;  %vm3476_vm14 = vweird.f32 %v7836_v42 }
 0x330   :  { %v3459_v49 = vsub.f32 1.0, %v3458_v37 }
 0x331   :  { %v2737_v56 = vmul.f32 1.442695, %v2593_v43  ;;  %v3483_v32 = vor.u32 1.1754944e-38, %v3482_v24 }
 0x332   :  { %v3460_v54 = vmul.f32 %v6642_v35, %v3459_v49 }
 0x333   :  { %6645 = vpow2.f32 %v2737_v56 }
 0x334   :  { %v3461_v31 = vadd.f32 %v6642_v35, %v3460_v54 }
 0x335   :  { %v6644_v57 = vpop.eup %6643  ;;  %v5796_v21 = vpop.f32.mrf.mxu3 }
 0x336   :  { %v3472_v62 = vmul.f32 %v6644_v57, %v7836_v42  ;;  %6181 = vst.msk [vmem:[%s11492_s8] sm:$0xff] %vm6180_vm9, %v5796_v21  ;;  %v2246_v0 = vpop.xlane.xlu1 %2245  ;;  %v7847_v9 = vpop.xlane.xlu0 %2992  ;;  %v3465_v12 = vsel %vm3464_vm11, %v6642_v35, %v3461_v31  ;;  %vm3477_vm13 = vweird.f32 %v6644_v57 }
 0x337   :  { %v2594_v8 = vsub.f32 %v7653_v38, %v2246_v0  ;;  %6647 = vrcp.f32 %v7847_v9  ;;  %v3470_v5 = vsel %vm3467_vm12, %v3469_v59, %v3465_v12  ;;  %vm3478_vm15 = vmor %vm3476_vm14, %vm3477_vm13  ;;  %v3496_v46 = vand.u32 2147483648, %v7847_v9 }
 0x338   :  { %v3473_v4 = vsub.f32 1.0, %v3472_v62  ;;  %v5145_v18 = vmul.f32 %v7620_v22, %v3470_v5  ;;  %v3480_v22 = vand.u32 2147483647, %v7836_v42  ;;  %v3494_v56 = vand.u32 2147483647, %v7847_v9 }
 0x339   :  { %v7852_v63 = vpop.eup %6645  ;;  %v2739_v20 = vmul.f32 1.442695, %v2594_v8  ;;  %vm3490_vm4 = vweird.f32 %v7847_v9  ;;  %v3497_v45 = vor.u32 1.1754944e-38, %v3496_v46 }
 0x33a   :  { %5273 = vst.msk [vmem:[%s11491_s9 + $0x40] sm:$0xff] %vm2192_vm3, %v5145_v18  ;;  %6453 = vmatmul.msk.f32.gmra.mxu3 %vm2192_vm3, %v5145_v18  ;;  %v3009_v38 = vsel %vm2192_vm3, %v7852_v63, 0.0  ;;  %v3474_v26 = vmul.f32 %v6644_v57, %v3473_v4  ;;  %vm3481_vm0 = vcmp.eq.f32.partialorder %v3480_v22, 8.507059e+37  ;;  %vm3495_vm6 = vcmp.eq.f32.partialorder %v3494_v56, 8.507059e+37 }
 0x33b   :  { %6649 = vpow2.f32 %v2739_v20  ;;  %3010 = vadd.xlane.f32.xlu0 %v3009_v38  ;;  %v7919_v4 = vadd.f32 %v7754_v28, %v1937_v34 }
 0x33c   :  { %v3475_v47 = vadd.f32 %v6644_v57, %v3474_v26 }
 0x33d   :  { %v6648_v7 = vpop.eup %6647  ;;  %v5799_v15 = vpop.f32.mrf.mxu3 }
 0x33e   :  { %v3486_v33 = vmul.f32 %v6648_v7, %v7847_v9  ;;  %6182 = vst.msk [vmem:[%s11492_s8 + $0x8] sm:$0xff] %vm6180_vm9, %v5799_v15  ;;  %v7872_v41 = vpop.xlane.xlu2 %2995  ;;  %v2249_v35 = vpop.xlane.xlu0 %2248  ;;  %v3479_v36 = vsel %vm3478_vm15, %v6644_v57, %v3475_v47  ;;  %vm3491_vm1 = vweird.f32 %v6648_v7  ;;  %v2268_v9 = vsel %vm2192_vm3, %v7892_v53, -inf }
 0x33f   :  { %6651 = vrcp.f32 %v7872_v41  ;;  %v2595_v11 = vsub.f32 %v7676_v17, %v2249_v35  ;;  %v3484_v37 = vsel %vm3481_vm0, %v3483_v32, %v3479_v36  ;;  %vm3492_vm5 = vmor %vm3490_vm4, %vm3491_vm1  ;;  %v3510_v12 = vand.u32 2147483648, %v7872_v41 }
 0x340   :  { %v3487_v40 = vsub.f32 1.0, %v3486_v33  ;;  %v5146_v42 = vmul.f32 %v7638_v44, %v3484_v37  ;;  %vm3504_vm8 = vweird.f32 %v7872_v41 }
 0x341   :  { %v7877_v43 = vpop.eup %6649  ;;  %v2741_v49 = vmul.f32 1.442695, %v2595_v11  ;;  %v3511_v20 = vor.u32 1.1754944e-38, %v3510_v12 }
 0x342   :  { %5274 = vst.msk [vmem:[%s11491_s9 + $0x48] sm:$0xff] %vm2192_vm3, %v5146_v42  ;;  %6454 = vmatmul.msk.f32.gmra.mxu3 %vm2192_vm3, %v5146_v42  ;;  %v3012_v17 = vsel %vm2192_vm3, %v7877_v43, 0.0  ;;  %v3488_v44 = vmul.f32 %v6648_v7, %v3487_v40  ;;  %v7946_v40 = vadd.f32 %v7754_v28, %v1939_v13  ;;  %v1942_v42 = vpop.f32.mrf.mxu2 }
 0x343   :  { %6653 = vpow2.f32 %v2741_v49  ;;  %2266 = vmax.xlane.f32.xlu0 %v2265_v50  ;;  %3013 = vadd.xlane.f32.xlu2 %v3012_v17  ;;  %v7979_v12 = vadd.f32 %v7754_v28, %v1942_v42 }
 0x344   :  { %v3489_v10 = vadd.f32 %v6648_v7, %v3488_v44 }
 0x345   :  { %v6652_v51 = vpop.eup %6651  ;;  %v5802_v54 = vpop.f32.mrf.mxu3 }
 0x346   :  { %v3500_v60 = vmul.f32 %v6652_v51, %v7872_v41  ;;  %6183 = vst.msk [vmem:[%s11492_s8 + $0x10] sm:$0xff] %vm6180_vm9, %v5802_v54  ;;  %v2252_v14 = vpop.xlane.xlu2 %2251  ;;  %v7899_v31 = vpop.xlane.xlu1 %2998  ;;  %v3493_v55 = vsel %vm3492_vm5, %v6648_v7, %v3489_v10  ;;  %vm3505_vm7 = vweird.f32 %v6652_v51 }
 0x347   :  { %v2596_v57 = vsub.f32 %v7699_v39, %v2252_v14  ;;  %6655 = vrcp.f32 %v7899_v31  ;;  %v3498_v21 = vsel %vm3495_vm6, %v3497_v45, %v3493_v55  ;;  %vm3506_vm10 = vmor %vm3504_vm8, %vm3505_vm7  ;;  %v3524_v35 = vand.u32 2147483648, %v7899_v31 }
 0x348   :  { %v3501_v59 = vsub.f32 1.0, %v3500_v60  ;;  %v5147_v61 = vmul.f32 %v7661_v3, %v3498_v21  ;;  %v3508_v3 = vand.u32 2147483647, %v7872_v41  ;;  %v2271_v41 = vsel %vm2192_vm3, %v7919_v4, -inf  ;;  %v88_v21 = vld [vmem:[%s11484_s0 + $0x1c0] sm:$0xff] }
 0x349   :  { %v7904_v62 = vpop.eup %6653  ;;  %v2743_v0 = vmul.f32 1.442695, %v2596_v57  ;;  %vm3518_vm13 = vweird.f32 %v7899_v31  ;;  %v3525_v49 = vor.u32 1.1754944e-38, %v3524_v35  ;;  %v2274_v14 = vsel %vm2192_vm3, %v7946_v40, -inf  ;;  %v558_v57 = vpop.f32.mrf.mxu0 }
 0x34a   :  { %5275 = vst.msk [vmem:[%s11491_s9 + $0x50] sm:$0xff] %vm2192_vm3, %v5147_v61  ;;  %6455 = vmatmul.msk.f32.gmra.mxu3 %vm2192_vm3, %v5147_v61  ;;  %v3015_v39 = vsel %vm2192_vm3, %v7904_v62, 0.0  ;;  %v3502_v30 = vmul.f32 %v6652_v51, %v3501_v59  ;;  %vm3509_vm11 = vcmp.eq.f32.partialorder %v3508_v3, 8.507059e+37  ;;  %v89_v59 = vld [vmem:[%s11484_s0 + $0x1c8] sm:$0xff] }
 0x34b   :  { %6657 = vpow2.f32 %v2743_v0  ;;  %2269 = vmax.xlane.f32.xlu2 %v2268_v9  ;;  %3016 = vadd.xlane.f32.xlu1 %v3015_v39  ;;  %v188_v0 = vpack.c.bf16 %v89_v59, %v88_v21 }
 0x34c   :  { %v3503_v8 = vadd.f32 %v6652_v51, %v3502_v30 }
 0x34d   :  { %v6656_v5 = vpop.eup %6655  ;;  %v5805_v18 = vpop.f32.mrf.mxu3  ;;  %6345 = vmatmul.msk.bf16.gmra.mxu0 %vm229_vm2, %v188_v0 }
 0x34e   :  { %v3514_v24 = vmul.f32 %v6656_v5, %v7899_v31  ;;  %6184 = vst.msk [vmem:[%s11492_s8 + $0x18] sm:$0xff] %vm6180_vm9, %v5805_v18  ;;  %v2255_v25 = vpop.xlane.xlu1 %2254  ;;  %v7926_v38 = vpop.xlane.xlu0 %3001  ;;  %v3507_v26 = vsel %vm3506_vm10, %v6652_v51, %v3503_v8  ;;  %vm3519_vm12 = vweird.f32 %v6656_v5 }
 0x34f   :  { %v2597_v22 = vsub.f32 %v7728_v1, %v2255_v25  ;;  %6659 = vrcp.f32 %v7926_v38  ;;  %v3512_v47 = vsel %vm3509_vm11, %v3511_v20, %v3507_v26  ;;  %vm3520_vm14 = vmor %vm3518_vm13, %vm3519_vm12  ;;  %vm3532_vm1 = vweird.f32 %v7926_v38  ;;  %v1944_v18 = vpop.f32.mrf.mxu2 }
 0x350   :  { %v3515_v7 = vsub.f32 1.0, %v3514_v24  ;;  %v5148_v15 = vmul.f32 %v7684_v2, %v3512_v47  ;;  %v3522_v2 = vand.u32 2147483647, %v7899_v31  ;;  %v3538_v31 = vand.u32 2147483648, %v7926_v38 }
 0x351   :  { %v7931_v32 = vpop.eup %6657  ;;  %v2745_v33 = vmul.f32 1.442695, %v2597_v22  ;;  %v2277_v47 = vsel %vm2192_vm3, %v7979_v12, -inf  ;;  %v560_v35 = vpop.f32.mrf.mxu0 }
 0x352   :  { %5276 = vst.msk [vmem:[%s11491_s9 + $0x58] sm:$0xff] %vm2192_vm3, %v5148_v15  ;;  %6456 = vmatmul.msk.f32.gmra.mxu3 %vm2192_vm3, %v5148_v15  ;;  %v3018_v1 = vsel %vm2192_vm3, %v7931_v32, 0.0  ;;  %v3516_v36 = vmul.f32 %v6656_v5, %v3515_v7  ;;  %vm3523_vm15 = vcmp.eq.f32.partialorder %v3522_v2, 8.507059e+37  ;;  %v3539_v30 = vor.u32 1.1754944e-38, %v3538_v31 }
 0x353   :  { %6661 = vpow2.f32 %v2745_v33  ;;  %3019 = vadd.xlane.f32.xlu0 %v3018_v1  ;;  %2272 = vmax.xlane.f32.xlu1 %v2271_v41  ;;  %v8008_v33 = vld [vmem:[%s11485_s3] ss:$0 sm:$0xff] }
 0x354   :  { %v3517_v11 = vadd.f32 %v6656_v5, %v3516_v36  ;;  %v559_v41 = vadd.f32 %v8008_v33, %v558_v57  ;;  %v561_v36 = vadd.f32 %v8008_v33, %v560_v35 }
 0x355   :  { %v6660_v37 = vpop.eup %6659  ;;  %v5808_v34 = vpop.f32.mrf.mxu3 }
 0x356   :  { %v3528_v50 = vmul.f32 %v6660_v37, %v7926_v38  ;;  %6185 = vst.msk [vmem:[%s11492_s8 + $0x20] sm:$0xff] %vm6180_vm9, %v5808_v34  ;;  %v7953_v46 = vpop.xlane.xlu2 %3004  ;;  %v2258_v17 = vpop.xlane.xlu0 %2257  ;;  %v3521_v44 = vsel %vm3520_vm14, %v6656_v5, %v3517_v11  ;;  %vm3533_vm0 = vweird.f32 %v6660_v37  ;;  %v8014_v11 = vadd.f32 %v7754_v28, %v1944_v18 }
 0x357   :  { %6663 = vrcp.f32 %v7953_v46  ;;  %v2598_v56 = vsub.f32 %v7757_v29, %v2258_v17  ;;  %v3526_v10 = vsel %vm3523_vm15, %v3525_v49, %v3521_v44  ;;  %vm3534_vm4 = vmor %vm3532_vm1, %vm3533_vm0  ;;  %v3552_v7 = vand.u32 2147483648, %v7953_v46 }
 0x358   :  { %v3529_v51 = vsub.f32 1.0, %v3528_v50  ;;  %v5149_v54 = vmul.f32 %v7707_v52, %v3526_v10  ;;  %v3536_v52 = vand.u32 2147483647, %v7926_v38  ;;  %vm3546_vm7 = vweird.f32 %v7953_v46 }
 0x359   :  { %v7958_v45 = vpop.eup %6661  ;;  %v2747_v60 = vmul.f32 1.442695, %v2598_v56  ;;  %v3553_v42 = vor.u32 1.1754944e-38, %v3552_v7  ;;  %v806_v44 = vmul.f32 0.01, %v559_v41  ;;  %v2280_v31 = vsel %vm2192_vm3, %v8014_v11, -inf }
 0x35a   :  { %5277 = vst.msk [vmem:[%s11491_s9 + $0x60] sm:$0xff] %vm2192_vm3, %v5149_v54  ;;  %6457 = vmatmul.msk.f32.gmra.mxu3 %vm2192_vm3, %v5149_v54  ;;  %v3021_v29 = vsel %vm2192_vm3, %v7958_v45, 0.0  ;;  %v3530_v55 = vmul.f32 %v6660_v37, %v3529_v51  ;;  %vm3537_vm5 = vcmp.eq.f32.partialorder %v3536_v52, 8.507059e+37  ;;  %v807_v56 = vmul.f32 0.01, %v561_v36 }
 0x35b   :  { %6665 = vpow2.f32 %v2747_v60  ;;  %2275 = vmax.xlane.f32.xlu0 %v2274_v14  ;;  %3022 = vadd.xlane.f32.xlu2 %v3021_v29  ;;  %v1947_v60 = vpop.f32.mrf.mxu2  ;;  %v934_v52 = vmax.f32 %v559_v41, %v806_v44 }
 0x35c   :  { %v3531_v61 = vadd.f32 %v6660_v37, %v3530_v55  ;;  %v935_v57 = vmax.f32 %v561_v36, %v807_v56  ;;  %v8038_v0 = vadd.f32 %v7754_v28, %v1947_v60 }
 0x35d   :  { %v6664_v9 = vpop.eup %6663  ;;  %v5811_v39 = vpop.f32.mrf.mxu3 }
 0x35e   :  { %v3542_v3 = vmul.f32 %v6664_v9, %v7953_v46  ;;  %6186 = vst.msk [vmem:[%s11492_s8 + $0x28] sm:$0xff] %vm6180_vm9, %v5811_v39  ;;  %v2261_v13 = vpop.xlane.xlu2 %2260  ;;  %v7986_v8 = vpop.xlane.xlu1 %3007  ;;  %v3535_v5 = vsel %vm3534_vm4, %v6660_v37, %v3531_v61  ;;  %vm3547_vm6 = vweird.f32 %v6664_v9 }
 0x35f   :  { %v2599_v20 = vsub.f32 %v7779_v58, %v2261_v13  ;;  %6667 = vrcp.f32 %v7986_v8  ;;  %v3540_v24 = vsel %vm3537_vm5, %v3539_v30, %v3535_v5  ;;  %vm3548_vm8 = vmor %vm3546_vm7, %vm3547_vm6  ;;  %v3566_v29 = vand.u32 2147483648, %v7986_v8 }
 0x360   :  { %v3543_v25 = vsub.f32 1.0, %v3542_v3  ;;  %v5150_v38 = vmul.f32 %v7737_v19, %v3540_v24  ;;  %v3550_v19 = vand.u32 2147483647, %v7953_v46  ;;  %v3564_v55 = vand.u32 2147483647, %v7986_v8 }
 0x361   :  { %v7992_v26 = vpop.eup %6665  ;;  %v2749_v22 = vmul.f32 1.442695, %v2599_v20  ;;  %vm3560_vm12 = vweird.f32 %v7986_v8  ;;  %v3567_v61 = vor.u32 1.1754944e-38, %v3566_v29  ;;  %v1038_v30 = vpack.c.bf16 %v935_v57, %v934_v52  ;;  %v1255_v20 = vpop.f32.mrf.mxu1 }
 0x362   :  { %5278 = vst.msk [vmem:[%s11491_s9 + $0x68] sm:$0xff] %vm2192_vm3, %v5150_v38  ;;  %6458 = vmatmul.msk.f32.gmra.mxu3 %vm2192_vm3, %v5150_v38  ;;  %v3024_v58 = vsel %vm2192_vm3, %v7992_v26, 0.0  ;;  %v3544_v15 = vmul.f32 %v6664_v9, %v3543_v25  ;;  %vm3551_vm10 = vcmp.eq.f32.partialorder %v3550_v19, 8.507059e+37  ;;  %vm3565_vm14 = vcmp.eq.f32.partialorder %v3564_v55, 8.507059e+37 }
 0x363   :  { %6669 = vpow2.f32 %v2749_v22  ;;  %2278 = vmax.xlane.f32.xlu2 %v2277_v47  ;;  %3025 = vadd.xlane.f32.xlu1 %v3024_v58  ;;  %v1949_v18 = vpop.f32.mrf.mxu2  ;;  %v1256_v38 = vadd.f32 %v7801_v16, %v1255_v20 }
 0x364   :  { %v3545_v1 = vadd.f32 %v6664_v9, %v3544_v15  ;;  %1274 = vmatmul.bf16.gmra.mxu1 %v1038_v30 }
 0x365   :  { %v6668_v2 = vpop.eup %6667  ;;  %v5814_v37 = vpop.f32.mrf.mxu3  ;;  %v1515_v47 = vmul.f32 0.01, %v1256_v38 }
 0x366   :  { %v3556_v34 = vmul.f32 %v6668_v2, %v7986_v8  ;;  %6187 = vst.msk [vmem:[%s11492_s8 + $0x30] sm:$0xff] %vm6180_vm9, %v5814_v37  ;;  %v2264_v49 = vpop.xlane.xlu1 %2263  ;;  %v3549_v50 = vsel %vm3548_vm8, %v6664_v9, %v3545_v1  ;;  %vm3561_vm11 = vweird.f32 %v6668_v2  ;;  %v2283_v8 = vsel %vm2192_vm3, %v8038_v0, -inf  ;;  %v563_v58 = vpop.f32.mrf.mxu0  ;;  %v91_v37 = vld [vmem:[%s11484_s0 + $0x1d8] sm:$0xff] }
 0x367   :  { %v2600_v46 = vsub.f32 %v7794_v48, %v2264_v49  ;;  %v3554_v17 = vsel %vm3551_vm10, %v3553_v42, %v3549_v50  ;;  %vm3562_vm13 = vmor %vm3560_vm12, %vm3561_vm11  ;;  %v1643_v15 = vmax.f32 %v1256_v38, %v1515_v47  ;;  %v564_v41 = vadd.f32 %v8008_v33, %v563_v58 }
 0x368   :  { %v3557_v10 = vsub.f32 1.0, %v3556_v34  ;;  %v5151_v51 = vmul.f32 %v7766_v23, %v3554_v17 }
 0x369   :  { %v8023_v54 = vpop.eup %6669  ;;  %v2751_v14 = vmul.f32 1.442695, %v2600_v46  ;;  %v1257_v25 = vpop.f32.mrf.mxu1  ;;  %v808_v1 = vmul.f32 0.01, %v564_v41 }
 0x36a   :  { %5279 = vst.msk [vmem:[%s11491_s9 + $0x70] sm:$0xff] %vm2192_vm3, %v5151_v51  ;;  %6459 = vmatmul.msk.f32.gmra.mxu3 %vm2192_vm3, %v5151_v51  ;;  %v3027_v48 = vsel %vm2192_vm3, %v8023_v54, 0.0  ;;  %v3558_v23 = vmul.f32 %v6668_v2, %v3557_v10  ;;  %v1258_v22 = vadd.f32 %v7801_v16, %v1257_v25 }
 0x36b   :  { %6671 = vpow2.f32 %v2751_v14  ;;  %3028 = vadd.xlane.f32.xlu0 %v3027_v48  ;;  %2281 = vmax.xlane.f32.xlu1 %v2280_v31  ;;  %v936_v49 = vmax.f32 %v564_v41, %v808_v1  ;;  %v95_v1 = vld [vmem:[%s11484_s0 + $0x1f8] sm:$0xff] }
 0x36c   :  { %v3559_v21 = vadd.f32 %v6668_v2, %v3558_v23  ;;  %v1516_v7 = vmul.f32 0.01, %v1258_v22 }
 0x36d   :  { %v5817_v59 = vpop.f32.mrf.mxu3 }
 0x36e   :  { %6188 = vst.msk [vmem:[%s11492_s8 + $0x38] sm:$0xff] %vm6180_vm9, %v5817_v59  ;;  %v3563_v9 = vsel %vm3562_vm13, %v6668_v2, %v3559_v21  ;;  %v1644_v19 = vmax.f32 %v1258_v22, %v1516_v7  ;;  %v565_v36 = vpop.f32.mrf.mxu0  ;;  %v90_v2 = vld [vmem:[%s11484_s0 + $0x1d0] sm:$0xff]  ;;  %v92_v21 = vld [vmem:[%s11484_s0 + $0x1e0] sm:$0xff]  ;;  %v93_v59 = vld [vmem:[%s11484_s0 + $0x1e8] sm:$0xff] }
 0x36f   :  { %v3568_v39 = vsel %vm3565_vm14, %v3567_v61, %v3563_v9  ;;  %v566_v42 = vadd.f32 %v8008_v33, %v565_v36  ;;  %v189_v34 = vpack.c.bf16 %v91_v37, %v90_v2  ;;  %v190_v9 = vpack.c.bf16 %v93_v59, %v92_v21 }
 0x370   :  { %v5152_v3 = vmul.f32 %v7782_v6, %v3568_v39  ;;  %v8057_v6 = vadd.f32 %v7754_v28, %v1949_v18  ;;  %v1751_v35 = vpack.c.bf16 %v1644_v19, %v1643_v15 }
 0x371   :  { %v8045_v13 = vpop.eup %6671  ;;  %v1260_v28 = vpop.f32.mrf.mxu1  ;;  %v809_v50 = vmul.f32 0.01, %v566_v42  ;;  %6346 = vmatmul.msk.bf16.gmra.mxu0 %vm229_vm2, %v189_v34 }
 0x372   :  { %5280 = vst.msk [vmem:[%s11491_s9 + $0x78] sm:$0xff] %vm2192_vm3, %v5152_v3  ;;  %6460 = vmatmul.msk.f32.gmra.mxu3 %vm2192_vm3, %v5152_v3  ;;  %v3030_v5 = vsel %vm2192_vm3, %v8045_v13, 0.0  ;;  %v2286_v24 = vsel %vm2192_vm3, %v8057_v6, -inf  ;;  %1971 = vmatmul.bf16.gmra.mxu2 %v1751_v35  ;;  %v1261_v17 = vadd.f32 %v7801_v16, %v1260_v28  ;;  %v94_v28 = vld [vmem:[%s11484_s0 + $0x1f0] sm:$0xff] }
 0x373   :  { %2284 = vmax.xlane.f32.xlu0 %v2283_v8  ;;  %3031 = vadd.xlane.f32.xlu2 %v3030_v5  ;;  %v937_v46 = vmax.f32 %v566_v42, %v809_v50  ;;  %v191_v2 = vpack.c.bf16 %v95_v1, %v94_v28  ;;  %v1952_v42 = vpop.f32.mrf.mxu2 }
 0x374   :  { %v1517_v51 = vmul.f32 0.01, %v1261_v17 }
 0x375   :  { %v1039_v10 = vpack.c.bf16 %v937_v46, %v936_v49 }
 0x376   :  { %v568_v60 = vpop.f32.mrf.mxu0  ;;  %v1645_v31 = vmax.f32 %v1261_v17, %v1517_v51 }
 0x377   :  { %1279 = vmatmul.bf16.gmra.mxu1 %v1039_v10  ;;  %v569_v23 = vadd.f32 %v8008_v33, %v568_v60 }
 0x379   :  { %v1262_v44 = vpop.f32.mrf.mxu1  ;;  %v810_v52 = vmul.f32 0.01, %v569_v23 }
 0x37a   :  { %v1263_v56 = vadd.f32 %v7801_v16, %v1262_v44 }
 0x37b   :  { %2287 = vmax.xlane.f32.xlu2 %v2286_v24  ;;  %v938_v39 = vmax.f32 %v569_v23, %v810_v52 }
 0x37c   :  { %v1518_v14 = vmul.f32 0.01, %v1263_v56 }
 0x37e   :  { %v1646_v29 = vmax.f32 %v1263_v56, %v1518_v14  ;;  %v570_v57 = vpop.f32.mrf.mxu0 }
 0x37f   :  { %v571_v61 = vadd.f32 %v8008_v33, %v570_v57 }
 0x380   :  { %v1752_v48 = vpack.c.bf16 %v1646_v29, %v1645_v31 }
 0x381   :  { %v1265_v55 = vpop.f32.mrf.mxu1  ;;  %v811_v30 = vmul.f32 0.01, %v571_v61  ;;  %6347 = vmatmul.msk.bf16.gmra.mxu0 %vm229_vm2, %v190_v9 }
 0x382   :  { %1976 = vmatmul.bf16.gmra.mxu2 %v1752_v48  ;;  %v1266_v8 = vadd.f32 %v7801_v16, %v1265_v55 }
 0x383   :  { %v939_v3 = vmax.f32 %v571_v61, %v811_v30 }
 0x384   :  { %v1519_v24 = vmul.f32 0.01, %v1266_v8 }
 0x385   :  { %v1040_v20 = vpack.c.bf16 %v939_v3, %v938_v39 }
 0x386   :  { %v573_v25 = vpop.f32.mrf.mxu0  ;;  %v1647_v22 = vmax.f32 %v1266_v8, %v1519_v24 }
 0x387   :  { %1284 = vmatmul.bf16.gmra.mxu1 %v1040_v20  ;;  %v574_v58 = vadd.f32 %v8008_v33, %v573_v25 }
 0x389   :  { %v1267_v5 = vpop.f32.mrf.mxu1  ;;  %v812_v19 = vmul.f32 0.01, %v574_v58 }
 0x38a   :  { %v1268_v18 = vadd.f32 %v7801_v16, %v1267_v5 }
 0x38b   :  { %v940_v17 = vmax.f32 %v574_v58, %v812_v19 }
 0x38c   :  { %v1520_v38 = vmul.f32 0.01, %v1268_v18 }
 0x38e   :  { %v1648_v47 = vmax.f32 %v1268_v18, %v1520_v38  ;;  %v575_v35 = vpop.f32.mrf.mxu0 }
 0x38f   :  { %v576_v36 = vadd.f32 %v8008_v33, %v575_v35 }
 0x390   :  { %v1753_v15 = vpack.c.bf16 %v1648_v47, %v1647_v22 }
 0x391   :  { %v1270_v41 = vpop.f32.mrf.mxu1  ;;  %v813_v34 = vmul.f32 0.01, %v576_v36  ;;  %6348 = vmatmul.msk.bf16.gmra.mxu0 %vm229_vm2, %v191_v2 }
 0x392   :  { %1981 = vmatmul.bf16.gmra.mxu2 %v1753_v15  ;;  %v1271_v10 = vadd.f32 %v7801_v16, %v1270_v41  ;;  %v8125_v41 = vld [vmem:[%s11489_s7] ss:$0 sm:$0xff] }
 0x393   :  { %v941_v51 = vmax.f32 %v576_v36, %v813_v34  ;;  %v8128_v35 = vadd.f32 %v8125_v41, %v1952_v42 }
 0x394   :  { %v1521_v55 = vmul.f32 0.01, %v1271_v10 }
 0x395   :  { %v1041_v23 = vpack.c.bf16 %v941_v51, %v940_v17 }
 0x396   :  { %v1649_v18 = vmax.f32 %v1271_v10, %v1521_v55  ;;  %v2289_v10 = vsel %vm2192_vm3, %v8128_v35, -inf }
 0x397   :  { %1289 = vmatmul.bf16.gmra.mxu1 %v1041_v23 }
 0x399   :  { %v1272_v48 = vpop.f32.mrf.mxu1 }
 0x39a   :  { %v1273_v52 = vadd.f32 %v7801_v16, %v1272_v48  ;;  %v1954_v16 = vpop.f32.mrf.mxu2 }
 0x39c   :  { %v1522_v61 = vmul.f32 0.01, %v1273_v52 }
 0x39e   :  { %v1650_v47 = vmax.f32 %v1273_v52, %v1522_v61 }
 0x3a0   :  { %v1754_v58 = vpack.c.bf16 %v1650_v47, %v1649_v18 }
 0x3a2   :  { %1986 = vmatmul.bf16.gmra.mxu2 %v1754_v58 }
 0x3ae   :  { %v3011_v7 = vpop.xlane.xlu0 %3010 }
 0x3af   :  { %6673 = vrcp.f32 %v3011_v7  ;;  %v3580_v14 = vand.u32 2147483648, %v3011_v7  ;;  %v3578_v29 = vand.u32 2147483647, %v3011_v7  ;;  %vm3574_vm0 = vweird.f32 %v3011_v7 }
 0x3b1   :  { %v3581_v59 = vor.u32 1.1754944e-38, %v3580_v14  ;;  %vm3579_vm4 = vcmp.eq.f32.partialorder %v3578_v29, 8.507059e+37  ;;  %v8155_v29 = vadd.f32 %v8125_v41, %v1954_v16 }
 0x3b5   :  { %v6674_v37 = vpop.eup %6673 }
 0x3b6   :  { %v3570_v49 = vmul.f32 %v6674_v37, %v3011_v7  ;;  %v8094_v50 = vpop.xlane.xlu2 %3013  ;;  %v2267_v46 = vpop.xlane.xlu0 %2266  ;;  %vm3575_vm15 = vweird.f32 %v6674_v37 }
 0x3b7   :  { %6675 = vrcp.f32 %v8094_v50  ;;  %v2601_v44 = vsub.f32 %v7865_v27, %v2267_v46  ;;  %vm3576_vm1 = vmor %vm3574_vm0, %vm3575_vm15  ;;  %v3594_v22 = vand.u32 2147483648, %v8094_v50  ;;  %vm3588_vm6 = vweird.f32 %v8094_v50 }
 0x3b8   :  { %v3571_v56 = vsub.f32 1.0, %v3570_v49 }
 0x3b9   :  { %v2753_v60 = vmul.f32 1.442695, %v2601_v44  ;;  %v3595_v1 = vor.u32 1.1754944e-38, %v3594_v22  ;;  %v1957_v44 = vpop.f32.mrf.mxu2 }
 0x3ba   :  { %v3572_v31 = vmul.f32 %v6674_v37, %v3571_v56 }
 0x3bb   :  { %6677 = vpow2.f32 %v2753_v60 }
 0x3bc   :  { %v3573_v57 = vadd.f32 %v6674_v37, %v3572_v31 }
 0x3bd   :  { %v6676_v21 = vpop.eup %6675  ;;  %v5820_v27 = vpop.f32.mrf.mxu3 }
 0x3be   :  { %v3584_v9 = vmul.f32 %v6676_v21, %v8094_v50  ;;  %6189 = vst.msk [vmem:[%s11492_s8 + $0x40] sm:$0xff] %vm6180_vm9, %v5820_v27  ;;  %v2270_v39 = vpop.xlane.xlu2 %2269  ;;  %v8105_v30 = vpop.xlane.xlu1 %3016  ;;  %v3577_v3 = vsel %vm3576_vm1, %v6674_v37, %v3573_v57  ;;  %vm3589_vm5 = vweird.f32 %v6676_v21 }
 0x3bf   :  { %v2602_v8 = vsub.f32 %v7892_v53, %v2270_v39  ;;  %6679 = vrcp.f32 %v8105_v30  ;;  %v3582_v5 = vsel %vm3579_vm4, %v3581_v59, %v3577_v3  ;;  %vm3590_vm7 = vmor %vm3588_vm6, %vm3589_vm5  ;;  %v3608_v51 = vand.u32 2147483648, %v8105_v30 }
 0x3c0   :  { %v3585_v20 = vsub.f32 1.0, %v3584_v9  ;;  %v5153_v24 = vmul.f32 %v7852_v63, %v3582_v5  ;;  %v3592_v63 = vand.u32 2147483647, %v8094_v50  ;;  %v3606_v60 = vand.u32 2147483647, %v8105_v30 }
 0x3c1   :  { %v8110_v25 = vpop.eup %6677  ;;  %v2755_v38 = vmul.f32 1.442695, %v2602_v8  ;;  %vm3602_vm11 = vweird.f32 %v8105_v30  ;;  %v3609_v23 = vor.u32 1.1754944e-38, %v3608_v51  ;;  %v2292_v3 = vsel %vm2192_vm3, %v8155_v29, -inf  ;;  %v1959_v5 = vpop.f32.mrf.mxu2 }
 0x3c2   :  { %5281 = vst.msk [vmem:[%s11491_s9 + $0x80] sm:$0xff] %vm2192_vm3, %v5153_v24  ;;  %6461 = vmatmul.msk.f32.gmra.mxu3 %vm2192_vm3, %v5153_v24  ;;  %v3033_v53 = vsel %vm2192_vm3, %v8110_v25, 0.0  ;;  %v3586_v7 = vmul.f32 %v6676_v21, %v3585_v20  ;;  %vm3593_vm8 = vcmp.eq.f32.partialorder %v3592_v63, 8.507059e+37  ;;  %vm3607_vm13 = vcmp.eq.f32.partialorder %v3606_v60, 8.507059e+37 }
 0x3c3   :  { %6681 = vpow2.f32 %v2755_v38  ;;  %3034 = vadd.xlane.f32.xlu1 %v3033_v53  ;;  %v8182_v24 = vadd.f32 %v8125_v41, %v1957_v44 }
 0x3c4   :  { %v3587_v15 = vadd.f32 %v6676_v21, %v3586_v7 }
 0x3c5   :  { %v6680_v19 = vpop.eup %6679  ;;  %v5823_v28 = vpop.f32.mrf.mxu3 }
 0x3c6   :  { %v3598_v36 = vmul.f32 %v6680_v19, %v8105_v30  ;;  %6190 = vst.msk [vmem:[%s11492_s8 + $0x48] sm:$0xff] %vm6180_vm9, %v5823_v28  ;;  %v2273_v2 = vpop.xlane.xlu1 %2272  ;;  %v8135_v37 = vpop.xlane.xlu0 %3019  ;;  %v3591_v34 = vsel %vm3590_vm7, %v6676_v21, %v3587_v15  ;;  %vm3603_vm10 = vweird.f32 %v6680_v19 }
 0x3c7   :  { %v2603_v49 = vsub.f32 %v7919_v4, %v2273_v2  ;;  %6683 = vrcp.f32 %v8135_v37  ;;  %v3596_v42 = vsel %vm3593_vm8, %v3595_v1, %v3591_v34  ;;  %vm3604_vm12 = vmor %vm3602_vm11, %vm3603_vm10  ;;  %v3622_v16 = vand.u32 2147483648, %v8135_v37 }
 0x3c8   :  { %v3599_v50 = vsub.f32 1.0, %v3598_v36  ;;  %v5154_v46 = vmul.f32 %v7877_v43, %v3596_v42  ;;  %vm3616_vm15 = vweird.f32 %v8135_v37  ;;  %v2295_v2 = vsel %vm2192_vm3, %v8182_v24, -inf }
 0x3c9   :  { %v8140_v17 = vpop.eup %6681  ;;  %v2757_v56 = vmul.f32 1.442695, %v2603_v49  ;;  %v3623_v22 = vor.u32 1.1754944e-38, %v3622_v16 }
 0x3ca   :  { %5282 = vst.msk [vmem:[%s11491_s9 + $0x88] sm:$0xff] %vm2192_vm3, %v5154_v46  ;;  %6462 = vmatmul.msk.f32.gmra.mxu3 %vm2192_vm3, %v5154_v46  ;;  %v3036_v4 = vsel %vm2192_vm3, %v8140_v17, 0.0  ;;  %v3600_v43 = vmul.f32 %v6680_v19, %v3599_v50  ;;  %v8209_v50 = vadd.f32 %v8125_v41, %v1959_v5  ;;  %v1962_v46 = vpop.f32.mrf.mxu2 }
 0x3cb   :  { %6685 = vpow2.f32 %v2757_v56  ;;  %3037 = vadd.xlane.f32.xlu0 %v3036_v4  ;;  %2290 = vmax.xlane.f32.xlu1 %v2289_v10  ;;  %v8242_v16 = vadd.f32 %v8125_v41, %v1962_v46 }
 0x3cc   :  { %v3601_v14 = vadd.f32 %v6680_v19, %v3600_v43 }
 0x3cd   :  { %v6684_v31 = vpop.eup %6683  ;;  %v5826_v48 = vpop.f32.mrf.mxu3 }
 0x3ce   :  { %v3612_v55 = vmul.f32 %v6684_v31, %v8135_v37  ;;  %6191 = vst.msk [vmem:[%s11492_s8 + $0x50] sm:$0xff] %vm6180_vm9, %v5826_v48  ;;  %v8162_v52 = vpop.xlane.xlu2 %3022  ;;  %v2276_v57 = vpop.xlane.xlu0 %2275  ;;  %v3605_v21 = vsel %vm3604_vm12, %v6680_v19, %v3601_v14  ;;  %vm3617_vm14 = vweird.f32 %v6684_v31 }
 0x3cf   :  { %6687 = vrcp.f32 %v8162_v52  ;;  %v2604_v27 = vsub.f32 %v7946_v40, %v2276_v57  ;;  %v3610_v59 = vsel %vm3607_vm13, %v3609_v23, %v3605_v21  ;;  %vm3618_vm0 = vmor %vm3616_vm15, %vm3617_vm14  ;;  %vm3630_vm5 = vweird.f32 %v8162_v52 }
 0x3d0   :  { %v3613_v61 = vsub.f32 1.0, %v3612_v55  ;;  %v5155_v9 = vmul.f32 %v7904_v62, %v3610_v59  ;;  %v3620_v62 = vand.u32 2147483647, %v8135_v37  ;;  %v3636_v37 = vand.u32 2147483648, %v8162_v52  ;;  %v96_v59 = vld [vmem:[%s11484_s0 + $0x200] sm:$0xff] }
 0x3d1   :  { %v8167_v39 = vpop.eup %6685  ;;  %v2759_v30 = vmul.f32 1.442695, %v2604_v27  ;;  %v578_v27 = vpop.f32.mrf.mxu0 }
 0x3d2   :  { %5283 = vst.msk [vmem:[%s11491_s9 + $0x90] sm:$0xff] %vm2192_vm3, %v5155_v9  ;;  %6463 = vmatmul.msk.f32.gmra.mxu3 %vm2192_vm3, %v5155_v9  ;;  %v3039_v40 = vsel %vm2192_vm3, %v8167_v39, 0.0  ;;  %v3614_v8 = vmul.f32 %v6684_v31, %v3613_v61  ;;  %vm3621_vm1 = vcmp.eq.f32.partialorder %v3620_v62, 8.507059e+37  ;;  %v3637_v56 = vor.u32 1.1754944e-38, %v3636_v37  ;;  %v97_v61 = vld [vmem:[%s11484_s0 + $0x208] sm:$0xff] }
 0x3d3   :  { %6689 = vpow2.f32 %v2759_v30  ;;  %2293 = vmax.xlane.f32.xlu0 %v2292_v3  ;;  %3040 = vadd.xlane.f32.xlu2 %v3039_v40  ;;  %v192_v30 = vpack.c.bf16 %v97_v61, %v96_v59 }
 0x3d4   :  { %v3615_v18 = vadd.f32 %v6684_v31, %v3614_v8 }
 0x3d5   :  { %v6688_v20 = vpop.eup %6687  ;;  %v5829_v38 = vpop.f32.mrf.mxu3  ;;  %6349 = vmatmul.msk.bf16.gmra.mxu0 %vm229_vm2, %v192_v30 }
 0x3d6   :  { %v3626_v47 = vmul.f32 %v6688_v20, %v8162_v52  ;;  %6192 = vst.msk [vmem:[%s11492_s8 + $0x58] sm:$0xff] %vm6180_vm9, %v5829_v38  ;;  %v2279_v53 = vpop.xlane.xlu2 %2278  ;;  %v8189_v7 = vpop.xlane.xlu1 %3025  ;;  %v3619_v63 = vsel %vm3618_vm0, %v6684_v31, %v3615_v18  ;;  %vm3631_vm4 = vweird.f32 %v6688_v20 }
 0x3d7   :  { %v2605_v58 = vsub.f32 %v7979_v12, %v2279_v53  ;;  %6691 = vrcp.f32 %v8189_v7  ;;  %v3624_v15 = vsel %vm3621_vm1, %v3623_v22, %v3619_v63  ;;  %vm3632_vm6 = vmor %vm3630_vm5, %vm3631_vm4  ;;  %v3650_v57 = vand.u32 2147483648, %v8189_v7  ;;  %v1964_v38 = vpop.f32.mrf.mxu2 }
 0x3d8   :  { %v3627_v19 = vsub.f32 1.0, %v3626_v47  ;;  %v5156_v28 = vmul.f32 %v7931_v32, %v3624_v15  ;;  %v3634_v32 = vand.u32 2147483647, %v8162_v52  ;;  %v2298_v52 = vsel %vm2192_vm3, %v8209_v50, -inf }
 0x3d9   :  { %v8194_v1 = vpop.eup %6689  ;;  %v2761_v36 = vmul.f32 1.442695, %v2605_v58  ;;  %vm3644_vm10 = vweird.f32 %v8189_v7  ;;  %v3651_v8 = vor.u32 1.1754944e-38, %v3650_v57  ;;  %v2301_v15 = vsel %vm2192_vm3, %v8242_v16, -inf }
 0x3da   :  { %5284 = vst.msk [vmem:[%s11491_s9 + $0x98] sm:$0xff] %vm2192_vm3, %v5156_v28  ;;  %6464 = vmatmul.msk.f32.gmra.mxu3 %vm2192_vm3, %v5156_v28  ;;  %v3042_v12 = vsel %vm2192_vm3, %v8194_v1, 0.0  ;;  %v3628_v34 = vmul.f32 %v6688_v20, %v3627_v19  ;;  %vm3635_vm7 = vcmp.eq.f32.partialorder %v3634_v32, 8.507059e+37  ;;  %v8272_v32 = vadd.f32 %v8125_v41, %v1964_v38 }
 0x3db   :  { %6693 = vpow2.f32 %v2761_v36  ;;  %2296 = vmax.xlane.f32.xlu2 %v2295_v2  ;;  %3043 = vadd.xlane.f32.xlu1 %v3042_v12  ;;  %v579_v36 = vadd.f32 %v8008_v33, %v578_v27  ;;  %v580_v2 = vpop.f32.mrf.mxu0 }
 0x3dc   :  { %v3629_v49 = vadd.f32 %v6688_v20, %v3628_v34  ;;  %v581_v12 = vadd.f32 %v8008_v33, %v580_v2 }
 0x3dd   :  { %v6692_v42 = vpop.eup %6691  ;;  %v5832_v44 = vpop.f32.mrf.mxu3 }
 0x3de   :  { %v3640_v10 = vmul.f32 %v6692_v42, %v8189_v7  ;;  %6193 = vst.msk [vmem:[%s11492_s8 + $0x60] sm:$0xff] %vm6180_vm9, %v5832_v44  ;;  %v2282_v51 = vpop.xlane.xlu1 %2281  ;;  %v8216_v4 = vpop.xlane.xlu0 %3028  ;;  %v3633_v43 = vsel %vm3632_vm6, %v6688_v20, %v3629_v49  ;;  %vm3645_vm8 = vweird.f32 %v6692_v42 }
 0x3df   :  { %v2606_v60 = vsub.f32 %v8014_v11, %v2282_v51  ;;  %6695 = vrcp.f32 %v8216_v4  ;;  %v3638_v14 = vsel %vm3635_vm7, %v3637_v56, %v3633_v43  ;;  %vm3646_vm11 = vmor %vm3644_vm10, %vm3645_vm8  ;;  %v3664_v19 = vand.u32 2147483648, %v8216_v4 }
 0x3e0   :  { %v3641_v31 = vsub.f32 1.0, %v3640_v10  ;;  %v5157_v48 = vmul.f32 %v7958_v45, %v3638_v14  ;;  %v3648_v45 = vand.u32 2147483647, %v8189_v7  ;;  %vm3658_vm14 = vweird.f32 %v8216_v4 }
 0x3e1   :  { %v8221_v23 = vpop.eup %6693  ;;  %v2763_v55 = vmul.f32 1.442695, %v2606_v60  ;;  %v815_v43 = vmul.f32 0.01, %v581_v12  ;;  %v1275_v38 = vpop.f32.mrf.mxu1 }
 0x3e2   :  { %5285 = vst.msk [vmem:[%s11491_s9 + $0xa0] sm:$0xff] %vm2192_vm3, %v5157_v48  ;;  %6465 = vmatmul.msk.f32.gmra.mxu3 %vm2192_vm3, %v5157_v48  ;;  %v3045_v11 = vsel %vm2192_vm3, %v8221_v23, 0.0  ;;  %v3642_v21 = vmul.f32 %v6692_v42, %v3641_v31  ;;  %vm3649_vm12 = vcmp.eq.f32.partialorder %v3648_v45, 8.507059e+37  ;;  %v1967_v48 = vpop.f32.mrf.mxu2 }
 0x3e3   :  { %6697 = vpow2.f32 %v2763_v55  ;;  %3046 = vadd.xlane.f32.xlu0 %v3045_v11  ;;  %2299 = vmax.xlane.f32.xlu1 %v2298_v52  ;;  %v2304_v52 = vsel %vm2192_vm3, %v8272_v32, -inf  ;;  %v943_v45 = vmax.f32 %v581_v12, %v815_v43 }
 0x3e4   :  { %v3643_v9 = vadd.f32 %v6692_v42, %v3642_v21 }
 0x3e5   :  { %v6696_v3 = vpop.eup %6695  ;;  %v5835_v40 = vpop.f32.mrf.mxu3 }
 0x3e6   :  { %v3654_v62 = vmul.f32 %v6696_v3, %v8216_v4  ;;  %6194 = vst.msk [vmem:[%s11492_s8 + $0x68] sm:$0xff] %vm6180_vm9, %v5835_v40  ;;  %v8249_v5 = vpop.xlane.xlu2 %3031  ;;  %v2285_v18 = vpop.xlane.xlu0 %2284  ;;  %v3647_v20 = vsel %vm3646_vm11, %v6692_v42, %v3643_v9  ;;  %vm3659_vm13 = vweird.f32 %v6696_v3  ;;  %v3665_v42 = vor.u32 1.1754944e-38, %v3664_v19 }
 0x3e7   :  { %6699 = vrcp.f32 %v8249_v5  ;;  %v2607_v22 = vsub.f32 %v8038_v0, %v2285_v18  ;;  %v3652_v47 = vsel %vm3649_vm12, %v3651_v8, %v3647_v20  ;;  %vm3660_vm15 = vmor %vm3658_vm14, %vm3659_vm13  ;;  %v3678_v57 = vand.u32 2147483648, %v8249_v5 }
 0x3e8   :  { %v3655_v53 = vsub.f32 1.0, %v3654_v62  ;;  %v5158_v7 = vmul.f32 %v7992_v26, %v3652_v47  ;;  %v3662_v26 = vand.u32 2147483647, %v8216_v4  ;;  %v814_v4 = vmul.f32 0.01, %v579_v36 }
 0x3e9   :  { %v8255_v63 = vpop.eup %6697  ;;  %v2765_v58 = vmul.f32 1.442695, %v2607_v22  ;;  %v3676_v11 = vand.u32 2147483647, %v8249_v5  ;;  %vm3672_vm4 = vweird.f32 %v8249_v5  ;;  %v3679_v61 = vor.u32 1.1754944e-38, %v3678_v57  ;;  %v1277_v47 = vpop.f32.mrf.mxu1 }
 0x3ea   :  { %5286 = vst.msk [vmem:[%s11491_s9 + $0xa8] sm:$0xff] %vm2192_vm3, %v5158_v7  ;;  %6466 = vmatmul.msk.f32.gmra.mxu3 %vm2192_vm3, %v5158_v7  ;;  %v3048_v0 = vsel %vm2192_vm3, %v8255_v63, 0.0  ;;  %v3656_v28 = vmul.f32 %v6696_v3, %v3655_v53  ;;  %vm3663_vm0 = vcmp.eq.f32.partialorder %v3662_v26, 8.507059e+37  ;;  %v942_v21 = vmax.f32 %v579_v36, %v814_v4  ;;  %v1969_v20 = vpop.f32.mrf.mxu2  ;;  %v8322_v53 = vld [vmem:[%s11487_s5] ss:$0 sm:$0xff] }
 0x3eb   :  { %6701 = vpow2.f32 %v2765_v58  ;;  %2302 = vmax.xlane.f32.xlu0 %v2301_v15  ;;  %3049 = vadd.xlane.f32.xlu2 %v3048_v0  ;;  %v8296_v9 = vadd.f32 %v8125_v41, %v1967_v48  ;;  %vm3677_vm6 = vcmp.eq.f32.partialorder %v3676_v11, 8.507059e+37  ;;  %v1276_v7 = vadd.f32 %v8322_v53, %v1275_v38 }
 0x3ec   :  { %v3657_v37 = vadd.f32 %v6696_v3, %v3656_v28  ;;  %v1042_v40 = vpack.c.bf16 %v943_v45, %v942_v21  ;;  %v1278_v58 = vadd.f32 %v8322_v53, %v1277_v47 }
 0x3ed   :  { %v6700_v34 = vpop.eup %6699  ;;  %v5838_v49 = vpop.f32.mrf.mxu3  ;;  %v2307_v18 = vsel %vm2192_vm3, %v8296_v9, -inf  ;;  %v1523_v15 = vmul.f32 0.01, %v1276_v7 }
 0x3ee   :  { %v3668_v46 = vmul.f32 %v6700_v34, %v8249_v5  ;;  %6195 = vst.msk [vmem:[%s11492_s8 + $0x70] sm:$0xff] %vm6180_vm9, %v5838_v49  ;;  %v2288_v44 = vpop.xlane.xlu2 %2287  ;;  %v3661_v56 = vsel %vm3660_vm15, %v6696_v3, %v3657_v37  ;;  %vm3673_vm1 = vweird.f32 %v6700_v34  ;;  %1294 = vmatmul.bf16.gmra.mxu1 %v1042_v40  ;;  %v1524_v19 = vmul.f32 0.01, %v1278_v58  ;;  %v583_v0 = vpop.f32.mrf.mxu0  ;;  %v98_v49 = vld [vmem:[%s11484_s0 + $0x210] sm:$0xff] }
 0x3ef   :  { %v2608_v10 = vsub.f32 %v8057_v6, %v2288_v44  ;;  %v3666_v51 = vsel %vm3663_vm0, %v3665_v42, %v3661_v56  ;;  %vm3674_vm5 = vmor %vm3672_vm4, %vm3673_vm1  ;;  %v1651_v28 = vmax.f32 %v1276_v7, %v1523_v15  ;;  %v584_v36 = vadd.f32 %v8008_v33, %v583_v0  ;;  %v99_v42 = vld [vmem:[%s11484_s0 + $0x218] sm:$0xff] }
 0x3f0   :  { %v3669_v60 = vsub.f32 1.0, %v3668_v46  ;;  %v5159_v14 = vmul.f32 %v8023_v54, %v3666_v51  ;;  %v1652_v26 = vmax.f32 %v1278_v58, %v1524_v19  ;;  %v193_v44 = vpack.c.bf16 %v99_v42, %v98_v49 }
 0x3f1   :  { %v8281_v31 = vpop.eup %6701  ;;  %v2767_v55 = vmul.f32 1.442695, %v2608_v10  ;;  %v816_v12 = vmul.f32 0.01, %v584_v36 }
 0x3f2   :  { %5287 = vst.msk [vmem:[%s11491_s9 + $0xb0] sm:$0xff] %vm2192_vm3, %v5159_v14  ;;  %6467 = vmatmul.msk.f32.gmra.mxu3 %vm2192_vm3, %v5159_v14  ;;  %v3051_v6 = vsel %vm2192_vm3, %v8281_v31, 0.0  ;;  %v3670_v54 = vmul.f32 %v6700_v34, %v3669_v60  ;;  %v1755_v2 = vpack.c.bf16 %v1652_v26, %v1651_v28  ;;  %6350 = vmatmul.msk.bf16.gmra.mxu0 %vm229_vm2, %v193_v44 }
 0x3f3   :  { %6703 = vpow2.f32 %v2767_v55  ;;  %2305 = vmax.xlane.f32.xlu2 %v2304_v52  ;;  %3052 = vadd.xlane.f32.xlu1 %v3051_v6  ;;  %v944_v56 = vmax.f32 %v584_v36, %v816_v12  ;;  %v103_v12 = vld [vmem:[%s11484_s0 + $0x238] sm:$0xff] }
 0x3f4   :  { %v3671_v27 = vadd.f32 %v6700_v34, %v3670_v54  ;;  %v1280_v37 = vpop.f32.mrf.mxu1  ;;  %1991 = vmatmul.bf16.gmra.mxu2 %v1755_v2 }
 0x3f5   :  { %v5841_v59 = vpop.f32.mrf.mxu3  ;;  %v1281_v43 = vadd.f32 %v8322_v53, %v1280_v37  ;;  %v102_v37 = vld [vmem:[%s11484_s0 + $0x230] sm:$0xff]  ;;  %v1972_v44 = vpop.f32.mrf.mxu2 }
 0x3f6   :  { %6196 = vst.msk [vmem:[%s11492_s8 + $0x78] sm:$0xff] %vm6180_vm9, %v5841_v59  ;;  %v3675_v30 = vsel %vm3674_vm5, %v6700_v34, %v3671_v27  ;;  %v585_v34 = vpop.f32.mrf.mxu0  ;;  %v100_v27 = vld [vmem:[%s11484_s0 + $0x220] sm:$0xff]  ;;  %v101_v59 = vld [vmem:[%s11484_s0 + $0x228] sm:$0xff]  ;;  %v195_v49 = vpack.c.bf16 %v103_v12, %v102_v37  ;;  %v8394_v12 = vadd.f32 %v8125_v41, %v1972_v44 }
 0x3f7   :  { %v3680_v3 = vsel %vm3677_vm6, %v3679_v61, %v3675_v30  ;;  %v586_v46 = vadd.f32 %v8008_v33, %v585_v34  ;;  %v1525_v55 = vmul.f32 0.01, %v1281_v43  ;;  %v194_v30 = vpack.c.bf16 %v101_v59, %v100_v27 }
 0x3f8   :  { %v5160_v8 = vmul.f32 %v8045_v13, %v3680_v3  ;;  %v8315_v13 = vadd.f32 %v8125_v41, %v1969_v20 }
 0x3f9   :  { %v8303_v62 = vpop.eup %6703  ;;  %v817_v10 = vmul.f32 0.01, %v586_v46  ;;  %v1653_v57 = vmax.f32 %v1281_v43, %v1525_v55 }
 0x3fa   :  { %5288 = vst.msk [vmem:[%s11491_s9 + $0xb8] sm:$0xff] %vm2192_vm3, %v5160_v8  ;;  %6468 = vmatmul.msk.f32.gmra.mxu3 %vm2192_vm3, %v5160_v8  ;;  %v3054_v5 = vsel %vm2192_vm3, %v8303_v62, 0.0  ;;  %v2310_v22 = vsel %vm2192_vm3, %v8315_v13, -inf }
 0x3fb   :  { %3055 = vadd.xlane.f32.xlu0 %v3054_v5  ;;  %2308 = vmax.xlane.f32.xlu1 %v2307_v18  ;;  %v945_v51 = vmax.f32 %v586_v46, %v817_v10 }
 0x3fc   :  { %v1282_v4 = vpop.f32.mrf.mxu1 }
 0x3fd   :  { %v1283_v60 = vadd.f32 %v8322_v53, %v1282_v4  ;;  %v1043_v14 = vpack.c.bf16 %v945_v51, %v944_v56 }
 0x3fe   :  { %v588_v48 = vpop.f32.mrf.mxu0 }
 0x3ff   :  { %v1526_v52 = vmul.f32 0.01, %v1283_v60  ;;  %1299 = vmatmul.bf16.gmra.mxu1 %v1043_v14  ;;  %v589_v21 = vadd.f32 %v8008_v33, %v588_v48 }
 0x401   :  { %v1654_v6 = vmax.f32 %v1283_v60, %v1526_v52  ;;  %v818_v3 = vmul.f32 0.01, %v589_v21 }
 0x402   :  { %6351 = vmatmul.msk.bf16.gmra.mxu0 %vm229_vm2, %v194_v30 }
 0x403   :  { %2311 = vmax.xlane.f32.xlu0 %v2310_v22  ;;  %v1756_v54 = vpack.c.bf16 %v1654_v6, %v1653_v57  ;;  %v946_v8 = vmax.f32 %v589_v21, %v818_v3 }
 0x404   :  { %v1285_v11 = vpop.f32.mrf.mxu1 }
 0x405   :  { %1996 = vmatmul.bf16.gmra.mxu2 %v1756_v54  ;;  %v1286_v20 = vadd.f32 %v8322_v53, %v1285_v11 }
 0x406   :  { %v590_v45 = vpop.f32.mrf.mxu0 }
 0x407   :  { %v591_v61 = vadd.f32 %v8008_v33, %v590_v45  ;;  %v1527_v7 = vmul.f32 0.01, %v1286_v20 }
 0x409   :  { %v819_v40 = vmul.f32 0.01, %v591_v61  ;;  %v1655_v15 = vmax.f32 %v1286_v20, %v1527_v7 }
 0x40b   :  { %v947_v5 = vmax.f32 %v591_v61, %v819_v40 }
 0x40c   :  { %v1287_v18 = vpop.f32.mrf.mxu1 }
 0x40d   :  { %v1288_v38 = vadd.f32 %v8322_v53, %v1287_v18  ;;  %v1044_v22 = vpack.c.bf16 %v947_v5, %v946_v8 }
 0x40e   :  { %v593_v47 = vpop.f32.mrf.mxu0 }
 0x40f   :  { %v1528_v58 = vmul.f32 0.01, %v1288_v38  ;;  %1304 = vmatmul.bf16.gmra.mxu1 %v1044_v22  ;;  %v594_v36 = vadd.f32 %v8008_v33, %v593_v47  ;;  %v8376_v22 = vpop.f32.mrf.mxu2 }
 0x411   :  { %v1656_v19 = vmax.f32 %v1288_v38, %v1528_v58  ;;  %v820_v42 = vmul.f32 0.01, %v594_v36 }
 0x412   :  { %6352 = vmatmul.msk.bf16.gmra.mxu0 %vm229_vm2, %v195_v49 }
 0x413   :  { %v1757_v28 = vpack.c.bf16 %v1656_v19, %v1655_v15  ;;  %v948_v43 = vmax.f32 %v594_v36, %v820_v42 }
 0x414   :  { %v1290_v26 = vpop.f32.mrf.mxu1 }
 0x415   :  { %2001 = vmatmul.bf16.gmra.mxu2 %v1757_v28  ;;  %v1291_v52 = vadd.f32 %v8322_v53, %v1290_v26 }
 0x416   :  { %v595_v2 = vpop.f32.mrf.mxu0 }
 0x417   :  { %v596_v34 = vadd.f32 %v8008_v33, %v595_v2  ;;  %v1529_v45 = vmul.f32 0.01, %v1291_v52 }
 0x419   :  { %v821_v56 = vmul.f32 0.01, %v596_v34  ;;  %v1657_v3 = vmax.f32 %v1291_v52, %v1529_v45 }
 0x41b   :  { %v949_v48 = vmax.f32 %v596_v34, %v821_v56 }
 0x41c   :  { %v1292_v57 = vpop.f32.mrf.mxu1 }
 0x41d   :  { %v1293_v54 = vadd.f32 %v8322_v53, %v1292_v57  ;;  %v1045_v11 = vpack.c.bf16 %v949_v48, %v948_v43 }
 0x41f   :  { %1309 = vmatmul.bf16.gmra.mxu1 %v1045_v11 }
 0x436   :  { %v3035_v0 = vpop.xlane.xlu1 %3034 }
 0x437   :  { %6705 = vrcp.f32 %v3035_v0  ;;  %v3692_v55 = vand.u32 2147483648, %v3035_v0  ;;  %v3690_v21 = vand.u32 2147483647, %v3035_v0  ;;  %vm3686_vm8 = vweird.f32 %v3035_v0 }
 0x439   :  { %v3693_v40 = vor.u32 1.1754944e-38, %v3692_v55  ;;  %vm3691_vm11 = vcmp.eq.f32.partialorder %v3690_v21, 8.507059e+37  ;;  %v2313_v55 = vsel %vm2192_vm3, %v8394_v12, -inf }
 0x43d   :  { %v6706_v46 = vpop.eup %6705 }
 0x43e   :  { %v3682_v10 = vmul.f32 %v6706_v46, %v3035_v0  ;;  %v2291_v51 = vpop.xlane.xlu1 %2290  ;;  %v8357_v4 = vpop.xlane.xlu0 %3037  ;;  %vm3687_vm7 = vweird.f32 %v6706_v46 }
 0x43f   :  { %v2609_v60 = vsub.f32 %v8128_v35, %v2291_v51  ;;  %6707 = vrcp.f32 %v8357_v4  ;;  %v1530_v35 = vmul.f32 0.01, %v1293_v54  ;;  %vm8363_vm10 = vmor %vm3686_vm8, %vm3687_vm7  ;;  %v3706_v36 = vand.u32 2147483648, %v8357_v4 }
 0x440   :  { %v3683_v14 = vsub.f32 1.0, %v3682_v10  ;;  %vm3700_vm13 = vweird.f32 %v8357_v4 }
 0x441   :  { %v2769_v33 = vmul.f32 1.442695, %v2609_v60  ;;  %v1658_v38 = vmax.f32 %v1293_v54, %v1530_v35  ;;  %v3707_v49 = vor.u32 1.1754944e-38, %v3706_v36  ;;  %v1977_v60 = vpop.f32.mrf.mxu2 }
 0x442   :  { %v3684_v6 = vmul.f32 %v6706_v46, %v3683_v14 }
 0x443   :  { %6709 = vpow2.f32 %v2769_v33  ;;  %v1758_v15 = vpack.c.bf16 %v1658_v38, %v1657_v3 }
 0x444   :  { %v3685_v27 = vadd.f32 %v6706_v46, %v3684_v6 }
 0x445   :  { %v6708_v59 = vpop.eup %6707  ;;  %v5844_v30 = vpop.f32.mrf.mxu3  ;;  %2006 = vmatmul.bf16.gmra.mxu2 %v1758_v15 }
 0x446   :  { %v3696_v8 = vmul.f32 %v6708_v59, %v8357_v4  ;;  %6197 = vst.msk [vmem:[%s11492_s8 + $0x80] sm:$0xff] %vm6180_vm9, %v5844_v30  ;;  %v8372_v5 = vpop.xlane.xlu2 %3040  ;;  %v2294_v18 = vpop.xlane.xlu0 %2293  ;;  %v3689_v20 = vsel %vm8363_vm10, %v6706_v46, %v3685_v27  ;;  %vm3701_vm12 = vweird.f32 %v6708_v59 }
 0x447   :  { %6711 = vrcp.f32 %v8372_v5  ;;  %v2610_v47 = vsub.f32 %v8155_v29, %v2294_v18  ;;  %v3694_v58 = vsel %vm3691_vm11, %v3693_v40, %v3689_v20  ;;  %v3704_v29 = vand.u32 2147483647, %v8357_v4  ;;  %vm3702_vm14 = vmor %vm3700_vm13, %vm3701_vm12 }
 0x448   :  { %v3697_v7 = vsub.f32 1.0, %v3696_v8  ;;  %v5161_v28 = vmul.f32 %v8110_v25, %v3694_v58  ;;  %v3720_v52 = vand.u32 2147483648, %v8372_v5  ;;  %vm3714_vm1 = vweird.f32 %v8372_v5 }
 0x449   :  { %v8380_v19 = vpop.eup %6709  ;;  %v2771_v0 = vmul.f32 1.442695, %v2610_v47  ;;  %vm3705_vm15 = vcmp.eq.f32.partialorder %v3704_v29, 8.507059e+37  ;;  %v8449_v58 = vadd.f32 %v8125_v41, %v1977_v60 }
 0x44a   :  { %v3698_v26 = vmul.f32 %v6708_v59, %v3697_v7  ;;  %v3057_v2 = vsel %vm2192_vm3, %v8380_v19, 0.0  ;;  %5289 = vst.msk [vmem:[%s11491_s9 + $0xc0] sm:$0xff] %vm2192_vm3, %v5161_v28  ;;  %6469 = vmatmul.msk.f32.gmra.mxu3 %vm2192_vm3, %v5161_v28  ;;  %v3721_v11 = vor.u32 1.1754944e-38, %v3720_v52 }
 0x44b   :  { %6713 = vpow2.f32 %v2771_v0  ;;  %3058 = vadd.xlane.f32.xlu2 %v3057_v2 }
 0x44c   :  { %v3699_v25 = vadd.f32 %v6708_v59, %v3698_v26 }
 0x44d   :  { %v6712_v37 = vpop.eup %6711  ;;  %v5847_v34 = vpop.f32.mrf.mxu3 }
 0x44e   :  { %v3710_v42 = vmul.f32 %v6712_v37, %v8372_v5  ;;  %6198 = vst.msk [vmem:[%s11492_s8 + $0x88] sm:$0xff] %vm6180_vm9, %v5847_v34  ;;  %v2297_v46 = vpop.xlane.xlu2 %2296  ;;  %v8401_v56 = vpop.xlane.xlu1 %3043  ;;  %v3703_v10 = vsel %vm3702_vm14, %v6708_v59, %v3699_v25  ;;  %vm3715_vm0 = vweird.f32 %v6712_v37  ;;  %v8429_v59 = vadd.f32 %v8125_v41, %v8376_v22 }
 0x44f   :  { %v2611_v51 = vsub.f32 %v8182_v24, %v2297_v46  ;;  %6715 = vrcp.f32 %v8401_v56  ;;  %v3708_v4 = vsel %vm3705_vm15, %v3707_v49, %v3703_v10  ;;  %vm3716_vm4 = vmor %vm3714_vm1, %vm3715_vm0  ;;  %v3734_v20 = vand.u32 2147483648, %v8401_v56  ;;  %v1979_v22 = vpop.f32.mrf.mxu2 }
 0x450   :  { %v3711_v44 = vsub.f32 1.0, %v3710_v42  ;;  %v5162_v48 = vmul.f32 %v8140_v17, %v3708_v4  ;;  %v3718_v17 = vand.u32 2147483647, %v8372_v5  ;;  %vm3728_vm7 = vweird.f32 %v8401_v56 }
 0x451   :  { %v8405_v43 = vpop.eup %6713  ;;  %v2773_v14 = vmul.f32 1.442695, %v2611_v51  ;;  %v3735_v0 = vor.u32 1.1754944e-38, %v3734_v20  ;;  %v2319_v46 = vsel %vm2192_vm3, %v8449_v58, -inf }
 0x452   :  { %v3712_v33 = vmul.f32 %v6712_v37, %v3711_v44  ;;  %v3060_v24 = vsel %vm2192_vm3, %v8405_v43, 0.0  ;;  %5290 = vst.msk [vmem:[%s11491_s9 + $0xc8] sm:$0xff] %vm2192_vm3, %v5162_v48  ;;  %6470 = vmatmul.msk.f32.gmra.mxu3 %vm2192_vm3, %v5162_v48  ;;  %vm3719_vm5 = vcmp.eq.f32.partialorder %v3718_v17, 8.507059e+37 }
 0x453   :  { %6717 = vpow2.f32 %v2773_v14  ;;  %2314 = vmax.xlane.f32.xlu2 %v2313_v55  ;;  %3061 = vadd.xlane.f32.xlu1 %v3060_v24  ;;  %v8484_v24 = vadd.f32 %v8125_v41, %v1979_v22 }
 0x454   :  { %v3713_v57 = vadd.f32 %v6712_v37, %v3712_v33 }
 0x455   :  { %v6716_v6 = vpop.eup %6715  ;;  %v5850_v54 = vpop.f32.mrf.mxu3 }
 0x456   :  { %v3724_v21 = vmul.f32 %v6716_v6, %v8401_v56  ;;  %6199 = vst.msk [vmem:[%s11492_s8 + $0x90] sm:$0xff] %vm6180_vm9, %v5850_v54  ;;  %v2300_v45 = vpop.xlane.xlu1 %2299  ;;  %v8425_v27 = vpop.xlane.xlu0 %3046  ;;  %v3717_v35 = vsel %vm3716_vm4, %v6712_v37, %v3713_v57  ;;  %vm3729_vm6 = vweird.f32 %v6716_v6 }
 0x457   :  { %v2612_v61 = vsub.f32 %v8209_v50, %v2300_v45  ;;  %6719 = vrcp.f32 %v8425_v27  ;;  %v3722_v3 = vsel %vm3719_vm5, %v3721_v11, %v3717_v35  ;;  %v3732_v50 = vand.u32 2147483647, %v8401_v56  ;;  %vm3730_vm8 = vmor %vm3728_vm7, %vm3729_vm6  ;;  %v1982_v4 = vpop.f32.mrf.mxu2 }
 0x458   :  { %v3725_v30 = vsub.f32 1.0, %v3724_v21  ;;  %v5163_v5 = vmul.f32 %v8167_v39, %v3722_v3  ;;  %v2316_v39 = vsel %vm2192_vm3, %v8429_v59, -inf  ;;  %v3748_v10 = vand.u32 2147483648, %v8425_v27  ;;  %v105_v3 = vld [vmem:[%s11484_s0 + $0x248] sm:$0xff] }
 0x459   :  { %v8433_v40 = vpop.eup %6717  ;;  %v2775_v8 = vmul.f32 1.442695, %v2612_v61  ;;  %vm3733_vm10 = vcmp.eq.f32.partialorder %v3732_v50, 8.507059e+37  ;;  %vm3742_vm12 = vweird.f32 %v8425_v27  ;;  %v598_v61 = vpop.f32.mrf.mxu0 }
 0x45a   :  { %v3726_v18 = vmul.f32 %v6716_v6, %v3725_v30  ;;  %v3063_v38 = vsel %vm2192_vm3, %v8433_v40, 0.0  ;;  %5291 = vst.msk [vmem:[%s11491_s9 + $0xd0] sm:$0xff] %vm2192_vm3, %v5163_v5  ;;  %6471 = vmatmul.msk.f32.gmra.mxu3 %vm2192_vm3, %v5163_v5  ;;  %v3749_v14 = vor.u32 1.1754944e-38, %v3748_v10  ;;  %v104_v30 = vld [vmem:[%s11484_s0 + $0x240] sm:$0xff] }
 0x45b   :  { %6721 = vpow2.f32 %v2775_v8  ;;  %3064 = vadd.xlane.f32.xlu0 %v3063_v38  ;;  %2317 = vmax.xlane.f32.xlu1 %v2316_v39  ;;  %v196_v5 = vpack.c.bf16 %v105_v3, %v104_v30 }
 0x45c   :  { %v3727_v47 = vadd.f32 %v6716_v6, %v3726_v18 }
 0x45d   :  { %v6720_v7 = vpop.eup %6719  ;;  %v5853_v15 = vpop.f32.mrf.mxu3  ;;  %6353 = vmatmul.msk.bf16.gmra.mxu0 %vm229_vm2, %v196_v5 }
 0x45e   :  { %v3738_v28 = vmul.f32 %v6720_v7, %v8425_v27  ;;  %6200 = vst.msk [vmem:[%s11492_s8 + $0x98] sm:$0xff] %vm6180_vm9, %v5853_v15  ;;  %v8457_v26 = vpop.xlane.xlu2 %3049  ;;  %v2303_v36 = vpop.xlane.xlu0 %2302  ;;  %v3731_v2 = vsel %vm3730_vm8, %v6716_v6, %v3727_v47  ;;  %vm3743_vm11 = vweird.f32 %v6720_v7  ;;  %v8525_v15 = vadd.f32 %v8125_v41, %v1982_v4 }
 0x45f   :  { %6723 = vrcp.f32 %v8457_v26  ;;  %v2613_v29 = vsub.f32 %v8242_v16, %v2303_v36  ;;  %v3736_v37 = vsel %vm3733_vm10, %v3735_v0, %v3731_v2  ;;  %vm3744_vm13 = vmor %vm3742_vm12, %vm3743_vm11  ;;  %vm3756_vm0 = vweird.f32 %v8457_v26  ;;  %v1984_v0 = vpop.f32.mrf.mxu2 }
 0x460   :  { %v3739_v25 = vsub.f32 1.0, %v3738_v28  ;;  %v5164_v42 = vmul.f32 %v8194_v1, %v3736_v37  ;;  %v3746_v1 = vand.u32 2147483647, %v8425_v27  ;;  %v3762_v27 = vand.u32 2147483648, %v8457_v26 }
 0x461   :  { %v8461_v34 = vpop.eup %6721  ;;  %v2777_v49 = vmul.f32 1.442695, %v2613_v29 }
 0x462   :  { %v3740_v56 = vmul.f32 %v6720_v7, %v3739_v25  ;;  %v3066_v51 = vsel %vm2192_vm3, %v8461_v34, 0.0  ;;  %5292 = vst.msk [vmem:[%s11491_s9 + $0xd8] sm:$0xff] %vm2192_vm3, %v5164_v42  ;;  %6472 = vmatmul.msk.f32.gmra.mxu3 %vm2192_vm3, %v5164_v42  ;;  %vm3747_vm14 = vcmp.eq.f32.partialorder %v3746_v1, 8.507059e+37  ;;  %v3763_v22 = vor.u32 1.1754944e-38, %v3762_v27 }
 0x463   :  { %6725 = vpow2.f32 %v2777_v49  ;;  %2320 = vmax.xlane.f32.xlu0 %v2319_v46  ;;  %3067 = vadd.xlane.f32.xlu2 %v3066_v51 }
 0x464   :  { %v3741_v16 = vadd.f32 %v6720_v7, %v3740_v56  ;;  %v600_v56 = vpop.f32.mrf.mxu0 }
 0x465   :  { %v6724_v44 = vpop.eup %6723  ;;  %v5856_v60 = vpop.f32.mrf.mxu3 }
 0x466   :  { %v3752_v48 = vmul.f32 %v6724_v44, %v8457_v26  ;;  %6201 = vst.msk [vmem:[%s11492_s8 + $0xa0] sm:$0xff] %vm6180_vm9, %v5856_v60  ;;  %v2306_v55 = vpop.xlane.xlu2 %2305  ;;  %v8481_v33 = vpop.xlane.xlu1 %3052  ;;  %v3745_v52 = vsel %vm3744_vm13, %v6720_v7, %v3741_v16  ;;  %vm3757_vm15 = vweird.f32 %v6724_v44  ;;  %v8554_v16 = vld [vmem:[%s11489_s7] ss:$0 sm:$0xff] }
 0x467   :  { %v2614_v17 = vsub.f32 %v8272_v32, %v2306_v55  ;;  %6727 = vrcp.f32 %v8481_v33  ;;  %v3750_v6 = vsel %vm3747_vm14, %v3749_v14, %v3745_v52  ;;  %v2322_v32 = vsel %vm2192_vm3, %v8484_v24, -inf  ;;  %vm8510_vm1 = vmor %vm3756_vm0, %vm3757_vm15 }
 0x468   :  { %v3753_v57 = vsub.f32 1.0, %v3752_v48  ;;  %v5165_v21 = vmul.f32 %v8221_v23, %v3750_v6  ;;  %v3760_v23 = vand.u32 2147483647, %v8457_v26  ;;  %v3776_v29 = vand.u32 2147483648, %v8481_v33 }
 0x469   :  { %v8488_v54 = vpop.eup %6725  ;;  %v2779_v11 = vmul.f32 1.442695, %v2614_v17  ;;  %v3774_v42 = vand.u32 2147483647, %v8481_v33  ;;  %vm3770_vm6 = vweird.f32 %v8481_v33 }
 0x46a   :  { %v3754_v45 = vmul.f32 %v6724_v44, %v3753_v57  ;;  %v3069_v35 = vsel %vm2192_vm3, %v8488_v54, 0.0  ;;  %5293 = vst.msk [vmem:[%s11491_s9 + $0xe0] sm:$0xff] %vm2192_vm3, %v5165_v21  ;;  %6473 = vmatmul.msk.f32.gmra.mxu3 %vm2192_vm3, %v5165_v21  ;;  %vm3761_vm4 = vcmp.eq.f32.partialorder %v3760_v23, 8.507059e+37  ;;  %v3777_v4 = vor.u32 1.1754944e-38, %v3776_v29 }
 0x46b   :  { %6729 = vpow2.f32 %v2779_v11  ;;  %3070 = vadd.xlane.f32.xlu1 %v3069_v35  ;;  %2323 = vmax.xlane.f32.xlu2 %v2322_v32  ;;  %vm3775_vm8 = vcmp.eq.f32.partialorder %v3774_v42, 8.507059e+37 }
 0x46c   :  { %v3755_v8 = vadd.f32 %v6724_v44, %v3754_v45  ;;  %v1987_v45 = vpop.f32.mrf.mxu2 }
 0x46d   :  { %v6728_v18 = vpop.eup %6727  ;;  %v5859_v38 = vpop.f32.mrf.mxu3  ;;  %v8586_v20 = vadd.f32 %v8554_v16, %v1987_v45 }
 0x46e   :  { %v3766_v39 = vmul.f32 %v6728_v18, %v8481_v33  ;;  %6202 = vst.msk [vmem:[%s11492_s8 + $0xa8] sm:$0xff] %vm6180_vm9, %v5859_v38  ;;  %v2309_v50 = vpop.xlane.xlu1 %2308  ;;  %v8519_v47 = vpop.xlane.xlu0 %3055  ;;  %v3759_v7 = vsel %vm8510_vm1, %v6724_v44, %v3755_v8  ;;  %vm3771_vm5 = vweird.f32 %v6728_v18  ;;  %v8557_v44 = vadd.f32 %v8554_v16, %v1984_v0 }
 0x46f   :  { %v2615_v28 = vsub.f32 %v8296_v9, %v2309_v50  ;;  %6731 = vrcp.f32 %v8519_v47  ;;  %v3764_v36 = vsel %vm3761_vm4, %v3763_v22, %v3759_v7  ;;  %v2325_v9 = vsel %vm2192_vm3, %v8525_v15, -inf  ;;  %vm3772_vm7 = vmor %vm3770_vm6, %vm3771_vm5 }
 0x470   :  { %v3767_v26 = vsub.f32 1.0, %v3766_v39  ;;  %v5166_v37 = vmul.f32 %v8255_v63, %v3764_v36  ;;  %v8546_v63 = vld [vmem:[%s11485_s3] ss:$0 sm:$0xff]  ;;  %v3790_v27 = vand.u32 2147483648, %v8519_v47  ;;  %v2328_v32 = vsel %vm2192_vm3, %v8557_v44, -inf }
 0x471   :  { %v8529_v2 = vpop.eup %6729  ;;  %v2781_v25 = vmul.f32 1.442695, %v2615_v28  ;;  %v599_v46 = vadd.f32 %v8546_v63, %v598_v61  ;;  %v601_v51 = vadd.f32 %v8546_v63, %v600_v56  ;;  %vm3784_vm11 = vweird.f32 %v8519_v47  ;;  %v1295_v28 = vpop.f32.mrf.mxu1 }
 0x472   :  { %v3768_v49 = vmul.f32 %v6728_v18, %v3767_v26  ;;  %v3072_v41 = vsel %vm2192_vm3, %v8529_v2, 0.0  ;;  %5294 = vst.msk [vmem:[%s11491_s9 + $0xe8] sm:$0xff] %vm2192_vm3, %v5166_v37  ;;  %6474 = vmatmul.msk.f32.gmra.mxu3 %vm2192_vm3, %v5166_v37  ;;  %v3791_v8 = vor.u32 1.1754944e-38, %v3790_v27  ;;  %v2331_v0 = vsel %vm2192_vm3, %v8586_v20, -inf }
 0x473   :  { %6733 = vpow2.f32 %v2781_v25  ;;  %3073 = vadd.xlane.f32.xlu0 %v3072_v41  ;;  %2326 = vmax.xlane.f32.xlu1 %v2325_v9  ;;  %v822_v17 = vmul.f32 0.01, %v599_v46  ;;  %v823_v57 = vmul.f32 0.01, %v601_v51  ;;  %v1296_v29 = vadd.f32 %v8322_v53, %v1295_v28  ;;  %v603_v41 = vpop.f32.mrf.mxu0 }
 0x474   :  { %v3769_v10 = vadd.f32 %v6728_v18, %v3768_v49  ;;  %v1989_v7 = vpop.f32.mrf.mxu2 }
 0x475   :  { %v6732_v1 = vpop.eup %6731  ;;  %v5862_v60 = vpop.f32.mrf.mxu3  ;;  %v950_v61 = vmax.f32 %v599_v46, %v822_v17  ;;  %v951_v30 = vmax.f32 %v601_v51, %v823_v57  ;;  %v1531_v37 = vmul.f32 0.01, %v1296_v29  ;;  %v604_v46 = vadd.f32 %v8546_v63, %v603_v41 }
 0x476   :  { %v3780_v14 = vmul.f32 %v6732_v1, %v8519_v47  ;;  %6203 = vst.msk [vmem:[%s11492_s8 + $0xb0] sm:$0xff] %vm6180_vm9, %v5862_v60  ;;  %v2312_v48 = vpop.xlane.xlu0 %2311  ;;  %v3773_v55 = vsel %vm3772_vm7, %v6728_v18, %v3769_v10  ;;  %vm3785_vm10 = vweird.f32 %v6732_v1  ;;  %v107_v60 = vld [vmem:[%s11484_s0 + $0x258] sm:$0xff] }
 0x477   :  { %v2616_v33 = vsub.f32 %v8315_v13, %v2312_v48  ;;  %v3778_v52 = vsel %vm3775_vm8, %v3777_v4, %v3773_v55  ;;  %vm3786_vm12 = vmor %vm3784_vm11, %vm3785_vm10  ;;  %v1046_v22 = vpack.c.bf16 %v951_v30, %v950_v61  ;;  %v1659_v42 = vmax.f32 %v1296_v29, %v1531_v37  ;;  %v106_v4 = vld [vmem:[%s11484_s0 + $0x250] sm:$0xff]  ;;  %v108_v30 = vld [vmem:[%s11484_s0 + $0x260] sm:$0xff] }
 0x478   :  { %v3781_v6 = vsub.f32 1.0, %v3780_v14  ;;  %v5167_v11 = vmul.f32 %v8281_v31, %v3778_v52  ;;  %v3788_v31 = vand.u32 2147483647, %v8519_v47  ;;  %v824_v51 = vmul.f32 0.01, %v604_v46 }
 0x479   :  { %v8567_v21 = vpop.eup %6733  ;;  %v2783_v35 = vmul.f32 1.442695, %v2616_v33  ;;  %1314 = vmatmul.bf16.gmra.mxu1 %v1046_v22  ;;  %v1297_v36 = vpop.f32.mrf.mxu1  ;;  %v197_v48 = vpack.c.bf16 %v107_v60, %v106_v4 }
 0x47a   :  { %v3782_v23 = vmul.f32 %v6732_v1, %v3781_v6  ;;  %5295 = vst.msk [vmem:[%s11491_s9 + $0xf0] sm:$0xff] %vm2192_vm3, %v5167_v11  ;;  %v3075_v13 = vsel %vm2192_vm3, %v8567_v21, 0.0  ;;  %6475 = vmatmul.msk.f32.gmra.mxu3 %vm2192_vm3, %v5167_v11  ;;  %vm3789_vm13 = vcmp.eq.f32.partialorder %v3788_v31, 8.507059e+37  ;;  %v1298_v25 = vadd.f32 %v8322_v53, %v1297_v36 }
 0x47b   :  { %6735 = vpow2.f32 %v2783_v35  ;;  %2329 = vmax.xlane.f32.xlu0 %v2328_v32  ;;  %3076 = vadd.xlane.f32.xlu2 %v3075_v13  ;;  %v952_v55 = vmax.f32 %v604_v46, %v824_v51  ;;  %v111_v51 = vld [vmem:[%s11484_s0 + $0x278] sm:$0xff] }
 0x47c   :  { %v3783_v3 = vadd.f32 %v6732_v1, %v3782_v23  ;;  %v1532_v49 = vmul.f32 0.01, %v1298_v25  ;;  %6354 = vmatmul.msk.bf16.gmra.mxu0 %vm229_vm2, %v197_v48 }
 0x47d   :  { %v5865_v5 = vpop.f32.mrf.mxu3 }
 0x47e   :  { %6204 = vst.msk [vmem:[%s11492_s8 + $0xb8] sm:$0xff] %vm6180_vm9, %v5865_v5  ;;  %v3787_v18 = vsel %vm3786_vm12, %v6732_v1, %v3783_v3  ;;  %v1660_v9 = vmax.f32 %v1298_v25, %v1532_v49  ;;  %v605_v1 = vpop.f32.mrf.mxu0  ;;  %v109_v3 = vld [vmem:[%s11484_s0 + $0x268] sm:$0xff] }
 0x47f   :  { %v3792_v38 = vsel %vm3789_vm13, %v3791_v8, %v3787_v18  ;;  %v606_v14 = vadd.f32 %v8546_v63, %v605_v1  ;;  %v198_v18 = vpack.c.bf16 %v109_v3, %v108_v30 }
 0x480   :  { %v5168_v39 = vmul.f32 %v8303_v62, %v3792_v38  ;;  %v8601_v62 = vadd.f32 %v8554_v16, %v1989_v7  ;;  %v1759_v56 = vpack.c.bf16 %v1660_v9, %v1659_v42 }
 0x481   :  { %v8589_v50 = vpop.eup %6735  ;;  %v1300_v10 = vpop.f32.mrf.mxu1  ;;  %v825_v33 = vmul.f32 0.01, %v606_v14 }
 0x482   :  { %5296 = vst.msk [vmem:[%s11491_s9 + $0xf8] sm:$0xff] %vm2192_vm3, %v5168_v39  ;;  %v3078_v47 = vsel %vm2192_vm3, %v8589_v50, 0.0  ;;  %6476 = vmatmul.msk.f32.gmra.mxu3 %vm2192_vm3, %v5168_v39  ;;  %v2334_v26 = vsel %vm2192_vm3, %v8601_v62, -inf  ;;  %2011 = vmatmul.bf16.gmra.mxu2 %v1759_v56  ;;  %v1301_v57 = vadd.f32 %v8322_v53, %v1300_v10  ;;  %v110_v10 = vld [vmem:[%s11484_s0 + $0x270] sm:$0xff] }
 0x483   :  { %3079 = vadd.xlane.f32.xlu1 %v3078_v47  ;;  %2332 = vmax.xlane.f32.xlu2 %v2331_v0  ;;  %v953_v52 = vmax.f32 %v606_v14, %v825_v33  ;;  %v199_v4 = vpack.c.bf16 %v111_v51, %v110_v10  ;;  %v1992_v14 = vpop.f32.mrf.mxu2 }
 0x484   :  { %v1533_v27 = vmul.f32 0.01, %v1301_v57  ;;  %v8674_v10 = vadd.f32 %v8554_v16, %v1992_v14 }
 0x485   :  { %v1047_v11 = vpack.c.bf16 %v953_v52, %v952_v55 }
 0x486   :  { %v608_v45 = vpop.f32.mrf.mxu0  ;;  %v1661_v32 = vmax.f32 %v1301_v57, %v1533_v27 }
 0x487   :  { %v609_v8 = vadd.f32 %v8546_v63, %v608_v45 }
 0x489   :  { %v1302_v17 = vpop.f32.mrf.mxu1  ;;  %1319 = vmatmul.bf16.gmra.mxu1 %v1047_v11  ;;  %v826_v38 = vmul.f32 0.01, %v609_v8 }
 0x48a   :  { %v1303_v6 = vadd.f32 %v8322_v53, %v1302_v17 }
 0x48b   :  { %2335 = vmax.xlane.f32.xlu1 %v2334_v26  ;;  %v954_v39 = vmax.f32 %v609_v8, %v826_v38 }
 0x48c   :  { %v1534_v35 = vmul.f32 0.01, %v1303_v6  ;;  %6355 = vmatmul.msk.bf16.gmra.mxu0 %vm229_vm2, %v198_v18 }
 0x48e   :  { %v1662_v23 = vmax.f32 %v1303_v6, %v1534_v35  ;;  %v610_v61 = vpop.f32.mrf.mxu0 }
 0x48f   :  { %v611_v5 = vadd.f32 %v8546_v63, %v610_v61 }
 0x490   :  { %v1760_v13 = vpack.c.bf16 %v1662_v23, %v1661_v32 }
 0x491   :  { %v1305_v31 = vpop.f32.mrf.mxu1  ;;  %v827_v22 = vmul.f32 0.01, %v611_v5 }
 0x492   :  { %2016 = vmatmul.bf16.gmra.mxu2 %v1760_v13  ;;  %v1306_v0 = vadd.f32 %v8322_v53, %v1305_v31 }
 0x493   :  { %v955_v47 = vmax.f32 %v611_v5, %v827_v22 }
 0x494   :  { %v1535_v29 = vmul.f32 0.01, %v1306_v0 }
 0x495   :  { %v1048_v26 = vpack.c.bf16 %v955_v47, %v954_v39 }
 0x496   :  { %v613_v36 = vpop.f32.mrf.mxu0  ;;  %v1663_v37 = vmax.f32 %v1306_v0, %v1535_v29  ;;  %v8652_v0 = vpop.f32.mrf.mxu2 }
 0x497   :  { %v614_v46 = vadd.f32 %v8546_v63, %v613_v36 }
 0x499   :  { %v1307_v7 = vpop.f32.mrf.mxu1  ;;  %1324 = vmatmul.bf16.gmra.mxu1 %v1048_v26  ;;  %v828_v48 = vmul.f32 0.01, %v614_v46 }
 0x49a   :  { %v1308_v28 = vadd.f32 %v8322_v53, %v1307_v7 }
 0x49b   :  { %v956_v6 = vmax.f32 %v614_v46, %v828_v48 }
 0x49c   :  { %v1536_v25 = vmul.f32 0.01, %v1308_v28  ;;  %6356 = vmatmul.msk.bf16.gmra.mxu0 %vm229_vm2, %v199_v4 }
 0x49e   :  { %v1664_v49 = vmax.f32 %v1308_v28, %v1536_v25  ;;  %v615_v56 = vpop.f32.mrf.mxu0 }
 0x49f   :  { %v616_v1 = vadd.f32 %v8546_v63, %v615_v56 }
 0x4a0   :  { %v1761_v42 = vpack.c.bf16 %v1664_v49, %v1663_v37 }
 0x4a1   :  { %v1310_v9 = vpop.f32.mrf.mxu1  ;;  %v829_v52 = vmul.f32 0.01, %v616_v1 }
 0x4a2   :  { %2021 = vmatmul.bf16.gmra.mxu2 %v1761_v42  ;;  %v1311_v13 = vadd.f32 %v8322_v53, %v1310_v9 }
 0x4a3   :  { %v957_v35 = vmax.f32 %v616_v1, %v829_v52 }
 0x4a4   :  { %v1537_v3 = vmul.f32 0.01, %v1311_v13 }
 0x4a5   :  { %v1049_v30 = vpack.c.bf16 %v957_v35, %v956_v6 }
 0x4a6   :  { %v1665_v47 = vmax.f32 %v1311_v13, %v1537_v3  ;;  %v8705_v3 = vadd.f32 %v8554_v16, %v8652_v0 }
 0x4a9   :  { %v1312_v32 = vpop.f32.mrf.mxu1  ;;  %1329 = vmatmul.bf16.gmra.mxu1 %v1049_v30 }
 0x4aa   :  { %v1313_v31 = vadd.f32 %v8322_v53, %v1312_v32 }
 0x4ac   :  { %v1538_v8 = vmul.f32 0.01, %v1313_v31 }
 0x4ae   :  { %v1666_v7 = vmax.f32 %v1313_v31, %v1538_v8 }
 0x4be   :  { %v3059_v41 = vpop.xlane.xlu2 %3058 }
 0x4bf   :  { %6737 = vrcp.f32 %v3059_v41  ;;  %v3804_v45 = vand.u32 2147483648, %v3059_v41  ;;  %v3802_v61 = vand.u32 2147483647, %v3059_v41  ;;  %vm3798_vm15 = vweird.f32 %v3059_v41 }
 0x4c1   :  { %v3805_v38 = vor.u32 1.1754944e-38, %v3804_v45  ;;  %vm3803_vm1 = vcmp.eq.f32.partialorder %v3802_v61, 8.507059e+37 }
 0x4c5   :  { %v6738_v60 = vpop.eup %6737 }
 0x4c6   :  { %v3794_v55 = vmul.f32 %v6738_v60, %v3059_v41  ;;  %v2315_v33 = vpop.xlane.xlu2 %2314  ;;  %v8639_v57 = vpop.xlane.xlu1 %3061  ;;  %vm3799_vm14 = vweird.f32 %v6738_v60  ;;  %v1762_v41 = vpack.c.bf16 %v1666_v7, %v1665_v47 }
 0x4c7   :  { %v2617_v17 = vsub.f32 %v8394_v12, %v2315_v33  ;;  %6739 = vrcp.f32 %v8639_v57  ;;  %vm8644_vm0 = vmor %vm3798_vm15, %vm3799_vm14  ;;  %v3818_v56 = vand.u32 2147483648, %v8639_v57  ;;  %vm3812_vm5 = vweird.f32 %v8639_v57 }
 0x4c8   :  { %v3795_v11 = vsub.f32 1.0, %v3794_v55  ;;  %2026 = vmatmul.bf16.gmra.mxu2 %v1762_v41 }
 0x4c9   :  { %v2785_v27 = vmul.f32 1.442695, %v2617_v17  ;;  %v3819_v48 = vor.u32 1.1754944e-38, %v3818_v56  ;;  %v1997_v17 = vpop.f32.mrf.mxu2 }
 0x4ca   :  { %v3796_v23 = vmul.f32 %v6738_v60, %v3795_v11  ;;  %v2337_v11 = vsel %vm2192_vm3, %v8674_v10, -inf }
 0x4cb   :  { %6741 = vpow2.f32 %v2785_v27 }
 0x4cc   :  { %v3797_v12 = vadd.f32 %v6738_v60, %v3796_v23 }
 0x4cd   :  { %v6740_v18 = vpop.eup %6739  ;;  %v5868_v22 = vpop.f32.mrf.mxu3 }
 0x4ce   :  { %v8648_v39 = vpop.xlane.xlu0 %3064  ;;  %v3801_v53 = vsel %vm8644_vm0, %v6738_v60, %v3797_v12  ;;  %v3808_v28 = vmul.f32 %v6740_v18, %v8639_v57  ;;  %6205 = vst.msk [vmem:[%s11492_s8 + $0xc0] sm:$0xff] %vm6180_vm9, %v5868_v22  ;;  %v2318_v26 = vpop.xlane.xlu1 %2317  ;;  %vm3813_vm4 = vweird.f32 %v6740_v18 }
 0x4cf   :  { %6743 = vrcp.f32 %v8648_v39  ;;  %v2618_v36 = vsub.f32 %v8429_v59, %v2318_v26  ;;  %v3806_v29 = vsel %vm3803_vm1, %v3805_v38, %v3801_v53  ;;  %vm3814_vm6 = vmor %vm3812_vm5, %vm3813_vm4  ;;  %v3832_v35 = vand.u32 2147483648, %v8648_v39 }
 0x4d0   :  { %v3809_v37 = vsub.f32 1.0, %v3808_v28  ;;  %v5169_v49 = vmul.f32 %v8380_v19, %v3806_v29  ;;  %v3816_v19 = vand.u32 2147483647, %v8639_v57  ;;  %v3830_v23 = vand.u32 2147483647, %v8648_v39 }
 0x4d1   :  { %v8661_v25 = vpop.eup %6741  ;;  %v2787_v42 = vmul.f32 1.442695, %v2618_v36  ;;  %vm3826_vm10 = vweird.f32 %v8648_v39  ;;  %v3833_v31 = vor.u32 1.1754944e-38, %v3832_v35  ;;  %v1999_v28 = vpop.f32.mrf.mxu2  ;;  %v8729_v29 = vadd.f32 %v8554_v16, %v1997_v17 }
 0x4d2   :  { %v3081_v9 = vsel %vm2192_vm3, %v8661_v25, 0.0  ;;  %v3810_v46 = vmul.f32 %v6740_v18, %v3809_v37  ;;  %5297 = vst.msk [vmem:[%s11491_s9 + $0x100] sm:$0xff] %vm2192_vm3, %v5169_v49  ;;  %6477 = vmatmul.msk.f32.gmra.mxu3 %vm2192_vm3, %v5169_v49  ;;  %vm3817_vm7 = vcmp.eq.f32.partialorder %v3816_v19, 8.507059e+37  ;;  %vm3831_vm12 = vcmp.eq.f32.partialorder %v3830_v23, 8.507059e+37 }
 0x4d3   :  { %3082 = vadd.xlane.f32.xlu0 %v3081_v9  ;;  %6745 = vpow2.f32 %v2787_v42 }
 0x4d4   :  { %v3811_v51 = vadd.f32 %v6740_v18, %v3810_v46 }
 0x4d5   :  { %v6744_v59 = vpop.eup %6743  ;;  %v5871_v4 = vpop.f32.mrf.mxu3 }
 0x4d6   :  { %v3822_v1 = vmul.f32 %v6744_v59, %v8648_v39  ;;  %v2321_v60 = vpop.xlane.xlu0 %2320  ;;  %6206 = vst.msk [vmem:[%s11492_s8 + $0xc8] sm:$0xff] %vm6180_vm9, %v5871_v4  ;;  %v8682_v55 = vpop.xlane.xlu2 %3067  ;;  %v3815_v14 = vsel %vm3814_vm6, %v6740_v18, %v3811_v51  ;;  %vm3827_vm8 = vweird.f32 %v6744_v59 }
 0x4d7   :  { %v2619_v33 = vsub.f32 %v8449_v58, %v2321_v60  ;;  %6747 = vrcp.f32 %v8682_v55  ;;  %v3820_v6 = vsel %vm3817_vm7, %v3819_v48, %v3815_v14  ;;  %vm3828_vm11 = vmor %vm3826_vm10, %vm3827_vm8  ;;  %v3846_v47 = vand.u32 2147483648, %v8682_v55 }
 0x4d8   :  { %v3823_v52 = vsub.f32 1.0, %v3822_v1  ;;  %v5170_v32 = vmul.f32 %v8405_v43, %v3820_v6  ;;  %vm3840_vm14 = vweird.f32 %v8682_v55  ;;  %v2343_v60 = vsel %vm2192_vm3, %v8729_v29, -inf }
 0x4d9   :  { %v2789_v57 = vmul.f32 1.442695, %v2619_v33  ;;  %v8688_v45 = vpop.eup %6745  ;;  %v3847_v49 = vor.u32 1.1754944e-38, %v3846_v47  ;;  %v2002_v17 = vpop.f32.mrf.mxu2  ;;  %v8757_v6 = vadd.f32 %v8554_v16, %v1999_v28 }
 0x4da   :  { %v3824_v27 = vmul.f32 %v6744_v59, %v3823_v52  ;;  %v3084_v58 = vsel %vm2192_vm3, %v8688_v45, 0.0  ;;  %5298 = vst.msk [vmem:[%s11491_s9 + $0x108] sm:$0xff] %vm2192_vm3, %v5170_v32  ;;  %6478 = vmatmul.msk.f32.gmra.mxu3 %vm2192_vm3, %v5170_v32 }
 0x4db   :  { %6749 = vpow2.f32 %v2789_v57  ;;  %2338 = vmax.xlane.f32.xlu0 %v2337_v11  ;;  %3085 = vadd.xlane.f32.xlu2 %v3084_v58 }
 0x4dc   :  { %v3825_v13 = vadd.f32 %v6744_v59, %v3824_v27 }
 0x4dd   :  { %v6748_v43 = vpop.eup %6747  ;;  %v5874_v61 = vpop.f32.mrf.mxu3 }
 0x4de   :  { %v8701_v30 = vpop.xlane.xlu1 %3070  ;;  %v3829_v12 = vsel %vm3828_vm11, %v6744_v59, %v3825_v13  ;;  %v3836_v8 = vmul.f32 %v6748_v43, %v8682_v55  ;;  %6207 = vst.msk [vmem:[%s11492_s8 + $0xd0] sm:$0xff] %vm6180_vm9, %v5874_v61  ;;  %v2324_v5 = vpop.xlane.xlu2 %2323  ;;  %vm3841_vm13 = vweird.f32 %v6748_v43 }
 0x4df   :  { %6751 = vrcp.f32 %v8701_v30  ;;  %v2620_v18 = vsub.f32 %v8484_v24, %v2324_v5  ;;  %v3834_v38 = vsel %vm3831_vm12, %v3833_v31, %v3829_v12  ;;  %v2340_v24 = vsel %vm2192_vm3, %v8705_v3, -inf  ;;  %vm3842_vm15 = vmor %vm3840_vm14, %vm3841_vm13 }
 0x4e0   :  { %v3837_v39 = vsub.f32 1.0, %v3836_v8  ;;  %v5171_v53 = vmul.f32 %v8433_v40, %v3834_v38  ;;  %v3844_v40 = vand.u32 2147483647, %v8682_v55  ;;  %v3860_v1 = vand.u32 2147483648, %v8701_v30  ;;  %v112_v38 = vld [vmem:[%s11484_s0 + $0x280] sm:$0xff] }
 0x4e1   :  { %v8714_v22 = vpop.eup %6749  ;;  %v2791_v7 = vmul.f32 1.442695, %v2620_v18  ;;  %v3858_v14 = vand.u32 2147483647, %v8701_v30  ;;  %vm3854_vm4 = vweird.f32 %v8701_v30  ;;  %v2346_v5 = vsel %vm2192_vm3, %v8757_v6, -inf  ;;  %v618_v18 = vpop.f32.mrf.mxu0 }
 0x4e2   :  { %v3087_v0 = vsel %vm2192_vm3, %v8714_v22, 0.0  ;;  %v3838_v26 = vmul.f32 %v6748_v43, %v3837_v39  ;;  %5299 = vst.msk [vmem:[%s11491_s9 + $0x110] sm:$0xff] %vm2192_vm3, %v5171_v53  ;;  %6479 = vmatmul.msk.f32.gmra.mxu3 %vm2192_vm3, %v5171_v53  ;;  %vm3845_vm0 = vcmp.eq.f32.partialorder %v3844_v40, 8.507059e+37  ;;  %v3861_v57 = vor.u32 1.1754944e-38, %v3860_v1  ;;  %v113_v39 = vld [vmem:[%s11484_s0 + $0x288] sm:$0xff] }
 0x4e3   :  { %3088 = vadd.xlane.f32.xlu1 %v3087_v0  ;;  %6753 = vpow2.f32 %v2791_v7  ;;  %2341 = vmax.xlane.f32.xlu2 %v2340_v24  ;;  %vm3859_vm6 = vcmp.eq.f32.partialorder %v3858_v14, 8.507059e+37  ;;  %v200_v47 = vpack.c.bf16 %v113_v39, %v112_v38 }
 0x4e4   :  { %v3839_v37 = vadd.f32 %v6748_v43, %v3838_v26 }
 0x4e5   :  { %v6752_v36 = vpop.eup %6751  ;;  %v5877_v42 = vpop.f32.mrf.mxu3  ;;  %6357 = vmatmul.msk.bf16.gmra.mxu0 %vm229_vm2, %v200_v47 }
 0x4e6   :  { %v3850_v41 = vmul.f32 %v6752_v36, %v8701_v30  ;;  %v8733_v9 = vpop.xlane.xlu0 %3073  ;;  %6208 = vst.msk [vmem:[%s11492_s8 + $0xd8] sm:$0xff] %vm6180_vm9, %v5877_v42  ;;  %v2327_v46 = vpop.xlane.xlu1 %2326  ;;  %v3843_v56 = vsel %vm3842_vm15, %v6748_v43, %v3839_v37  ;;  %vm3855_vm1 = vweird.f32 %v6752_v36 }
 0x4e7   :  { %6755 = vrcp.f32 %v8733_v9  ;;  %v2621_v59 = vsub.f32 %v8525_v15, %v2327_v46  ;;  %v3848_v51 = vsel %vm3845_vm0, %v3847_v49, %v3843_v56  ;;  %vm3856_vm5 = vmor %vm3854_vm4, %vm3855_vm1  ;;  %v3874_v8 = vand.u32 2147483648, %v8733_v9 }
 0x4e8   :  { %v3851_v19 = vsub.f32 1.0, %v3850_v41  ;;  %v5172_v4 = vmul.f32 %v8461_v34, %v3848_v51  ;;  %vm3868_vm8 = vweird.f32 %v8733_v9  ;;  %v8806_v41 = vadd.f32 %v8554_v16, %v2002_v17 }
 0x4e9   :  { %v8745_v48 = vpop.eup %6753  ;;  %v2793_v33 = vmul.f32 1.442695, %v2621_v59  ;;  %v3875_v28 = vor.u32 1.1754944e-38, %v3874_v8 }
 0x4ea   :  { %v3852_v55 = vmul.f32 %v6752_v36, %v3851_v19  ;;  %5300 = vst.msk [vmem:[%s11491_s9 + $0x118] sm:$0xff] %vm2192_vm3, %v5172_v4  ;;  %v3090_v15 = vsel %vm2192_vm3, %v8745_v48, 0.0  ;;  %6480 = vmatmul.msk.f32.gmra.mxu3 %vm2192_vm3, %v5172_v4 }
 0x4eb   :  { %2344 = vmax.xlane.f32.xlu1 %v2343_v60  ;;  %6757 = vpow2.f32 %v2793_v33  ;;  %3091 = vadd.xlane.f32.xlu0 %v3090_v15 }
 0x4ec   :  { %v3853_v34 = vadd.f32 %v6752_v36, %v3852_v55  ;;  %v620_v55 = vpop.f32.mrf.mxu0 }
 0x4ed   :  { %v6756_v52 = vpop.eup %6755  ;;  %v5880_v27 = vpop.f32.mrf.mxu3  ;;  %v621_v33 = vadd.f32 %v8546_v63, %v620_v55 }
 0x4ee   :  { %v3864_v11 = vmul.f32 %v6756_v52, %v8733_v9  ;;  %v2330_v35 = vpop.xlane.xlu0 %2329  ;;  %v3857_v32 = vsel %vm3856_vm5, %v6752_v36, %v3853_v34  ;;  %6209 = vst.msk [vmem:[%s11492_s8 + $0xe0] sm:$0xff] %vm6180_vm9, %v5880_v27  ;;  %v8764_v58 = vpop.xlane.xlu2 %3076  ;;  %vm3869_vm7 = vweird.f32 %v6756_v52 }
 0x4ef   :  { %v2622_v23 = vsub.f32 %v8557_v44, %v2330_v35  ;;  %v3862_v13 = vsel %vm3859_vm6, %v3861_v57, %v3857_v32  ;;  %6759 = vrcp.f32 %v8764_v58  ;;  %vm8790_vm10 = vmor %vm3868_vm8, %vm3869_vm7  ;;  %v2004_v36 = vpop.f32.mrf.mxu2  ;;  %v3888_v59 = vand.u32 2147483648, %v8764_v58 }
 0x4f0   :  { %v3865_v43 = vsub.f32 1.0, %v3864_v11  ;;  %v5173_v61 = vmul.f32 %v8488_v54, %v3862_v13  ;;  %v3872_v54 = vand.u32 2147483647, %v8733_v9  ;;  %v3886_v4 = vand.u32 2147483647, %v8764_v58 }
 0x4f1   :  { %v2795_v31 = vmul.f32 1.442695, %v2622_v23  ;;  %v8769_v30 = vpop.eup %6757  ;;  %vm3882_vm13 = vweird.f32 %v8764_v58  ;;  %v8827_v34 = vadd.f32 %v8554_v16, %v2004_v36 }
 0x4f2   :  { %v3866_v12 = vmul.f32 %v6756_v52, %v3865_v43  ;;  %5301 = vst.msk [vmem:[%s11491_s9 + $0x120] sm:$0xff] %vm2192_vm3, %v5173_v61  ;;  %v3093_v44 = vsel %vm2192_vm3, %v8769_v30, 0.0  ;;  %6481 = vmatmul.msk.f32.gmra.mxu3 %vm2192_vm3, %v5173_v61  ;;  %vm3873_vm11 = vcmp.eq.f32.partialorder %v3872_v54, 8.507059e+37  ;;  %vm3887_vm15 = vcmp.eq.f32.partialorder %v3886_v4, 8.507059e+37 }
 0x4f3   :  { %6761 = vpow2.f32 %v2795_v31  ;;  %2347 = vmax.xlane.f32.xlu0 %v2346_v5  ;;  %3094 = vadd.xlane.f32.xlu2 %v3093_v44  ;;  %v2352_v44 = vsel %vm2192_vm3, %v8827_v34, -inf }
 0x4f4   :  { %v3867_v53 = vadd.f32 %v6756_v52, %v3866_v12 }
 0x4f5   :  { %v6760_v0 = vpop.eup %6759  ;;  %v5883_v26 = vpop.f32.mrf.mxu3 }
 0x4f6   :  { %v8794_v24 = vpop.xlane.xlu1 %3079  ;;  %v3871_v40 = vsel %vm8790_vm10, %v6756_v52, %v3867_v53  ;;  %v3878_v37 = vmul.f32 %v6760_v0, %v8764_v58  ;;  %6210 = vst.msk [vmem:[%s11492_s8 + $0xe8] sm:$0xff] %vm6180_vm9, %v5883_v26  ;;  %v2333_v49 = vpop.xlane.xlu2 %2332  ;;  %vm3883_vm12 = vweird.f32 %v6760_v0  ;;  %v3889_v52 = vor.u32 1.1754944e-38, %v3888_v59 }
 0x4f7   :  { %6763 = vrcp.f32 %v8794_v24  ;;  %v2623_v42 = vsub.f32 %v8586_v20, %v2333_v49  ;;  %v3876_v9 = vsel %vm3873_vm11, %v3875_v28, %v3871_v40  ;;  %v619_v20 = vadd.f32 %v8546_v63, %v618_v18  ;;  %vm3884_vm14 = vmor %vm3882_vm13, %vm3883_vm12  ;;  %v2007_v43 = vpop.f32.mrf.mxu2  ;;  %v1315_v49 = vpop.f32.mrf.mxu1 }
 0x4f8   :  { %v3879_v56 = vsub.f32 1.0, %v3878_v37  ;;  %v5174_v19 = vmul.f32 %v8529_v2, %v3876_v9  ;;  %v2349_v2 = vsel %vm2192_vm3, %v8806_v41, -inf  ;;  %v831_v58 = vmul.f32 0.01, %v621_v33 }
 0x4f9   :  { %v8809_v46 = vpop.eup %6761  ;;  %v2797_v51 = vmul.f32 1.442695, %v2623_v42  ;;  %v830_v32 = vmul.f32 0.01, %v619_v20  ;;  %v3902_v31 = vand.u32 2147483648, %v8794_v24  ;;  %vm3896_vm1 = vweird.f32 %v8794_v24  ;;  %v623_v4 = vpop.f32.mrf.mxu0 }
 0x4fa   :  { %v3096_v1 = vsel %vm2192_vm3, %v8809_v46, 0.0  ;;  %v3880_v60 = vmul.f32 %v6760_v0, %v3879_v56  ;;  %5302 = vst.msk [vmem:[%s11491_s9 + $0x128] sm:$0xff] %vm2192_vm3, %v5174_v19  ;;  %6482 = vmatmul.msk.f32.gmra.mxu3 %vm2192_vm3, %v5174_v19  ;;  %v959_v18 = vmax.f32 %v621_v33, %v831_v58  ;;  %v8851_v7 = vadd.f32 %v8554_v16, %v2007_v43  ;;  %v8877_v56 = vld [vmem:[%s11487_s5] ss:$0 sm:$0xff] }
 0x4fb   :  { %3097 = vadd.xlane.f32.xlu1 %v3096_v1  ;;  %6765 = vpow2.f32 %v2797_v51  ;;  %2350 = vmax.xlane.f32.xlu2 %v2349_v2  ;;  %v3903_v39 = vor.u32 1.1754944e-38, %v3902_v31  ;;  %v1316_v19 = vadd.f32 %v8877_v56, %v1315_v49 }
 0x4fc   :  { %v3881_v15 = vadd.f32 %v6760_v0, %v3880_v60  ;;  %v2355_v37 = vsel %vm2192_vm3, %v8851_v7, -inf }
 0x4fd   :  { %v6764_v14 = vpop.eup %6763  ;;  %v5886_v57 = vpop.f32.mrf.mxu3  ;;  %v1539_v51 = vmul.f32 0.01, %v1316_v19 }
 0x4fe   :  { %v3892_v17 = vmul.f32 %v6764_v14, %v8794_v24  ;;  %v2336_v11 = vpop.xlane.xlu1 %2335  ;;  %6211 = vst.msk [vmem:[%s11492_s8 + $0xf0] sm:$0xff] %vm6180_vm9, %v5886_v57  ;;  %v3885_v35 = vsel %vm3884_vm14, %v6760_v0, %v3881_v15  ;;  %vm3897_vm0 = vweird.f32 %v6764_v14  ;;  %v114_v15 = vld [vmem:[%s11484_s0 + $0x290] sm:$0xff] }
 0x4ff   :  { %v2624_v27 = vsub.f32 %v8601_v62, %v2336_v11  ;;  %v3890_v13 = vsel %vm3887_vm15, %v3889_v52, %v3885_v35  ;;  %v3900_v62 = vand.u32 2147483647, %v8794_v24  ;;  %vm3898_vm4 = vmor %vm3896_vm1, %vm3897_vm0  ;;  %v2009_v36 = vpop.f32.mrf.mxu2  ;;  %v1317_v9 = vpop.f32.mrf.mxu1  ;;  %v115_v52 = vld [vmem:[%s11484_s0 + $0x298] sm:$0xff] }
 0x500   :  { %v3893_v23 = vsub.f32 1.0, %v3892_v17  ;;  %v5175_v12 = vmul.f32 %v8567_v21, %v3890_v13  ;;  %v958_v21 = vmax.f32 %v619_v20, %v830_v32  ;;  %v1318_v59 = vadd.f32 %v8877_v56, %v1317_v9 }
 0x501   :  { %v2799_v61 = vmul.f32 1.442695, %v2624_v27  ;;  %v8837_v8 = vpop.eup %6765  ;;  %vm3901_vm5 = vcmp.eq.f32.partialorder %v3900_v62, 8.507059e+37  ;;  %v624_v20 = vadd.f32 %v8546_v63, %v623_v4  ;;  %v201_v57 = vpack.c.bf16 %v115_v52, %v114_v15 }
 0x502   :  { %v3894_v5 = vmul.f32 %v6764_v14, %v3893_v23  ;;  %5303 = vst.msk [vmem:[%s11491_s9 + $0x130] sm:$0xff] %vm2192_vm3, %v5175_v12  ;;  %v3099_v54 = vsel %vm2192_vm3, %v8837_v8, 0.0  ;;  %6483 = vmatmul.msk.f32.gmra.mxu3 %vm2192_vm3, %v5175_v12  ;;  %v1050_v28 = vpack.c.bf16 %v959_v18, %v958_v21  ;;  %v1540_v1 = vmul.f32 0.01, %v1318_v59  ;;  %v116_v18 = vld [vmem:[%s11484_s0 + $0x2a0] sm:$0xff] }
 0x503   :  { %6767 = vpow2.f32 %v2799_v61  ;;  %2353 = vmax.xlane.f32.xlu1 %v2352_v44  ;;  %3100 = vadd.xlane.f32.xlu0 %v3099_v54  ;;  %v832_v33 = vmul.f32 0.01, %v624_v20 }
 0x504   :  { %v3895_v38 = vadd.f32 %v6764_v14, %v3894_v5  ;;  %1334 = vmatmul.bf16.gmra.mxu1 %v1050_v28  ;;  %v1668_v60 = vmax.f32 %v1318_v59, %v1540_v1  ;;  %6358 = vmatmul.msk.bf16.gmra.mxu0 %vm229_vm2, %v201_v57 }
 0x505   :  { %v5889_v53 = vpop.f32.mrf.mxu3  ;;  %v960_v11 = vmax.f32 %v624_v20, %v832_v33  ;;  %v119_v33 = vld [vmem:[%s11484_s0 + $0x2b8] sm:$0xff] }
 0x506   :  { %v3899_v47 = vsel %vm3898_vm4, %v6764_v14, %v3895_v38  ;;  %6212 = vst.msk [vmem:[%s11492_s8 + $0xf8] sm:$0xff] %vm6180_vm9, %v5889_v53  ;;  %v625_v14 = vpop.f32.mrf.mxu0  ;;  %v117_v38 = vld [vmem:[%s11484_s0 + $0x2a8] sm:$0xff] }
 0x507   :  { %v3904_v0 = vsel %vm3901_vm5, %v3903_v39, %v3899_v47  ;;  %v1320_v2 = vpop.f32.mrf.mxu1  ;;  %v626_v17 = vadd.f32 %v8546_v63, %v625_v14  ;;  %v202_v53 = vpack.c.bf16 %v117_v38, %v116_v18 }
 0x508   :  { %v5176_v26 = vmul.f32 %v8589_v50, %v3904_v0  ;;  %v8870_v50 = vadd.f32 %v8554_v16, %v2009_v36  ;;  %v1667_v16 = vmax.f32 %v1316_v19, %v1539_v51  ;;  %v1321_v58 = vadd.f32 %v8877_v56, %v1320_v2  ;;  %v118_v2 = vld [vmem:[%s11484_s0 + $0x2b0] sm:$0xff] }
 0x509   :  { %v8858_v24 = vpop.eup %6767  ;;  %v833_v27 = vmul.f32 0.01, %v626_v17  ;;  %v203_v15 = vpack.c.bf16 %v119_v33, %v118_v2 }
 0x50a   :  { %5304 = vst.msk [vmem:[%s11491_s9 + $0x138] sm:$0xff] %vm2192_vm3, %v5176_v26  ;;  %v3102_v40 = vsel %vm2192_vm3, %v8858_v24, 0.0  ;;  %6484 = vmatmul.msk.f32.gmra.mxu3 %vm2192_vm3, %v5176_v26  ;;  %v2358_v42 = vsel %vm2192_vm3, %v8870_v50, -inf  ;;  %v1763_v55 = vpack.c.bf16 %v1668_v60, %v1667_v16  ;;  %v1541_v31 = vmul.f32 0.01, %v1321_v58  ;;  %v8903_v60 = vpop.f32.mrf.mxu2 }
 0x50b   :  { %3103 = vadd.xlane.f32.xlu2 %v3102_v40  ;;  %2356 = vmax.xlane.f32.xlu0 %v2355_v37  ;;  %v961_v35 = vmax.f32 %v626_v17, %v833_v27 }
 0x50c   :  { %2031 = vmatmul.bf16.gmra.mxu2 %v1763_v55  ;;  %v1669_v12 = vmax.f32 %v1321_v58, %v1541_v31 }
 0x50d   :  { %v1051_v13 = vpack.c.bf16 %v961_v35, %v960_v11 }
 0x50e   :  { %v628_v43 = vpop.f32.mrf.mxu0 }
 0x50f   :  { %v1322_v32 = vpop.f32.mrf.mxu1  ;;  %v629_v54 = vadd.f32 %v8546_v63, %v628_v43 }
 0x510   :  { %v1323_v23 = vadd.f32 %v8877_v56, %v1322_v32 }
 0x511   :  { %v834_v47 = vmul.f32 0.01, %v629_v54 }
 0x512   :  { %v1542_v61 = vmul.f32 0.01, %v1323_v23  ;;  %v8924_v18 = vpop.f32.mrf.mxu2 }
 0x513   :  { %2359 = vmax.xlane.f32.xlu2 %v2358_v42  ;;  %v962_v28 = vmax.f32 %v629_v54, %v834_v47 }
 0x514   :  { %1339 = vmatmul.bf16.gmra.mxu1 %v1051_v13  ;;  %v1670_v5 = vmax.f32 %v1323_v23, %v1542_v61  ;;  %6359 = vmatmul.msk.bf16.gmra.mxu0 %vm229_vm2, %v202_v53 }
 0x516   :  { %v1764_v44 = vpack.c.bf16 %v1670_v5, %v1669_v12  ;;  %v630_v21 = vpop.f32.mrf.mxu0 }
 0x517   :  { %v1325_v62 = vpop.f32.mrf.mxu1  ;;  %v631_v39 = vadd.f32 %v8546_v63, %v630_v21 }
 0x518   :  { %v1326_v36 = vadd.f32 %v8877_v56, %v1325_v62 }
 0x519   :  { %v835_v0 = vmul.f32 0.01, %v631_v39 }
 0x51a   :  { %v1543_v9 = vmul.f32 0.01, %v1326_v36 }
 0x51b   :  { %v963_v26 = vmax.f32 %v631_v39, %v835_v0 }
 0x51c   :  { %2036 = vmatmul.bf16.gmra.mxu2 %v1764_v44  ;;  %v1671_v51 = vmax.f32 %v1326_v36, %v1543_v9 }
 0x51d   :  { %v1052_v49 = vpack.c.bf16 %v963_v26, %v962_v28 }
 0x51e   :  { %v633_v42 = vpop.f32.mrf.mxu0 }
 0x51f   :  { %v1327_v40 = vpop.f32.mrf.mxu1  ;;  %v634_v20 = vadd.f32 %v8546_v63, %v633_v42 }
 0x520   :  { %v1328_v37 = vadd.f32 %v8877_v56, %v1327_v40 }
 0x521   :  { %v836_v17 = vmul.f32 0.01, %v634_v20 }
 0x522   :  { %v1544_v19 = vmul.f32 0.01, %v1328_v37 }
 0x523   :  { %v964_v58 = vmax.f32 %v634_v20, %v836_v17 }
 0x524   :  { %1344 = vmatmul.bf16.gmra.mxu1 %v1052_v49  ;;  %v1672_v1 = vmax.f32 %v1328_v37, %v1544_v19  ;;  %6360 = vmatmul.msk.bf16.gmra.mxu0 %vm229_vm2, %v203_v15 }
 0x526   :  { %v1765_v4 = vpack.c.bf16 %v1672_v1, %v1671_v51  ;;  %v635_v55 = vpop.f32.mrf.mxu0 }
 0x527   :  { %v1330_v16 = vpop.f32.mrf.mxu1  ;;  %v636_v14 = vadd.f32 %v8546_v63, %v635_v55  ;;  %v8952_v55 = vld [vmem:[%s11489_s7] ss:$0 sm:$0xff] }
 0x528   :  { %v1331_v61 = vadd.f32 %v8877_v56, %v1330_v16  ;;  %v8956_v2 = vadd.f32 %v8952_v55, %v8903_v60 }
 0x529   :  { %v837_v27 = vmul.f32 0.01, %v636_v14 }
 0x52b   :  { %v965_v43 = vmax.f32 %v636_v14, %v837_v27 }
 0x52c   :  { %2041 = vmatmul.bf16.gmra.mxu2 %v1765_v4 }
 0x52d   :  { %v1053_v62 = vpack.c.bf16 %v965_v43, %v964_v58 }
 0x52f   :  { %v1332_v12 = vpop.f32.mrf.mxu1 }
 0x530   :  { %v1333_v44 = vadd.f32 %v8877_v56, %v1332_v12 }
 0x532   :  { %v1546_v38 = vmul.f32 0.01, %v1333_v44 }
 0x534   :  { %1349 = vmatmul.bf16.gmra.mxu1 %v1053_v62 }
 0x546   :  { %v3083_v59 = vpop.xlane.xlu0 %3082 }
 0x547   :  { %6769 = vrcp.f32 %v3083_v59  ;;  %v3916_v63 = vand.u32 2147483648, %v3083_v59  ;;  %v3914_v5 = vand.u32 2147483647, %v3083_v59  ;;  %vm3910_vm7 = vweird.f32 %v3083_v59 }
 0x549   :  { %v3917_v53 = vor.u32 1.1754944e-38, %v3916_v63  ;;  %vm3915_vm10 = vcmp.eq.f32.partialorder %v3914_v5, 8.507059e+37 }
 0x54d   :  { %v6770_v52 = vpop.eup %6769 }
 0x54e   :  { %v3906_v57 = vmul.f32 %v6770_v52, %v3083_v59  ;;  %v2339_v11 = vpop.xlane.xlu0 %2338  ;;  %v8914_v35 = vpop.xlane.xlu2 %3085  ;;  %vm3911_vm6 = vweird.f32 %v6770_v52  ;;  %v1674_v59 = vmax.f32 %v1333_v44, %v1546_v38 }
 0x54f   :  { %v2625_v32 = vsub.f32 %v8674_v10, %v2339_v11  ;;  %6771 = vrcp.f32 %v8914_v35  ;;  %v1545_v10 = vmul.f32 0.01, %v1331_v61  ;;  %vm8920_vm8 = vmor %vm3910_vm7, %vm3911_vm6  ;;  %v3930_v16 = vand.u32 2147483648, %v8914_v35 }
 0x550   :  { %v3907_v23 = vsub.f32 1.0, %v3906_v57  ;;  %vm3924_vm12 = vweird.f32 %v8914_v35 }
 0x551   :  { %v2801_v13 = vmul.f32 1.442695, %v2625_v32  ;;  %v1673_v36 = vmax.f32 %v1331_v61, %v1545_v10  ;;  %v3931_v17 = vor.u32 1.1754944e-38, %v3930_v16  ;;  %v2017_v32 = vpop.f32.mrf.mxu2 }
 0x552   :  { %v3908_v31 = vmul.f32 %v6770_v52, %v3907_v23 }
 0x553   :  { %6773 = vpow2.f32 %v2801_v13 }
 0x554   :  { %v3909_v54 = vadd.f32 %v6770_v52, %v3908_v31 }
 0x555   :  { %v6772_v39 = vpop.eup %6771  ;;  %v5892_v47 = vpop.f32.mrf.mxu3 }
 0x556   :  { %v8926_v0 = vpop.xlane.xlu1 %3088  ;;  %v3913_v28 = vsel %vm8920_vm8, %v6770_v52, %v3909_v54  ;;  %v3920_v26 = vmul.f32 %v6772_v39, %v8914_v35  ;;  %6213 = vst.msk [vmem:[%s11492_s8 + $0x100] sm:$0xff] %vm6180_vm9, %v5892_v47  ;;  %v2342_v40 = vpop.xlane.xlu2 %2341  ;;  %vm3925_vm11 = vweird.f32 %v6772_v39  ;;  %v8991_v54 = vadd.f32 %v8952_v55, %v8924_v18 }
 0x557   :  { %6775 = vrcp.f32 %v8926_v0  ;;  %v2626_v37 = vsub.f32 %v8705_v3, %v2342_v40  ;;  %v3918_v49 = vsel %vm3915_vm10, %v3917_v53, %v3913_v28  ;;  %v1766_v3 = vpack.c.bf16 %v1674_v59, %v1673_v36  ;;  %vm8959_vm13 = vmor %vm3924_vm12, %vm3925_vm11 }
 0x558   :  { %v3921_v9 = vsub.f32 1.0, %v3920_v26  ;;  %v5177_v19 = vmul.f32 %v8661_v25, %v3918_v49  ;;  %v3928_v25 = vand.u32 2147483647, %v8914_v35  ;;  %v3944_v58 = vand.u32 2147483648, %v8926_v0 }
 0x559   :  { %v8937_v42 = vpop.eup %6773  ;;  %v2803_v51 = vmul.f32 1.442695, %v2626_v37  ;;  %2046 = vmatmul.bf16.gmra.mxu2 %v1766_v3  ;;  %v3942_v61 = vand.u32 2147483647, %v8926_v0  ;;  %vm3938_vm0 = vweird.f32 %v8926_v0  ;;  %v2019_v26 = vpop.f32.mrf.mxu2 }
 0x55a   :  { %v3105_v1 = vsel %vm2192_vm3, %v8937_v42, 0.0  ;;  %v3922_v4 = vmul.f32 %v6772_v39, %v3921_v9  ;;  %5305 = vst.msk [vmem:[%s11491_s9 + $0x140] sm:$0xff] %vm2192_vm3, %v5177_v19  ;;  %6485 = vmatmul.msk.f32.gmra.mxu3 %vm2192_vm3, %v5177_v19  ;;  %vm3929_vm14 = vcmp.eq.f32.partialorder %v3928_v25, 8.507059e+37  ;;  %v9018_v19 = vadd.f32 %v8952_v55, %v2017_v32 }
 0x55b   :  { %3106 = vadd.xlane.f32.xlu1 %v3105_v1  ;;  %6777 = vpow2.f32 %v2803_v51  ;;  %vm3943_vm4 = vcmp.eq.f32.partialorder %v3942_v61, 8.507059e+37 }
 0x55c   :  { %v3923_v33 = vadd.f32 %v6772_v39, %v3922_v4 }
 0x55d   :  { %v6776_v20 = vpop.eup %6775  ;;  %v5895_v57 = vpop.f32.mrf.mxu3 }
 0x55e   :  { %v3934_v15 = vmul.f32 %v6776_v20, %v8926_v0  ;;  %v2345_v52 = vpop.xlane.xlu1 %2344  ;;  %v8965_v27 = vpop.xlane.xlu0 %3091  ;;  %v3927_v60 = vsel %vm8959_vm13, %v6772_v39, %v3923_v33  ;;  %6214 = vst.msk [vmem:[%s11492_s8 + $0x108] sm:$0xff] %vm6180_vm9, %v5895_v57  ;;  %vm3939_vm15 = vweird.f32 %v6776_v20 }
 0x55f   :  { %v2627_v11 = vsub.f32 %v8729_v29, %v2345_v52  ;;  %6779 = vrcp.f32 %v8965_v27  ;;  %v3932_v13 = vsel %vm3929_vm14, %v3931_v17, %v3927_v60  ;;  %v2361_v29 = vsel %vm2192_vm3, %v8956_v2, -inf  ;;  %vm3940_vm1 = vmor %vm3938_vm0, %vm3939_vm15 }
 0x560   :  { %v3935_v35 = vsub.f32 1.0, %v3934_v15  ;;  %v5178_v63 = vmul.f32 %v8688_v45, %v3932_v13  ;;  %v3945_v45 = vor.u32 1.1754944e-38, %v3944_v58  ;;  %v3958_v40 = vand.u32 2147483648, %v8965_v27 }
 0x561   :  { %v2805_v23 = vmul.f32 1.442695, %v2627_v11  ;;  %v8977_v43 = vpop.eup %6777  ;;  %v3956_v49 = vand.u32 2147483647, %v8965_v27  ;;  %vm3952_vm6 = vweird.f32 %v8965_v27  ;;  %v2367_v17 = vsel %vm2192_vm3, %v9018_v19, -inf }
 0x562   :  { %v3936_v31 = vmul.f32 %v6776_v20, %v3935_v35  ;;  %v3108_v12 = vsel %vm2192_vm3, %v8977_v43, 0.0  ;;  %5306 = vst.msk [vmem:[%s11491_s9 + $0x148] sm:$0xff] %vm2192_vm3, %v5178_v63  ;;  %6486 = vmatmul.msk.f32.gmra.mxu3 %vm2192_vm3, %v5178_v63  ;;  %v3959_v59 = vor.u32 1.1754944e-38, %v3958_v40  ;;  %v9045_v13 = vadd.f32 %v8952_v55, %v2019_v26 }
 0x563   :  { %6781 = vpow2.f32 %v2805_v23  ;;  %2362 = vmax.xlane.f32.xlu1 %v2361_v29  ;;  %3109 = vadd.xlane.f32.xlu0 %v3108_v12  ;;  %vm3957_vm8 = vcmp.eq.f32.partialorder %v3956_v49, 8.507059e+37 }
 0x564   :  { %v3937_v5 = vadd.f32 %v6776_v20, %v3936_v31 }
 0x565   :  { %v6780_v44 = vpop.eup %6779  ;;  %v5898_v21 = vpop.f32.mrf.mxu3 }
 0x566   :  { %v3941_v62 = vsel %vm3940_vm1, %v6776_v20, %v3937_v5  ;;  %v3948_v10 = vmul.f32 %v6780_v44, %v8965_v27  ;;  %v2348_v38 = vpop.xlane.xlu0 %2347  ;;  %6215 = vst.msk [vmem:[%s11492_s8 + $0x110] sm:$0xff] %vm6180_vm9, %v5898_v21  ;;  %v8998_v53 = vpop.xlane.xlu2 %3094  ;;  %vm3953_vm5 = vweird.f32 %v6780_v44 }
 0x567   :  { %v3946_v39 = vsel %vm3943_vm4, %v3945_v45, %v3941_v62  ;;  %v2628_v47 = vsub.f32 %v8757_v6, %v2348_v38  ;;  %6783 = vrcp.f32 %v8998_v53  ;;  %vm3954_vm7 = vmor %vm3952_vm6, %vm3953_vm5  ;;  %v2022_v27 = vpop.f32.mrf.mxu2  ;;  %v3970_v32 = vand.u32 2147483647, %v8998_v53 }
 0x568   :  { %v5179_v0 = vmul.f32 %v8714_v22, %v3946_v39  ;;  %v3949_v18 = vsub.f32 1.0, %v3948_v10  ;;  %v2364_v22 = vsel %vm2192_vm3, %v8991_v54, -inf  ;;  %vm3966_vm11 = vweird.f32 %v8998_v53 }
 0x569   :  { %v9002_v28 = vpop.eup %6781  ;;  %v2807_v36 = vmul.f32 1.442695, %v2628_v47  ;;  %vm3971_vm13 = vcmp.eq.f32.partialorder %v3970_v32, 8.507059e+37  ;;  %v2370_v38 = vsel %vm2192_vm3, %v9045_v13, -inf  ;;  %v120_v47 = vld [vmem:[%s11484_s0 + $0x2c0] sm:$0xff] }
 0x56a   :  { %5307 = vst.msk [vmem:[%s11491_s9 + $0x150] sm:$0xff] %vm2192_vm3, %v5179_v0  ;;  %v3111_v37 = vsel %vm2192_vm3, %v9002_v28, 0.0  ;;  %v3950_v6 = vmul.f32 %v6780_v44, %v3949_v18  ;;  %6487 = vmatmul.msk.f32.gmra.mxu3 %vm2192_vm3, %v5179_v0  ;;  %v121_v0 = vld [vmem:[%s11484_s0 + $0x2c8] sm:$0xff] }
 0x56b   :  { %3112 = vadd.xlane.f32.xlu2 %v3111_v37  ;;  %6785 = vpow2.f32 %v2807_v36  ;;  %2365 = vmax.xlane.f32.xlu0 %v2364_v22  ;;  %v204_v26 = vpack.c.bf16 %v121_v0, %v120_v47 }
 0x56c   :  { %v3951_v9 = vadd.f32 %v6780_v44, %v3950_v6 }
 0x56d   :  { %v6784_v1 = vpop.eup %6783  ;;  %v5901_v4 = vpop.f32.mrf.mxu3  ;;  %6361 = vmatmul.msk.bf16.gmra.mxu0 %vm229_vm2, %v204_v26 }
 0x56e   :  { %v9020_v51 = vpop.xlane.xlu1 %3097  ;;  %v3955_v16 = vsel %vm3954_vm7, %v6780_v44, %v3951_v9  ;;  %v3962_v3 = vmul.f32 %v6784_v1, %v8998_v53  ;;  %6216 = vst.msk [vmem:[%s11492_s8 + $0x118] sm:$0xff] %vm6180_vm9, %v5901_v4  ;;  %v2351_v25 = vpop.xlane.xlu2 %2350  ;;  %vm3967_vm10 = vweird.f32 %v6784_v1 }
 0x56f   :  { %6787 = vrcp.f32 %v9020_v51  ;;  %v3960_v20 = vsel %vm3957_vm8, %v3959_v59, %v3955_v16  ;;  %v2629_v33 = vsub.f32 %v8806_v41, %v2351_v25  ;;  %vm3968_vm12 = vmor %vm3966_vm11, %vm3967_vm10  ;;  %v3986_v62 = vand.u32 2147483648, %v9020_v51  ;;  %v2024_v37 = vpop.f32.mrf.mxu2 }
 0x570   :  { %v5180_v14 = vmul.f32 %v8745_v48, %v3960_v20  ;;  %v3963_v52 = vsub.f32 1.0, %v3962_v3  ;;  %v3972_v48 = vand.u32 2147483648, %v8998_v53  ;;  %v3984_v39 = vand.u32 2147483647, %v9020_v51  ;;  %v638_v53 = vpop.f32.mrf.mxu0 }
 0x571   :  { %v9030_v15 = vpop.eup %6785  ;;  %v2809_v57 = vmul.f32 1.442695, %v2629_v33  ;;  %vm3980_vm15 = vweird.f32 %v9020_v51  ;;  %v3987_v6 = vor.u32 1.1754944e-38, %v3986_v62  ;;  %v9120_v32 = vadd.f32 %v8952_v55, %v2024_v37 }
 0x572   :  { %5308 = vst.msk [vmem:[%s11491_s9 + $0x158] sm:$0xff] %vm2192_vm3, %v5180_v14  ;;  %v3114_v11 = vsel %vm2192_vm3, %v9030_v15, 0.0  ;;  %v3964_v41 = vmul.f32 %v6784_v1, %v3963_v52  ;;  %6488 = vmatmul.msk.f32.gmra.mxu3 %vm2192_vm3, %v5180_v14  ;;  %v3973_v61 = vor.u32 1.1754944e-38, %v3972_v48  ;;  %vm3985_vm1 = vcmp.eq.f32.partialorder %v3984_v39, 8.507059e+37 }
 0x573   :  { %2368 = vmax.xlane.f32.xlu2 %v2367_v17  ;;  %3115 = vadd.xlane.f32.xlu1 %v3114_v11  ;;  %6789 = vpow2.f32 %v2809_v57  ;;  %v9113_v11 = vld [vmem:[%s11485_s3] ss:$0 sm:$0xff]  ;;  %v2376_v39 = vsel %vm2192_vm3, %v9120_v32, -inf }
 0x574   :  { %v3965_v23 = vadd.f32 %v6784_v1, %v3964_v41 }
 0x575   :  { %v6788_v60 = vpop.eup %6787  ;;  %v5904_v29 = vpop.f32.mrf.mxu3 }
 0x576   :  { %v3976_v35 = vmul.f32 %v6788_v60, %v9020_v51  ;;  %v2354_v58 = vpop.xlane.xlu1 %2353  ;;  %v9049_v63 = vpop.xlane.xlu0 %3100  ;;  %6217 = vst.msk [vmem:[%s11492_s8 + $0x120] sm:$0xff] %vm6180_vm9, %v5904_v29  ;;  %v3969_v45 = vsel %vm3968_vm12, %v6784_v1, %v3965_v23  ;;  %vm3981_vm14 = vweird.f32 %v6788_v60  ;;  %v9090_v1 = vadd.f32 %v8952_v55, %v2022_v27 }
 0x577   :  { %v2630_v31 = vsub.f32 %v8827_v34, %v2354_v58  ;;  %6791 = vrcp.f32 %v9049_v63  ;;  %v3974_v34 = vsel %vm3971_vm13, %v3973_v61, %v3969_v45  ;;  %vm9073_vm0 = vmor %vm3980_vm15, %vm3981_vm14  ;;  %v4000_v33 = vand.u32 2147483648, %v9049_v63 }
 0x578   :  { %v3977_v12 = vsub.f32 1.0, %v3976_v35  ;;  %v5181_v21 = vmul.f32 %v8769_v30, %v3974_v34  ;;  %v640_v57 = vpop.f32.mrf.mxu0  ;;  %v639_v27 = vadd.f32 %v9113_v11, %v638_v53  ;;  %vm3994_vm5 = vweird.f32 %v9049_v63 }
 0x579   :  { %v2811_v5 = vmul.f32 1.442695, %v2630_v31  ;;  %v9057_v10 = vpop.eup %6789  ;;  %v641_v41 = vadd.f32 %v9113_v11, %v640_v57  ;;  %v4001_v35 = vor.u32 1.1754944e-38, %v4000_v33 }
 0x57a   :  { %v3978_v44 = vmul.f32 %v6788_v60, %v3977_v12  ;;  %v3117_v18 = vsel %vm2192_vm3, %v9057_v10, 0.0  ;;  %5309 = vst.msk [vmem:[%s11491_s9 + $0x160] sm:$0xff] %vm2192_vm3, %v5181_v21  ;;  %6489 = vmatmul.msk.f32.gmra.mxu3 %vm2192_vm3, %v5181_v21 }
 0x57b   :  { %6793 = vpow2.f32 %v2811_v5  ;;  %2371 = vmax.xlane.f32.xlu1 %v2370_v38  ;;  %3118 = vadd.xlane.f32.xlu0 %v3117_v18  ;;  %v838_v5 = vmul.f32 0.01, %v639_v27  ;;  %v839_v45 = vmul.f32 0.01, %v641_v41 }
 0x57c   :  { %v3979_v30 = vadd.f32 %v6788_v60, %v3978_v44  ;;  %v2027_v44 = vpop.f32.mrf.mxu2 }
 0x57d   :  { %v6792_v36 = vpop.eup %6791  ;;  %v5907_v59 = vpop.f32.mrf.mxu3  ;;  %v966_v0 = vmax.f32 %v639_v27, %v838_v5  ;;  %v967_v18 = vmax.f32 %v641_v41, %v839_v45  ;;  %v9145_v40 = vadd.f32 %v8952_v55, %v2027_v44 }
 0x57e   :  { %v9082_v22 = vpop.xlane.xlu2 %3103  ;;  %v3983_v49 = vsel %vm9073_vm0, %v6788_v60, %v3979_v30  ;;  %v3990_v9 = vmul.f32 %v6792_v36, %v9049_v63  ;;  %v2357_v51 = vpop.xlane.xlu0 %2356  ;;  %6218 = vst.msk [vmem:[%s11492_s8 + $0x128] sm:$0xff] %vm6180_vm9, %v5907_v59  ;;  %vm3995_vm4 = vweird.f32 %v6792_v36 }
 0x57f   :  { %6795 = vrcp.f32 %v9082_v22  ;;  %v2631_v4 = vsub.f32 %v8851_v7, %v2357_v51  ;;  %v3988_v16 = vsel %vm3985_vm1, %v3987_v6, %v3983_v49  ;;  %v3998_v7 = vand.u32 2147483647, %v9049_v63  ;;  %vm3996_vm6 = vmor %vm3994_vm5, %vm3995_vm4 }
 0x580   :  { %v3991_v25 = vsub.f32 1.0, %v3990_v9  ;;  %v5182_v20 = vmul.f32 %v8809_v46, %v3988_v16  ;;  %v2373_v46 = vsel %vm2192_vm3, %v9090_v1, -inf  ;;  %v4014_v62 = vand.u32 2147483648, %v9082_v22 }
 0x581   :  { %v9097_v3 = vpop.eup %6793  ;;  %v2813_v14 = vmul.f32 1.442695, %v2631_v4  ;;  %vm3999_vm7 = vcmp.eq.f32.partialorder %v3998_v7, 8.507059e+37  ;;  %v4012_v53 = vand.u32 2147483647, %v9082_v22  ;;  %vm4008_vm10 = vweird.f32 %v9082_v22  ;;  %v1335_v4 = vpop.f32.mrf.mxu1 }
 0x582   :  { %v3120_v52 = vsel %vm2192_vm3, %v9097_v3, 0.0  ;;  %v3992_v17 = vmul.f32 %v6792_v36, %v3991_v25  ;;  %5310 = vst.msk [vmem:[%s11491_s9 + $0x168] sm:$0xff] %vm2192_vm3, %v5182_v20  ;;  %6490 = vmatmul.msk.f32.gmra.mxu3 %vm2192_vm3, %v5182_v20  ;;  %v4015_v30 = vor.u32 1.1754944e-38, %v4014_v62  ;;  %v2379_v51 = vsel %vm2192_vm3, %v9145_v40, -inf }
 0x583   :  { %3121 = vadd.xlane.f32.xlu2 %v3120_v52  ;;  %6797 = vpow2.f32 %v2813_v14  ;;  %2374 = vmax.xlane.f32.xlu0 %v2373_v46  ;;  %vm4013_vm12 = vcmp.eq.f32.partialorder %v4012_v53, 8.507059e+37  ;;  %v1336_v20 = vadd.f32 %v8877_v56, %v1335_v4 }
 0x584   :  { %v3993_v60 = vadd.f32 %v6792_v36, %v3992_v17  ;;  %v2029_v59 = vpop.f32.mrf.mxu2  ;;  %v643_v17 = vpop.f32.mrf.mxu0 }
 0x585   :  { %v6796_v48 = vpop.eup %6795  ;;  %v5910_v29 = vpop.f32.mrf.mxu3  ;;  %v1547_v14 = vmul.f32 0.01, %v1336_v20  ;;  %v644_v46 = vadd.f32 %v9113_v11, %v643_v17 }
 0x586   :  { %v4004_v58 = vmul.f32 %v6796_v48, %v9082_v22  ;;  %v2360_v23 = vpop.xlane.xlu2 %2359  ;;  %v3997_v61 = vsel %vm3996_vm6, %v6792_v36, %v3993_v60  ;;  %6219 = vst.msk [vmem:[%s11492_s8 + $0x130] sm:$0xff] %vm6180_vm9, %v5910_v29  ;;  %vm4009_vm8 = vweird.f32 %v6796_v48  ;;  %v1054_v22 = vpack.c.bf16 %v967_v18, %v966_v0  ;;  %v124_v18 = vld [vmem:[%s11484_s0 + $0x2e0] sm:$0xff] }
 0x587   :  { %v2632_v31 = vsub.f32 %v8870_v50, %v2360_v23  ;;  %v4002_v63 = vsel %vm3999_vm7, %v4001_v35, %v3997_v61  ;;  %vm4010_vm11 = vmor %vm4008_vm10, %vm4009_vm8  ;;  %v1675_v7 = vmax.f32 %v1336_v20, %v1547_v14  ;;  %v122_v35 = vld [vmem:[%s11484_s0 + $0x2d0] sm:$0xff] }
 0x588   :  { %v4005_v12 = vsub.f32 1.0, %v4004_v58  ;;  %v5183_v21 = vmul.f32 %v8837_v8, %v4002_v63  ;;  %1354 = vmatmul.bf16.gmra.mxu1 %v1054_v22  ;;  %v123_v58 = vld [vmem:[%s11484_s0 + $0x2d8] sm:$0xff] }
 0x589   :  { %v2815_v34 = vmul.f32 1.442695, %v2632_v31  ;;  %v9131_v38 = vpop.eup %6797  ;;  %v1337_v25 = vpop.f32.mrf.mxu1  ;;  %v205_v29 = vpack.c.bf16 %v123_v58, %v122_v35 }
 0x58a   :  { %v4006_v50 = vmul.f32 %v6796_v48, %v4005_v12  ;;  %5311 = vst.msk [vmem:[%s11491_s9 + $0x170] sm:$0xff] %vm2192_vm3, %v5183_v21  ;;  %v3123_v47 = vsel %vm2192_vm3, %v9131_v38, 0.0  ;;  %6491 = vmatmul.msk.f32.gmra.mxu3 %vm2192_vm3, %v5183_v21  ;;  %v1338_v33 = vadd.f32 %v8877_v56, %v1337_v25 }
 0x58b   :  { %6799 = vpow2.f32 %v2815_v34  ;;  %2377 = vmax.xlane.f32.xlu2 %v2376_v39  ;;  %3124 = vadd.xlane.f32.xlu1 %v3123_v47 }
 0x58c   :  { %v4007_v8 = vadd.f32 %v6796_v48, %v4006_v50  ;;  %v1548_v52 = vmul.f32 0.01, %v1338_v33  ;;  %v645_v60 = vpop.f32.mrf.mxu0  ;;  %6362 = vmatmul.msk.bf16.gmra.mxu0 %vm229_vm2, %v205_v29 }
 0x58d   :  { %v5913_v36 = vpop.f32.mrf.mxu3  ;;  %v646_v23 = vadd.f32 %v9113_v11, %v645_v60 }
 0x58e   :  { %v4011_v26 = vsel %vm4010_vm11, %v6796_v48, %v4007_v8  ;;  %6220 = vst.msk [vmem:[%s11492_s8 + $0x138] sm:$0xff] %vm6180_vm9, %v5913_v36  ;;  %v1676_v57 = vmax.f32 %v1338_v33, %v1548_v52  ;;  %v840_v48 = vmul.f32 0.01, %v644_v46 }
 0x58f   :  { %v4016_v37 = vsel %vm4013_vm12, %v4015_v30, %v4011_v26  ;;  %v841_v61 = vmul.f32 0.01, %v646_v23  ;;  %v125_v30 = vld [vmem:[%s11484_s0 + $0x2e8] sm:$0xff]  ;;  %v2032_v60 = vpop.f32.mrf.mxu2 }
 0x590   :  { %v5184_v6 = vmul.f32 %v8858_v24, %v4016_v37  ;;  %v9164_v24 = vadd.f32 %v8952_v55, %v2029_v59  ;;  %v1767_v27 = vpack.c.bf16 %v1676_v57, %v1675_v7  ;;  %v968_v31 = vmax.f32 %v644_v46, %v840_v48 }
 0x591   :  { %v9152_v49 = vpop.eup %6799  ;;  %v1340_v41 = vpop.f32.mrf.mxu1  ;;  %v969_v12 = vmax.f32 %v646_v23, %v841_v61  ;;  %v206_v37 = vpack.c.bf16 %v125_v30, %v124_v18 }
 0x592   :  { %5312 = vst.msk [vmem:[%s11491_s9 + $0x178] sm:$0xff] %vm2192_vm3, %v5184_v6  ;;  %v3126_v9 = vsel %vm2192_vm3, %v9152_v49, 0.0  ;;  %6492 = vmatmul.msk.f32.gmra.mxu3 %vm2192_vm3, %v5184_v6  ;;  %v2382_v16 = vsel %vm2192_vm3, %v9164_v24, -inf  ;;  %2051 = vmatmul.bf16.gmra.mxu2 %v1767_v27  ;;  %v1341_v63 = vadd.f32 %v8877_v56, %v1340_v41  ;;  %v126_v27 = vld [vmem:[%s11484_s0 + $0x2f0] sm:$0xff]  ;;  %v127_v41 = vld [vmem:[%s11484_s0 + $0x2f8] sm:$0xff] }
 0x593   :  { %3127 = vadd.xlane.f32.xlu0 %v3126_v9  ;;  %2380 = vmax.xlane.f32.xlu1 %v2379_v51  ;;  %v1055_v44 = vpack.c.bf16 %v969_v12, %v968_v31  ;;  %v207_v23 = vpack.c.bf16 %v127_v41, %v126_v27  ;;  %v9237_v41 = vadd.f32 %v8952_v55, %v2032_v60 }
 0x594   :  { %v1549_v62 = vmul.f32 0.01, %v1341_v63  ;;  %v648_v34 = vpop.f32.mrf.mxu0 }
 0x595   :  { %v649_v8 = vadd.f32 %v9113_v11, %v648_v34 }
 0x596   :  { %v1677_v50 = vmax.f32 %v1341_v63, %v1549_v62 }
 0x597   :  { %v842_v26 = vmul.f32 0.01, %v649_v8 }
 0x598   :  { %1359 = vmatmul.bf16.gmra.mxu1 %v1055_v44 }
 0x599   :  { %v1342_v5 = vpop.f32.mrf.mxu1  ;;  %v970_v6 = vmax.f32 %v649_v8, %v842_v26 }
 0x59a   :  { %v1343_v45 = vadd.f32 %v8877_v56, %v1342_v5 }
 0x59b   :  { %2383 = vmax.xlane.f32.xlu0 %v2382_v16 }
 0x59c   :  { %v1550_v21 = vmul.f32 0.01, %v1343_v45  ;;  %v650_v0 = vpop.f32.mrf.mxu0  ;;  %6363 = vmatmul.msk.bf16.gmra.mxu0 %vm229_vm2, %v206_v37 }
 0x59d   :  { %v651_v36 = vadd.f32 %v9113_v11, %v650_v0 }
 0x59e   :  { %v1678_v39 = vmax.f32 %v1343_v45, %v1550_v21 }
 0x59f   :  { %v843_v22 = vmul.f32 0.01, %v651_v36 }
 0x5a0   :  { %v1768_v53 = vpack.c.bf16 %v1678_v39, %v1677_v50 }
 0x5a1   :  { %v1345_v47 = vpop.f32.mrf.mxu1  ;;  %v971_v9 = vmax.f32 %v651_v36, %v843_v22 }
 0x5a2   :  { %2056 = vmatmul.bf16.gmra.mxu2 %v1768_v53  ;;  %v1346_v59 = vadd.f32 %v8877_v56, %v1345_v47 }
 0x5a3   :  { %v1056_v16 = vpack.c.bf16 %v971_v9, %v970_v6 }
 0x5a4   :  { %v1551_v25 = vmul.f32 0.01, %v1346_v59  ;;  %v653_v20 = vpop.f32.mrf.mxu0 }
 0x5a5   :  { %v654_v35 = vadd.f32 %v9113_v11, %v653_v20 }
 0x5a6   :  { %v1679_v52 = vmax.f32 %v1346_v59, %v1551_v25  ;;  %v9215_v59 = vpop.f32.mrf.mxu2 }
 0x5a7   :  { %v844_v63 = vmul.f32 0.01, %v654_v35 }
 0x5a8   :  { %1364 = vmatmul.bf16.gmra.mxu1 %v1056_v16 }
 0x5a9   :  { %v1347_v51 = vpop.f32.mrf.mxu1  ;;  %v972_v62 = vmax.f32 %v654_v35, %v844_v63 }
 0x5aa   :  { %v1348_v4 = vadd.f32 %v8877_v56, %v1347_v51 }
 0x5ac   :  { %v1552_v33 = vmul.f32 0.01, %v1348_v4  ;;  %v655_v46 = vpop.f32.mrf.mxu0  ;;  %6364 = vmatmul.msk.bf16.gmra.mxu0 %vm229_vm2, %v207_v23 }
 0x5ad   :  { %v656_v58 = vadd.f32 %v9113_v11, %v655_v46 }
 0x5ae   :  { %v1680_v17 = vmax.f32 %v1348_v4, %v1552_v33 }
 0x5af   :  { %v845_v5 = vmul.f32 0.01, %v656_v58 }
 0x5b0   :  { %v1769_v57 = vpack.c.bf16 %v1680_v17, %v1679_v52 }
 0x5b1   :  { %v1350_v7 = vpop.f32.mrf.mxu1  ;;  %v973_v34 = vmax.f32 %v656_v58, %v845_v5 }
 0x5b2   :  { %2061 = vmatmul.bf16.gmra.mxu2 %v1769_v57 }
 0x5b3   :  { %v1057_v0 = vpack.c.bf16 %v973_v34, %v972_v62 }
 0x5b8   :  { %1369 = vmatmul.bf16.gmra.mxu1 %v1057_v0  ;;  %v9272_v0 = vadd.f32 %v8952_v55, %v9215_v59 }
 0x5b9   :  { %v1352_v39 = vpop.f32.mrf.mxu1 }
 0x5ba   :  { %v1353_v47 = vadd.f32 %v8877_v56, %v1352_v39 }
 0x5bc   :  { %v1554_v26 = vmul.f32 0.01, %v1353_v47 }
 0x5be   :  { %v1682_v52 = vmax.f32 %v1353_v47, %v1554_v26 }
 0x5ce   :  { %v3107_v14 = vpop.xlane.xlu1 %3106 }
 0x5cf   :  { %6801 = vrcp.f32 %v3107_v14  ;;  %v4028_v50 = vand.u32 2147483648, %v3107_v14  ;;  %v4026_v53 = vand.u32 2147483647, %v3107_v14  ;;  %vm4022_vm14 = vweird.f32 %v3107_v14 }
 0x5d1   :  { %v4029_v37 = vor.u32 1.1754944e-38, %v4028_v50  ;;  %vm4027_vm0 = vcmp.eq.f32.partialorder %v4026_v53, 8.507059e+37 }
 0x5d5   :  { %v6802_v48 = vpop.eup %6801 }
 0x5d6   :  { %v4018_v29 = vmul.f32 %v6802_v48, %v3107_v14  ;;  %v2363_v31 = vpop.xlane.xlu1 %2362  ;;  %v9201_v12 = vpop.xlane.xlu0 %3109  ;;  %vm4023_vm13 = vweird.f32 %v6802_v48 }
 0x5d7   :  { %v2633_v61 = vsub.f32 %v8956_v2, %v2363_v31  ;;  %6803 = vrcp.f32 %v9201_v12  ;;  %v1351_v2 = vadd.f32 %v8877_v56, %v1350_v7  ;;  %vm9207_vm15 = vmor %vm4022_vm14, %vm4023_vm13  ;;  %v4042_v46 = vand.u32 2147483648, %v9201_v12 }
 0x5d8   :  { %v4019_v45 = vsub.f32 1.0, %v4018_v29  ;;  %vm4036_vm4 = vweird.f32 %v9201_v12 }
 0x5d9   :  { %v2817_v44 = vmul.f32 1.442695, %v2633_v61  ;;  %v1553_v30 = vmul.f32 0.01, %v1351_v2  ;;  %v4043_v29 = vor.u32 1.1754944e-38, %v4042_v46 }
 0x5da   :  { %v4020_v21 = vmul.f32 %v6802_v48, %v4019_v45 }
 0x5db   :  { %6805 = vpow2.f32 %v2817_v44  ;;  %v1681_v25 = vmax.f32 %v1351_v2, %v1553_v30 }
 0x5dc   :  { %v4021_v8 = vadd.f32 %v6802_v48, %v4020_v21 }
 0x5dd   :  { %v6804_v36 = vpop.eup %6803  ;;  %v5916_v6 = vpop.f32.mrf.mxu3 }
 0x5de   :  { %v9211_v22 = vpop.xlane.xlu2 %3112  ;;  %v4025_v9 = vsel %vm9207_vm15, %v6802_v48, %v4021_v8  ;;  %v4032_v56 = vmul.f32 %v6804_v36, %v9201_v12  ;;  %6221 = vst.msk [vmem:[%s11492_s8 + $0x140] sm:$0xff] %vm6180_vm9, %v5916_v6  ;;  %v2366_v51 = vpop.xlane.xlu0 %2365  ;;  %vm4037_vm1 = vweird.f32 %v6804_v36 }
 0x5df   :  { %6807 = vrcp.f32 %v9211_v22  ;;  %v2634_v4 = vsub.f32 %v8991_v54, %v2366_v51  ;;  %v4030_v16 = vsel %vm4027_vm0, %v4029_v37, %v4025_v9  ;;  %v1770_v54 = vpack.c.bf16 %v1682_v52, %v1681_v25  ;;  %vm9240_vm5 = vmor %vm4036_vm4, %vm4037_vm1 }
 0x5e0   :  { %v4033_v33 = vsub.f32 1.0, %v4032_v56  ;;  %v5185_v14 = vmul.f32 %v8937_v42, %v4030_v16  ;;  %v4040_v42 = vand.u32 2147483647, %v9201_v12  ;;  %v2037_v12 = vpop.f32.mrf.mxu2  ;;  %v4056_v45 = vand.u32 2147483648, %v9211_v22 }
 0x5e1   :  { %v9224_v20 = vpop.eup %6805  ;;  %v2819_v17 = vmul.f32 1.442695, %v2634_v4  ;;  %2066 = vmatmul.bf16.gmra.mxu2 %v1770_v54  ;;  %v4054_v39 = vand.u32 2147483647, %v9211_v22  ;;  %vm4050_vm8 = vweird.f32 %v9211_v22 }
 0x5e2   :  { %v3129_v7 = vsel %vm2192_vm3, %v9224_v20, 0.0  ;;  %v4034_v57 = vmul.f32 %v6804_v36, %v4033_v33  ;;  %5313 = vst.msk [vmem:[%s11491_s9 + $0x180] sm:$0xff] %vm2192_vm3, %v5185_v14  ;;  %6493 = vmatmul.msk.f32.gmra.mxu3 %vm2192_vm3, %v5185_v14  ;;  %vm4041_vm6 = vcmp.eq.f32.partialorder %v4040_v42, 8.507059e+37  ;;  %v9298_v14 = vadd.f32 %v8952_v55, %v2037_v12 }
 0x5e3   :  { %3130 = vadd.xlane.f32.xlu2 %v3129_v7  ;;  %6809 = vpow2.f32 %v2819_v17  ;;  %vm4055_vm11 = vcmp.eq.f32.partialorder %v4054_v39, 8.507059e+37 }
 0x5e4   :  { %v4035_v48 = vadd.f32 %v6804_v36, %v4034_v57 }
 0x5e5   :  { %v6808_v27 = vpop.eup %6807  ;;  %v5919_v31 = vpop.f32.mrf.mxu3 }
 0x5e6   :  { %v4046_v58 = vmul.f32 %v6808_v27, %v9211_v22  ;;  %v2369_v23 = vpop.xlane.xlu2 %2368  ;;  %v9246_v63 = vpop.xlane.xlu1 %3115  ;;  %v4039_v60 = vsel %vm9240_vm5, %v6804_v36, %v4035_v48  ;;  %6222 = vst.msk [vmem:[%s11492_s8 + $0x148] sm:$0xff] %vm6180_vm9, %v5919_v31  ;;  %vm4051_vm7 = vweird.f32 %v6808_v27 }
 0x5e7   :  { %v2635_v61 = vsub.f32 %v9018_v19, %v2369_v23  ;;  %6811 = vrcp.f32 %v9246_v63  ;;  %v4044_v62 = vsel %vm4041_vm6, %v4043_v29, %v4039_v60  ;;  %v2385_v19 = vsel %vm2192_vm3, %v9237_v41, -inf  ;;  %vm4052_vm10 = vmor %vm4050_vm8, %vm4051_vm7 }
 0x5e8   :  { %v4047_v5 = vsub.f32 1.0, %v4046_v58  ;;  %v5186_v50 = vmul.f32 %v8977_v43, %v4044_v62  ;;  %v4057_v43 = vor.u32 1.1754944e-38, %v4056_v45  ;;  %v2039_v4 = vpop.f32.mrf.mxu2  ;;  %v4070_v16 = vand.u32 2147483648, %v9246_v63 }
 0x5e9   :  { %v2821_v44 = vmul.f32 1.442695, %v2635_v61  ;;  %v9258_v34 = vpop.eup %6809  ;;  %v4068_v25 = vand.u32 2147483647, %v9246_v63  ;;  %vm4064_vm13 = vweird.f32 %v9246_v63  ;;  %v2391_v29 = vsel %vm2192_vm3, %v9298_v14, -inf }
 0x5ea   :  { %v4048_v21 = vmul.f32 %v6808_v27, %v4047_v5  ;;  %v3132_v53 = vsel %vm2192_vm3, %v9258_v34, 0.0  ;;  %5314 = vst.msk [vmem:[%s11491_s9 + $0x188] sm:$0xff] %vm2192_vm3, %v5186_v50  ;;  %6494 = vmatmul.msk.f32.gmra.mxu3 %vm2192_vm3, %v5186_v50  ;;  %v4071_v7 = vor.u32 1.1754944e-38, %v4070_v16  ;;  %v9326_v62 = vadd.f32 %v8952_v55, %v2039_v4 }
 0x5eb   :  { %6813 = vpow2.f32 %v2821_v44  ;;  %2386 = vmax.xlane.f32.xlu2 %v2385_v19  ;;  %3133 = vadd.xlane.f32.xlu1 %v3132_v53  ;;  %vm4069_vm15 = vcmp.eq.f32.partialorder %v4068_v25, 8.507059e+37 }
 0x5ec   :  { %v4049_v2 = vadd.f32 %v6808_v27, %v4048_v21 }
 0x5ed   :  { %v6812_v47 = vpop.eup %6811  ;;  %v5922_v30 = vpop.f32.mrf.mxu3 }
 0x5ee   :  { %v4053_v8 = vsel %vm4052_vm10, %v6808_v27, %v4049_v2  ;;  %v4060_v18 = vmul.f32 %v6812_v47, %v9246_v63  ;;  %v2372_v26 = vpop.xlane.xlu1 %2371  ;;  %6223 = vst.msk [vmem:[%s11492_s8 + $0x150] sm:$0xff] %vm6180_vm9, %v5922_v30  ;;  %v9280_v6 = vpop.xlane.xlu0 %3118  ;;  %vm4065_vm12 = vweird.f32 %v6812_v47 }
 0x5ef   :  { %v4058_v36 = vsel %vm4055_vm11, %v4057_v43, %v4053_v8  ;;  %v2636_v37 = vsub.f32 %v9045_v13, %v2372_v26  ;;  %6815 = vrcp.f32 %v9280_v6  ;;  %vm4066_vm14 = vmor %vm4064_vm13, %vm4065_vm12  ;;  %v4084_v60 = vand.u32 2147483648, %v9280_v6 }
 0x5f0   :  { %v5187_v22 = vmul.f32 %v9002_v28, %v4058_v36  ;;  %v4061_v59 = vsub.f32 1.0, %v4060_v18  ;;  %v2388_v28 = vsel %vm2192_vm3, %v9272_v0, -inf  ;;  %v4082_v5 = vand.u32 2147483647, %v9280_v6 }
 0x5f1   :  { %v9283_v9 = vpop.eup %6813  ;;  %v2823_v56 = vmul.f32 1.442695, %v2636_v37  ;;  %vm4078_vm1 = vweird.f32 %v9280_v6  ;;  %v4085_v50 = vor.u32 1.1754944e-38, %v4084_v60  ;;  %v2394_v36 = vsel %vm2192_vm3, %v9326_v62, -inf  ;;  %v658_v37 = vpop.f32.mrf.mxu0 }
 0x5f2   :  { %5315 = vst.msk [vmem:[%s11491_s9 + $0x190] sm:$0xff] %vm2192_vm3, %v5187_v22  ;;  %v3135_v51 = vsel %vm2192_vm3, %v9283_v9, 0.0  ;;  %v4062_v13 = vmul.f32 %v6812_v47, %v4061_v59  ;;  %6495 = vmatmul.msk.f32.gmra.mxu3 %vm2192_vm3, %v5187_v22  ;;  %vm4083_vm5 = vcmp.eq.f32.partialorder %v4082_v5, 8.507059e+37  ;;  %v129_v22 = vld [vmem:[%s11484_s0 + $0x308] sm:$0xff] }
 0x5f3   :  { %3136 = vadd.xlane.f32.xlu0 %v3135_v51  ;;  %6817 = vpow2.f32 %v2823_v56  ;;  %2389 = vmax.xlane.f32.xlu1 %v2388_v28 }
 0x5f4   :  { %v4063_v33 = vadd.f32 %v6812_v47, %v4062_v13 }
 0x5f5   :  { %v6816_v17 = vpop.eup %6815  ;;  %v5925_v57 = vpop.f32.mrf.mxu3 }
 0x5f6   :  { %v9301_v52 = vpop.xlane.xlu2 %3121  ;;  %v4074_v46 = vmul.f32 %v6816_v17, %v9280_v6  ;;  %6224 = vst.msk [vmem:[%s11492_s8 + $0x158] sm:$0xff] %vm6180_vm9, %v5925_v57  ;;  %v2375_v54 = vpop.xlane.xlu0 %2374  ;;  %v4067_v42 = vsel %vm4066_vm14, %v6812_v47, %v4063_v33  ;;  %vm4079_vm0 = vweird.f32 %v6816_v17  ;;  %v128_v6 = vld [vmem:[%s11484_s0 + $0x300] sm:$0xff] }
 0x5f7   :  { %6819 = vrcp.f32 %v9301_v52  ;;  %v2637_v27 = vsub.f32 %v9090_v1, %v2375_v54  ;;  %v4072_v48 = vsel %vm4069_vm15, %v4071_v7, %v4067_v42  ;;  %v2042_v1 = vpop.f32.mrf.mxu2  ;;  %vm4080_vm4 = vmor %vm4078_vm1, %vm4079_vm0  ;;  %v4096_v30 = vand.u32 2147483647, %v9301_v52 }
 0x5f8   :  { %v4075_v58 = vsub.f32 1.0, %v4074_v46  ;;  %v5188_v23 = vmul.f32 %v9030_v15, %v4072_v48  ;;  %vm4092_vm7 = vweird.f32 %v9301_v52 }
 0x5f9   :  { %v9310_v35 = vpop.eup %6817  ;;  %v2825_v31 = vmul.f32 1.442695, %v2637_v27  ;;  %vm4097_vm10 = vcmp.eq.f32.partialorder %v4096_v30, 8.507059e+37 }
 0x5fa   :  { %v3138_v61 = vsel %vm2192_vm3, %v9310_v35, 0.0  ;;  %v4076_v63 = vmul.f32 %v6816_v17, %v4075_v58  ;;  %5316 = vst.msk [vmem:[%s11491_s9 + $0x198] sm:$0xff] %vm2192_vm3, %v5188_v23  ;;  %6496 = vmatmul.msk.f32.gmra.mxu3 %vm2192_vm3, %v5188_v23 }
 0x5fb   :  { %2392 = vmax.xlane.f32.xlu0 %v2391_v29  ;;  %3139 = vadd.xlane.f32.xlu2 %v3138_v61  ;;  %6821 = vpow2.f32 %v2825_v31  ;;  %v660_v29 = vpop.f32.mrf.mxu0  ;;  %v659_v31 = vadd.f32 %v9113_v11, %v658_v37 }
 0x5fc   :  { %v4077_v12 = vadd.f32 %v6816_v17, %v4076_v63  ;;  %v661_v60 = vadd.f32 %v9113_v11, %v660_v29 }
 0x5fd   :  { %v6820_v15 = vpop.eup %6819  ;;  %v5928_v53 = vpop.f32.mrf.mxu3 }
 0x5fe   :  { %v4088_v45 = vmul.f32 %v6820_v15, %v9301_v52  ;;  %v2378_v44 = vpop.xlane.xlu2 %2377  ;;  %v9330_v21 = vpop.xlane.xlu1 %3124  ;;  %6225 = vst.msk [vmem:[%s11492_s8 + $0x160] sm:$0xff] %vm6180_vm9, %v5928_v53  ;;  %v4081_v43 = vsel %vm4080_vm4, %v6816_v17, %v4077_v12  ;;  %vm4093_vm6 = vweird.f32 %v6820_v15  ;;  %v9371_v17 = vadd.f32 %v8952_v55, %v2042_v1 }
 0x5ff   :  { %v2638_v19 = vsub.f32 %v9120_v32, %v2378_v44  ;;  %6823 = vrcp.f32 %v9330_v21  ;;  %v4098_v32 = vand.u32 2147483648, %v9301_v52  ;;  %v4086_v8 = vsel %vm4083_vm5, %v4085_v50, %v4081_v43  ;;  %vm9354_vm8 = vmor %vm4092_vm7, %vm4093_vm6  ;;  %v2044_v25 = vpop.f32.mrf.mxu2 }
 0x600   :  { %v4089_v39 = vsub.f32 1.0, %v4088_v45  ;;  %v5189_v26 = vmul.f32 %v9057_v10, %v4086_v8  ;;  %v208_v10 = vpack.c.bf16 %v129_v22, %v128_v6  ;;  %v4112_v48 = vand.u32 2147483648, %v9330_v21 }
 0x601   :  { %v2827_v2 = vmul.f32 1.442695, %v2638_v19  ;;  %v9338_v18 = vpop.eup %6821  ;;  %v4099_v13 = vor.u32 1.1754944e-38, %v4098_v32  ;;  %vm4106_vm12 = vweird.f32 %v9330_v21  ;;  %v846_v53 = vmul.f32 0.01, %v659_v31 }
 0x602   :  { %v4090_v47 = vmul.f32 %v6820_v15, %v4089_v39  ;;  %v3141_v56 = vsel %vm2192_vm3, %v9338_v18, 0.0  ;;  %5317 = vst.msk [vmem:[%s11491_s9 + $0x1a0] sm:$0xff] %vm2192_vm3, %v5189_v26  ;;  %6497 = vmatmul.msk.f32.gmra.mxu3 %vm2192_vm3, %v5189_v26  ;;  %6365 = vmatmul.msk.bf16.gmra.mxu0 %vm229_vm2, %v208_v10  ;;  %v4113_v5 = vor.u32 1.1754944e-38, %v4112_v48  ;;  %v847_v8 = vmul.f32 0.01, %v661_v60 }
 0x603   :  { %6825 = vpow2.f32 %v2827_v2  ;;  %2395 = vmax.xlane.f32.xlu2 %v2394_v36  ;;  %3142 = vadd.xlane.f32.xlu1 %v3141_v56  ;;  %v974_v22 = vmax.f32 %v659_v31, %v846_v53 }
 0x604   :  { %v4091_v59 = vadd.f32 %v6820_v15, %v4090_v47 }
 0x605   :  { %v6824_v4 = vpop.eup %6823  ;;  %v5931_v7 = vpop.f32.mrf.mxu3 }
 0x606   :  { %v9363_v16 = vpop.xlane.xlu0 %3127  ;;  %v4095_v28 = vsel %vm9354_vm8, %v6820_v15, %v4091_v59  ;;  %v4102_v33 = vmul.f32 %v6824_v4, %v9330_v21  ;;  %v2381_v52 = vpop.xlane.xlu1 %2380  ;;  %6226 = vst.msk [vmem:[%s11492_s8 + $0x168] sm:$0xff] %vm6180_vm9, %v5931_v7  ;;  %vm4107_vm11 = vweird.f32 %v6824_v4  ;;  %v9398_v15 = vld [vmem:[%s11489_s7] ss:$0 sm:$0xff]  ;;  %v975_v59 = vmax.f32 %v661_v60, %v847_v8 }
 0x607   :  { %6827 = vrcp.f32 %v9363_v16  ;;  %v2639_v57 = vsub.f32 %v9145_v40, %v2381_v52  ;;  %v4100_v46 = vsel %vm4097_vm10, %v4099_v13, %v4095_v28  ;;  %v4110_v40 = vand.u32 2147483647, %v9330_v21  ;;  %vm4108_vm13 = vmor %vm4106_vm12, %vm4107_vm11  ;;  %v2047_v2 = vpop.f32.mrf.mxu2  ;;  %v1355_v7 = vpop.f32.mrf.mxu1 }
 0x608   :  { %v4103_v42 = vsub.f32 1.0, %v4102_v33  ;;  %v5190_v27 = vmul.f32 %v9097_v3, %v4100_v46  ;;  %v2397_v3 = vsel %vm2192_vm3, %v9371_v17, -inf  ;;  %v9401_v1 = vadd.f32 %v9398_v15, %v2044_v25 }
 0x609   :  { %v9374_v54 = vpop.eup %6825  ;;  %v2829_v58 = vmul.f32 1.442695, %v2639_v57  ;;  %vm4111_vm14 = vcmp.eq.f32.partialorder %v4110_v40, 8.507059e+37  ;;  %v4126_v43 = vand.u32 2147483648, %v9363_v16  ;;  %v4124_v26 = vand.u32 2147483647, %v9363_v16 }
 0x60a   :  { %v3144_v55 = vsel %vm2192_vm3, %v9374_v54, 0.0  ;;  %v4104_v23 = vmul.f32 %v6824_v4, %v4103_v42  ;;  %5318 = vst.msk [vmem:[%s11491_s9 + $0x1a8] sm:$0xff] %vm2192_vm3, %v5190_v27  ;;  %6498 = vmatmul.msk.f32.gmra.mxu3 %vm2192_vm3, %v5190_v27  ;;  %v2400_v36 = vsel %vm2192_vm3, %v9401_v1, -inf  ;;  %vm4120_vm0 = vweird.f32 %v9363_v16  ;;  %v9452_v42 = vld [vmem:[%s11487_s5] ss:$0 sm:$0xff] }
 0x60b   :  { %3145 = vadd.xlane.f32.xlu0 %v3144_v55  ;;  %6829 = vpow2.f32 %v2829_v58  ;;  %2398 = vmax.xlane.f32.xlu1 %v2397_v3  ;;  %v4127_v6 = vor.u32 1.1754944e-38, %v4126_v43  ;;  %vm4125_vm4 = vcmp.eq.f32.partialorder %v4124_v26, 8.507059e+37  ;;  %v9426_v10 = vadd.f32 %v9398_v15, %v2047_v2 }
 0x60c   :  { %v4105_v63 = vadd.f32 %v6824_v4, %v4104_v23  ;;  %v1356_v27 = vadd.f32 %v9452_v42, %v1355_v7  ;;  %v663_v23 = vpop.f32.mrf.mxu0 }
 0x60d   :  { %v6828_v61 = vpop.eup %6827  ;;  %v5934_v50 = vpop.f32.mrf.mxu3  ;;  %v664_v3 = vadd.f32 %v9113_v11, %v663_v23 }
 0x60e   :  { %v4116_v12 = vmul.f32 %v6828_v61, %v9363_v16  ;;  %v2384_v45 = vpop.xlane.xlu0 %2383  ;;  %v4109_v19 = vsel %vm4108_vm13, %v6824_v4, %v4105_v63  ;;  %6227 = vst.msk [vmem:[%s11492_s8 + $0x170] sm:$0xff] %vm6180_vm9, %v5934_v50  ;;  %vm4121_vm15 = vweird.f32 %v6828_v61  ;;  %v1058_v16 = vpack.c.bf16 %v975_v59, %v974_v22  ;;  %v133_v22 = vld [vmem:[%s11484_s0 + $0x328] sm:$0xff] }
 0x60f   :  { %v2640_v44 = vsub.f32 %v9164_v24, %v2384_v45  ;;  %v4114_v39 = vsel %vm4111_vm14, %v4113_v5, %v4109_v19  ;;  %vm4122_vm1 = vmor %vm4120_vm0, %vm4121_vm15  ;;  %v2049_v33 = vpop.f32.mrf.mxu2  ;;  %v1357_v46 = vpop.f32.mrf.mxu1  ;;  %v1555_v58 = vmul.f32 0.01, %v1356_v27  ;;  %v848_v63 = vmul.f32 0.01, %v664_v3  ;;  %v130_v5 = vld [vmem:[%s11484_s0 + $0x310] sm:$0xff] }
 0x610   :  { %v4117_v21 = vsub.f32 1.0, %v4116_v12  ;;  %v5191_v32 = vmul.f32 %v9131_v38, %v4114_v39  ;;  %1374 = vmatmul.bf16.gmra.mxu1 %v1058_v16  ;;  %v9445_v52 = vadd.f32 %v9398_v15, %v2049_v33  ;;  %v1358_v48 = vadd.f32 %v9452_v42, %v1357_v46  ;;  %v131_v12 = vld [vmem:[%s11484_s0 + $0x318] sm:$0xff] }
 0x611   :  { %v2831_v47 = vmul.f32 1.442695, %v2640_v44  ;;  %v9412_v30 = vpop.eup %6829  ;;  %v1683_v40 = vmax.f32 %v1356_v27, %v1555_v58  ;;  %v209_v44 = vpack.c.bf16 %v131_v12, %v130_v5  ;;  %v976_v19 = vmax.f32 %v664_v3, %v848_v63 }
 0x612   :  { %v4118_v24 = vmul.f32 %v6828_v61, %v4117_v21  ;;  %5319 = vst.msk [vmem:[%s11491_s9 + $0x1b0] sm:$0xff] %vm2192_vm3, %v5191_v32  ;;  %v3147_v38 = vsel %vm2192_vm3, %v9412_v30, 0.0  ;;  %6499 = vmatmul.msk.f32.gmra.mxu3 %vm2192_vm3, %v5191_v32  ;;  %v2406_v57 = vsel %vm2192_vm3, %v9445_v52, -inf  ;;  %v1556_v55 = vmul.f32 0.01, %v1358_v48 }
 0x613   :  { %6831 = vpow2.f32 %v2831_v47  ;;  %2401 = vmax.xlane.f32.xlu0 %v2400_v36  ;;  %3148 = vadd.xlane.f32.xlu2 %v3147_v38 }
 0x614   :  { %v4119_v37 = vadd.f32 %v6828_v61, %v4118_v24  ;;  %v1684_v29 = vmax.f32 %v1358_v48, %v1556_v55  ;;  %v665_v60 = vpop.f32.mrf.mxu0  ;;  %6366 = vmatmul.msk.bf16.gmra.mxu0 %vm229_vm2, %v209_v44 }
 0x615   :  { %v5937_v4 = vpop.f32.mrf.mxu3  ;;  %v666_v45 = vadd.f32 %v9113_v11, %v665_v60 }
 0x616   :  { %v4123_v56 = vsel %vm4122_vm1, %v6828_v61, %v4119_v37  ;;  %6228 = vst.msk [vmem:[%s11492_s8 + $0x178] sm:$0xff] %vm6180_vm9, %v5937_v4  ;;  %v1771_v31 = vpack.c.bf16 %v1684_v29, %v1683_v40 }
 0x617   :  { %v4128_v51 = vsel %vm4125_vm4, %v4127_v6, %v4123_v56  ;;  %v1360_v61 = vpop.f32.mrf.mxu1  ;;  %v849_v21 = vmul.f32 0.01, %v666_v45  ;;  %v132_v6 = vld [vmem:[%s11484_s0 + $0x320] sm:$0xff]  ;;  %v2052_v60 = vpop.f32.mrf.mxu2 }
 0x618   :  { %v5192_v13 = vmul.f32 %v9152_v49, %v4128_v51  ;;  %v2403_v49 = vsel %vm2192_vm3, %v9426_v10, -inf  ;;  %2071 = vmatmul.bf16.gmra.mxu2 %v1771_v31  ;;  %v1361_v53 = vadd.f32 %v9452_v42, %v1360_v61  ;;  %v210_v51 = vpack.c.bf16 %v133_v22, %v132_v6  ;;  %v134_v31 = vld [vmem:[%s11484_s0 + $0x330] sm:$0xff]  ;;  %v135_v61 = vld [vmem:[%s11484_s0 + $0x338] sm:$0xff] }
 0x619   :  { %v9429_v28 = vpop.eup %6831  ;;  %v977_v50 = vmax.f32 %v666_v45, %v849_v21  ;;  %v211_v45 = vpack.c.bf16 %v135_v61, %v134_v31  ;;  %v9523_v61 = vadd.f32 %v9398_v15, %v2052_v60 }
 0x61a   :  { %5320 = vst.msk [vmem:[%s11491_s9 + $0x1b8] sm:$0xff] %vm2192_vm3, %v5192_v13  ;;  %v3150_v25 = vsel %vm2192_vm3, %v9429_v28, 0.0  ;;  %6500 = vmatmul.msk.f32.gmra.mxu3 %vm2192_vm3, %v5192_v13  ;;  %v1557_v32 = vmul.f32 0.01, %v1361_v53 }
 0x61b   :  { %3151 = vadd.xlane.f32.xlu1 %v3150_v25  ;;  %2404 = vmax.xlane.f32.xlu2 %v2403_v49  ;;  %v1059_v43 = vpack.c.bf16 %v977_v50, %v976_v19 }
 0x61c   :  { %v668_v47 = vpop.f32.mrf.mxu0  ;;  %v1685_v24 = vmax.f32 %v1361_v53, %v1557_v32 }
 0x61d   :  { %v669_v59 = vadd.f32 %v9113_v11, %v668_v47 }
 0x61f   :  { %v1362_v39 = vpop.f32.mrf.mxu1  ;;  %v850_v4 = vmul.f32 0.01, %v669_v59 }
 0x620   :  { %v1363_v2 = vadd.f32 %v9452_v42, %v1362_v39  ;;  %1379 = vmatmul.bf16.gmra.mxu1 %v1059_v43 }
 0x621   :  { %v978_v16 = vmax.f32 %v669_v59, %v850_v4 }
 0x622   :  { %v1558_v8 = vmul.f32 0.01, %v1363_v2 }
 0x623   :  { %2407 = vmax.xlane.f32.xlu1 %v2406_v57 }
 0x624   :  { %v1686_v26 = vmax.f32 %v1363_v2, %v1558_v8  ;;  %v670_v37 = vpop.f32.mrf.mxu0  ;;  %6367 = vmatmul.msk.bf16.gmra.mxu0 %vm229_vm2, %v210_v51 }
 0x625   :  { %v671_v56 = vadd.f32 %v9113_v11, %v670_v37 }
 0x626   :  { %v1772_v36 = vpack.c.bf16 %v1686_v26, %v1685_v24 }
 0x627   :  { %v1365_v38 = vpop.f32.mrf.mxu1  ;;  %v851_v13 = vmul.f32 0.01, %v671_v56 }
 0x628   :  { %2076 = vmatmul.bf16.gmra.mxu2 %v1772_v36  ;;  %v1366_v49 = vadd.f32 %v9452_v42, %v1365_v38 }
 0x629   :  { %v979_v25 = vmax.f32 %v671_v56, %v851_v13 }
 0x62a   :  { %v1559_v27 = vmul.f32 0.01, %v1366_v49 }
 0x62b   :  { %v1060_v57 = vpack.c.bf16 %v979_v25, %v978_v16  ;;  %v9501_v25 = vpop.f32.mrf.mxu2 }
 0x62c   :  { %v673_v46 = vpop.f32.mrf.mxu0  ;;  %v1687_v55 = vmax.f32 %v1366_v49, %v1559_v27 }
 0x62d   :  { %v674_v5 = vadd.f32 %v9113_v11, %v673_v46 }
 0x62f   :  { %v1367_v33 = vpop.f32.mrf.mxu1  ;;  %v852_v39 = vmul.f32 0.01, %v674_v5 }
 0x630   :  { %v1368_v7 = vadd.f32 %v9452_v42, %v1367_v33  ;;  %1384 = vmatmul.bf16.gmra.mxu1 %v1060_v57 }
 0x631   :  { %v980_v47 = vmax.f32 %v674_v5, %v852_v39 }
 0x632   :  { %v1560_v48 = vmul.f32 0.01, %v1368_v7 }
 0x634   :  { %v1688_v23 = vmax.f32 %v1368_v7, %v1560_v48  ;;  %v675_v3 = vpop.f32.mrf.mxu0  ;;  %6368 = vmatmul.msk.bf16.gmra.mxu0 %vm229_vm2, %v211_v45 }
 0x635   :  { %v676_v12 = vadd.f32 %v9113_v11, %v675_v3 }
 0x636   :  { %v1773_v40 = vpack.c.bf16 %v1688_v23, %v1687_v55 }
 0x637   :  { %v1370_v29 = vpop.f32.mrf.mxu1  ;;  %v853_v53 = vmul.f32 0.01, %v676_v12 }
 0x638   :  { %2081 = vmatmul.bf16.gmra.mxu2 %v1773_v40  ;;  %v1371_v26 = vadd.f32 %v9452_v42, %v1370_v29 }
 0x639   :  { %v981_v32 = vmax.f32 %v676_v12, %v853_v53 }
 0x63a   :  { %v1561_v22 = vmul.f32 0.01, %v1371_v26 }
 0x63b   :  { %v1061_v36 = vpack.c.bf16 %v981_v32, %v980_v47 }
 0x640   :  { %1389 = vmatmul.bf16.gmra.mxu1 %v1061_v36 }
 0x656   :  { %v3131_v58 = vpop.xlane.xlu2 %3130 }
 0x657   :  { %6833 = vrcp.f32 %v3131_v58  ;;  %v4140_v11 = vand.u32 2147483648, %v3131_v58  ;;  %v4138_v24 = vand.u32 2147483647, %v3131_v58  ;;  %vm4134_vm6 = vweird.f32 %v3131_v58 }
 0x659   :  { %v4141_v56 = vor.u32 1.1754944e-38, %v4140_v11  ;;  %vm4139_vm8 = vcmp.eq.f32.partialorder %v4138_v24, 8.507059e+37 }
 0x65d   :  { %v6834_v63 = vpop.eup %6833 }
 0x65e   :  { %v4130_v44 = vmul.f32 %v6834_v63, %v3131_v58  ;;  %v2387_v19 = vpop.xlane.xlu2 %2386  ;;  %v9487_v50 = vpop.xlane.xlu1 %3133  ;;  %vm4135_vm5 = vweird.f32 %v6834_v63  ;;  %v1689_v58 = vmax.f32 %v1371_v26, %v1561_v22 }
 0x65f   :  { %v2641_v21 = vsub.f32 %v9237_v41, %v2387_v19  ;;  %6835 = vrcp.f32 %v9487_v50  ;;  %v1372_v41 = vpop.f32.mrf.mxu1  ;;  %vm9493_vm7 = vmor %vm4134_vm6, %vm4135_vm5  ;;  %v4154_v3 = vand.u32 2147483648, %v9487_v50  ;;  %vm4148_vm11 = vweird.f32 %v9487_v50 }
 0x660   :  { %v4131_v2 = vsub.f32 1.0, %v4130_v44  ;;  %v1373_v37 = vadd.f32 %v9452_v42, %v1372_v41 }
 0x661   :  { %v2833_v43 = vmul.f32 1.442695, %v2641_v21  ;;  %v4155_v44 = vor.u32 1.1754944e-38, %v4154_v3 }
 0x662   :  { %v4132_v8 = vmul.f32 %v6834_v63, %v4131_v2  ;;  %v1562_v16 = vmul.f32 0.01, %v1373_v37 }
 0x663   :  { %6837 = vpow2.f32 %v2833_v43 }
 0x664   :  { %v4133_v38 = vadd.f32 %v6834_v63, %v4132_v8  ;;  %v1690_v55 = vmax.f32 %v1373_v37, %v1562_v16  ;;  %v9558_v37 = vadd.f32 %v9398_v15, %v9501_v25 }
 0x665   :  { %v6836_v59 = vpop.eup %6835  ;;  %v5940_v51 = vpop.f32.mrf.mxu3 }
 0x666   :  { %v9497_v4 = vpop.xlane.xlu0 %3136  ;;  %v4137_v13 = vsel %vm9493_vm7, %v6834_v63, %v4133_v38  ;;  %v4144_v33 = vmul.f32 %v6836_v59, %v9487_v50  ;;  %6229 = vst.msk [vmem:[%s11492_s8 + $0x180] sm:$0xff] %vm6180_vm9, %v5940_v51  ;;  %v2390_v49 = vpop.xlane.xlu1 %2389  ;;  %vm4149_vm10 = vweird.f32 %v6836_v59 }
 0x667   :  { %6839 = vrcp.f32 %v9497_v4  ;;  %v2642_v7 = vsub.f32 %v9272_v0, %v2390_v49  ;;  %v4142_v57 = vsel %vm4139_vm8, %v4141_v56, %v4137_v13  ;;  %v1774_v0 = vpack.c.bf16 %v1690_v55, %v1689_v58  ;;  %vm9526_vm12 = vmor %vm4148_vm11, %vm4149_vm10 }
 0x668   :  { %v4145_v27 = vsub.f32 1.0, %v4144_v33  ;;  %v5193_v48 = vmul.f32 %v9224_v20, %v4142_v57  ;;  %v4152_v20 = vand.u32 2147483647, %v9487_v50  ;;  %v2057_v50 = vpop.f32.mrf.mxu2  ;;  %v4168_v2 = vand.u32 2147483648, %v9497_v4 }
 0x669   :  { %v9510_v46 = vpop.eup %6837  ;;  %v2835_v23 = vmul.f32 1.442695, %v2642_v7  ;;  %2086 = vmatmul.bf16.gmra.mxu2 %v1774_v0  ;;  %v4166_v11 = vand.u32 2147483647, %v9497_v4  ;;  %vm4162_vm15 = vweird.f32 %v9497_v4  ;;  %v9584_v58 = vadd.f32 %v9398_v15, %v2057_v50 }
 0x66a   :  { %v3153_v40 = vsel %vm2192_vm3, %v9510_v46, 0.0  ;;  %v4146_v29 = vmul.f32 %v6836_v59, %v4145_v27  ;;  %5321 = vst.msk [vmem:[%s11491_s9 + $0x1c0] sm:$0xff] %vm2192_vm3, %v5193_v48  ;;  %6501 = vmatmul.msk.f32.gmra.mxu3 %vm2192_vm3, %v5193_v48  ;;  %vm4153_vm13 = vcmp.eq.f32.partialorder %v4152_v20, 8.507059e+37  ;;  %v4169_v36 = vor.u32 1.1754944e-38, %v4168_v2 }
 0x66b   :  { %3154 = vadd.xlane.f32.xlu0 %v3153_v40  ;;  %6841 = vpow2.f32 %v2835_v23  ;;  %vm4167_vm1 = vcmp.eq.f32.partialorder %v4166_v11, 8.507059e+37 }
 0x66c   :  { %v4147_v63 = vadd.f32 %v6836_v59, %v4146_v29 }
 0x66d   :  { %v6840_v31 = vpop.eup %6839  ;;  %v5943_v19 = vpop.f32.mrf.mxu3 }
 0x66e   :  { %v4158_v12 = vmul.f32 %v6840_v31, %v9497_v4  ;;  %v2393_v45 = vpop.xlane.xlu0 %2392  ;;  %v9531_v21 = vpop.xlane.xlu2 %3139  ;;  %v4151_v60 = vsel %vm9526_vm12, %v6836_v59, %v4147_v63  ;;  %6230 = vst.msk [vmem:[%s11492_s8 + $0x188] sm:$0xff] %vm6180_vm9, %v5943_v19  ;;  %vm4163_vm14 = vweird.f32 %v6840_v31 }
 0x66f   :  { %v2643_v39 = vsub.f32 %v9298_v14, %v2393_v45  ;;  %6843 = vrcp.f32 %v9531_v21  ;;  %v4156_v47 = vsel %vm4153_vm13, %v4155_v44, %v4151_v60  ;;  %v2409_v14 = vsel %vm2192_vm3, %v9523_v61, -inf  ;;  %vm4164_vm0 = vmor %vm4162_vm15, %vm4163_vm14 }
 0x670   :  { %v4159_v53 = vsub.f32 1.0, %v4158_v12  ;;  %v5194_v24 = vmul.f32 %v9258_v34, %v4156_v47  ;;  %v2059_v7 = vpop.f32.mrf.mxu2  ;;  %v4182_v57 = vand.u32 2147483648, %v9531_v21  ;;  %v4180_v27 = vand.u32 2147483647, %v9531_v21 }
 0x671   :  { %v2837_v43 = vmul.f32 1.442695, %v2643_v39  ;;  %v9544_v32 = vpop.eup %6841  ;;  %vm4176_vm5 = vweird.f32 %v9531_v21  ;;  %v2415_v44 = vsel %vm2192_vm3, %v9584_v58, -inf  ;;  %v9612_v47 = vadd.f32 %v9398_v15, %v2059_v7 }
 0x672   :  { %v4160_v8 = vmul.f32 %v6840_v31, %v4159_v53  ;;  %v3156_v26 = vsel %vm2192_vm3, %v9544_v32, 0.0  ;;  %5322 = vst.msk [vmem:[%s11491_s9 + $0x1c8] sm:$0xff] %vm2192_vm3, %v5194_v24  ;;  %6502 = vmatmul.msk.f32.gmra.mxu3 %vm2192_vm3, %v5194_v24  ;;  %v4183_v40 = vor.u32 1.1754944e-38, %v4182_v57  ;;  %vm4181_vm7 = vcmp.eq.f32.partialorder %v4180_v27, 8.507059e+37 }
 0x673   :  { %6845 = vpow2.f32 %v2837_v43  ;;  %2410 = vmax.xlane.f32.xlu0 %v2409_v14  ;;  %3157 = vadd.xlane.f32.xlu2 %v3156_v26 }
 0x674   :  { %v4161_v41 = vadd.f32 %v6840_v31, %v4160_v8 }
 0x675   :  { %v6844_v38 = vpop.eup %6843  ;;  %v5946_v22 = vpop.f32.mrf.mxu3 }
 0x676   :  { %v4165_v34 = vsel %vm4164_vm0, %v6840_v31, %v4161_v41  ;;  %v4172_v6 = vmul.f32 %v6844_v38, %v9531_v21  ;;  %v2396_v59 = vpop.xlane.xlu2 %2395  ;;  %6231 = vst.msk [vmem:[%s11492_s8 + $0x190] sm:$0xff] %vm6180_vm9, %v5946_v22  ;;  %v9566_v4 = vpop.xlane.xlu1 %3142  ;;  %vm4177_vm4 = vweird.f32 %v6844_v38 }
 0x677   :  { %v4170_v56 = vsel %vm4167_vm1, %v4169_v36, %v4165_v34  ;;  %v2644_v51 = vsub.f32 %v9326_v62, %v2396_v59  ;;  %6847 = vrcp.f32 %v9566_v4  ;;  %vm4178_vm6 = vmor %vm4176_vm5, %vm4177_vm4  ;;  %v4196_v60 = vand.u32 2147483648, %v9566_v4 }
 0x678   :  { %v5195_v13 = vmul.f32 %v9283_v9, %v4170_v56  ;;  %v4173_v25 = vsub.f32 1.0, %v4172_v6  ;;  %v2412_v9 = vsel %vm2192_vm3, %v9558_v37, -inf  ;;  %v4194_v53 = vand.u32 2147483647, %v9566_v4 }
 0x679   :  { %v9569_v16 = vpop.eup %6845  ;;  %v2839_v33 = vmul.f32 1.442695, %v2644_v51  ;;  %vm4190_vm10 = vweird.f32 %v9566_v4  ;;  %v4197_v11 = vor.u32 1.1754944e-38, %v4196_v60  ;;  %v2418_v56 = vsel %vm2192_vm3, %v9612_v47, -inf }
 0x67a   :  { %5323 = vst.msk [vmem:[%s11491_s9 + $0x1d0] sm:$0xff] %vm2192_vm3, %v5195_v13  ;;  %v3159_v49 = vsel %vm2192_vm3, %v9569_v16, 0.0  ;;  %v4174_v62 = vmul.f32 %v6844_v38, %v4173_v25  ;;  %6503 = vmatmul.msk.f32.gmra.mxu3 %vm2192_vm3, %v5195_v13  ;;  %vm4195_vm12 = vcmp.eq.f32.partialorder %v4194_v53, 8.507059e+37  ;;  %v137_v13 = vld [vmem:[%s11484_s0 + $0x348] sm:$0xff] }
 0x67b   :  { %3160 = vadd.xlane.f32.xlu1 %v3159_v49  ;;  %6849 = vpow2.f32 %v2839_v33  ;;  %2413 = vmax.xlane.f32.xlu2 %v2412_v9 }
 0x67c   :  { %v4175_v48 = vadd.f32 %v6844_v38, %v4174_v62 }
 0x67d   :  { %v6848_v23 = vpop.eup %6847  ;;  %v5949_v29 = vpop.f32.mrf.mxu3 }
 0x67e   :  { %v9587_v55 = vpop.xlane.xlu0 %3145  ;;  %v4186_v3 = vmul.f32 %v6848_v23, %v9566_v4  ;;  %6232 = vst.msk [vmem:[%s11492_s8 + $0x198] sm:$0xff] %vm6180_vm9, %v5949_v29  ;;  %v2399_v0 = vpop.xlane.xlu1 %2398  ;;  %v4179_v20 = vsel %vm4178_vm6, %v6844_v38, %v4175_v48  ;;  %vm4191_vm8 = vweird.f32 %v6848_v23  ;;  %v136_v4 = vld [vmem:[%s11484_s0 + $0x340] sm:$0xff] }
 0x67f   :  { %6851 = vrcp.f32 %v9587_v55  ;;  %v2645_v31 = vsub.f32 %v9371_v17, %v2399_v0  ;;  %v4184_v63 = vsel %vm4181_vm7, %v4183_v40, %v4179_v20  ;;  %v2062_v17 = vpop.f32.mrf.mxu2  ;;  %vm4192_vm11 = vmor %vm4190_vm10, %vm4191_vm8  ;;  %v4210_v34 = vand.u32 2147483648, %v9587_v55  ;;  %v678_v51 = vpop.f32.mrf.mxu0 }
 0x680   :  { %v4187_v12 = vsub.f32 1.0, %v4186_v3  ;;  %v5196_v45 = vmul.f32 %v9310_v35, %v4184_v63  ;;  %v4208_v22 = vand.u32 2147483647, %v9587_v55  ;;  %vm4204_vm14 = vweird.f32 %v9587_v55 }
 0x681   :  { %v9596_v5 = vpop.eup %6849  ;;  %v2841_v19 = vmul.f32 1.442695, %v2645_v31  ;;  %v4211_v62 = vor.u32 1.1754944e-38, %v4210_v34 }
 0x682   :  { %v3162_v21 = vsel %vm2192_vm3, %v9596_v5, 0.0  ;;  %v4188_v39 = vmul.f32 %v6848_v23, %v4187_v12  ;;  %5324 = vst.msk [vmem:[%s11491_s9 + $0x1d8] sm:$0xff] %vm2192_vm3, %v5196_v45  ;;  %6504 = vmatmul.msk.f32.gmra.mxu3 %vm2192_vm3, %v5196_v45  ;;  %vm4209_vm0 = vcmp.eq.f32.partialorder %v4208_v22, 8.507059e+37 }
 0x683   :  { %2416 = vmax.xlane.f32.xlu1 %v2415_v44  ;;  %3163 = vadd.xlane.f32.xlu0 %v3162_v21  ;;  %6853 = vpow2.f32 %v2841_v19  ;;  %v9680_v21 = vld [vmem:[%s11485_s3] ss:$0 sm:$0xff] }
 0x684   :  { %v4189_v50 = vadd.f32 %v6848_v23, %v4188_v39  ;;  %v679_v39 = vadd.f32 %v9680_v21, %v678_v51 }
 0x685   :  { %v6852_v35 = vpop.eup %6851  ;;  %v5952_v26 = vpop.f32.mrf.mxu3 }
 0x686   :  { %v4200_v2 = vmul.f32 %v6852_v35, %v9587_v55  ;;  %v2402_v43 = vpop.xlane.xlu0 %2401  ;;  %v9615_v14 = vpop.xlane.xlu2 %3148  ;;  %6233 = vst.msk [vmem:[%s11492_s8 + $0x1a0] sm:$0xff] %vm6180_vm9, %v5952_v26  ;;  %v4193_v36 = vsel %vm4192_vm11, %v6848_v23, %v4189_v50  ;;  %vm4205_vm13 = vweird.f32 %v6852_v35  ;;  %v9657_v23 = vadd.f32 %v9398_v15, %v2062_v17 }
 0x687   :  { %v2646_v8 = vsub.f32 %v9401_v1, %v2402_v43  ;;  %6855 = vrcp.f32 %v9615_v14  ;;  %v4198_v6 = vsel %vm4195_vm12, %v4197_v11, %v4193_v36  ;;  %vm9640_vm15 = vmor %vm4204_vm14, %vm4205_vm13  ;;  %v2064_v27 = vpop.f32.mrf.mxu2  ;;  %v4224_v63 = vand.u32 2147483648, %v9615_v14  ;;  %v680_v19 = vpop.f32.mrf.mxu0 }
 0x688   :  { %v4201_v24 = vsub.f32 1.0, %v4200_v2  ;;  %v5197_v59 = vmul.f32 %v9338_v18, %v4198_v6  ;;  %v212_v18 = vpack.c.bf16 %v137_v13, %v136_v4  ;;  %vm4218_vm4 = vweird.f32 %v9615_v14 }
 0x689   :  { %v2843_v41 = vmul.f32 1.442695, %v2646_v8  ;;  %v9624_v1 = vpop.eup %6853  ;;  %v681_v17 = vadd.f32 %v9680_v21, %v680_v19  ;;  %v9687_v53 = vadd.f32 %v9398_v15, %v2064_v27  ;;  %v4225_v50 = vor.u32 1.1754944e-38, %v4224_v63 }
 0x68a   :  { %v4202_v38 = vmul.f32 %v6852_v35, %v4201_v24  ;;  %v3165_v33 = vsel %vm2192_vm3, %v9624_v1, 0.0  ;;  %5325 = vst.msk [vmem:[%s11491_s9 + $0x1e0] sm:$0xff] %vm2192_vm3, %v5197_v59  ;;  %6505 = vmatmul.msk.f32.gmra.mxu3 %vm2192_vm3, %v5197_v59  ;;  %6369 = vmatmul.msk.bf16.gmra.mxu0 %vm229_vm2, %v212_v18 }
 0x68b   :  { %6857 = vpow2.f32 %v2843_v41  ;;  %2419 = vmax.xlane.f32.xlu0 %v2418_v56  ;;  %3166 = vadd.xlane.f32.xlu2 %v3165_v33  ;;  %v854_v41 = vmul.f32 0.01, %v679_v39  ;;  %v855_v22 = vmul.f32 0.01, %v681_v17  ;;  %v2424_v51 = vsel %vm2192_vm3, %v9687_v53, -inf }
 0x68c   :  { %v4203_v25 = vadd.f32 %v6852_v35, %v4202_v38 }
 0x68d   :  { %v6856_v7 = vpop.eup %6855  ;;  %v5955_v40 = vpop.f32.mrf.mxu3  ;;  %v983_v33 = vmax.f32 %v681_v17, %v855_v22  ;;  %v138_v17 = vld [vmem:[%s11484_s0 + $0x350] sm:$0xff] }
 0x68e   :  { %v9649_v57 = vpop.xlane.xlu1 %3151  ;;  %v4207_v9 = vsel %vm9640_vm15, %v6852_v35, %v4203_v25  ;;  %v4214_v48 = vmul.f32 %v6856_v7, %v9615_v14  ;;  %v2405_v55 = vpop.xlane.xlu2 %2404  ;;  %6234 = vst.msk [vmem:[%s11492_s8 + $0x1a8] sm:$0xff] %vm6180_vm9, %v5955_v40  ;;  %vm4219_vm1 = vweird.f32 %v6856_v7  ;;  %v982_v25 = vmax.f32 %v679_v39, %v854_v41 }
 0x68f   :  { %6859 = vrcp.f32 %v9649_v57  ;;  %v2647_v29 = vsub.f32 %v9426_v10, %v2405_v55  ;;  %v4212_v3 = vsel %vm4209_vm0, %v4211_v62, %v4207_v9  ;;  %v4222_v10 = vand.u32 2147483647, %v9615_v14  ;;  %vm4220_vm5 = vmor %vm4218_vm4, %vm4219_vm1  ;;  %v2067_v36 = vpop.f32.mrf.mxu2 }
 0x690   :  { %v4215_v20 = vsub.f32 1.0, %v4214_v48  ;;  %v5198_v31 = vmul.f32 %v9374_v54, %v4212_v3  ;;  %v2421_v54 = vsel %vm2192_vm3, %v9657_v23, -inf  ;;  %v4238_v38 = vand.u32 2147483648, %v9649_v57 }
 0x691   :  { %v9660_v0 = vpop.eup %6857  ;;  %v2845_v12 = vmul.f32 1.442695, %v2647_v29  ;;  %vm4223_vm6 = vcmp.eq.f32.partialorder %v4222_v10, 8.507059e+37  ;;  %v4236_v56 = vand.u32 2147483647, %v9649_v57  ;;  %vm4232_vm8 = vweird.f32 %v9649_v57  ;;  %v1375_v29 = vpop.f32.mrf.mxu1 }
 0x692   :  { %v3168_v45 = vsel %vm2192_vm3, %v9660_v0, 0.0  ;;  %v4216_v44 = vmul.f32 %v6856_v7, %v4215_v20  ;;  %5326 = vst.msk [vmem:[%s11491_s9 + $0x1e8] sm:$0xff] %vm2192_vm3, %v5198_v31  ;;  %6506 = vmatmul.msk.f32.gmra.mxu3 %vm2192_vm3, %v5198_v31  ;;  %v4239_v13 = vor.u32 1.1754944e-38, %v4238_v38  ;;  %v9712_v49 = vadd.f32 %v9398_v15, %v2067_v36 }
 0x693   :  { %3169 = vadd.xlane.f32.xlu1 %v3168_v45  ;;  %6861 = vpow2.f32 %v2845_v12  ;;  %2422 = vmax.xlane.f32.xlu2 %v2421_v54  ;;  %vm4237_vm11 = vcmp.eq.f32.partialorder %v4236_v56, 8.507059e+37  ;;  %v1376_v31 = vadd.f32 %v9452_v42, %v1375_v29 }
 0x694   :  { %v4217_v35 = vadd.f32 %v6856_v7, %v4216_v44  ;;  %v683_v44 = vpop.f32.mrf.mxu0 }
 0x695   :  { %v6860_v60 = vpop.eup %6859  ;;  %v5958_v14 = vpop.f32.mrf.mxu3  ;;  %v1563_v12 = vmul.f32 0.01, %v1376_v31  ;;  %v684_v54 = vadd.f32 %v9680_v21, %v683_v44 }
 0x696   :  { %v4228_v2 = vmul.f32 %v6860_v60, %v9649_v57  ;;  %v2408_v43 = vpop.xlane.xlu1 %2407  ;;  %v4221_v11 = vsel %vm4220_vm5, %v6856_v7, %v4217_v35  ;;  %6235 = vst.msk [vmem:[%s11492_s8 + $0x1b0] sm:$0xff] %vm6180_vm9, %v5958_v14  ;;  %vm4233_vm7 = vweird.f32 %v6860_v60  ;;  %v1062_v57 = vpack.c.bf16 %v983_v33, %v982_v25 }
 0x697   :  { %v2648_v8 = vsub.f32 %v9445_v52, %v2408_v43  ;;  %v4226_v26 = vsel %vm4223_vm6, %v4225_v50, %v4221_v11  ;;  %vm4234_vm10 = vmor %vm4232_vm8, %vm4233_vm7  ;;  %v2069_v55 = vpop.f32.mrf.mxu2  ;;  %v1691_v10 = vmax.f32 %v1376_v31, %v1563_v12  ;;  %v139_v50 = vld [vmem:[%s11484_s0 + $0x358] sm:$0xff] }
 0x698   :  { %v4229_v24 = vsub.f32 1.0, %v4228_v2  ;;  %v5199_v6 = vmul.f32 %v9412_v30, %v4226_v26  ;;  %1394 = vmatmul.bf16.gmra.mxu1 %v1062_v57  ;;  %v9731_v40 = vadd.f32 %v9398_v15, %v2069_v55  ;;  %v213_v43 = vpack.c.bf16 %v139_v50, %v138_v17 }
 0x699   :  { %v2847_v34 = vmul.f32 1.442695, %v2648_v8  ;;  %v9698_v59 = vpop.eup %6861  ;;  %v1377_v20 = vpop.f32.mrf.mxu1 }
 0x69a   :  { %v4230_v52 = vmul.f32 %v6860_v60, %v4229_v24  ;;  %5327 = vst.msk [vmem:[%s11491_s9 + $0x1f0] sm:$0xff] %vm2192_vm3, %v5199_v6  ;;  %v3171_v4 = vsel %vm2192_vm3, %v9698_v59, 0.0  ;;  %6507 = vmatmul.msk.f32.gmra.mxu3 %vm2192_vm3, %v5199_v6  ;;  %v2430_v3 = vsel %vm2192_vm3, %v9731_v40, -inf  ;;  %v1378_v63 = vadd.f32 %v9452_v42, %v1377_v20  ;;  %6370 = vmatmul.msk.bf16.gmra.mxu0 %vm229_vm2, %v213_v43 }
 0x69b   :  { %6863 = vpow2.f32 %v2847_v34  ;;  %2425 = vmax.xlane.f32.xlu1 %v2424_v51  ;;  %3172 = vadd.xlane.f32.xlu0 %v3171_v4 }
 0x69c   :  { %v4231_v30 = vadd.f32 %v6860_v60, %v4230_v52  ;;  %v1564_v45 = vmul.f32 0.01, %v1378_v63  ;;  %v685_v35 = vpop.f32.mrf.mxu0 }
 0x69d   :  { %v5961_v62 = vpop.f32.mrf.mxu3  ;;  %v686_v2 = vadd.f32 %v9680_v21, %v685_v35 }
 0x69e   :  { %v4235_v18 = vsel %vm4234_vm10, %v6860_v60, %v4231_v30  ;;  %6236 = vst.msk [vmem:[%s11492_s8 + $0x1b8] sm:$0xff] %vm6180_vm9, %v5961_v62  ;;  %v1692_v19 = vmax.f32 %v1378_v63, %v1564_v45  ;;  %v856_v60 = vmul.f32 0.01, %v684_v54  ;;  %v140_v30 = vld [vmem:[%s11484_s0 + $0x360] sm:$0xff] }
 0x69f   :  { %v4240_v7 = vsel %vm4237_vm11, %v4239_v13, %v4235_v18  ;;  %v857_v11 = vmul.f32 0.01, %v686_v2  ;;  %v141_v13 = vld [vmem:[%s11484_s0 + $0x368] sm:$0xff] }
 0x6a0   :  { %v5200_v9 = vmul.f32 %v9429_v28, %v4240_v7  ;;  %v2427_v28 = vsel %vm2192_vm3, %v9712_v49, -inf  ;;  %v1775_v39 = vpack.c.bf16 %v1692_v19, %v1691_v10  ;;  %v984_v8 = vmax.f32 %v684_v54, %v856_v60  ;;  %v142_v54 = vld [vmem:[%s11484_s0 + $0x370] sm:$0xff]  ;;  %v2072_v60 = vpop.f32.mrf.mxu2 }
 0x6a1   :  { %v9715_v27 = vpop.eup %6863  ;;  %v1380_v15 = vpop.f32.mrf.mxu1  ;;  %v985_v24 = vmax.f32 %v686_v2, %v857_v11  ;;  %v214_v18 = vpack.c.bf16 %v141_v13, %v140_v30 }
 0x6a2   :  { %5328 = vst.msk [vmem:[%s11491_s9 + $0x1f8] sm:$0xff] %vm2192_vm3, %v5200_v9  ;;  %v3174_v48 = vsel %vm2192_vm3, %v9715_v27, 0.0  ;;  %6508 = vmatmul.msk.f32.gmra.mxu3 %vm2192_vm3, %v5200_v9  ;;  %2091 = vmatmul.bf16.gmra.mxu2 %v1775_v39  ;;  %v1381_v26 = vadd.f32 %v9452_v42, %v1380_v15  ;;  %v143_v39 = vld [vmem:[%s11484_s0 + $0x378] sm:$0xff] }
 0x6a3   :  { %3175 = vadd.xlane.f32.xlu2 %v3174_v48  ;;  %2428 = vmax.xlane.f32.xlu0 %v2427_v28  ;;  %v1063_v36 = vpack.c.bf16 %v985_v24, %v984_v8  ;;  %v215_v50 = vpack.c.bf16 %v143_v39, %v142_v54  ;;  %v9806_v54 = vld [vmem:[%s11489_s7] ss:$0 sm:$0xff] }
 0x6a4   :  { %v688_v38 = vpop.f32.mrf.mxu0  ;;  %v1565_v34 = vmul.f32 0.01, %v1381_v26  ;;  %v9809_v39 = vadd.f32 %v9806_v54, %v2072_v60 }
 0x6a5   :  { %v689_v25 = vadd.f32 %v9680_v21, %v688_v38 }
 0x6a6   :  { %v1693_v22 = vmax.f32 %v1381_v26, %v1565_v34 }
 0x6a7   :  { %v858_v7 = vmul.f32 0.01, %v689_v25 }
 0x6a8   :  { %1399 = vmatmul.bf16.gmra.mxu1 %v1063_v36 }
 0x6a9   :  { %v1382_v14 = vpop.f32.mrf.mxu1  ;;  %v986_v9 = vmax.f32 %v689_v25, %v858_v7 }
 0x6aa   :  { %v1383_v41 = vadd.f32 %v9452_v42, %v1382_v14  ;;  %6371 = vmatmul.msk.bf16.gmra.mxu0 %vm229_vm2, %v214_v18 }
 0x6ab   :  { %2431 = vmax.xlane.f32.xlu2 %v2430_v3 }
 0x6ac   :  { %v1566_v6 = vmul.f32 0.01, %v1383_v41  ;;  %v690_v4 = vpop.f32.mrf.mxu0 }
 0x6ad   :  { %v691_v33 = vadd.f32 %v9680_v21, %v690_v4 }
 0x6ae   :  { %v1694_v52 = vmax.f32 %v1383_v41, %v1566_v6 }
 0x6af   :  { %v859_v62 = vmul.f32 0.01, %v691_v33 }
 0x6b0   :  { %v1776_v56 = vpack.c.bf16 %v1694_v52, %v1693_v22 }
 0x6b1   :  { %v1385_v51 = vpop.f32.mrf.mxu1  ;;  %v987_v57 = vmax.f32 %v691_v33, %v859_v62 }
 0x6b2   :  { %2096 = vmatmul.bf16.gmra.mxu2 %v1776_v56  ;;  %v1386_v55 = vadd.f32 %v9452_v42, %v1385_v51 }
 0x6b3   :  { %v1064_v29 = vpack.c.bf16 %v987_v57, %v986_v9 }
 0x6b4   :  { %v693_v3 = vpop.f32.mrf.mxu0  ;;  %v1567_v20 = vmul.f32 0.01, %v1386_v55 }
 0x6b5   :  { %v694_v35 = vadd.f32 %v9680_v21, %v693_v3 }
 0x6b6   :  { %v1695_v12 = vmax.f32 %v1386_v55, %v1567_v20 }
 0x6b7   :  { %v860_v24 = vmul.f32 0.01, %v694_v35 }
 0x6b8   :  { %1404 = vmatmul.bf16.gmra.mxu1 %v1064_v29 }
 0x6b9   :  { %v1387_v48 = vpop.f32.mrf.mxu1  ;;  %v988_v36 = vmax.f32 %v694_v35, %v860_v24 }
 0x6ba   :  { %v1388_v28 = vadd.f32 %v9452_v42, %v1387_v48  ;;  %6372 = vmatmul.msk.bf16.gmra.mxu0 %vm229_vm2, %v215_v50 }
 0x6bc   :  { %v1568_v31 = vmul.f32 0.01, %v1388_v28  ;;  %v695_v19 = vpop.f32.mrf.mxu0 }
 0x6bd   :  { %v696_v17 = vadd.f32 %v9680_v21, %v695_v19 }
 0x6be   :  { %v1696_v45 = vmax.f32 %v1388_v28, %v1568_v31 }
 0x6bf   :  { %v861_v14 = vmul.f32 0.01, %v696_v17 }
 0x6c0   :  { %v1777_v10 = vpack.c.bf16 %v1696_v45, %v1695_v12 }
 0x6c1   :  { %v1390_v44 = vpop.f32.mrf.mxu1  ;;  %v989_v38 = vmax.f32 %v696_v17, %v861_v14 }
 0x6c2   :  { %2101 = vmatmul.bf16.gmra.mxu2 %v1777_v10  ;;  %v1391_v56 = vadd.f32 %v9452_v42, %v1390_v44 }
 0x6c3   :  { %v1065_v4 = vpack.c.bf16 %v989_v38, %v988_v36 }
 0x6c4   :  { %v1569_v13 = vmul.f32 0.01, %v1391_v56 }
 0x6c6   :  { %v1697_v31 = vmax.f32 %v1391_v56, %v1569_v13 }
 0x6c8   :  { %1409 = vmatmul.bf16.gmra.mxu1 %v1065_v4 }
 0x6c9   :  { %v1392_v22 = vpop.f32.mrf.mxu1 }
 0x6de   :  { %v3155_v63 = vpop.xlane.xlu0 %3154 }
 0x6df   :  { %6865 = vrcp.f32 %v3155_v63  ;;  %v4252_v6 = vand.u32 2147483648, %v3155_v63  ;;  %v4250_v52 = vand.u32 2147483647, %v3155_v63  ;;  %vm4246_vm13 = vweird.f32 %v3155_v63 }
 0x6e1   :  { %v4253_v18 = vor.u32 1.1754944e-38, %v4252_v6  ;;  %vm4251_vm15 = vcmp.eq.f32.partialorder %v4250_v52, 8.507059e+37 }
 0x6e5   :  { %v6866_v15 = vpop.eup %6865 }
 0x6e6   :  { %v4242_v2 = vmul.f32 %v6866_v15, %v3155_v63  ;;  %v2411_v43 = vpop.xlane.xlu0 %2410  ;;  %v9767_v8 = vpop.xlane.xlu2 %3157  ;;  %vm4247_vm12 = vweird.f32 %v6866_v15 }
 0x6e7   :  { %v2649_v11 = vsub.f32 %v9523_v61, %v2411_v43  ;;  %6867 = vrcp.f32 %v9767_v8  ;;  %v1393_v61 = vadd.f32 %v9452_v42, %v1392_v22  ;;  %vm9774_vm14 = vmor %vm4246_vm13, %vm4247_vm12  ;;  %v9782_v42 = vpop.f32.mrf.mxu2  ;;  %v4266_v10 = vand.u32 2147483648, %v9767_v8 }
 0x6e8   :  { %v4243_v26 = vsub.f32 1.0, %v4242_v2  ;;  %vm4260_vm1 = vweird.f32 %v9767_v8  ;;  %v9844_v4 = vadd.f32 %v9806_v54, %v9782_v42 }
 0x6e9   :  { %v2849_v41 = vmul.f32 1.442695, %v2649_v11  ;;  %v1570_v25 = vmul.f32 0.01, %v1393_v61  ;;  %v4267_v2 = vor.u32 1.1754944e-38, %v4266_v10 }
 0x6ea   :  { %v4244_v34 = vmul.f32 %v6866_v15, %v4243_v26 }
 0x6eb   :  { %6869 = vpow2.f32 %v2849_v41  ;;  %v1698_v63 = vmax.f32 %v1393_v61, %v1570_v25 }
 0x6ec   :  { %v4245_v51 = vadd.f32 %v6866_v15, %v4244_v34 }
 0x6ed   :  { %v6868_v33 = vpop.eup %6867  ;;  %v5964_v7 = vpop.f32.mrf.mxu3 }
 0x6ee   :  { %v9778_v62 = vpop.xlane.xlu1 %3160  ;;  %v4249_v9 = vsel %vm9774_vm14, %v6866_v15, %v4245_v51  ;;  %v4256_v57 = vmul.f32 %v6868_v33, %v9767_v8  ;;  %6237 = vst.msk [vmem:[%s11492_s8 + $0x1c0] sm:$0xff] %vm6180_vm9, %v5964_v7  ;;  %v2414_v48 = vpop.xlane.xlu2 %2413  ;;  %vm4261_vm0 = vweird.f32 %v6868_v33 }
 0x6ef   :  { %6871 = vrcp.f32 %v9778_v62  ;;  %v2650_v55 = vsub.f32 %v9558_v37, %v2414_v48  ;;  %v4254_v28 = vsel %vm4251_vm15, %v4253_v18, %v4249_v9  ;;  %v1778_v37 = vpack.c.bf16 %v1698_v63, %v1697_v31  ;;  %vm9812_vm4 = vmor %vm4260_vm1, %vm4261_vm0 }
 0x6f0   :  { %v4257_v3 = vsub.f32 1.0, %v4256_v57  ;;  %v5201_v20 = vmul.f32 %v9510_v46, %v4254_v28  ;;  %v4264_v46 = vand.u32 2147483647, %v9767_v8  ;;  %v2077_v8 = vpop.f32.mrf.mxu2  ;;  %v4280_v26 = vand.u32 2147483648, %v9778_v62 }
 0x6f1   :  { %v9791_v29 = vpop.eup %6869  ;;  %v2851_v12 = vmul.f32 1.442695, %v2650_v55  ;;  %2106 = vmatmul.bf16.gmra.mxu2 %v1778_v37  ;;  %v4278_v6 = vand.u32 2147483647, %v9778_v62  ;;  %vm4274_vm7 = vweird.f32 %v9778_v62  ;;  %v9870_v31 = vadd.f32 %v9806_v54, %v2077_v8 }
 0x6f2   :  { %v3177_v45 = vsel %vm2192_vm3, %v9791_v29, 0.0  ;;  %v4258_v44 = vmul.f32 %v6868_v33, %v4257_v3  ;;  %5329 = vst.msk [vmem:[%s11491_s9 + $0x200] sm:$0xff] %vm2192_vm3, %v5201_v20  ;;  %6509 = vmatmul.msk.f32.gmra.mxu3 %vm2192_vm3, %v5201_v20  ;;  %vm4265_vm5 = vcmp.eq.f32.partialorder %v4264_v46, 8.507059e+37  ;;  %v4281_v61 = vor.u32 1.1754944e-38, %v4280_v26 }
 0x6f3   :  { %3178 = vadd.xlane.f32.xlu1 %v3177_v45  ;;  %6873 = vpow2.f32 %v2851_v12  ;;  %vm4279_vm10 = vcmp.eq.f32.partialorder %v4278_v6, 8.507059e+37 }
 0x6f4   :  { %v4259_v15 = vadd.f32 %v6868_v33, %v4258_v44 }
 0x6f5   :  { %v6872_v19 = vpop.eup %6871  ;;  %v5967_v43 = vpop.f32.mrf.mxu3 }
 0x6f6   :  { %v4270_v17 = vmul.f32 %v6872_v19, %v9778_v62  ;;  %v2417_v50 = vpop.xlane.xlu1 %2416  ;;  %v9818_v24 = vpop.xlane.xlu0 %3163  ;;  %v4263_v60 = vsel %vm9812_vm4, %v6868_v33, %v4259_v15  ;;  %6238 = vst.msk [vmem:[%s11492_s8 + $0x1c8] sm:$0xff] %vm6180_vm9, %v5967_v43  ;;  %vm4275_vm6 = vweird.f32 %v6872_v19 }
 0x6f7   :  { %v2651_v11 = vsub.f32 %v9584_v58, %v2417_v50  ;;  %6875 = vrcp.f32 %v9818_v24  ;;  %v4268_v36 = vsel %vm4265_vm5, %v4267_v2, %v4263_v60  ;;  %v2433_v58 = vsel %vm2192_vm3, %v9809_v39, -inf  ;;  %vm4276_vm8 = vmor %vm4274_vm7, %vm4275_vm6 }
 0x6f8   :  { %v4271_v14 = vsub.f32 1.0, %v4270_v17  ;;  %v5202_v22 = vmul.f32 %v9544_v32, %v4268_v36  ;;  %v2079_v55 = vpop.f32.mrf.mxu2  ;;  %v4292_v3 = vand.u32 2147483647, %v9818_v24  ;;  %vm4288_vm12 = vweird.f32 %v9818_v24 }
 0x6f9   :  { %v2853_v41 = vmul.f32 1.442695, %v2651_v11  ;;  %v9830_v38 = vpop.eup %6873  ;;  %v2439_v2 = vsel %vm2192_vm3, %v9870_v31, -inf  ;;  %v9898_v36 = vadd.f32 %v9806_v54, %v2079_v55 }
 0x6fa   :  { %v4272_v34 = vmul.f32 %v6872_v19, %v4271_v14  ;;  %v3180_v52 = vsel %vm2192_vm3, %v9830_v38, 0.0  ;;  %5330 = vst.msk [vmem:[%s11491_s9 + $0x208] sm:$0xff] %vm2192_vm3, %v5202_v22  ;;  %6510 = vmatmul.msk.f32.gmra.mxu3 %vm2192_vm3, %v5202_v22  ;;  %vm4293_vm14 = vcmp.eq.f32.partialorder %v4292_v3, 8.507059e+37 }
 0x6fb   :  { %6877 = vpow2.f32 %v2853_v41  ;;  %2434 = vmax.xlane.f32.xlu1 %v2433_v58  ;;  %3181 = vadd.xlane.f32.xlu0 %v3180_v52 }
 0x6fc   :  { %v4273_v56 = vadd.f32 %v6872_v19, %v4272_v34 }
 0x6fd   :  { %v6876_v51 = vpop.eup %6875  ;;  %v5970_v13 = vpop.f32.mrf.mxu3 }
 0x6fe   :  { %v4277_v32 = vsel %vm4276_vm8, %v6872_v19, %v4273_v56  ;;  %v4284_v30 = vmul.f32 %v6876_v51, %v9818_v24  ;;  %v2420_v25 = vpop.xlane.xlu0 %2419  ;;  %6239 = vst.msk [vmem:[%s11492_s8 + $0x1d0] sm:$0xff] %vm6180_vm9, %v5970_v13  ;;  %v9851_v18 = vpop.xlane.xlu2 %3166  ;;  %vm4289_vm11 = vweird.f32 %v6876_v51 }
 0x6ff   :  { %v4282_v33 = vsel %vm4279_vm10, %v4281_v61, %v4277_v32  ;;  %v2652_v7 = vsub.f32 %v9612_v47, %v2420_v25  ;;  %6879 = vrcp.f32 %v9851_v18  ;;  %v4294_v47 = vand.u32 2147483648, %v9818_v24  ;;  %vm4290_vm13 = vmor %vm4288_vm12, %vm4289_vm11 }
 0x700   :  { %v5203_v62 = vmul.f32 %v9569_v16, %v4282_v33  ;;  %v4285_v42 = vsub.f32 1.0, %v4284_v30  ;;  %v2436_v16 = vsel %vm2192_vm3, %v9844_v4, -inf  ;;  %v4308_v60 = vand.u32 2147483648, %v9851_v18 }
 0x701   :  { %v9855_v9 = vpop.eup %6877  ;;  %v2855_v57 = vmul.f32 1.442695, %v2652_v7  ;;  %v4295_v45 = vor.u32 1.1754944e-38, %v4294_v47  ;;  %v4306_v14 = vand.u32 2147483647, %v9851_v18  ;;  %vm4302_vm0 = vweird.f32 %v9851_v18  ;;  %v144_v7 = vld [vmem:[%s11484_s0 + $0x380] sm:$0xff] }
 0x702   :  { %5331 = vst.msk [vmem:[%s11491_s9 + $0x210] sm:$0xff] %vm2192_vm3, %v5203_v62  ;;  %v3183_v48 = vsel %vm2192_vm3, %v9855_v9, 0.0  ;;  %v4286_v28 = vmul.f32 %v6876_v51, %v4285_v42  ;;  %6511 = vmatmul.msk.f32.gmra.mxu3 %vm2192_vm3, %v5203_v62  ;;  %v4309_v6 = vor.u32 1.1754944e-38, %v4308_v60  ;;  %v2442_v33 = vsel %vm2192_vm3, %v9898_v36, -inf  ;;  %v145_v62 = vld [vmem:[%s11484_s0 + $0x388] sm:$0xff] }
 0x703   :  { %3184 = vadd.xlane.f32.xlu2 %v3183_v48  ;;  %6881 = vpow2.f32 %v2855_v57  ;;  %2437 = vmax.xlane.f32.xlu0 %v2436_v16  ;;  %vm4307_vm4 = vcmp.eq.f32.partialorder %v4306_v14, 8.507059e+37 }
 0x704   :  { %v4287_v20 = vadd.f32 %v6876_v51, %v4286_v28 }
 0x705   :  { %v6880_v12 = vpop.eup %6879  ;;  %v5973_v44 = vpop.f32.mrf.mxu3 }
 0x706   :  { %v9873_v63 = vpop.xlane.xlu1 %3169  ;;  %v4298_v10 = vmul.f32 %v6880_v12, %v9851_v18  ;;  %6240 = vst.msk [vmem:[%s11492_s8 + $0x1d8] sm:$0xff] %vm6180_vm9, %v5973_v44  ;;  %v2423_v37 = vpop.xlane.xlu2 %2422  ;;  %v4291_v46 = vsel %vm4290_vm13, %v6876_v51, %v4287_v20  ;;  %vm4303_vm15 = vweird.f32 %v6880_v12 }
 0x707   :  { %6883 = vrcp.f32 %v9873_v63  ;;  %v2653_v19 = vsub.f32 %v9657_v23, %v2423_v37  ;;  %v4296_v15 = vsel %vm4293_vm14, %v4295_v45, %v4291_v46  ;;  %v2082_v23 = vpop.f32.mrf.mxu2  ;;  %vm4304_vm1 = vmor %vm4302_vm0, %vm4303_vm15  ;;  %v4320_v13 = vand.u32 2147483647, %v9873_v63  ;;  %v698_v18 = vpop.f32.mrf.mxu0 }
 0x708   :  { %v4299_v17 = vsub.f32 1.0, %v4298_v10  ;;  %v5204_v50 = vmul.f32 %v9596_v5, %v4296_v15  ;;  %vm4316_vm6 = vweird.f32 %v9873_v63 }
 0x709   :  { %v9882_v35 = vpop.eup %6881  ;;  %v2857_v43 = vmul.f32 1.442695, %v2653_v19  ;;  %vm4321_vm8 = vcmp.eq.f32.partialorder %v4320_v13, 8.507059e+37 }
 0x70a   :  { %v3186_v11 = vsel %vm2192_vm3, %v9882_v35, 0.0  ;;  %v4300_v24 = vmul.f32 %v6880_v12, %v4299_v17  ;;  %5332 = vst.msk [vmem:[%s11491_s9 + $0x218] sm:$0xff] %vm2192_vm3, %v5204_v50  ;;  %6512 = vmatmul.msk.f32.gmra.mxu3 %vm2192_vm3, %v5204_v50 }
 0x70b   :  { %2440 = vmax.xlane.f32.xlu2 %v2439_v2  ;;  %3187 = vadd.xlane.f32.xlu1 %v3186_v11  ;;  %6885 = vpow2.f32 %v2857_v43  ;;  %v699_v11 = vadd.f32 %v9680_v21, %v698_v18 }
 0x70c   :  { %v4301_v8 = vadd.f32 %v6880_v12, %v4300_v24 }
 0x70d   :  { %v6884_v5 = vpop.eup %6883  ;;  %v5976_v52 = vpop.f32.mrf.mxu3 }
 0x70e   :  { %v4312_v26 = vmul.f32 %v6884_v5, %v9873_v63  ;;  %v2426_v41 = vpop.xlane.xlu1 %2425  ;;  %v9902_v34 = vpop.xlane.xlu0 %3172  ;;  %6241 = vst.msk [vmem:[%s11492_s8 + $0x1e0] sm:$0xff] %vm6180_vm9, %v5976_v52  ;;  %v4305_v61 = vsel %vm4304_vm1, %v6880_v12, %v4301_v8  ;;  %vm4317_vm5 = vweird.f32 %v6884_v5  ;;  %v9943_v12 = vadd.f32 %v9806_v54, %v2082_v23 }
 0x70f   :  { %v2654_v58 = vsub.f32 %v9687_v53, %v2426_v41  ;;  %6887 = vrcp.f32 %v9902_v34  ;;  %v4322_v53 = vand.u32 2147483648, %v9873_v63  ;;  %v4310_v32 = vsel %vm4307_vm4, %v4309_v6, %v4305_v61  ;;  %vm9926_vm7 = vmor %vm4316_vm6, %vm4317_vm5  ;;  %v2084_v3 = vpop.f32.mrf.mxu2  ;;  %v700_v43 = vpop.f32.mrf.mxu0 }
 0x710   :  { %v4313_v22 = vsub.f32 1.0, %v4312_v26  ;;  %v5205_v25 = vmul.f32 %v9624_v1, %v4310_v32  ;;  %v216_v1 = vpack.c.bf16 %v145_v62, %v144_v7  ;;  %v4336_v15 = vand.u32 2147483648, %v9902_v34 }
 0x711   :  { %v2859_v56 = vmul.f32 1.442695, %v2654_v58  ;;  %v9910_v30 = vpop.eup %6885  ;;  %v4323_v28 = vor.u32 1.1754944e-38, %v4322_v53  ;;  %vm4330_vm11 = vweird.f32 %v9902_v34  ;;  %v9968_v23 = vadd.f32 %v9806_v54, %v2084_v3 }
 0x712   :  { %v4314_v51 = vmul.f32 %v6884_v5, %v4313_v22  ;;  %v3189_v57 = vsel %vm2192_vm3, %v9910_v30, 0.0  ;;  %5333 = vst.msk [vmem:[%s11491_s9 + $0x220] sm:$0xff] %vm2192_vm3, %v5205_v25  ;;  %6513 = vmatmul.msk.f32.gmra.mxu3 %vm2192_vm3, %v5205_v25  ;;  %6373 = vmatmul.msk.bf16.gmra.mxu0 %vm229_vm2, %v216_v1  ;;  %v4337_v14 = vor.u32 1.1754944e-38, %v4336_v15  ;;  %v862_v52 = vmul.f32 0.01, %v699_v11 }
 0x713   :  { %6889 = vpow2.f32 %v2859_v56  ;;  %2443 = vmax.xlane.f32.xlu1 %v2442_v33  ;;  %3190 = vadd.xlane.f32.xlu0 %v3189_v57  ;;  %v2448_v33 = vsel %vm2192_vm3, %v9968_v23, -inf }
 0x714   :  { %v4315_v42 = vadd.f32 %v6884_v5, %v4314_v51  ;;  %v990_v62 = vmax.f32 %v699_v11, %v862_v52 }
 0x715   :  { %v6888_v55 = vpop.eup %6887  ;;  %v5979_v45 = vpop.f32.mrf.mxu3 }
 0x716   :  { %v9935_v47 = vpop.xlane.xlu2 %3175  ;;  %v4319_v16 = vsel %vm9926_vm7, %v6884_v5, %v4315_v42  ;;  %v4326_v20 = vmul.f32 %v6888_v55, %v9902_v34  ;;  %v2429_v63 = vpop.xlane.xlu0 %2428  ;;  %6242 = vst.msk [vmem:[%s11492_s8 + $0x1e8] sm:$0xff] %vm6180_vm9, %v5979_v45  ;;  %vm4331_vm10 = vweird.f32 %v6888_v55  ;;  %v701_v5 = vadd.f32 %v9680_v21, %v700_v43 }
 0x717   :  { %6891 = vrcp.f32 %v9935_v47  ;;  %v2655_v44 = vsub.f32 %v9712_v49, %v2429_v63  ;;  %v4324_v10 = vsel %vm4321_vm8, %v4323_v28, %v4319_v16  ;;  %v4334_v49 = vand.u32 2147483647, %v9902_v34  ;;  %vm4332_vm12 = vmor %vm4330_vm11, %vm4331_vm10  ;;  %v2087_v56 = vpop.f32.mrf.mxu2  ;;  %v1395_v45 = vpop.f32.mrf.mxu1 }
 0x718   :  { %v4327_v46 = vsub.f32 1.0, %v4326_v20  ;;  %v5206_v19 = vmul.f32 %v9660_v0, %v4324_v10  ;;  %v2445_v0 = vsel %vm2192_vm3, %v9943_v12, -inf  ;;  %v4350_v61 = vand.u32 2147483648, %v9935_v47 }
 0x719   :  { %v9946_v37 = vpop.eup %6889  ;;  %v2861_v17 = vmul.f32 1.442695, %v2655_v44  ;;  %vm4335_vm13 = vcmp.eq.f32.partialorder %v4334_v49, 8.507059e+37  ;;  %v863_v32 = vmul.f32 0.01, %v701_v5  ;;  %vm4344_vm15 = vweird.f32 %v9935_v47 }
 0x71a   :  { %v3192_v50 = vsel %vm2192_vm3, %v9946_v37, 0.0  ;;  %v4328_v2 = vmul.f32 %v6888_v55, %v4327_v46  ;;  %5334 = vst.msk [vmem:[%s11491_s9 + $0x228] sm:$0xff] %vm2192_vm3, %v5206_v19  ;;  %6514 = vmatmul.msk.f32.gmra.mxu3 %vm2192_vm3, %v5206_v19  ;;  %v4348_v25 = vand.u32 2147483647, %v9935_v47  ;;  %v4351_v7 = vor.u32 1.1754944e-38, %v4350_v61 }
 0x71b   :  { %3193 = vadd.xlane.f32.xlu2 %v3192_v50  ;;  %6893 = vpow2.f32 %v2861_v17  ;;  %2446 = vmax.xlane.f32.xlu0 %v2445_v0  ;;  %v991_v42 = vmax.f32 %v701_v5, %v863_v32  ;;  %v9993_v1 = vadd.f32 %v9806_v54, %v2087_v56  ;;  %v10019_v46 = vld [vmem:[%s11487_s5] ss:$0 sm:$0xff] }
 0x71c   :  { %v4329_v60 = vadd.f32 %v6888_v55, %v4328_v2  ;;  %vm4349_vm1 = vcmp.eq.f32.partialorder %v4348_v25, 8.507059e+37  ;;  %v1396_v19 = vadd.f32 %v10019_v46, %v1395_v45  ;;  %v703_v2 = vpop.f32.mrf.mxu0 }
 0x71d   :  { %v6892_v24 = vpop.eup %6891  ;;  %v5982_v34 = vpop.f32.mrf.mxu3  ;;  %v704_v0 = vadd.f32 %v9680_v21, %v703_v2 }
 0x71e   :  { %v4340_v8 = vmul.f32 %v6892_v24, %v9935_v47  ;;  %v2432_v26 = vpop.xlane.xlu2 %2431  ;;  %v4333_v58 = vsel %vm4332_vm12, %v6888_v55, %v4329_v60  ;;  %6243 = vst.msk [vmem:[%s11492_s8 + $0x1f0] sm:$0xff] %vm6180_vm9, %v5982_v34  ;;  %vm4345_vm14 = vweird.f32 %v6892_v24  ;;  %v1066_v47 = vpack.c.bf16 %v991_v42, %v990_v62  ;;  %v149_v62 = vld [vmem:[%s11484_s0 + $0x3a8] sm:$0xff] }
 0x71f   :  { %v2656_v41 = vsub.f32 %v9731_v40, %v2432_v26  ;;  %v4338_v22 = vsel %vm4335_vm13, %v4337_v14, %v4333_v58  ;;  %vm4346_vm0 = vmor %vm4344_vm15, %vm4345_vm14  ;;  %v2089_v20 = vpop.f32.mrf.mxu2  ;;  %v1397_v10 = vpop.f32.mrf.mxu1  ;;  %v1571_v17 = vmul.f32 0.01, %v1396_v19  ;;  %v864_v60 = vmul.f32 0.01, %v704_v0  ;;  %v146_v14 = vld [vmem:[%s11484_s0 + $0x390] sm:$0xff] }
 0x720   :  { %v4341_v6 = vsub.f32 1.0, %v4340_v8  ;;  %v5207_v53 = vmul.f32 %v9698_v59, %v4338_v22  ;;  %1414 = vmatmul.bf16.gmra.mxu1 %v1066_v47  ;;  %v10012_v63 = vadd.f32 %v9806_v54, %v2089_v20  ;;  %v1398_v15 = vadd.f32 %v10019_v46, %v1397_v10  ;;  %v147_v8 = vld [vmem:[%s11484_s0 + $0x398] sm:$0xff] }
 0x721   :  { %v2863_v51 = vmul.f32 1.442695, %v2656_v41  ;;  %v9979_v13 = vpop.eup %6893  ;;  %v1699_v49 = vmax.f32 %v1396_v19, %v1571_v17  ;;  %v217_v41 = vpack.c.bf16 %v147_v8, %v146_v14  ;;  %v992_v58 = vmax.f32 %v704_v0, %v864_v60 }
 0x722   :  { %v4342_v40 = vmul.f32 %v6892_v24, %v4341_v6  ;;  %5335 = vst.msk [vmem:[%s11491_s9 + $0x230] sm:$0xff] %vm2192_vm3, %v5207_v53  ;;  %v3195_v59 = vsel %vm2192_vm3, %v9979_v13, 0.0  ;;  %6515 = vmatmul.msk.f32.gmra.mxu3 %vm2192_vm3, %v5207_v53  ;;  %v2454_v44 = vsel %vm2192_vm3, %v10012_v63, -inf  ;;  %v1572_v50 = vmul.f32 0.01, %v1398_v15 }
 0x723   :  { %6895 = vpow2.f32 %v2863_v51  ;;  %2449 = vmax.xlane.f32.xlu2 %v2448_v33  ;;  %3196 = vadd.xlane.f32.xlu1 %v3195_v59 }
 0x724   :  { %v4343_v18 = vadd.f32 %v6892_v24, %v4342_v40  ;;  %v1700_v43 = vmax.f32 %v1398_v15, %v1572_v50  ;;  %v705_v5 = vpop.f32.mrf.mxu0  ;;  %6374 = vmatmul.msk.bf16.gmra.mxu0 %vm229_vm2, %v217_v41 }
 0x725   :  { %v5985_v55 = vpop.f32.mrf.mxu3  ;;  %v706_v26 = vadd.f32 %v9680_v21, %v705_v5 }
 0x726   :  { %v4347_v57 = vsel %vm4346_vm0, %v6892_v24, %v4343_v18  ;;  %6244 = vst.msk [vmem:[%s11492_s8 + $0x1f8] sm:$0xff] %vm6180_vm9, %v5985_v55  ;;  %v1779_v11 = vpack.c.bf16 %v1700_v43, %v1699_v49 }
 0x727   :  { %v4352_v48 = vsel %vm4349_vm1, %v4351_v7, %v4347_v57  ;;  %v1400_v24 = vpop.f32.mrf.mxu1  ;;  %v865_v6 = vmul.f32 0.01, %v706_v26  ;;  %v148_v7 = vld [vmem:[%s11484_s0 + $0x3a0] sm:$0xff]  ;;  %v2092_v5 = vpop.f32.mrf.mxu2 }
 0x728   :  { %v5208_v28 = vmul.f32 %v9715_v27, %v4352_v48  ;;  %v2451_v27 = vsel %vm2192_vm3, %v9993_v1, -inf  ;;  %2111 = vmatmul.bf16.gmra.mxu2 %v1779_v11  ;;  %v1401_v52 = vadd.f32 %v10019_v46, %v1400_v24  ;;  %v218_v48 = vpack.c.bf16 %v149_v62, %v148_v7  ;;  %v150_v11 = vld [vmem:[%s11484_s0 + $0x3b0] sm:$0xff]  ;;  %v151_v24 = vld [vmem:[%s11484_s0 + $0x3b8] sm:$0xff] }
 0x729   :  { %v9996_v16 = vpop.eup %6895  ;;  %v993_v34 = vmax.f32 %v706_v26, %v865_v6  ;;  %v219_v26 = vpack.c.bf16 %v151_v24, %v150_v11  ;;  %v10090_v24 = vadd.f32 %v9806_v54, %v2092_v5 }
 0x72a   :  { %5336 = vst.msk [vmem:[%s11491_s9 + $0x238] sm:$0xff] %vm2192_vm3, %v5208_v28  ;;  %v3198_v3 = vsel %vm2192_vm3, %v9996_v16, 0.0  ;;  %6516 = vmatmul.msk.f32.gmra.mxu3 %vm2192_vm3, %v5208_v28  ;;  %v1573_v53 = vmul.f32 0.01, %v1401_v52 }
 0x72b   :  { %3199 = vadd.xlane.f32.xlu0 %v3198_v3  ;;  %2452 = vmax.xlane.f32.xlu1 %v2451_v27  ;;  %v1067_v61 = vpack.c.bf16 %v993_v34, %v992_v58 }
 0x72c   :  { %v708_v51 = vpop.f32.mrf.mxu0  ;;  %v1701_v40 = vmax.f32 %v1401_v52, %v1573_v53 }
 0x72d   :  { %v709_v42 = vadd.f32 %v9680_v21, %v708_v51 }
 0x72f   :  { %v1402_v22 = vpop.f32.mrf.mxu1  ;;  %v866_v55 = vmul.f32 0.01, %v709_v42 }
 0x730   :  { %v1403_v56 = vadd.f32 %v10019_v46, %v1402_v22  ;;  %1419 = vmatmul.bf16.gmra.mxu1 %v1067_v61 }
 0x731   :  { %v994_v47 = vmax.f32 %v709_v42, %v866_v55 }
 0x732   :  { %v1574_v32 = vmul.f32 0.01, %v1403_v56 }
 0x733   :  { %2455 = vmax.xlane.f32.xlu0 %v2454_v44 }
 0x734   :  { %v1702_v25 = vmax.f32 %v1403_v56, %v1574_v32  ;;  %v710_v18 = vpop.f32.mrf.mxu0  ;;  %6375 = vmatmul.msk.bf16.gmra.mxu0 %vm229_vm2, %v218_v48 }
 0x735   :  { %v711_v57 = vadd.f32 %v9680_v21, %v710_v18 }
 0x736   :  { %v1780_v33 = vpack.c.bf16 %v1702_v25, %v1701_v40 }
 0x737   :  { %v1405_v59 = vpop.f32.mrf.mxu1  ;;  %v867_v28 = vmul.f32 0.01, %v711_v57 }
 0x738   :  { %2116 = vmatmul.bf16.gmra.mxu2 %v1780_v33  ;;  %v1406_v27 = vadd.f32 %v10019_v46, %v1405_v59 }
 0x739   :  { %v995_v3 = vmax.f32 %v711_v57, %v867_v28 }
 0x73a   :  { %v1575_v19 = vmul.f32 0.01, %v1406_v27 }
 0x73b   :  { %v1068_v44 = vpack.c.bf16 %v995_v3, %v994_v47  ;;  %v10068_v3 = vpop.f32.mrf.mxu2 }
 0x73c   :  { %v713_v10 = vpop.f32.mrf.mxu0  ;;  %v1703_v50 = vmax.f32 %v1406_v27, %v1575_v19 }
 0x73d   :  { %v714_v14 = vadd.f32 %v9680_v21, %v713_v10 }
 0x73f   :  { %v1407_v20 = vpop.f32.mrf.mxu1  ;;  %v868_v22 = vmul.f32 0.01, %v714_v14 }
 0x740   :  { %v1408_v45 = vadd.f32 %v10019_v46, %v1407_v20  ;;  %1424 = vmatmul.bf16.gmra.mxu1 %v1068_v44 }
 0x741   :  { %v996_v51 = vmax.f32 %v714_v14, %v868_v22 }
 0x742   :  { %v1576_v15 = vmul.f32 0.01, %v1408_v45 }
 0x744   :  { %v1704_v2 = vmax.f32 %v1408_v45, %v1576_v15  ;;  %v715_v0 = vpop.f32.mrf.mxu0  ;;  %6376 = vmatmul.msk.bf16.gmra.mxu0 %vm229_vm2, %v219_v26 }
 0x745   :  { %v716_v8 = vadd.f32 %v9680_v21, %v715_v0 }
 0x746   :  { %v1781_v49 = vpack.c.bf16 %v1704_v2, %v1703_v50 }
 0x747   :  { %v1410_v43 = vpop.f32.mrf.mxu1  ;;  %v869_v52 = vmul.f32 0.01, %v716_v8 }
 0x748   :  { %2121 = vmatmul.bf16.gmra.mxu2 %v1781_v49  ;;  %v1411_v25 = vadd.f32 %v10019_v46, %v1410_v43 }
 0x749   :  { %v997_v53 = vmax.f32 %v716_v8, %v869_v52 }
 0x74a   :  { %v1577_v62 = vmul.f32 0.01, %v1411_v25 }
 0x74b   :  { %v1069_v33 = vpack.c.bf16 %v997_v53, %v996_v51 }
 0x750   :  { %1429 = vmatmul.bf16.gmra.mxu1 %v1069_v33 }
 0x766   :  { %v3179_v17 = vpop.xlane.xlu1 %3178 }
 0x767   :  { %6897 = vrcp.f32 %v3179_v17  ;;  %v4364_v21 = vand.u32 2147483648, %v3179_v17  ;;  %v4362_v40 = vand.u32 2147483647, %v3179_v17  ;;  %vm4358_vm5 = vweird.f32 %v3179_v17 }
 0x769   :  { %v4365_v57 = vor.u32 1.1754944e-38, %v4364_v21  ;;  %vm4363_vm7 = vcmp.eq.f32.partialorder %v4362_v40, 8.507059e+37 }
 0x76d   :  { %v6898_v60 = vpop.eup %6897 }
 0x76e   :  { %v4354_v41 = vmul.f32 %v6898_v60, %v3179_v17  ;;  %v2435_v58 = vpop.xlane.xlu1 %2434  ;;  %v10054_v34 = vpop.xlane.xlu0 %3181  ;;  %vm4359_vm4 = vweird.f32 %v6898_v60  ;;  %v1705_v17 = vmax.f32 %v1411_v25, %v1577_v62 }
 0x76f   :  { %v2657_v6 = vsub.f32 %v9809_v39, %v2435_v58  ;;  %6899 = vrcp.f32 %v10054_v34  ;;  %v1412_v39 = vpop.f32.mrf.mxu1  ;;  %vm10060_vm6 = vmor %vm4358_vm5, %vm4359_vm4  ;;  %v4378_v0 = vand.u32 2147483648, %v10054_v34  ;;  %vm4372_vm10 = vweird.f32 %v10054_v34 }
 0x770   :  { %v4355_v56 = vsub.f32 1.0, %v4354_v41  ;;  %v1413_v18 = vadd.f32 %v10019_v46, %v1412_v39 }
 0x771   :  { %v2865_v61 = vmul.f32 1.442695, %v2657_v6  ;;  %v4379_v41 = vor.u32 1.1754944e-38, %v4378_v0 }
 0x772   :  { %v4356_v32 = vmul.f32 %v6898_v60, %v4355_v56  ;;  %v1578_v47 = vmul.f32 0.01, %v1413_v18 }
 0x773   :  { %6901 = vpow2.f32 %v2865_v61 }
 0x774   :  { %v4357_v59 = vadd.f32 %v6898_v60, %v4356_v32  ;;  %v1706_v50 = vmax.f32 %v1413_v18, %v1578_v47  ;;  %v10125_v18 = vadd.f32 %v9806_v54, %v10068_v3 }
 0x775   :  { %v6900_v42 = vpop.eup %6899  ;;  %v5988_v48 = vpop.f32.mrf.mxu3 }
 0x776   :  { %v10064_v55 = vpop.xlane.xlu2 %3184  ;;  %v4361_v28 = vsel %vm10060_vm6, %v6898_v60, %v4357_v59  ;;  %v4368_v20 = vmul.f32 %v6900_v42, %v10054_v34  ;;  %6245 = vst.msk [vmem:[%s11492_s8 + $0x200] sm:$0xff] %vm6180_vm9, %v5988_v48  ;;  %v2438_v27 = vpop.xlane.xlu0 %2437  ;;  %vm4373_vm8 = vweird.f32 %v6900_v42 }
 0x777   :  { %6903 = vrcp.f32 %v10064_v55  ;;  %v2658_v45 = vsub.f32 %v9844_v4, %v2438_v27  ;;  %v4366_v44 = vsel %vm4363_vm7, %v4365_v57, %v4361_v28  ;;  %v1782_v4 = vpack.c.bf16 %v1706_v50, %v1705_v17  ;;  %vm10093_vm11 = vmor %vm4372_vm10, %vm4373_vm8 }
 0x778   :  { %v4369_v19 = vsub.f32 1.0, %v4368_v20  ;;  %v5209_v15 = vmul.f32 %v9791_v29, %v4366_v44  ;;  %v4376_v29 = vand.u32 2147483647, %v10054_v34  ;;  %v2097_v34 = vpop.f32.mrf.mxu2  ;;  %v4392_v56 = vand.u32 2147483648, %v10064_v55 }
 0x779   :  { %v10077_v10 = vpop.eup %6901  ;;  %v2867_v2 = vmul.f32 1.442695, %v2658_v45  ;;  %2126 = vmatmul.bf16.gmra.mxu2 %v1782_v4  ;;  %v4390_v21 = vand.u32 2147483647, %v10064_v55  ;;  %vm4386_vm14 = vweird.f32 %v10064_v55  ;;  %v10151_v17 = vadd.f32 %v9806_v54, %v2097_v34 }
 0x77a   :  { %v3201_v49 = vsel %vm2192_vm3, %v10077_v10, 0.0  ;;  %v4370_v43 = vmul.f32 %v6900_v42, %v4369_v19  ;;  %5337 = vst.msk [vmem:[%s11491_s9 + $0x240] sm:$0xff] %vm2192_vm3, %v5209_v15  ;;  %6517 = vmatmul.msk.f32.gmra.mxu3 %vm2192_vm3, %v5209_v15  ;;  %vm4377_vm12 = vcmp.eq.f32.partialorder %v4376_v29, 8.507059e+37  ;;  %v4393_v33 = vor.u32 1.1754944e-38, %v4392_v56 }
 0x77b   :  { %3202 = vadd.xlane.f32.xlu2 %v3201_v49  ;;  %6905 = vpow2.f32 %v2867_v2  ;;  %vm4391_vm0 = vcmp.eq.f32.partialorder %v4390_v21, 8.507059e+37 }
 0x77c   :  { %v4371_v60 = vadd.f32 %v6900_v42, %v4370_v43 }
 0x77d   :  { %v6904_v11 = vpop.eup %6903  ;;  %v5991_v58 = vpop.f32.mrf.mxu3 }
 0x77e   :  { %v4382_v8 = vmul.f32 %v6904_v11, %v10064_v55  ;;  %v2441_v26 = vpop.xlane.xlu2 %2440  ;;  %v10099_v22 = vpop.xlane.xlu1 %3187  ;;  %v4375_v5 = vsel %vm10093_vm11, %v6900_v42, %v4371_v60  ;;  %6246 = vst.msk [vmem:[%s11492_s8 + $0x208] sm:$0xff] %vm6180_vm9, %v5991_v58  ;;  %vm4387_vm13 = vweird.f32 %v6904_v11 }
 0x77f   :  { %v2659_v6 = vsub.f32 %v9870_v31, %v2441_v26  ;;  %6907 = vrcp.f32 %v10099_v22  ;;  %v4380_v51 = vsel %vm4377_vm12, %v4379_v41, %v4375_v5  ;;  %v2457_v31 = vsel %vm2192_vm3, %v10090_v24, -inf  ;;  %vm4388_vm15 = vmor %vm4386_vm14, %vm4387_vm13 }
 0x780   :  { %v4383_v52 = vsub.f32 1.0, %v4382_v8  ;;  %v5210_v40 = vmul.f32 %v9830_v38, %v4380_v51  ;;  %v2099_v45 = vpop.f32.mrf.mxu2  ;;  %v4406_v44 = vand.u32 2147483648, %v10099_v22  ;;  %v4404_v19 = vand.u32 2147483647, %v10099_v22 }
 0x781   :  { %v2869_v61 = vmul.f32 1.442695, %v2659_v6  ;;  %v10111_v53 = vpop.eup %6905  ;;  %vm4400_vm4 = vweird.f32 %v10099_v22  ;;  %v2463_v41 = vsel %vm2192_vm3, %v10151_v17, -inf  ;;  %v10179_v51 = vadd.f32 %v9806_v54, %v2099_v45 }
 0x782   :  { %v4384_v32 = vmul.f32 %v6904_v11, %v4383_v52  ;;  %v3204_v25 = vsel %vm2192_vm3, %v10111_v53, 0.0  ;;  %5338 = vst.msk [vmem:[%s11491_s9 + $0x248] sm:$0xff] %vm2192_vm3, %v5210_v40  ;;  %6518 = vmatmul.msk.f32.gmra.mxu3 %vm2192_vm3, %v5210_v40  ;;  %v4407_v49 = vor.u32 1.1754944e-38, %v4406_v44  ;;  %vm4405_vm6 = vcmp.eq.f32.partialorder %v4404_v19, 8.507059e+37 }
 0x783   :  { %6909 = vpow2.f32 %v2869_v61  ;;  %2458 = vmax.xlane.f32.xlu2 %v2457_v31  ;;  %3205 = vadd.xlane.f32.xlu1 %v3204_v25 }
 0x784   :  { %v4385_v39 = vadd.f32 %v6904_v11, %v4384_v32 }
 0x785   :  { %v6908_v59 = vpop.eup %6907  ;;  %v5994_v62 = vpop.f32.mrf.mxu3 }
 0x786   :  { %v4389_v38 = vsel %vm4388_vm15, %v6904_v11, %v4385_v39  ;;  %v4396_v7 = vmul.f32 %v6908_v59, %v10099_v22  ;;  %v2444_v42 = vpop.xlane.xlu1 %2443  ;;  %6247 = vst.msk [vmem:[%s11492_s8 + $0x210] sm:$0xff] %vm6180_vm9, %v5994_v62  ;;  %v10133_v55 = vpop.xlane.xlu0 %3190  ;;  %vm4401_vm1 = vweird.f32 %v6908_v59 }
 0x787   :  { %v4394_v57 = vsel %vm4391_vm0, %v4393_v33, %v4389_v38  ;;  %v2660_v48 = vsub.f32 %v9898_v36, %v2444_v42  ;;  %6911 = vrcp.f32 %v10133_v55  ;;  %vm4402_vm5 = vmor %vm4400_vm4, %vm4401_vm1  ;;  %v4420_v5 = vand.u32 2147483648, %v10133_v55 }
 0x788   :  { %v5211_v28 = vmul.f32 %v9855_v9, %v4394_v57  ;;  %v4397_v3 = vsub.f32 1.0, %v4396_v7  ;;  %v2460_v9 = vsel %vm2192_vm3, %v10125_v18, -inf  ;;  %v4418_v52 = vand.u32 2147483647, %v10133_v55 }
 0x789   :  { %v10136_v47 = vpop.eup %6909  ;;  %v2871_v20 = vmul.f32 1.442695, %v2660_v48  ;;  %vm4414_vm8 = vweird.f32 %v10133_v55  ;;  %v4421_v21 = vor.u32 1.1754944e-38, %v4420_v5  ;;  %v2466_v57 = vsel %vm2192_vm3, %v10179_v51, -inf }
 0x78a   :  { %5339 = vst.msk [vmem:[%s11491_s9 + $0x250] sm:$0xff] %vm2192_vm3, %v5211_v28  ;;  %v3207_v27 = vsel %vm2192_vm3, %v10136_v47, 0.0  ;;  %v4398_v36 = vmul.f32 %v6908_v59, %v4397_v3  ;;  %6519 = vmatmul.msk.f32.gmra.mxu3 %vm2192_vm3, %v5211_v28  ;;  %vm4419_vm11 = vcmp.eq.f32.partialorder %v4418_v52, 8.507059e+37  ;;  %v153_v28 = vld [vmem:[%s11484_s0 + $0x3c8] sm:$0xff] }
 0x78b   :  { %3208 = vadd.xlane.f32.xlu0 %v3207_v27  ;;  %6913 = vpow2.f32 %v2871_v20  ;;  %2461 = vmax.xlane.f32.xlu1 %v2460_v9 }
 0x78c   :  { %v4399_v15 = vadd.f32 %v6908_v59, %v4398_v36 }
 0x78d   :  { %v6912_v2 = vpop.eup %6911  ;;  %v5997_v43 = vpop.f32.mrf.mxu3 }
 0x78e   :  { %v10154_v50 = vpop.xlane.xlu2 %3193  ;;  %v4410_v0 = vmul.f32 %v6912_v2, %v10133_v55  ;;  %6248 = vst.msk [vmem:[%s11492_s8 + $0x218] sm:$0xff] %vm6180_vm9, %v5997_v43  ;;  %v2447_v4 = vpop.xlane.xlu0 %2446  ;;  %v4403_v29 = vsel %vm4402_vm5, %v6908_v59, %v4399_v15  ;;  %vm4415_vm7 = vweird.f32 %v6912_v2  ;;  %v152_v55 = vld [vmem:[%s11484_s0 + $0x3c0] sm:$0xff] }
 0x78f   :  { %6915 = vrcp.f32 %v10154_v50  ;;  %v2661_v11 = vsub.f32 %v9943_v12, %v2447_v4  ;;  %v4408_v60 = vsel %vm4405_vm6, %v4407_v49, %v4403_v29  ;;  %v2102_v12 = vpop.f32.mrf.mxu2  ;;  %vm4416_vm10 = vmor %vm4414_vm8, %vm4415_vm7  ;;  %v4432_v62 = vand.u32 2147483647, %v10154_v50  ;;  %v718_v48 = vpop.f32.mrf.mxu0 }
 0x790   :  { %v4411_v8 = vsub.f32 1.0, %v4410_v0  ;;  %v5212_v26 = vmul.f32 %v9882_v35, %v4408_v60  ;;  %vm4428_vm13 = vweird.f32 %v10154_v50 }
 0x791   :  { %v10163_v14 = vpop.eup %6913  ;;  %v2873_v58 = vmul.f32 1.442695, %v2661_v11  ;;  %vm4433_vm15 = vcmp.eq.f32.partialorder %v4432_v62, 8.507059e+37 }
 0x792   :  { %v3210_v6 = vsel %vm2192_vm3, %v10163_v14, 0.0  ;;  %v4412_v22 = vmul.f32 %v6912_v2, %v4411_v8  ;;  %5340 = vst.msk [vmem:[%s11491_s9 + $0x258] sm:$0xff] %vm2192_vm3, %v5212_v26  ;;  %6520 = vmatmul.msk.f32.gmra.mxu3 %vm2192_vm3, %v5212_v26 }
 0x793   :  { %2464 = vmax.xlane.f32.xlu0 %v2463_v41  ;;  %3211 = vadd.xlane.f32.xlu2 %v3210_v6  ;;  %6917 = vpow2.f32 %v2873_v58  ;;  %v10247_v58 = vld [vmem:[%s11485_s3] ss:$0 sm:$0xff] }
 0x794   :  { %v4413_v34 = vadd.f32 %v6912_v2, %v4412_v22  ;;  %v719_v6 = vadd.f32 %v10247_v58, %v718_v48 }
 0x795   :  { %v6916_v35 = vpop.eup %6915  ;;  %v6000_v25 = vpop.f32.mrf.mxu3 }
 0x796   :  { %v4424_v56 = vmul.f32 %v6916_v35, %v10154_v50  ;;  %v2450_v61 = vpop.xlane.xlu2 %2449  ;;  %v10183_v32 = vpop.xlane.xlu1 %3196  ;;  %6249 = vst.msk [vmem:[%s11492_s8 + $0x220] sm:$0xff] %vm6180_vm9, %v6000_v25  ;;  %v4417_v33 = vsel %vm4416_vm10, %v6912_v2, %v4413_v34  ;;  %vm4429_vm12 = vweird.f32 %v6916_v35  ;;  %v10224_v2 = vadd.f32 %v9806_v54, %v2102_v12  ;;  %v10256_v12 = vld [vmem:[%s11489_s7] ss:$0 sm:$0xff] }
 0x797   :  { %v2662_v31 = vsub.f32 %v9968_v23, %v2450_v61  ;;  %6919 = vrcp.f32 %v10183_v32  ;;  %v4434_v23 = vand.u32 2147483648, %v10154_v50  ;;  %v4422_v38 = vsel %vm4419_vm11, %v4421_v21, %v4417_v33  ;;  %vm10207_vm14 = vmor %vm4428_vm13, %vm4429_vm12  ;;  %v2104_v19 = vpop.f32.mrf.mxu2  ;;  %v720_v41 = vpop.f32.mrf.mxu0 }
 0x798   :  { %v4425_v40 = vsub.f32 1.0, %v4424_v56  ;;  %v5213_v42 = vmul.f32 %v9910_v30, %v4422_v38  ;;  %v220_v30 = vpack.c.bf16 %v153_v28, %v152_v55  ;;  %v4448_v60 = vand.u32 2147483648, %v10183_v32 }
 0x799   :  { %v2875_v39 = vmul.f32 1.442695, %v2662_v31  ;;  %v10191_v7 = vpop.eup %6917  ;;  %v4435_v36 = vor.u32 1.1754944e-38, %v4434_v23  ;;  %vm4442_vm1 = vweird.f32 %v10183_v32  ;;  %v10259_v52 = vadd.f32 %v10256_v12, %v2104_v19 }
 0x79a   :  { %v4426_v59 = vmul.f32 %v6916_v35, %v4425_v40  ;;  %v3213_v20 = vsel %vm2192_vm3, %v10191_v7, 0.0  ;;  %5341 = vst.msk [vmem:[%s11491_s9 + $0x260] sm:$0xff] %vm2192_vm3, %v5213_v42  ;;  %6521 = vmatmul.msk.f32.gmra.mxu3 %vm2192_vm3, %v5213_v42  ;;  %6377 = vmatmul.msk.bf16.gmra.mxu0 %vm229_vm2, %v220_v30  ;;  %v4449_v34 = vor.u32 1.1754944e-38, %v4448_v60 }
 0x79b   :  { %6921 = vpow2.f32 %v2875_v39  ;;  %2467 = vmax.xlane.f32.xlu2 %v2466_v57  ;;  %3214 = vadd.xlane.f32.xlu1 %v3213_v20  ;;  %v870_v39 = vmul.f32 0.01, %v719_v6  ;;  %v2472_v48 = vsel %vm2192_vm3, %v10259_v52, -inf }
 0x79c   :  { %v4427_v3 = vadd.f32 %v6916_v35, %v4426_v59 }
 0x79d   :  { %v6920_v45 = vpop.eup %6919  ;;  %v6003_v49 = vpop.f32.mrf.mxu3 }
 0x79e   :  { %v10216_v44 = vpop.xlane.xlu0 %3199  ;;  %v4431_v9 = vsel %vm10207_vm14, %v6916_v35, %v4427_v3  ;;  %v4438_v15 = vmul.f32 %v6920_v45, %v10183_v32  ;;  %v2453_v50 = vpop.xlane.xlu1 %2452  ;;  %6250 = vst.msk [vmem:[%s11492_s8 + $0x228] sm:$0xff] %vm6180_vm9, %v6003_v49  ;;  %vm4443_vm0 = vweird.f32 %v6920_v45  ;;  %v721_v35 = vadd.f32 %v10247_v58, %v720_v41 }
 0x79f   :  { %6923 = vrcp.f32 %v10216_v44  ;;  %v2663_v43 = vsub.f32 %v9993_v1, %v2453_v50  ;;  %v4436_v0 = vsel %vm4433_vm15, %v4435_v36, %v4431_v9  ;;  %v4446_v1 = vand.u32 2147483647, %v10183_v32  ;;  %vm4444_vm4 = vmor %vm4442_vm1, %vm4443_vm0  ;;  %v2107_v33 = vpop.f32.mrf.mxu2 }
 0x7a0   :  { %v4439_v29 = vsub.f32 1.0, %v4438_v15  ;;  %v5214_v11 = vmul.f32 %v9946_v37, %v4436_v0  ;;  %v2469_v37 = vsel %vm2192_vm3, %v10224_v2, -inf  ;;  %v4462_v59 = vand.u32 2147483648, %v10216_v44 }
 0x7a1   :  { %v10227_v4 = vpop.eup %6921  ;;  %v2877_v8 = vmul.f32 1.442695, %v2663_v43  ;;  %vm4447_vm5 = vcmp.eq.f32.partialorder %v4446_v1, 8.507059e+37  ;;  %v871_v62 = vmul.f32 0.01, %v721_v35  ;;  %vm4456_vm7 = vweird.f32 %v10216_v44  ;;  %v1415_v43 = vpop.f32.mrf.mxu1 }
 0x7a2   :  { %v3216_v54 = vsel %vm2192_vm3, %v10227_v4, 0.0  ;;  %v4440_v26 = vmul.f32 %v6920_v45, %v4439_v29  ;;  %5342 = vst.msk [vmem:[%s11491_s9 + $0x268] sm:$0xff] %vm2192_vm3, %v5214_v11  ;;  %6522 = vmatmul.msk.f32.gmra.mxu3 %vm2192_vm3, %v5214_v11  ;;  %v4460_v57 = vand.u32 2147483647, %v10216_v44  ;;  %v4463_v28 = vor.u32 1.1754944e-38, %v4462_v59 }
 0x7a3   :  { %3217 = vadd.xlane.f32.xlu0 %v3216_v54  ;;  %6925 = vpow2.f32 %v2877_v8  ;;  %2470 = vmax.xlane.f32.xlu1 %v2469_v37  ;;  %v998_v3 = vmax.f32 %v719_v6, %v870_v39  ;;  %v999_v20 = vmax.f32 %v721_v35, %v871_v62  ;;  %v10284_v27 = vadd.f32 %v10256_v12, %v2107_v33 }
 0x7a4   :  { %v4441_v5 = vadd.f32 %v6920_v45, %v4440_v26  ;;  %vm4461_vm10 = vcmp.eq.f32.partialorder %v4460_v57, 8.507059e+37  ;;  %v1416_v11 = vadd.f32 %v10019_v46, %v1415_v43  ;;  %v723_v26 = vpop.f32.mrf.mxu0 }
 0x7a5   :  { %v6924_v22 = vpop.eup %6923  ;;  %v6006_v40 = vpop.f32.mrf.mxu3  ;;  %v724_v37 = vadd.f32 %v10247_v58, %v723_v26 }
 0x7a6   :  { %v4452_v56 = vmul.f32 %v6924_v22, %v10216_v44  ;;  %v2456_v61 = vpop.xlane.xlu0 %2455  ;;  %v4445_v32 = vsel %vm4444_vm4, %v6920_v45, %v4441_v5  ;;  %6251 = vst.msk [vmem:[%s11492_s8 + $0x230] sm:$0xff] %vm6180_vm9, %v6006_v40  ;;  %vm4457_vm6 = vweird.f32 %v6924_v22  ;;  %v1070_v44 = vpack.c.bf16 %v999_v20, %v998_v3  ;;  %v157_v3 = vld [vmem:[%s11484_s0 + $0x3e8] sm:$0xff] }
 0x7a7   :  { %v2664_v31 = vsub.f32 %v10012_v63, %v2456_v61  ;;  %v4450_v25 = vsel %vm4447_vm5, %v4449_v34, %v4445_v32  ;;  %vm4458_vm8 = vmor %vm4456_vm7, %vm4457_vm6  ;;  %v2109_v50 = vpop.f32.mrf.mxu2  ;;  %v1579_v8 = vmul.f32 0.01, %v1416_v11  ;;  %v872_v5 = vmul.f32 0.01, %v724_v37  ;;  %v154_v34 = vld [vmem:[%s11484_s0 + $0x3d0] sm:$0xff] }
 0x7a8   :  { %v4453_v21 = vsub.f32 1.0, %v4452_v56  ;;  %v5215_v38 = vmul.f32 %v9979_v13, %v4450_v25  ;;  %1434 = vmatmul.bf16.gmra.mxu1 %v1070_v44  ;;  %v10303_v49 = vadd.f32 %v10256_v12, %v2109_v50  ;;  %v155_v56 = vld [vmem:[%s11484_s0 + $0x3d8] sm:$0xff] }
 0x7a9   :  { %v2879_v23 = vmul.f32 1.442695, %v2664_v31  ;;  %v10270_v42 = vpop.eup %6925  ;;  %v1417_v29 = vpop.f32.mrf.mxu1  ;;  %v1707_v1 = vmax.f32 %v1416_v11, %v1579_v8  ;;  %v221_v31 = vpack.c.bf16 %v155_v56, %v154_v34  ;;  %v1000_v32 = vmax.f32 %v724_v37, %v872_v5 }
 0x7aa   :  { %v4454_v63 = vmul.f32 %v6924_v22, %v4453_v21  ;;  %5343 = vst.msk [vmem:[%s11491_s9 + $0x270] sm:$0xff] %vm2192_vm3, %v5215_v38  ;;  %v3219_v13 = vsel %vm2192_vm3, %v10270_v42, 0.0  ;;  %6523 = vmatmul.msk.f32.gmra.mxu3 %vm2192_vm3, %v5215_v38  ;;  %v2478_v0 = vsel %vm2192_vm3, %v10303_v49, -inf  ;;  %v1418_v60 = vadd.f32 %v10019_v46, %v1417_v29 }
 0x7ab   :  { %6927 = vpow2.f32 %v2879_v23  ;;  %2473 = vmax.xlane.f32.xlu0 %v2472_v48  ;;  %3220 = vadd.xlane.f32.xlu2 %v3219_v13 }
 0x7ac   :  { %v4455_v55 = vadd.f32 %v6924_v22, %v4454_v63  ;;  %v1580_v54 = vmul.f32 0.01, %v1418_v60  ;;  %v725_v35 = vpop.f32.mrf.mxu0  ;;  %6378 = vmatmul.msk.bf16.gmra.mxu0 %vm229_vm2, %v221_v31 }
 0x7ad   :  { %v6009_v36 = vpop.f32.mrf.mxu3  ;;  %v726_v61 = vadd.f32 %v10247_v58, %v725_v35 }
 0x7ae   :  { %v4459_v30 = vsel %vm4458_vm8, %v6924_v22, %v4455_v55  ;;  %6252 = vst.msk [vmem:[%s11492_s8 + $0x238] sm:$0xff] %vm6180_vm9, %v6009_v36  ;;  %v1708_v41 = vmax.f32 %v1418_v60, %v1580_v54 }
 0x7af   :  { %v4464_v45 = vsel %vm4461_vm10, %v4463_v28, %v4459_v30  ;;  %v873_v21 = vmul.f32 0.01, %v726_v61  ;;  %v156_v28 = vld [vmem:[%s11484_s0 + $0x3e0] sm:$0xff]  ;;  %v2112_v35 = vpop.f32.mrf.mxu2 }
 0x7b0   :  { %v5216_v9 = vmul.f32 %v9996_v16, %v4464_v45  ;;  %v2475_v16 = vsel %vm2192_vm3, %v10284_v27, -inf  ;;  %v1783_v6 = vpack.c.bf16 %v1708_v41, %v1707_v1  ;;  %v222_v45 = vpack.c.bf16 %v157_v3, %v156_v28 }
 0x7b1   :  { %v10287_v19 = vpop.eup %6927  ;;  %v1420_v22 = vpop.f32.mrf.mxu1  ;;  %v1001_v40 = vmax.f32 %v726_v61, %v873_v21 }
 0x7b2   :  { %5344 = vst.msk [vmem:[%s11491_s9 + $0x278] sm:$0xff] %vm2192_vm3, %v5216_v9  ;;  %v3222_v15 = vsel %vm2192_vm3, %v10287_v19, 0.0  ;;  %6524 = vmatmul.msk.f32.gmra.mxu3 %vm2192_vm3, %v5216_v9  ;;  %2131 = vmatmul.bf16.gmra.mxu2 %v1783_v6  ;;  %v1421_v39 = vadd.f32 %v10019_v46, %v1420_v22  ;;  %v158_v6 = vld [vmem:[%s11484_s0 + $0x3f0] sm:$0xff]  ;;  %v159_v22 = vld [vmem:[%s11484_s0 + $0x3f8] sm:$0xff] }
 0x7b3   :  { %3223 = vadd.xlane.f32.xlu1 %v3222_v15  ;;  %2476 = vmax.xlane.f32.xlu2 %v2475_v16  ;;  %v1071_v59 = vpack.c.bf16 %v1001_v40, %v1000_v32  ;;  %v223_v61 = vpack.c.bf16 %v159_v22, %v158_v6  ;;  %v10376_v22 = vadd.f32 %v10256_v12, %v2112_v35 }
 0x7b4   :  { %v728_v23 = vpop.f32.mrf.mxu0  ;;  %v1581_v38 = vmul.f32 0.01, %v1421_v39 }
 0x7b5   :  { %v729_v20 = vadd.f32 %v10247_v58, %v728_v23 }
 0x7b6   :  { %v1709_v63 = vmax.f32 %v1421_v39, %v1581_v38 }
 0x7b7   :  { %v874_v36 = vmul.f32 0.01, %v729_v20 }
 0x7b8   :  { %1439 = vmatmul.bf16.gmra.mxu1 %v1071_v59 }
 0x7b9   :  { %v1422_v25 = vpop.f32.mrf.mxu1  ;;  %v1002_v44 = vmax.f32 %v729_v20, %v874_v36 }
 0x7ba   :  { %v1423_v33 = vadd.f32 %v10019_v46, %v1422_v25 }
 0x7bb   :  { %2479 = vmax.xlane.f32.xlu1 %v2478_v0 }
 0x7bc   :  { %v1582_v62 = vmul.f32 0.01, %v1423_v33  ;;  %v730_v55 = vpop.f32.mrf.mxu0  ;;  %6379 = vmatmul.msk.bf16.gmra.mxu0 %vm229_vm2, %v222_v45 }
 0x7bd   :  { %v731_v30 = vadd.f32 %v10247_v58, %v730_v55 }
 0x7be   :  { %v1710_v57 = vmax.f32 %v1423_v33, %v1582_v62 }
 0x7bf   :  { %v875_v9 = vmul.f32 0.01, %v731_v30 }
 0x7c0   :  { %v1784_v48 = vpack.c.bf16 %v1710_v57, %v1709_v63 }
 0x7c1   :  { %v1425_v13 = vpop.f32.mrf.mxu1  ;;  %v1003_v15 = vmax.f32 %v731_v30, %v875_v9 }
 0x7c2   :  { %2136 = vmatmul.bf16.gmra.mxu2 %v1784_v48  ;;  %v1426_v16 = vadd.f32 %v10019_v46, %v1425_v13 }
 0x7c3   :  { %v1072_v0 = vpack.c.bf16 %v1003_v15, %v1002_v44 }
 0x7c4   :  { %v733_v29 = vpop.f32.mrf.mxu0  ;;  %v1583_v11 = vmul.f32 0.01, %v1426_v16 }
 0x7c5   :  { %v734_v34 = vadd.f32 %v10247_v58, %v733_v29 }
 0x7c6   :  { %v1711_v54 = vmax.f32 %v1426_v16, %v1583_v11 }
 0x7c7   :  { %v876_v25 = vmul.f32 0.01, %v734_v34 }
 0x7c8   :  { %1444 = vmatmul.bf16.gmra.mxu1 %v1072_v0 }
 0x7c9   :  { %v1427_v50 = vpop.f32.mrf.mxu1  ;;  %v1004_v23 = vmax.f32 %v734_v34, %v876_v25 }
 0x7ca   :  { %v1428_v43 = vadd.f32 %v10019_v46, %v1427_v50 }
 0x7cc   :  { %v1584_v60 = vmul.f32 0.01, %v1428_v43  ;;  %v735_v37 = vpop.f32.mrf.mxu0  ;;  %6380 = vmatmul.msk.bf16.gmra.mxu0 %vm229_vm2, %v223_v61 }
 0x7cd   :  { %v736_v56 = vadd.f32 %v10247_v58, %v735_v37 }
 0x7ce   :  { %v1712_v26 = vmax.f32 %v1428_v43, %v1584_v60 }
 0x7cf   :  { %v877_v39 = vmul.f32 0.01, %v736_v56 }
 0x7d0   :  { %v1785_v41 = vpack.c.bf16 %v1712_v26, %v1711_v54 }
 0x7d1   :  { %v1430_v1 = vpop.f32.mrf.mxu1  ;;  %v1005_v38 = vmax.f32 %v736_v56, %v877_v39 }
 0x7d2   :  { %2141 = vmatmul.bf16.gmra.mxu2 %v1785_v41 }
 0x7d3   :  { %v1073_v28 = vpack.c.bf16 %v1005_v38, %v1004_v23 }
 0x7d8   :  { %1449 = vmatmul.bf16.gmra.mxu1 %v1073_v28 }
 0x7d9   :  { %v1432_v57 = vpop.f32.mrf.mxu1 }
 0x7da   :  { %v1433_v13 = vadd.f32 %v10019_v46, %v1432_v57 }
 0x7dc   :  { %v1586_v30 = vmul.f32 0.01, %v1433_v13 }
 0x7de   :  { %v1714_v54 = vmax.f32 %v1433_v13, %v1586_v30 }
 0x7ee   :  { %v3203_v8 = vpop.xlane.xlu2 %3202 }
 0x7ef   :  { %6929 = vrcp.f32 %v3203_v8  ;;  %v4476_v63 = vand.u32 2147483648, %v3203_v8  ;;  %v4474_v48 = vand.u32 2147483647, %v3203_v8  ;;  %vm4470_vm12 = vweird.f32 %v3203_v8 }
 0x7f1   :  { %v4477_v36 = vor.u32 1.1754944e-38, %v4476_v63  ;;  %vm4475_vm13 = vcmp.eq.f32.partialorder %v4474_v48, 8.507059e+37 }
 0x7f5   :  { %v6930_v5 = vpop.eup %6929 }
 0x7f6   :  { %v4466_v31 = vmul.f32 %v6930_v5, %v3203_v8  ;;  %v2459_v32 = vpop.xlane.xlu2 %2458  ;;  %v10340_v40 = vpop.xlane.xlu1 %3205  ;;  %vm4471_vm11 = vweird.f32 %v6930_v5 }
 0x7f7   :  { %v2665_v21 = vsub.f32 %v10090_v24, %v2459_v32  ;;  %6931 = vrcp.f32 %v10340_v40  ;;  %v1431_v24 = vadd.f32 %v10019_v46, %v1430_v1  ;;  %vm10346_vm2 = vmor %vm4470_vm12, %vm4471_vm11  ;;  %v10354_v46 = vpop.f32.mrf.mxu2  ;;  %v4490_v37 = vand.u32 2147483648, %v10340_v40 }
 0x7f8   :  { %v4467_v33 = vsub.f32 1.0, %v4466_v31  ;;  %vm4484_vm15 = vweird.f32 %v10340_v40  ;;  %v10411_v28 = vadd.f32 %v10256_v12, %v10354_v46 }
 0x7f9   :  { %v2881_v59 = vmul.f32 1.442695, %v2665_v21  ;;  %v1585_v20 = vmul.f32 0.01, %v1431_v24  ;;  %v4491_v31 = vor.u32 1.1754944e-38, %v4490_v37 }
 0x7fa   :  { %v4468_v62 = vmul.f32 %v6930_v5, %v4467_v33 }
 0x7fb   :  { %6933 = vpow2.f32 %v2881_v59  ;;  %v1713_v8 = vmax.f32 %v1431_v24, %v1585_v20 }
 0x7fc   :  { %v4469_v55 = vadd.f32 %v6930_v5, %v4468_v62 }
 0x7fd   :  { %v6932_v45 = vpop.eup %6931  ;;  %v6012_v9 = vpop.f32.mrf.mxu3 }
 0x7fe   :  { %v10350_v44 = vpop.xlane.xlu0 %3208  ;;  %v4473_v15 = vsel %vm10346_vm2, %v6930_v5, %v4469_v55  ;;  %v4480_v50 = vmul.f32 %v6932_v45, %v10340_v40  ;;  %6253 = vst.msk [vmem:[%s11492_s8 + $0x240] sm:$0xff] %vm6180_vm9, %v6012_v9  ;;  %v2462_v16 = vpop.xlane.xlu1 %2461  ;;  %vm4485_vm14 = vweird.f32 %v6932_v45 }
 0x7ff   :  { %6935 = vrcp.f32 %v10350_v44  ;;  %v2666_v43 = vsub.f32 %v10125_v18, %v2462_v16  ;;  %v4478_v0 = vsel %vm4475_vm13, %v4477_v36, %v4473_v15  ;;  %v1786_v18 = vpack.c.bf16 %v1714_v54, %v1713_v8  ;;  %vm10379_vm0 = vmor %vm4484_vm15, %vm4485_vm14 }
 0x800   :  { %v4481_v11 = vsub.f32 1.0, %v4480_v50  ;;  %v5217_v60 = vmul.f32 %v10077_v10, %v4478_v0  ;;  %v4488_v10 = vand.u32 2147483647, %v10340_v40  ;;  %v2117_v40 = vpop.f32.mrf.mxu2  ;;  %v4504_v33 = vand.u32 2147483648, %v10350_v44 }
 0x801   :  { %v10363_v29 = vpop.eup %6933  ;;  %v2883_v26 = vmul.f32 1.442695, %v2666_v43  ;;  %2146 = vmatmul.bf16.gmra.mxu2 %v1786_v18  ;;  %v4502_v63 = vand.u32 2147483647, %v10350_v44  ;;  %vm4498_vm5 = vweird.f32 %v10350_v44  ;;  %v10437_v8 = vadd.f32 %v10256_v12, %v2117_v40 }
 0x802   :  { %v3225_v1 = vsel %vm2192_vm3, %v10363_v29, 0.0  ;;  %v4482_v41 = vmul.f32 %v6932_v45, %v4481_v11  ;;  %5345 = vst.msk [vmem:[%s11491_s9 + $0x280] sm:$0xff] %vm2192_vm3, %v5217_v60  ;;  %6525 = vmatmul.msk.f32.gmra.mxu3 %vm2192_vm3, %v5217_v60  ;;  %vm4489_vm1 = vcmp.eq.f32.partialorder %v4488_v10, 8.507059e+37  ;;  %v4505_v13 = vor.u32 1.1754944e-38, %v4504_v33 }
 0x803   :  { %3226 = vadd.xlane.f32.xlu0 %v3225_v1  ;;  %6937 = vpow2.f32 %v2883_v26  ;;  %vm4503_vm7 = vcmp.eq.f32.partialorder %v4502_v63, 8.507059e+37 }
 0x804   :  { %v4483_v5 = vadd.f32 %v6932_v45, %v4482_v41 }
 0x805   :  { %v6936_v6 = vpop.eup %6935  ;;  %v6015_v32 = vpop.f32.mrf.mxu3 }
 0x806   :  { %v4494_v56 = vmul.f32 %v6936_v6, %v10350_v44  ;;  %v2465_v61 = vpop.xlane.xlu0 %2464  ;;  %v10384_v21 = vpop.xlane.xlu2 %3211  ;;  %v4487_v35 = vsel %vm10379_vm0, %v6932_v45, %v4483_v5  ;;  %6254 = vst.msk [vmem:[%s11492_s8 + $0x248] sm:$0xff] %vm6180_vm9, %v6015_v32  ;;  %vm4499_vm4 = vweird.f32 %v6936_v6 }
 0x807   :  { %v2667_v25 = vsub.f32 %v10151_v17, %v2465_v61  ;;  %6939 = vrcp.f32 %v10384_v21  ;;  %v4492_v23 = vsel %vm4489_vm1, %v4491_v31, %v4487_v35  ;;  %v2481_v17 = vsel %vm2192_vm3, %v10376_v22, -inf  ;;  %vm4500_vm6 = vmor %vm4498_vm5, %vm4499_vm4 }
 0x808   :  { %v4495_v39 = vsub.f32 1.0, %v4494_v56  ;;  %v5218_v57 = vmul.f32 %v10111_v53, %v4492_v23  ;;  %v2119_v43 = vpop.f32.mrf.mxu2  ;;  %v4518_v0 = vand.u32 2147483648, %v10384_v21  ;;  %v4516_v11 = vand.u32 2147483647, %v10384_v21 }
 0x809   :  { %v2885_v59 = vmul.f32 1.442695, %v2667_v25  ;;  %v10397_v38 = vpop.eup %6937  ;;  %vm4512_vm10 = vweird.f32 %v10384_v21  ;;  %v2487_v31 = vsel %vm2192_vm3, %v10437_v8, -inf  ;;  %v10465_v23 = vadd.f32 %v10256_v12, %v2119_v43 }
 0x80a   :  { %v4496_v62 = vmul.f32 %v6936_v6, %v4495_v39  ;;  %v3228_v48 = vsel %vm2192_vm3, %v10397_v38, 0.0  ;;  %5346 = vst.msk [vmem:[%s11491_s9 + $0x288] sm:$0xff] %vm2192_vm3, %v5218_v57  ;;  %6526 = vmatmul.msk.f32.gmra.mxu3 %vm2192_vm3, %v5218_v57  ;;  %v4519_v1 = vor.u32 1.1754944e-38, %v4518_v0  ;;  %vm4517_vm12 = vcmp.eq.f32.partialorder %v4516_v11, 8.507059e+37 }
 0x80b   :  { %6941 = vpow2.f32 %v2885_v59  ;;  %2482 = vmax.xlane.f32.xlu0 %v2481_v17  ;;  %3229 = vadd.xlane.f32.xlu2 %v3228_v48 }
 0x80c   :  { %v4497_v24 = vadd.f32 %v6936_v6, %v4496_v62 }
 0x80d   :  { %v6940_v55 = vpop.eup %6939  ;;  %v6018_v20 = vpop.f32.mrf.mxu3 }
 0x80e   :  { %v4501_v53 = vsel %vm4500_vm6, %v6936_v6, %v4497_v24  ;;  %v4508_v3 = vmul.f32 %v6940_v55, %v10384_v21  ;;  %v2468_v30 = vpop.xlane.xlu2 %2467  ;;  %6255 = vst.msk [vmem:[%s11492_s8 + $0x250] sm:$0xff] %vm6180_vm9, %v6018_v20  ;;  %v10419_v9 = vpop.xlane.xlu1 %3214  ;;  %vm4513_vm8 = vweird.f32 %v6940_v55 }
 0x80f   :  { %v4506_v45 = vsel %vm4503_vm7, %v4505_v13, %v4501_v53  ;;  %v2668_v36 = vsub.f32 %v10179_v51, %v2468_v30  ;;  %6943 = vrcp.f32 %v10419_v9  ;;  %vm4514_vm11 = vmor %vm4512_vm10, %vm4513_vm8  ;;  %v4532_v35 = vand.u32 2147483648, %v10419_v9 }
 0x810   :  { %v5219_v44 = vmul.f32 %v10136_v47, %v4506_v45  ;;  %v4509_v46 = vsub.f32 1.0, %v4508_v3  ;;  %v2484_v47 = vsel %vm2192_vm3, %v10411_v28, -inf  ;;  %v4530_v39 = vand.u32 2147483647, %v10419_v9 }
 0x811   :  { %v10422_v15 = vpop.eup %6941  ;;  %v2887_v50 = vmul.f32 1.442695, %v2668_v36  ;;  %vm4526_vm13 = vweird.f32 %v10419_v9  ;;  %v4533_v63 = vor.u32 1.1754944e-38, %v4532_v35  ;;  %v2490_v45 = vsel %vm2192_vm3, %v10465_v23, -inf }
 0x812   :  { %5347 = vst.msk [vmem:[%s11491_s9 + $0x290] sm:$0xff] %vm2192_vm3, %v5219_v44  ;;  %v3231_v16 = vsel %vm2192_vm3, %v10422_v15, 0.0  ;;  %v4510_v51 = vmul.f32 %v6940_v55, %v4509_v46  ;;  %6527 = vmatmul.msk.f32.gmra.mxu3 %vm2192_vm3, %v5219_v44  ;;  %vm4531_vm15 = vcmp.eq.f32.partialorder %v4530_v39, 8.507059e+37 }
 0x813   :  { %3232 = vadd.xlane.f32.xlu1 %v3231_v16  ;;  %6945 = vpow2.f32 %v2887_v50  ;;  %2485 = vmax.xlane.f32.xlu2 %v2484_v47 }
 0x814   :  { %v4511_v60 = vadd.f32 %v6940_v55, %v4510_v51 }
 0x815   :  { %v6944_v26 = vpop.eup %6943  ;;  %v6021_v41 = vpop.f32.mrf.mxu3 }
 0x816   :  { %v10440_v54 = vpop.xlane.xlu0 %3217  ;;  %v4522_v37 = vmul.f32 %v6944_v26, %v10419_v9  ;;  %6256 = vst.msk [vmem:[%s11492_s8 + $0x258] sm:$0xff] %vm6180_vm9, %v6021_v41  ;;  %v2471_v18 = vpop.xlane.xlu1 %2470  ;;  %v4515_v10 = vsel %vm4514_vm11, %v6940_v55, %v4511_v60  ;;  %vm4527_vm2 = vweird.f32 %v6944_v26 }
 0x817   :  { %6947 = vrcp.f32 %v10440_v54  ;;  %v2669_v6 = vsub.f32 %v10224_v2, %v2471_v18  ;;  %v4520_v5 = vsel %vm4517_vm12, %v4519_v1, %v4515_v10  ;;  %v2122_v2 = vpop.f32.mrf.mxu2  ;;  %vm4528_vm14 = vmor %vm4526_vm13, %vm4527_vm2  ;;  %v4546_v53 = vand.u32 2147483648, %v10440_v54  ;;  %v738_v36 = vpop.f32.mrf.mxu0 }
 0x818   :  { %v4523_v56 = vsub.f32 1.0, %v4522_v37  ;;  %v5220_v61 = vmul.f32 %v10163_v14, %v4520_v5  ;;  %v4544_v20 = vand.u32 2147483647, %v10440_v54  ;;  %vm4540_vm1 = vweird.f32 %v10440_v54 }
 0x819   :  { %v10449_v34 = vpop.eup %6945  ;;  %v2889_v32 = vmul.f32 1.442695, %v2669_v6  ;;  %v4547_v50 = vor.u32 1.1754944e-38, %v4546_v53  ;;  %v10502_v11 = vadd.f32 %v10256_v12, %v2122_v2 }
 0x81a   :  { %v3234_v21 = vsel %vm2192_vm3, %v10449_v34, 0.0  ;;  %v4524_v25 = vmul.f32 %v6944_v26, %v4523_v56  ;;  %5348 = vst.msk [vmem:[%s11491_s9 + $0x298] sm:$0xff] %vm2192_vm3, %v5220_v61  ;;  %6528 = vmatmul.msk.f32.gmra.mxu3 %vm2192_vm3, %v5220_v61  ;;  %vm4545_vm5 = vcmp.eq.f32.partialorder %v4544_v20, 8.507059e+37  ;;  %v739_v61 = vadd.f32 %v10247_v58, %v738_v36 }
 0x81b   :  { %2488 = vmax.xlane.f32.xlu1 %v2487_v31  ;;  %3235 = vadd.xlane.f32.xlu0 %v3234_v21  ;;  %6949 = vpow2.f32 %v2889_v32 }
 0x81c   :  { %v4525_v40 = vadd.f32 %v6944_v26, %v4524_v25 }
 0x81d   :  { %v6948_v14 = vpop.eup %6947  ;;  %v6024_v48 = vpop.f32.mrf.mxu3 }
 0x81e   :  { %v4536_v33 = vmul.f32 %v6948_v14, %v10440_v54  ;;  %v2474_v59 = vpop.xlane.xlu0 %2473  ;;  %v10468_v17 = vpop.xlane.xlu2 %3220  ;;  %6257 = vst.msk [vmem:[%s11492_s8 + $0x260] sm:$0xff] %vm6180_vm9, %v6024_v48  ;;  %v4529_v13 = vsel %vm4528_vm14, %v6944_v26, %v4525_v40  ;;  %vm4541_vm0 = vweird.f32 %v6948_v14 }
 0x81f   :  { %v2670_v62 = vsub.f32 %v10259_v52, %v2474_v59  ;;  %6951 = vrcp.f32 %v10468_v17  ;;  %v4534_v3 = vsel %vm4531_vm15, %v4533_v63, %v4529_v13  ;;  %vm10486_vm4 = vmor %vm4540_vm1, %vm4541_vm0  ;;  %v2124_v51 = vpop.f32.mrf.mxu2  ;;  %v4560_v18 = vand.u32 2147483648, %v10468_v17  ;;  %v740_v56 = vpop.f32.mrf.mxu0 }
 0x820   :  { %v4537_v57 = vsub.f32 1.0, %v4536_v33  ;;  %v5221_v30 = vmul.f32 %v10191_v7, %v4534_v3  ;;  %vm4554_vm7 = vweird.f32 %v10468_v17  ;;  %v741_v21 = vadd.f32 %v10247_v58, %v740_v56 }
 0x821   :  { %v2891_v24 = vmul.f32 1.442695, %v2670_v62  ;;  %v10477_v52 = vpop.eup %6949  ;;  %v10527_v25 = vadd.f32 %v10256_v12, %v2124_v51  ;;  %v4561_v35 = vor.u32 1.1754944e-38, %v4560_v18  ;;  %v878_v62 = vmul.f32 0.01, %v739_v61 }
 0x822   :  { %v4538_v55 = vmul.f32 %v6948_v14, %v4537_v57  ;;  %v3237_v44 = vsel %vm2192_vm3, %v10477_v52, 0.0  ;;  %5349 = vst.msk [vmem:[%s11491_s9 + $0x2a0] sm:$0xff] %vm2192_vm3, %v5221_v30  ;;  %6529 = vmatmul.msk.f32.gmra.mxu3 %vm2192_vm3, %v5221_v30  ;;  %v879_v13 = vmul.f32 0.01, %v741_v21 }
 0x823   :  { %6953 = vpow2.f32 %v2891_v24  ;;  %2491 = vmax.xlane.f32.xlu0 %v2490_v45  ;;  %3238 = vadd.xlane.f32.xlu2 %v3237_v44  ;;  %v2496_v3 = vsel %vm2192_vm3, %v10527_v25, -inf  ;;  %v1006_v45 = vmax.f32 %v739_v61, %v878_v62 }
 0x824   :  { %v4539_v9 = vadd.f32 %v6948_v14, %v4538_v55  ;;  %v1007_v36 = vmax.f32 %v741_v21, %v879_v13 }
 0x825   :  { %v6952_v7 = vpop.eup %6951  ;;  %v6027_v60 = vpop.f32.mrf.mxu3 }
 0x826   :  { %v10495_v16 = vpop.xlane.xlu1 %3223  ;;  %v4543_v43 = vsel %vm10486_vm4, %v6948_v14, %v4539_v9  ;;  %v4550_v0 = vmul.f32 %v6952_v7, %v10468_v17  ;;  %v2477_v47 = vpop.xlane.xlu2 %2476  ;;  %6258 = vst.msk [vmem:[%s11492_s8 + $0x268] sm:$0xff] %vm6180_vm9, %v6027_v60  ;;  %vm4555_vm6 = vweird.f32 %v6952_v7 }
 0x827   :  { %6955 = vrcp.f32 %v10495_v16  ;;  %v2671_v54 = vsub.f32 %v10284_v27, %v2477_v47  ;;  %v4548_v26 = vsel %vm4545_vm5, %v4547_v50, %v4543_v43  ;;  %v4558_v27 = vand.u32 2147483647, %v10468_v17  ;;  %vm4556_vm8 = vmor %vm4554_vm7, %vm4555_vm6  ;;  %v2127_v63 = vpop.f32.mrf.mxu2  ;;  %v1435_v60 = vpop.f32.mrf.mxu1 }
 0x828   :  { %v4551_v41 = vsub.f32 1.0, %v4550_v0  ;;  %v5222_v37 = vmul.f32 %v10227_v4, %v4548_v26  ;;  %v2493_v4 = vsel %vm2192_vm3, %v10502_v11, -inf  ;;  %v4574_v57 = vand.u32 2147483648, %v10495_v16 }
 0x829   :  { %v10505_v1 = vpop.eup %6953  ;;  %v2893_v10 = vmul.f32 1.442695, %v2671_v54  ;;  %vm4559_vm10 = vcmp.eq.f32.partialorder %v4558_v27, 8.507059e+37  ;;  %v4572_v53 = vand.u32 2147483647, %v10495_v16  ;;  %vm4568_vm12 = vweird.f32 %v10495_v16 }
 0x82a   :  { %v3240_v6 = vsel %vm2192_vm3, %v10505_v1, 0.0  ;;  %v4552_v5 = vmul.f32 %v6952_v7, %v4551_v41  ;;  %5350 = vst.msk [vmem:[%s11491_s9 + $0x2a8] sm:$0xff] %vm2192_vm3, %v5222_v37  ;;  %6530 = vmatmul.msk.f32.gmra.mxu3 %vm2192_vm3, %v5222_v37  ;;  %v4575_v30 = vor.u32 1.1754944e-38, %v4574_v57  ;;  %v10552_v44 = vadd.f32 %v10256_v12, %v2127_v63  ;;  %v10578_v41 = vld [vmem:[%s11487_s5] ss:$0 sm:$0xff] }
 0x82b   :  { %3241 = vadd.xlane.f32.xlu1 %v3240_v6  ;;  %6957 = vpow2.f32 %v2893_v10  ;;  %2494 = vmax.xlane.f32.xlu2 %v2493_v4  ;;  %vm4573_vm13 = vcmp.eq.f32.partialorder %v4572_v53, 8.507059e+37  ;;  %v1436_v37 = vadd.f32 %v10578_v41, %v1435_v60 }
 0x82c   :  { %v4553_v32 = vadd.f32 %v6952_v7, %v4552_v5  ;;  %v743_v5 = vpop.f32.mrf.mxu0 }
 0x82d   :  { %v6956_v31 = vpop.eup %6955  ;;  %v6030_v59 = vpop.f32.mrf.mxu3  ;;  %v1587_v10 = vmul.f32 0.01, %v1436_v37  ;;  %v744_v56 = vadd.f32 %v10247_v58, %v743_v5 }
 0x82e   :  { %v4564_v14 = vmul.f32 %v6956_v31, %v10495_v16  ;;  %v2480_v2 = vpop.xlane.xlu1 %2479  ;;  %v4557_v40 = vsel %vm4556_vm8, %v6952_v7, %v4553_v32  ;;  %6259 = vst.msk [vmem:[%s11492_s8 + $0x270] sm:$0xff] %vm6180_vm9, %v6030_v59  ;;  %vm4569_vm11 = vweird.f32 %v6956_v31  ;;  %v1074_v16 = vpack.c.bf16 %v1007_v36, %v1006_v45 }
 0x82f   :  { %v2672_v39 = vsub.f32 %v10303_v49, %v2480_v2  ;;  %v4562_v17 = vsel %vm4559_vm10, %v4561_v35, %v4557_v40  ;;  %vm4570_vm2 = vmor %vm4568_vm12, %vm4569_vm11  ;;  %v2129_v0 = vpop.f32.mrf.mxu2  ;;  %v1437_v26 = vpop.f32.mrf.mxu1 }
 0x830   :  { %v4565_v33 = vsub.f32 1.0, %v4564_v14  ;;  %v5223_v24 = vmul.f32 %v10270_v42, %v4562_v17  ;;  %1454 = vmatmul.bf16.gmra.mxu1 %v1074_v16  ;;  %v10571_v47 = vadd.f32 %v10256_v12, %v2129_v0  ;;  %v1438_v18 = vadd.f32 %v10578_v41, %v1437_v26 }
 0x831   :  { %v2895_v48 = vmul.f32 1.442695, %v2672_v39  ;;  %v10538_v55 = vpop.eup %6957  ;;  %v1715_v12 = vmax.f32 %v1436_v37, %v1587_v10 }
 0x832   :  { %v4566_v49 = vmul.f32 %v6956_v31, %v4565_v33  ;;  %5351 = vst.msk [vmem:[%s11491_s9 + $0x2b0] sm:$0xff] %vm2192_vm3, %v5223_v24  ;;  %v3243_v20 = vsel %vm2192_vm3, %v10538_v55, 0.0  ;;  %6531 = vmatmul.msk.f32.gmra.mxu3 %vm2192_vm3, %v5223_v24  ;;  %v2502_v54 = vsel %vm2192_vm3, %v10571_v47, -inf  ;;  %v1588_v6 = vmul.f32 0.01, %v1438_v18 }
 0x833   :  { %6959 = vpow2.f32 %v2895_v48  ;;  %2497 = vmax.xlane.f32.xlu1 %v2496_v3  ;;  %3244 = vadd.xlane.f32.xlu0 %v3243_v20 }
 0x834   :  { %v4567_v42 = vadd.f32 %v6956_v31, %v4566_v49  ;;  %v1716_v27 = vmax.f32 %v1438_v18, %v1588_v6  ;;  %v745_v32 = vpop.f32.mrf.mxu0 }
 0x835   :  { %v6033_v7 = vpop.f32.mrf.mxu3  ;;  %v746_v21 = vadd.f32 %v10247_v58, %v745_v32 }
 0x836   :  { %v4571_v9 = vsel %vm4570_vm2, %v6956_v31, %v4567_v42  ;;  %6260 = vst.msk [vmem:[%s11492_s8 + $0x278] sm:$0xff] %vm6180_vm9, %v6033_v7  ;;  %v1787_v4 = vpack.c.bf16 %v1716_v27, %v1715_v12  ;;  %v880_v31 = vmul.f32 0.01, %v744_v56 }
 0x837   :  { %v4576_v46 = vsel %vm4573_vm13, %v4575_v30, %v4571_v9  ;;  %v1440_v61 = vpop.f32.mrf.mxu1  ;;  %v881_v14 = vmul.f32 0.01, %v746_v21  ;;  %v2132_v10 = vpop.f32.mrf.mxu2 }
 0x838   :  { %v5224_v50 = vmul.f32 %v10287_v19, %v4576_v46  ;;  %v2499_v19 = vsel %vm2192_vm3, %v10552_v44, -inf  ;;  %2151 = vmatmul.bf16.gmra.mxu2 %v1787_v4  ;;  %v1008_v35 = vmax.f32 %v744_v56, %v880_v31  ;;  %v1441_v40 = vadd.f32 %v10578_v41, %v1440_v61 }
 0x839   :  { %v10555_v43 = vpop.eup %6959  ;;  %v1009_v2 = vmax.f32 %v746_v21, %v881_v14 }
 0x83a   :  { %5352 = vst.msk [vmem:[%s11491_s9 + $0x2b8] sm:$0xff] %vm2192_vm3, %v5224_v50  ;;  %v3246_v51 = vsel %vm2192_vm3, %v10555_v43, 0.0  ;;  %6532 = vmatmul.msk.f32.gmra.mxu3 %vm2192_vm3, %v5224_v50  ;;  %v1589_v62 = vmul.f32 0.01, %v1441_v40 }
 0x83b   :  { %3247 = vadd.xlane.f32.xlu2 %v3246_v51  ;;  %2500 = vmax.xlane.f32.xlu0 %v2499_v19  ;;  %v1075_v59 = vpack.c.bf16 %v1009_v2, %v1008_v35 }
 0x83c   :  { %v748_v17 = vpop.f32.mrf.mxu0  ;;  %v1717_v57 = vmax.f32 %v1441_v40, %v1589_v62 }
 0x83d   :  { %v749_v53 = vadd.f32 %v10247_v58, %v748_v17 }
 0x83f   :  { %v1442_v39 = vpop.f32.mrf.mxu1  ;;  %v882_v20 = vmul.f32 0.01, %v749_v53 }
 0x840   :  { %v1443_v33 = vadd.f32 %v10578_v41, %v1442_v39  ;;  %1459 = vmatmul.bf16.gmra.mxu1 %v1075_v59 }
 0x841   :  { %v1010_v30 = vmax.f32 %v749_v53, %v882_v20 }
 0x842   :  { %v1590_v63 = vmul.f32 0.01, %v1443_v33 }
 0x843   :  { %2503 = vmax.xlane.f32.xlu2 %v2502_v54 }
 0x844   :  { %v1718_v48 = vmax.f32 %v1443_v33, %v1590_v63  ;;  %v750_v49 = vpop.f32.mrf.mxu0 }
 0x845   :  { %v751_v3 = vadd.f32 %v10247_v58, %v750_v49 }
 0x846   :  { %v1788_v24 = vpack.c.bf16 %v1718_v48, %v1717_v57 }
 0x847   :  { %v1445_v13 = vpop.f32.mrf.mxu1  ;;  %v883_v42 = vmul.f32 0.01, %v751_v3 }
 0x848   :  { %2156 = vmatmul.bf16.gmra.mxu2 %v1788_v24  ;;  %v1446_v9 = vadd.f32 %v10578_v41, %v1445_v13 }
 0x849   :  { %v1011_v45 = vmax.f32 %v751_v3, %v883_v42  ;;  %v10606_v3 = vpop.f32.mrf.mxu2 }
 0x84a   :  { %v1591_v16 = vmul.f32 0.01, %v1446_v9 }
 0x84b   :  { %v1076_v7 = vpack.c.bf16 %v1011_v45, %v1010_v30 }
 0x84c   :  { %v753_v50 = vpop.f32.mrf.mxu0  ;;  %v1719_v19 = vmax.f32 %v1446_v9, %v1591_v16 }
 0x84d   :  { %v754_v6 = vadd.f32 %v10247_v58, %v753_v50 }
 0x84f   :  { %v1447_v36 = vpop.f32.mrf.mxu1  ;;  %v884_v61 = vmul.f32 0.01, %v754_v6 }
 0x850   :  { %v1448_v46 = vadd.f32 %v10578_v41, %v1447_v36  ;;  %1464 = vmatmul.bf16.gmra.mxu1 %v1076_v7 }
 0x851   :  { %v1012_v35 = vmax.f32 %v754_v6, %v884_v61 }
 0x852   :  { %v1592_v51 = vmul.f32 0.01, %v1448_v46 }
 0x854   :  { %v1720_v60 = vmax.f32 %v1448_v46, %v1592_v51  ;;  %v755_v37 = vpop.f32.mrf.mxu0 }
 0x855   :  { %v756_v5 = vadd.f32 %v10247_v58, %v755_v37 }
 0x856   :  { %v1789_v54 = vpack.c.bf16 %v1720_v60, %v1719_v19 }
 0x857   :  { %v1450_v26 = vpop.f32.mrf.mxu1  ;;  %v885_v31 = vmul.f32 0.01, %v756_v5 }
 0x858   :  { %2161 = vmatmul.bf16.gmra.mxu2 %v1789_v54  ;;  %v1451_v58 = vadd.f32 %v10578_v41, %v1450_v26  ;;  %v10630_v54 = vld [vmem:[%s11489_s7] ss:$0 sm:$0xff] }
 0x859   :  { %v1013_v14 = vmax.f32 %v756_v5, %v885_v31  ;;  %v10633_v26 = vadd.f32 %v10630_v54, %v2132_v10 }
 0x85a   :  { %v1593_v63 = vmul.f32 0.01, %v1451_v58 }
 0x85b   :  { %v1077_v59 = vpack.c.bf16 %v1013_v14, %v1012_v35 }
 0x85c   :  { %v1721_v7 = vmax.f32 %v1451_v58, %v1593_v63 }
 0x85f   :  { %v1452_v33 = vpop.f32.mrf.mxu1 }
 0x860   :  { %1469 = vmatmul.bf16.gmra.mxu1 %v1077_v59 }
 0x876   :  { %v3227_v0 = vpop.xlane.xlu0 %3226 }
 0x877   :  { %6961 = vrcp.f32 %v3227_v0  ;;  %v4588_v39 = vand.u32 2147483648, %v3227_v0  ;;  %v4586_v40 = vand.u32 2147483647, %v3227_v0  ;;  %vm4582_vm15 = vweird.f32 %v3227_v0 }
 0x879   :  { %v4589_v48 = vor.u32 1.1754944e-38, %v4588_v39  ;;  %vm4587_vm1 = vcmp.eq.f32.partialorder %v4586_v40, 8.507059e+37 }
 0x87d   :  { %v6962_v18 = vpop.eup %6961 }
 0x87e   :  { %v4578_v12 = vmul.f32 %v6962_v18, %v3227_v0  ;;  %v2483_v27 = vpop.xlane.xlu0 %2482  ;;  %v10592_v56 = vpop.xlane.xlu2 %3229  ;;  %vm4583_vm14 = vweird.f32 %v6962_v18 }
 0x87f   :  { %v2673_v4 = vsub.f32 %v10376_v22, %v2483_v27  ;;  %6963 = vrcp.f32 %v10592_v56  ;;  %v1453_v22 = vadd.f32 %v10578_v41, %v1452_v33  ;;  %vm10598_vm0 = vmor %vm4582_vm15, %vm4583_vm14  ;;  %v4602_v19 = vand.u32 2147483648, %v10592_v56 }
 0x880   :  { %v4579_v32 = vsub.f32 1.0, %v4578_v12  ;;  %vm4596_vm5 = vweird.f32 %v10592_v56 }
 0x881   :  { %v2897_v21 = vmul.f32 1.442695, %v2673_v4  ;;  %v1594_v53 = vmul.f32 0.01, %v1453_v22  ;;  %v4603_v12 = vor.u32 1.1754944e-38, %v4602_v19 }
 0x882   :  { %v4580_v2 = vmul.f32 %v6962_v18, %v4579_v32 }
 0x883   :  { %6965 = vpow2.f32 %v2897_v21  ;;  %v1722_v50 = vmax.f32 %v1453_v22, %v1594_v53  ;;  %v10668_v22 = vadd.f32 %v10630_v54, %v10606_v3 }
 0x884   :  { %v4581_v17 = vadd.f32 %v6962_v18, %v4580_v2 }
 0x885   :  { %v6964_v57 = vpop.eup %6963  ;;  %v6036_v24 = vpop.f32.mrf.mxu3 }
 0x886   :  { %v10602_v13 = vpop.xlane.xlu1 %3232  ;;  %v4585_v49 = vsel %vm10598_vm0, %v6962_v18, %v4581_v17  ;;  %v4592_v20 = vmul.f32 %v6964_v57, %v10592_v56  ;;  %6261 = vst.msk [vmem:[%s11492_s8 + $0x280] sm:$0xff] %vm6180_vm9, %v6036_v24  ;;  %v2486_v42 = vpop.xlane.xlu2 %2485  ;;  %vm4597_vm4 = vweird.f32 %v6964_v57 }
 0x887   :  { %6967 = vrcp.f32 %v10602_v13  ;;  %v2674_v30 = vsub.f32 %v10411_v28, %v2486_v42  ;;  %v4590_v45 = vsel %vm4587_vm1, %v4589_v48, %v4585_v49  ;;  %v1790_v28 = vpack.c.bf16 %v1722_v50, %v1721_v7  ;;  %vm10636_vm6 = vmor %vm4596_vm5, %vm4597_vm4 }
 0x888   :  { %v4593_v9 = vsub.f32 1.0, %v4592_v20  ;;  %v5225_v46 = vmul.f32 %v10363_v29, %v4590_v45  ;;  %v4600_v29 = vand.u32 2147483647, %v10592_v56  ;;  %v2137_v56 = vpop.f32.mrf.mxu2  ;;  %v4616_v32 = vand.u32 2147483648, %v10602_v13 }
 0x889   :  { %v10615_v36 = vpop.eup %6965  ;;  %v2899_v16 = vmul.f32 1.442695, %v2674_v30  ;;  %2166 = vmatmul.bf16.gmra.mxu2 %v1790_v28  ;;  %v4614_v39 = vand.u32 2147483647, %v10602_v13  ;;  %vm4610_vm10 = vweird.f32 %v10602_v13  ;;  %v10694_v7 = vadd.f32 %v10630_v54, %v2137_v56 }
 0x88a   :  { %v3249_v51 = vsel %vm2192_vm3, %v10615_v36, 0.0  ;;  %v4594_v0 = vmul.f32 %v6964_v57, %v4593_v9  ;;  %5353 = vst.msk [vmem:[%s11491_s9 + $0x2c0] sm:$0xff] %vm2192_vm3, %v5225_v46  ;;  %6533 = vmatmul.msk.f32.gmra.mxu3 %vm2192_vm3, %v5225_v46  ;;  %vm4601_vm7 = vcmp.eq.f32.partialorder %v4600_v29, 8.507059e+37  ;;  %v4617_v59 = vor.u32 1.1754944e-38, %v4616_v32 }
 0x88b   :  { %3250 = vadd.xlane.f32.xlu1 %v3249_v51  ;;  %6969 = vpow2.f32 %v2899_v16  ;;  %vm4615_vm12 = vcmp.eq.f32.partialorder %v4614_v39, 8.507059e+37 }
 0x88c   :  { %v4595_v37 = vadd.f32 %v6964_v57, %v4594_v0 }
 0x88d   :  { %v6968_v60 = vpop.eup %6967  ;;  %v6039_v27 = vpop.f32.mrf.mxu3 }
 0x88e   :  { %v4606_v6 = vmul.f32 %v6968_v60, %v10602_v13  ;;  %v2489_v5 = vpop.xlane.xlu1 %2488  ;;  %v10642_v61 = vpop.xlane.xlu0 %3235  ;;  %v4599_v10 = vsel %vm10636_vm6, %v6964_v57, %v4595_v37  ;;  %6262 = vst.msk [vmem:[%s11492_s8 + $0x288] sm:$0xff] %vm6180_vm9, %v6039_v27  ;;  %vm4611_vm8 = vweird.f32 %v6968_v60 }
 0x88f   :  { %v2675_v4 = vsub.f32 %v10437_v8, %v2489_v5  ;;  %6971 = vrcp.f32 %v10642_v61  ;;  %v4604_v35 = vsel %vm4601_vm7, %v4603_v12, %v4599_v10  ;;  %v2505_v8 = vsel %vm2192_vm3, %v10633_v26, -inf  ;;  %vm4612_vm11 = vmor %vm4610_vm10, %vm4611_vm8 }
 0x890   :  { %v4607_v31 = vsub.f32 1.0, %v4606_v6  ;;  %v5226_v40 = vmul.f32 %v10397_v38, %v4604_v35  ;;  %v2139_v30 = vpop.f32.mrf.mxu2  ;;  %v4628_v9 = vand.u32 2147483647, %v10642_v61  ;;  %vm4624_vm13 = vweird.f32 %v10642_v61 }
 0x891   :  { %v2901_v21 = vmul.f32 1.442695, %v2675_v4  ;;  %v10654_v14 = vpop.eup %6969  ;;  %v2511_v12 = vsel %vm2192_vm3, %v10694_v7, -inf  ;;  %v10722_v35 = vadd.f32 %v10630_v54, %v2139_v30 }
 0x892   :  { %v4608_v2 = vmul.f32 %v6968_v60, %v4607_v31  ;;  %v3252_v58 = vsel %vm2192_vm3, %v10654_v14, 0.0  ;;  %5354 = vst.msk [vmem:[%s11491_s9 + $0x2c8] sm:$0xff] %vm2192_vm3, %v5226_v40  ;;  %6534 = vmatmul.msk.f32.gmra.mxu3 %vm2192_vm3, %v5226_v40  ;;  %vm4629_vm15 = vcmp.eq.f32.partialorder %v4628_v9, 8.507059e+37 }
 0x893   :  { %6973 = vpow2.f32 %v2901_v21  ;;  %2506 = vmax.xlane.f32.xlu1 %v2505_v8  ;;  %3253 = vadd.xlane.f32.xlu0 %v3252_v58 }
 0x894   :  { %v4609_v33 = vadd.f32 %v6968_v60, %v4608_v2 }
 0x895   :  { %v6972_v17 = vpop.eup %6971  ;;  %v6042_v63 = vpop.f32.mrf.mxu3 }
 0x896   :  { %v4613_v38 = vsel %vm4612_vm11, %v6968_v60, %v4609_v33  ;;  %v4620_v62 = vmul.f32 %v6972_v17, %v10642_v61  ;;  %v2492_v57 = vpop.xlane.xlu0 %2491  ;;  %6263 = vst.msk [vmem:[%s11492_s8 + $0x290] sm:$0xff] %vm6180_vm9, %v6042_v63  ;;  %v10675_v24 = vpop.xlane.xlu2 %3238  ;;  %vm4625_vm2 = vweird.f32 %v6972_v17 }
 0x897   :  { %v4618_v48 = vsel %vm4615_vm12, %v4617_v59, %v4613_v38  ;;  %v2676_v13 = vsub.f32 %v10465_v23, %v2492_v57  ;;  %6975 = vrcp.f32 %v10675_v24  ;;  %v4630_v23 = vand.u32 2147483648, %v10642_v61  ;;  %vm4626_vm14 = vmor %vm4624_vm13, %vm4625_vm2 }
 0x898   :  { %v5227_v49 = vmul.f32 %v10422_v15, %v4618_v48  ;;  %v4621_v3 = vsub.f32 1.0, %v4620_v62  ;;  %v2508_v15 = vsel %vm2192_vm3, %v10668_v22, -inf  ;;  %v4644_v10 = vand.u32 2147483648, %v10675_v24 }
 0x899   :  { %v10679_v53 = vpop.eup %6973  ;;  %v2903_v20 = vmul.f32 1.442695, %v2676_v13  ;;  %v4631_v51 = vor.u32 1.1754944e-38, %v4630_v23  ;;  %v4642_v31 = vand.u32 2147483647, %v10675_v24  ;;  %vm4638_vm1 = vweird.f32 %v10675_v24 }
 0x89a   :  { %5355 = vst.msk [vmem:[%s11491_s9 + $0x2d0] sm:$0xff] %vm2192_vm3, %v5227_v49  ;;  %v3255_v42 = vsel %vm2192_vm3, %v10679_v53, 0.0  ;;  %v4622_v45 = vmul.f32 %v6972_v17, %v4621_v3  ;;  %6535 = vmatmul.msk.f32.gmra.mxu3 %vm2192_vm3, %v5227_v49  ;;  %v4645_v39 = vor.u32 1.1754944e-38, %v4644_v10  ;;  %v2514_v48 = vsel %vm2192_vm3, %v10722_v35, -inf }
 0x89b   :  { %3256 = vadd.xlane.f32.xlu2 %v3255_v42  ;;  %6977 = vpow2.f32 %v2903_v20  ;;  %2509 = vmax.xlane.f32.xlu0 %v2508_v15  ;;  %vm4643_vm5 = vcmp.eq.f32.partialorder %v4642_v31, 8.507059e+37 }
 0x89c   :  { %v4623_v46 = vadd.f32 %v6972_v17, %v4622_v45 }
 0x89d   :  { %v6976_v16 = vpop.eup %6975  ;;  %v6045_v0 = vpop.f32.mrf.mxu3 }
 0x89e   :  { %v10697_v50 = vpop.xlane.xlu1 %3241  ;;  %v4634_v19 = vmul.f32 %v6976_v16, %v10675_v24  ;;  %6264 = vst.msk [vmem:[%s11492_s8 + $0x298] sm:$0xff] %vm6180_vm9, %v6045_v0  ;;  %v2495_v28 = vpop.xlane.xlu2 %2494  ;;  %v4627_v29 = vsel %vm4626_vm14, %v6972_v17, %v4623_v46  ;;  %vm4639_vm0 = vweird.f32 %v6976_v16 }
 0x89f   :  { %6979 = vrcp.f32 %v10697_v50  ;;  %v2677_v60 = vsub.f32 %v10502_v11, %v2495_v28  ;;  %v4632_v37 = vsel %vm4629_vm15, %v4631_v51, %v4627_v29  ;;  %v2142_v11 = vpop.f32.mrf.mxu2  ;;  %vm4640_vm4 = vmor %vm4638_vm1, %vm4639_vm0  ;;  %v4656_v63 = vand.u32 2147483647, %v10697_v50 }
 0x8a0   :  { %v4635_v6 = vsub.f32 1.0, %v4634_v19  ;;  %v5228_v5 = vmul.f32 %v10449_v34, %v4632_v37  ;;  %vm4652_vm7 = vweird.f32 %v10697_v50  ;;  %v10756_v15 = vadd.f32 %v10630_v54, %v2142_v11 }
 0x8a1   :  { %v10706_v18 = vpop.eup %6977  ;;  %v2905_v27 = vmul.f32 1.442695, %v2677_v60  ;;  %vm4657_vm10 = vcmp.eq.f32.partialorder %v4656_v63, 8.507059e+37 }
 0x8a2   :  { %v3258_v4 = vsel %vm2192_vm3, %v10706_v18, 0.0  ;;  %v4636_v61 = vmul.f32 %v6976_v16, %v4635_v6  ;;  %5356 = vst.msk [vmem:[%s11491_s9 + $0x2d8] sm:$0xff] %vm2192_vm3, %v5228_v5  ;;  %6536 = vmatmul.msk.f32.gmra.mxu3 %vm2192_vm3, %v5228_v5 }
 0x8a3   :  { %2512 = vmax.xlane.f32.xlu2 %v2511_v12  ;;  %3259 = vadd.xlane.f32.xlu1 %v3258_v4  ;;  %6981 = vpow2.f32 %v2905_v27 }
 0x8a4   :  { %v4637_v56 = vadd.f32 %v6976_v16, %v4636_v61 }
 0x8a5   :  { %v6980_v34 = vpop.eup %6979  ;;  %v6048_v58 = vpop.f32.mrf.mxu3 }
 0x8a6   :  { %v4648_v32 = vmul.f32 %v6980_v34, %v10697_v50  ;;  %v2498_v21 = vpop.xlane.xlu1 %2497  ;;  %v10726_v2 = vpop.xlane.xlu0 %3244  ;;  %6265 = vst.msk [vmem:[%s11492_s8 + $0x2a0] sm:$0xff] %vm6180_vm9, %v6048_v58  ;;  %v4641_v59 = vsel %vm4640_vm4, %v6976_v16, %v4637_v56  ;;  %vm4653_vm6 = vweird.f32 %v6980_v34 }
 0x8a7   :  { %v2678_v8 = vsub.f32 %v10527_v25, %v2498_v21  ;;  %6983 = vrcp.f32 %v10726_v2  ;;  %v4658_v25 = vand.u32 2147483648, %v10697_v50  ;;  %v4646_v38 = vsel %vm4643_vm5, %v4645_v39, %v4641_v59  ;;  %vm10743_vm8 = vmor %vm4652_vm7, %vm4653_vm6  ;;  %v2144_v30 = vpop.f32.mrf.mxu2 }
 0x8a8   :  { %v4649_v40 = vsub.f32 1.0, %v4648_v32  ;;  %v5229_v57 = vmul.f32 %v10477_v52, %v4646_v38  ;;  %v4672_v19 = vand.u32 2147483648, %v10726_v2  ;;  %vm4666_vm12 = vweird.f32 %v10726_v2 }
 0x8a9   :  { %v2907_v33 = vmul.f32 1.442695, %v2678_v8  ;;  %v10734_v62 = vpop.eup %6981  ;;  %v4659_v3 = vor.u32 1.1754944e-38, %v4658_v25  ;;  %v10779_v5 = vadd.f32 %v10630_v54, %v2144_v30 }
 0x8aa   :  { %v4650_v17 = vmul.f32 %v6980_v34, %v4649_v40  ;;  %v3261_v13 = vsel %vm2192_vm3, %v10734_v62, 0.0  ;;  %5357 = vst.msk [vmem:[%s11491_s9 + $0x2e0] sm:$0xff] %vm2192_vm3, %v5229_v57  ;;  %6537 = vmatmul.msk.f32.gmra.mxu3 %vm2192_vm3, %v5229_v57  ;;  %v4673_v12 = vor.u32 1.1754944e-38, %v4672_v19 }
 0x8ab   :  { %6985 = vpow2.f32 %v2907_v33  ;;  %2515 = vmax.xlane.f32.xlu1 %v2514_v48  ;;  %3262 = vadd.xlane.f32.xlu0 %v3261_v13 }
 0x8ac   :  { %v4651_v24 = vadd.f32 %v6980_v34, %v4650_v17 }
 0x8ad   :  { %v6984_v52 = vpop.eup %6983  ;;  %v6051_v9 = vpop.f32.mrf.mxu3 }
 0x8ae   :  { %v3248_v20 = vpop.xlane.xlu2 %3247  ;;  %v4655_v42 = vsel %vm10743_vm8, %v6980_v34, %v4651_v24  ;;  %v4662_v45 = vmul.f32 %v6984_v52, %v10726_v2  ;;  %v2501_v23 = vpop.xlane.xlu0 %2500  ;;  %6266 = vst.msk [vmem:[%s11492_s8 + $0x2a8] sm:$0xff] %vm6180_vm9, %v6051_v9  ;;  %vm4667_vm11 = vweird.f32 %v6984_v52 }
 0x8af   :  { %6987 = vrcp.f32 %v3248_v20  ;;  %v2679_v46 = vsub.f32 %v10552_v44, %v2501_v23  ;;  %v4660_v50 = vsel %vm4657_vm10, %v4659_v3, %v4655_v42  ;;  %v4670_v44 = vand.u32 2147483647, %v10726_v2  ;;  %vm4668_vm2 = vmor %vm4666_vm12, %vm4667_vm11  ;;  %v2147_v56 = vpop.f32.mrf.mxu2  ;;  %v1455_v49 = vpop.f32.mrf.mxu1 }
 0x8b0   :  { %v4663_v51 = vsub.f32 1.0, %v4662_v45  ;;  %v5230_v0 = vmul.f32 %v10505_v1, %v4660_v50  ;;  %v2517_v1 = vsel %vm2192_vm3, %v10756_v15, -inf  ;;  %v4686_v32 = vand.u32 2147483648, %v3248_v20 }
 0x8b1   :  { %v10759_v16 = vpop.eup %6985  ;;  %v2909_v28 = vmul.f32 1.442695, %v2679_v46  ;;  %vm4671_vm13 = vcmp.eq.f32.partialorder %v4670_v44, 8.507059e+37  ;;  %v4684_v40 = vand.u32 2147483647, %v3248_v20  ;;  %vm4680_vm15 = vweird.f32 %v3248_v20 }
 0x8b2   :  { %v3264_v29 = vsel %vm2192_vm3, %v10759_v16, 0.0  ;;  %v4664_v60 = vmul.f32 %v6984_v52, %v4663_v51  ;;  %5358 = vst.msk [vmem:[%s11491_s9 + $0x2e8] sm:$0xff] %vm2192_vm3, %v5230_v0  ;;  %6538 = vmatmul.msk.f32.gmra.mxu3 %vm2192_vm3, %v5230_v0  ;;  %v10799_v17 = vadd.f32 %v10630_v54, %v2147_v56 }
 0x8b3   :  { %3265 = vadd.xlane.f32.xlu2 %v3264_v29  ;;  %6989 = vpow2.f32 %v2909_v28  ;;  %2518 = vmax.xlane.f32.xlu0 %v2517_v1  ;;  %vm4685_vm1 = vcmp.eq.f32.partialorder %v4684_v40, 8.507059e+37 }
 0x8b4   :  { %v4665_v6 = vadd.f32 %v6984_v52, %v4664_v60 }
 0x8b5   :  { %v6988_v37 = vpop.eup %6987  ;;  %v6054_v11 = vpop.f32.mrf.mxu3 }
 0x8b6   :  { %v4676_v27 = vmul.f32 %v6988_v37, %v3248_v20  ;;  %v2504_v4 = vpop.xlane.xlu2 %2503  ;;  %v4669_v10 = vsel %vm4668_vm2, %v6984_v52, %v4665_v6  ;;  %6267 = vst.msk [vmem:[%s11492_s8 + $0x2b0] sm:$0xff] %vm6180_vm9, %v6054_v11  ;;  %vm4681_vm14 = vweird.f32 %v6988_v37  ;;  %v1456_v20 = vadd.f32 %v10578_v41, %v1455_v49 }
 0x8b7   :  { %v2680_v61 = vsub.f32 %v10571_v47, %v2504_v4  ;;  %v4674_v31 = vsel %vm4671_vm13, %v4673_v12, %v4669_v10  ;;  %v2520_v47 = vsel %vm2192_vm3, %v10779_v5, -inf  ;;  %vm4682_vm0 = vmor %vm4680_vm15, %vm4681_vm14  ;;  %v2149_v24 = vpop.f32.mrf.mxu2  ;;  %v1457_v3 = vpop.f32.mrf.mxu1 }
 0x8b8   :  { %v4677_v34 = vsub.f32 1.0, %v4676_v27  ;;  %v5231_v8 = vmul.f32 %v10538_v55, %v4674_v31  ;;  %v4687_v55 = vor.u32 1.1754944e-38, %v4686_v32  ;;  %v10818_v13 = vadd.f32 %v10630_v54, %v2149_v24 }
 0x8b9   :  { %v2911_v21 = vmul.f32 1.442695, %v2680_v61  ;;  %v10787_v2 = vpop.eup %6989  ;;  %v1458_v42 = vadd.f32 %v10578_v41, %v1457_v3  ;;  %v1595_v30 = vmul.f32 0.01, %v1456_v20 }
 0x8ba   :  { %v4678_v39 = vmul.f32 %v6988_v37, %v4677_v34  ;;  %5359 = vst.msk [vmem:[%s11491_s9 + $0x2f0] sm:$0xff] %vm2192_vm3, %v5231_v8  ;;  %v3267_v58 = vsel %vm2192_vm3, %v10787_v2, 0.0  ;;  %6539 = vmatmul.msk.f32.gmra.mxu3 %vm2192_vm3, %v5231_v8  ;;  %v2526_v52 = vsel %vm2192_vm3, %v10818_v13, -inf }
 0x8bb   :  { %6991 = vpow2.f32 %v2911_v21  ;;  %2521 = vmax.xlane.f32.xlu2 %v2520_v47  ;;  %3268 = vadd.xlane.f32.xlu1 %v3267_v58  ;;  %v1596_v45 = vmul.f32 0.01, %v1458_v42  ;;  %v1723_v23 = vmax.f32 %v1456_v20, %v1595_v30 }
 0x8bc   :  { %v4679_v33 = vadd.f32 %v6988_v37, %v4678_v39 }
 0x8bd   :  { %v6057_v38 = vpop.f32.mrf.mxu3  ;;  %v1724_v9 = vmax.f32 %v1458_v42, %v1596_v45 }
 0x8be   :  { %v4683_v59 = vsel %vm4682_vm0, %v6988_v37, %v4679_v33  ;;  %6268 = vst.msk [vmem:[%s11492_s8 + $0x2b8] sm:$0xff] %vm6180_vm9, %v6057_v38 }
 0x8bf   :  { %v4688_v25 = vsel %vm4685_vm1, %v4687_v55, %v4683_v59  ;;  %v1791_v46 = vpack.c.bf16 %v1724_v9, %v1723_v23  ;;  %v1460_v50 = vpop.f32.mrf.mxu1  ;;  %v2152_v21 = vpop.f32.mrf.mxu2 }
 0x8c0   :  { %v5232_v63 = vmul.f32 %v10555_v43, %v4688_v25  ;;  %v2523_v43 = vsel %vm2192_vm3, %v10799_v17, -inf  ;;  %v1461_v0 = vadd.f32 %v10578_v41, %v1460_v50 }
 0x8c1   :  { %v10802_v57 = vpop.eup %6991  ;;  %2171 = vmatmul.bf16.gmra.mxu2 %v1791_v46 }
 0x8c2   :  { %5360 = vst.msk [vmem:[%s11491_s9 + $0x2f8] sm:$0xff] %vm2192_vm3, %v5232_v63  ;;  %v3270_v48 = vsel %vm2192_vm3, %v10802_v57, 0.0  ;;  %6540 = vmatmul.msk.f32.gmra.mxu3 %vm2192_vm3, %v5232_v63  ;;  %v1597_v28 = vmul.f32 0.01, %v1461_v0 }
 0x8c3   :  { %3271 = vadd.xlane.f32.xlu0 %v3270_v48  ;;  %2524 = vmax.xlane.f32.xlu1 %v2523_v43 }
 0x8c4   :  { %v1725_v60 = vmax.f32 %v1461_v0, %v1597_v28 }
 0x8c7   :  { %v1462_v51 = vpop.f32.mrf.mxu1  ;;  %v10839_v45 = vpop.f32.mrf.mxu2 }
 0x8c8   :  { %v1463_v19 = vadd.f32 %v10578_v41, %v1462_v51 }
 0x8ca   :  { %v1598_v29 = vmul.f32 0.01, %v1463_v19 }
 0x8cb   :  { %2527 = vmax.xlane.f32.xlu0 %v2526_v52 }
 0x8cc   :  { %v1726_v44 = vmax.f32 %v1463_v19, %v1598_v29 }
 0x8ce   :  { %v1792_v1 = vpack.c.bf16 %v1726_v44, %v1725_v60 }
 0x8cf   :  { %v1465_v37 = vpop.f32.mrf.mxu1 }
 0x8d0   :  { %v1466_v12 = vadd.f32 %v10578_v41, %v1465_v37 }
 0x8d1   :  { %2176 = vmatmul.bf16.gmra.mxu2 %v1792_v1 }
 0x8d2   :  { %v1599_v4 = vmul.f32 0.01, %v1466_v12 }
 0x8d4   :  { %v1727_v34 = vmax.f32 %v1466_v12, %v1599_v4 }
 0x8d7   :  { %v1467_v6 = vpop.f32.mrf.mxu1 }
 0x8d8   :  { %v1468_v27 = vadd.f32 %v10578_v41, %v1467_v6  ;;  %v10858_v6 = vadd.f32 %v10630_v54, %v2152_v21  ;;  %v2157_v21 = vpop.f32.mrf.mxu2 }
 0x8da   :  { %v1600_v61 = vmul.f32 0.01, %v1468_v27 }
 0x8dc   :  { %v1728_v11 = vmax.f32 %v1468_v27, %v1600_v61 }
 0x8de   :  { %v1793_v56 = vpack.c.bf16 %v1728_v11, %v1727_v34 }
 0x8df   :  { %v1470_v31 = vpop.f32.mrf.mxu1 }
 0x8e0   :  { %v1471_v63 = vadd.f32 %v10578_v41, %v1470_v31 }
 0x8e1   :  { %2181 = vmatmul.bf16.gmra.mxu2 %v1793_v56 }
 0x8e7   :  { %v1472_v25 = vpop.f32.mrf.mxu1 }
 0x8e8   :  { %v1473_v48 = vadd.f32 %v10578_v41, %v1472_v25 }
 0x8ea   :  { %v1602_v49 = vmul.f32 0.01, %v1473_v48 }
 0x8ec   :  { %v1730_v28 = vmax.f32 %v1473_v48, %v1602_v49  ;;  %v10892_v48 = vadd.f32 %v10630_v54, %v10839_v45 }
 0x8fe   :  { %v3251_v10 = vpop.xlane.xlu1 %3250 }
 0x8ff   :  { %6993 = vrcp.f32 %v3251_v10  ;;  %v4700_v59 = vand.u32 2147483648, %v3251_v10  ;;  %v4698_v38 = vand.u32 2147483647, %v3251_v10  ;;  %vm4694_vm5 = vweird.f32 %v3251_v10 }
 0x901   :  { %v4701_v3 = vor.u32 1.1754944e-38, %v4700_v59  ;;  %vm4699_vm7 = vcmp.eq.f32.partialorder %v4698_v38, 8.507059e+37 }
 0x905   :  { %v6994_v32 = vpop.eup %6993 }
 0x906   :  { %v4690_v8 = vmul.f32 %v6994_v32, %v3251_v10  ;;  %v2507_v39 = vpop.xlane.xlu1 %2506  ;;  %v3254_v47 = vpop.xlane.xlu0 %3253  ;;  %vm4695_vm4 = vweird.f32 %v6994_v32 }
 0x907   :  { %v2681_v40 = vsub.f32 %v10633_v26, %v2507_v39  ;;  %6995 = vrcp.f32 %v3254_v47  ;;  %vm10831_vm6 = vmor %vm4694_vm5, %vm4695_vm4  ;;  %v1601_v26 = vmul.f32 0.01, %v1471_v63  ;;  %v4714_v1 = vand.u32 2147483648, %v3254_v47 }
 0x908   :  { %v4691_v58 = vsub.f32 1.0, %v4690_v8  ;;  %v4712_v37 = vand.u32 2147483647, %v3254_v47  ;;  %vm4708_vm10 = vweird.f32 %v3254_v47 }
 0x909   :  { %v2913_v33 = vmul.f32 1.442695, %v2681_v40  ;;  %v1729_v19 = vmax.f32 %v1471_v63, %v1601_v26  ;;  %v4715_v10 = vor.u32 1.1754944e-38, %v4714_v1 }
 0x90a   :  { %v4692_v55 = vmul.f32 %v6994_v32, %v4691_v58  ;;  %vm4713_vm12 = vcmp.eq.f32.partialorder %v4712_v37, 8.507059e+37 }
 0x90b   :  { %6997 = vpow2.f32 %v2913_v33 }
 0x90c   :  { %v4693_v24 = vadd.f32 %v6994_v32, %v4692_v55 }
 0x90d   :  { %v6996_v52 = vpop.eup %6995  ;;  %v6060_v20 = vpop.f32.mrf.mxu3 }
 0x90e   :  { %v10835_v42 = vpop.xlane.xlu2 %3256  ;;  %v4697_v30 = vsel %vm10831_vm6, %v6994_v32, %v4693_v24  ;;  %v4704_v41 = vmul.f32 %v6996_v52, %v3254_v47  ;;  %6269 = vst.msk [vmem:[%s11492_s8 + $0x2c0] sm:$0xff] %vm6180_vm9, %v6060_v20  ;;  %v2510_v23 = vpop.xlane.xlu0 %2509  ;;  %vm4709_vm8 = vweird.f32 %v6996_v52 }
 0x90f   :  { %6999 = vrcp.f32 %v10835_v42  ;;  %v2682_v9 = vsub.f32 %v10668_v22, %v2510_v23  ;;  %v4702_v46 = vsel %vm4699_vm7, %v4701_v3, %v4697_v30  ;;  %v1794_v22 = vpack.c.bf16 %v1730_v28, %v1729_v19  ;;  %vm10860_vm11 = vmor %vm4708_vm10, %vm4709_vm8  ;;  %v2159_v23 = vpop.f32.mrf.mxu2 }
 0x910   :  { %v4705_v51 = vsub.f32 1.0, %v4704_v41  ;;  %v5233_v0 = vmul.f32 %v10615_v36, %v4702_v46  ;;  %v4728_v8 = vand.u32 2147483648, %v10835_v42  ;;  %v4726_v33 = vand.u32 2147483647, %v10835_v42 }
 0x911   :  { %v10847_v50 = vpop.eup %6997  ;;  %v2915_v29 = vmul.f32 1.442695, %v2682_v9  ;;  %2186 = vmatmul.bf16.gmra.mxu2 %v1794_v22  ;;  %vm4722_vm13 = vweird.f32 %v10835_v42 }
 0x912   :  { %v3273_v60 = vsel %vm2192_vm3, %v10847_v50, 0.0  ;;  %v4706_v44 = vmul.f32 %v6996_v52, %v4705_v51  ;;  %5361 = vst.msk [vmem:[%s11491_s9 + $0x300] sm:$0xff] %vm2192_vm3, %v5233_v0  ;;  %6541 = vmatmul.msk.f32.gmra.mxu3 %vm2192_vm3, %v5233_v0  ;;  %v4729_v38 = vor.u32 1.1754944e-38, %v4728_v8  ;;  %vm4727_vm15 = vcmp.eq.f32.partialorder %v4726_v33, 8.507059e+37 }
 0x913   :  { %3274 = vadd.xlane.f32.xlu2 %v3273_v60  ;;  %7001 = vpow2.f32 %v2915_v29  ;;  %v10918_v0 = vadd.f32 %v10630_v54, %v2157_v21 }
 0x914   :  { %v4707_v12 = vadd.f32 %v6996_v52, %v4706_v44 }
 0x915   :  { %v7000_v36 = vpop.eup %6999  ;;  %v6063_v34 = vpop.f32.mrf.mxu3 }
 0x916   :  { %v4718_v4 = vmul.f32 %v7000_v36, %v10835_v42  ;;  %v2513_v61 = vpop.xlane.xlu2 %2512  ;;  %v10866_v31 = vpop.xlane.xlu1 %3259  ;;  %v4711_v56 = vsel %vm10860_vm11, %v6996_v52, %v4707_v12  ;;  %6270 = vst.msk [vmem:[%s11492_s8 + $0x2c8] sm:$0xff] %vm6180_vm9, %v6063_v34  ;;  %vm4723_vm2 = vweird.f32 %v7000_v36 }
 0x917   :  { %v2683_v11 = vsub.f32 %v10694_v7, %v2513_v61  ;;  %7003 = vrcp.f32 %v10866_v31  ;;  %v4716_v40 = vsel %vm4713_vm12, %v4715_v10, %v4711_v56  ;;  %v2529_v7 = vsel %vm2192_vm3, %v10858_v6, -inf  ;;  %vm4724_vm14 = vmor %vm4722_vm13, %vm4723_vm2 }
 0x918   :  { %v4719_v32 = vsub.f32 1.0, %v4718_v4  ;;  %v5234_v55 = vmul.f32 %v10654_v14, %v4716_v40  ;;  %v4742_v9 = vand.u32 2147483648, %v10866_v31  ;;  %v4740_v46 = vand.u32 2147483647, %v10866_v31 }
 0x919   :  { %v2917_v39 = vmul.f32 1.442695, %v2683_v11  ;;  %v10878_v47 = vpop.eup %7001  ;;  %vm4736_vm1 = vweird.f32 %v10866_v31  ;;  %v2535_v61 = vsel %vm2192_vm3, %v10918_v0, -inf }
 0x91a   :  { %v4720_v58 = vmul.f32 %v7000_v36, %v4719_v32  ;;  %v3276_v59 = vsel %vm2192_vm3, %v10878_v47, 0.0  ;;  %5362 = vst.msk [vmem:[%s11491_s9 + $0x308] sm:$0xff] %vm2192_vm3, %v5234_v55  ;;  %6542 = vmatmul.msk.f32.gmra.mxu3 %vm2192_vm3, %v5234_v55  ;;  %v4743_v29 = vor.u32 1.1754944e-38, %v4742_v9  ;;  %vm4741_vm5 = vcmp.eq.f32.partialorder %v4740_v46, 8.507059e+37 }
 0x91b   :  { %7005 = vpow2.f32 %v2917_v39  ;;  %2530 = vmax.xlane.f32.xlu2 %v2529_v7  ;;  %3277 = vadd.xlane.f32.xlu1 %v3276_v59  ;;  %v10946_v39 = vadd.f32 %v10630_v54, %v2159_v23 }
 0x91c   :  { %v4721_v25 = vadd.f32 %v7000_v36, %v4720_v58 }
 0x91d   :  { %v7004_v63 = vpop.eup %7003  ;;  %v6066_v43 = vpop.f32.mrf.mxu3 }
 0x91e   :  { %v4725_v14 = vsel %vm4724_vm14, %v7000_v36, %v4721_v25  ;;  %v4732_v24 = vmul.f32 %v7004_v63, %v10866_v31  ;;  %v2516_v26 = vpop.xlane.xlu1 %2515  ;;  %6271 = vst.msk [vmem:[%s11492_s8 + $0x2d0] sm:$0xff] %vm6180_vm9, %v6066_v43  ;;  %v10900_v3 = vpop.xlane.xlu0 %3262  ;;  %vm4737_vm0 = vweird.f32 %v7004_v63 }
 0x91f   :  { %v4730_v49 = vsel %vm4727_vm15, %v4729_v38, %v4725_v14  ;;  %v2684_v52 = vsub.f32 %v10722_v35, %v2516_v26  ;;  %7007 = vrcp.f32 %v10900_v3  ;;  %vm4738_vm4 = vmor %vm4736_vm1, %vm4737_vm0  ;;  %v4756_v31 = vand.u32 2147483648, %v10900_v3 }
 0x920   :  { %v5235_v20 = vmul.f32 %v10679_v53, %v4730_v49  ;;  %v4733_v30 = vsub.f32 1.0, %v4732_v24  ;;  %v2532_v53 = vsel %vm2192_vm3, %v10892_v48, -inf  ;;  %v4754_v56 = vand.u32 2147483647, %v10900_v3 }
 0x921   :  { %v10903_v42 = vpop.eup %7005  ;;  %v2919_v45 = vmul.f32 1.442695, %v2684_v52  ;;  %vm4750_vm7 = vweird.f32 %v10900_v3  ;;  %v4757_v58 = vor.u32 1.1754944e-38, %v4756_v31  ;;  %v2538_v26 = vsel %vm2192_vm3, %v10946_v39, -inf }
 0x922   :  { %5363 = vst.msk [vmem:[%s11491_s9 + $0x310] sm:$0xff] %vm2192_vm3, %v5235_v20  ;;  %v3279_v41 = vsel %vm2192_vm3, %v10903_v42, 0.0  ;;  %v4734_v35 = vmul.f32 %v7004_v63, %v4733_v30  ;;  %6543 = vmatmul.msk.f32.gmra.mxu3 %vm2192_vm3, %v5235_v20  ;;  %vm4755_vm10 = vcmp.eq.f32.partialorder %v4754_v56, 8.507059e+37 }
 0x923   :  { %3280 = vadd.xlane.f32.xlu0 %v3279_v41  ;;  %7009 = vpow2.f32 %v2919_v45  ;;  %2533 = vmax.xlane.f32.xlu1 %v2532_v53 }
 0x924   :  { %v4735_v51 = vadd.f32 %v7004_v63, %v4734_v35 }
 0x925   :  { %v7008_v28 = vpop.eup %7007  ;;  %v6069_v60 = vpop.f32.mrf.mxu3 }
 0x926   :  { %v10921_v19 = vpop.xlane.xlu2 %3265  ;;  %v4746_v44 = vmul.f32 %v7008_v28, %v10900_v3  ;;  %6272 = vst.msk [vmem:[%s11492_s8 + $0x2d8] sm:$0xff] %vm6180_vm9, %v6069_v60  ;;  %v2519_v1 = vpop.xlane.xlu0 %2518  ;;  %v4739_v22 = vsel %vm4738_vm4, %v7004_v63, %v4735_v51  ;;  %vm4751_vm6 = vweird.f32 %v7008_v28 }
 0x927   :  { %7011 = vrcp.f32 %v10921_v19  ;;  %v2685_v37 = vsub.f32 %v10756_v15, %v2519_v1  ;;  %v4744_v36 = vsel %vm4741_vm5, %v4743_v29, %v4739_v22  ;;  %v2162_v15 = vpop.f32.mrf.mxu2  ;;  %vm4752_vm8 = vmor %vm4750_vm7, %vm4751_vm6  ;;  %v4768_v24 = vand.u32 2147483647, %v10921_v19 }
 0x928   :  { %v4747_v27 = vsub.f32 1.0, %v4746_v44  ;;  %v5236_v4 = vmul.f32 %v10706_v18, %v4744_v36  ;;  %vm4764_vm12 = vweird.f32 %v10921_v19  ;;  %v10980_v9 = vadd.f32 %v10630_v54, %v2162_v15 }
 0x929   :  { %v10930_v12 = vpop.eup %7009  ;;  %v2921_v10 = vmul.f32 1.442695, %v2685_v37  ;;  %vm4769_vm13 = vcmp.eq.f32.partialorder %v4768_v24, 8.507059e+37 }
 0x92a   :  { %v3282_v34 = vsel %vm2192_vm3, %v10930_v12, 0.0  ;;  %v4748_v11 = vmul.f32 %v7008_v28, %v4747_v27  ;;  %5364 = vst.msk [vmem:[%s11491_s9 + $0x318] sm:$0xff] %vm2192_vm3, %v5236_v4  ;;  %6544 = vmatmul.msk.f32.gmra.mxu3 %vm2192_vm3, %v5236_v4 }
 0x92b   :  { %2536 = vmax.xlane.f32.xlu0 %v2535_v61  ;;  %3283 = vadd.xlane.f32.xlu2 %v3282_v34  ;;  %7013 = vpow2.f32 %v2921_v10 }
 0x92c   :  { %v4749_v32 = vadd.f32 %v7008_v28, %v4748_v11 }
 0x92d   :  { %v7012_v18 = vpop.eup %7011  ;;  %v6072_v55 = vpop.f32.mrf.mxu3 }
 0x92e   :  { %v4760_v21 = vmul.f32 %v7012_v18, %v10921_v19  ;;  %v2522_v8 = vpop.xlane.xlu2 %2521  ;;  %v10950_v7 = vpop.xlane.xlu1 %3268  ;;  %6273 = vst.msk [vmem:[%s11492_s8 + $0x2e0] sm:$0xff] %vm6180_vm9, %v6072_v55  ;;  %v4753_v25 = vsel %vm4752_vm8, %v7008_v28, %v4749_v32  ;;  %vm4765_vm11 = vweird.f32 %v7012_v18 }
 0x92f   :  { %v2686_v40 = vsub.f32 %v10779_v5, %v2522_v8  ;;  %7015 = vrcp.f32 %v10950_v7  ;;  %v4770_v5 = vand.u32 2147483648, %v10921_v19  ;;  %v4758_v63 = vsel %vm4755_vm10, %v4757_v58, %v4753_v25  ;;  %vm10967_vm2 = vmor %vm4764_vm12, %vm4765_vm11  ;;  %v2164_v41 = vpop.f32.mrf.mxu2 }
 0x930   :  { %v4761_v33 = vsub.f32 1.0, %v4760_v21  ;;  %v5237_v43 = vmul.f32 %v10734_v62, %v4758_v63  ;;  %v4784_v60 = vand.u32 2147483648, %v10950_v7  ;;  %vm4778_vm15 = vweird.f32 %v10950_v7 }
 0x931   :  { %v2923_v59 = vmul.f32 1.442695, %v2686_v40  ;;  %v10958_v14 = vpop.eup %7013  ;;  %v4771_v20 = vor.u32 1.1754944e-38, %v4770_v5  ;;  %v11003_v27 = vadd.f32 %v10630_v54, %v2164_v41 }
 0x932   :  { %v4762_v38 = vmul.f32 %v7012_v18, %v4761_v33  ;;  %v3285_v52 = vsel %vm2192_vm3, %v10958_v14, 0.0  ;;  %5365 = vst.msk [vmem:[%s11491_s9 + $0x320] sm:$0xff] %vm2192_vm3, %v5237_v43  ;;  %6545 = vmatmul.msk.f32.gmra.mxu3 %vm2192_vm3, %v5237_v43  ;;  %v4785_v4 = vor.u32 1.1754944e-38, %v4784_v60 }
 0x933   :  { %7017 = vpow2.f32 %v2923_v59  ;;  %2539 = vmax.xlane.f32.xlu2 %v2538_v26  ;;  %3286 = vadd.xlane.f32.xlu1 %v3285_v52 }
 0x934   :  { %v4763_v49 = vadd.f32 %v7012_v18, %v4762_v38 }
 0x935   :  { %v7016_v62 = vpop.eup %7015  ;;  %v6075_v53 = vpop.f32.mrf.mxu3 }
 0x936   :  { %v3272_v30 = vpop.xlane.xlu0 %3271  ;;  %v4767_v45 = vsel %vm10967_vm2, %v7012_v18, %v4763_v49  ;;  %v4774_v23 = vmul.f32 %v7016_v62, %v10950_v7  ;;  %v2525_v35 = vpop.xlane.xlu1 %2524  ;;  %6274 = vst.msk [vmem:[%s11492_s8 + $0x2e8] sm:$0xff] %vm6180_vm9, %v6075_v53  ;;  %vm4779_vm14 = vweird.f32 %v7016_v62 }
 0x937   :  { %7019 = vrcp.f32 %v3272_v30  ;;  %v2687_v46 = vsub.f32 %v10799_v17, %v2525_v35  ;;  %v4772_v51 = vsel %vm4769_vm13, %v4771_v20, %v4767_v45  ;;  %v4782_v17 = vand.u32 2147483647, %v10950_v7  ;;  %vm4780_vm0 = vmor %vm4778_vm15, %vm4779_vm14  ;;  %v2167_v56 = vpop.f32.mrf.mxu2 }
 0x938   :  { %v4775_v28 = vsub.f32 1.0, %v4774_v23  ;;  %v5238_v29 = vmul.f32 %v10759_v16, %v4772_v51  ;;  %v2541_v16 = vsel %vm2192_vm3, %v10980_v9, -inf  ;;  %v4798_v32 = vand.u32 2147483648, %v3272_v30 }
 0x939   :  { %v10983_v19 = vpop.eup %7017  ;;  %v2925_v44 = vmul.f32 1.442695, %v2687_v46  ;;  %vm4783_vm1 = vcmp.eq.f32.partialorder %v4782_v17, 8.507059e+37  ;;  %v4796_v58 = vand.u32 2147483647, %v3272_v30  ;;  %vm4792_vm5 = vweird.f32 %v3272_v30 }
 0x93a   :  { %v3288_v1 = vsel %vm2192_vm3, %v10983_v19, 0.0  ;;  %v4776_v22 = vmul.f32 %v7016_v62, %v4775_v28  ;;  %5366 = vst.msk [vmem:[%s11491_s9 + $0x328] sm:$0xff] %vm2192_vm3, %v5238_v29  ;;  %6546 = vmatmul.msk.f32.gmra.mxu3 %vm2192_vm3, %v5238_v29  ;;  %v11023_v25 = vadd.f32 %v10630_v54, %v2167_v56 }
 0x93b   :  { %3289 = vadd.xlane.f32.xlu0 %v3288_v1  ;;  %7021 = vpow2.f32 %v2925_v44  ;;  %2542 = vmax.xlane.f32.xlu1 %v2541_v16  ;;  %vm4797_vm7 = vcmp.eq.f32.partialorder %v4796_v58, 8.507059e+37 }
 0x93c   :  { %v4777_v36 = vadd.f32 %v7016_v62, %v4776_v22  ;;  %v2547_v49 = vsel %vm2192_vm3, %v11023_v25, -inf }
 0x93d   :  { %v7020_v37 = vpop.eup %7019  ;;  %v6078_v18 = vpop.f32.mrf.mxu3 }
 0x93e   :  { %v4788_v61 = vmul.f32 %v7020_v37, %v3272_v30  ;;  %v2528_v10 = vpop.xlane.xlu0 %2527  ;;  %v4781_v11 = vsel %vm4780_vm0, %v7016_v62, %v4777_v36  ;;  %6275 = vst.msk [vmem:[%s11492_s8 + $0x2f0] sm:$0xff] %vm6180_vm9, %v6078_v18  ;;  %vm4793_vm4 = vweird.f32 %v7020_v37 }
 0x93f   :  { %v2688_v34 = vsub.f32 %v10818_v13, %v2528_v10  ;;  %v4786_v15 = vsel %vm4783_vm1, %v4785_v4, %v4781_v11  ;;  %v2544_v13 = vsel %vm2192_vm3, %v11003_v27, -inf  ;;  %vm4794_vm6 = vmor %vm4792_vm5, %vm4793_vm4  ;;  %v2169_v26 = vpop.f32.mrf.mxu2 }
 0x940   :  { %v4789_v31 = vsub.f32 1.0, %v4788_v61  ;;  %v5239_v8 = vmul.f32 %v10787_v2, %v4786_v15  ;;  %v4799_v2 = vor.u32 1.1754944e-38, %v4798_v32 }
 0x941   :  { %v2927_v21 = vmul.f32 1.442695, %v2688_v34  ;;  %v11011_v40 = vpop.eup %7021 }
 0x942   :  { %v4790_v7 = vmul.f32 %v7020_v37, %v4789_v31  ;;  %5367 = vst.msk [vmem:[%s11491_s9 + $0x330] sm:$0xff] %vm2192_vm3, %v5239_v8  ;;  %v3291_v33 = vsel %vm2192_vm3, %v11011_v40, 0.0  ;;  %6547 = vmatmul.msk.f32.gmra.mxu3 %vm2192_vm3, %v5239_v8 }
 0x943   :  { %7023 = vpow2.f32 %v2927_v21  ;;  %2545 = vmax.xlane.f32.xlu0 %v2544_v13  ;;  %3292 = vadd.xlane.f32.xlu2 %v3291_v33 }
 0x944   :  { %v4791_v55 = vadd.f32 %v7020_v37, %v4790_v7 }
 0x945   :  { %v6081_v5 = vpop.f32.mrf.mxu3 }
 0x946   :  { %v4795_v59 = vsel %vm4794_vm6, %v7020_v37, %v4791_v55  ;;  %6276 = vst.msk [vmem:[%s11492_s8 + $0x2f8] sm:$0xff] %vm6180_vm9, %v6081_v5 }
 0x947   :  { %v4800_v38 = vsel %vm4797_vm7, %v4799_v2, %v4795_v59  ;;  %v2172_v20 = vpop.f32.mrf.mxu2 }
 0x948   :  { %v5240_v63 = vmul.f32 %v10802_v57, %v4800_v38  ;;  %v11042_v57 = vadd.f32 %v10630_v54, %v2169_v26 }
 0x949   :  { %v11026_v24 = vpop.eup %7023 }
 0x94a   :  { %5368 = vst.msk [vmem:[%s11491_s9 + $0x338] sm:$0xff] %vm2192_vm3, %v5240_v63  ;;  %v3294_v43 = vsel %vm2192_vm3, %v11026_v24, 0.0  ;;  %6548 = vmatmul.msk.f32.gmra.mxu3 %vm2192_vm3, %v5240_v63  ;;  %v2550_v52 = vsel %vm2192_vm3, %v11042_v57, -inf }
 0x94b   :  { %3295 = vadd.xlane.f32.xlu1 %v3294_v43  ;;  %2548 = vmax.xlane.f32.xlu2 %v2547_v49 }
 0x94f   :  { %v2174_v17 = vpop.f32.mrf.mxu2 }
 0x953   :  { %2551 = vmax.xlane.f32.xlu1 %v2550_v52 }
 0x957   :  { %v2177_v38 = vpop.f32.mrf.mxu2 }
 0x986   :  { %v3275_v3 = vpop.xlane.xlu2 %3274 }
 0x987   :  { %7025 = vrcp.f32 %v3275_v3  ;;  %v4812_v54 = vand.u32 2147483648, %v3275_v3  ;;  %v4810_v51 = vand.u32 2147483647, %v3275_v3  ;;  %vm4806_vm10 = vweird.f32 %v3275_v3 }
 0x989   :  { %v4813_v60 = vor.u32 1.1754944e-38, %v4812_v54  ;;  %vm4811_vm12 = vcmp.eq.f32.partialorder %v4810_v51, 8.507059e+37 }
 0x98d   :  { %v7026_v62 = vpop.eup %7025 }
 0x98e   :  { %v4802_v30 = vmul.f32 %v7026_v62, %v3275_v3  ;;  %v2531_v45 = vpop.xlane.xlu2 %2530  ;;  %v3278_v23 = vpop.xlane.xlu1 %3277  ;;  %vm4807_vm8 = vweird.f32 %v7026_v62 }
 0x98f   :  { %v2689_v41 = vsub.f32 %v10858_v6, %v2531_v45  ;;  %7027 = vrcp.f32 %v3278_v23  ;;  %vm4808_vm11 = vmor %vm4806_vm10, %vm4807_vm8  ;;  %v4826_v18 = vand.u32 2147483648, %v3278_v23  ;;  %vm4820_vm13 = vweird.f32 %v3278_v23 }
 0x990   :  { %v4803_v35 = vsub.f32 1.0, %v4802_v30 }
 0x991   :  { %v2929_v53 = vmul.f32 1.442695, %v2689_v41  ;;  %v4827_v58 = vor.u32 1.1754944e-38, %v4826_v18 }
 0x992   :  { %v4804_v46 = vmul.f32 %v7026_v62, %v4803_v35 }
 0x993   :  { %7029 = vpow2.f32 %v2929_v53 }
 0x994   :  { %v4805_v28 = vadd.f32 %v7026_v62, %v4804_v46 }
 0x995   :  { %v7028_v29 = vpop.eup %7027  ;;  %v6084_v44 = vpop.f32.mrf.mxu3 }
 0x996   :  { %v3281_v1 = vpop.xlane.xlu0 %3280  ;;  %v4809_v22 = vsel %vm4808_vm11, %v7026_v62, %v4805_v28  ;;  %v4816_v6 = vmul.f32 %v7028_v29, %v3278_v23  ;;  %6277 = vst.msk [vmem:[%s11492_s8 + $0x300] sm:$0xff] %vm6180_vm9, %v6084_v44  ;;  %v2534_v16 = vpop.xlane.xlu1 %2533  ;;  %vm4821_vm2 = vweird.f32 %v7028_v29 }
 0x997   :  { %7031 = vrcp.f32 %v3281_v1  ;;  %v2690_v37 = vsub.f32 %v10892_v48, %v2534_v16  ;;  %v4814_v36 = vsel %vm4811_vm12, %v4813_v60, %v4809_v22  ;;  %v4824_v48 = vand.u32 2147483647, %v3278_v23  ;;  %vm11070_vm14 = vmor %vm4820_vm13, %vm4821_vm2  ;;  %v2179_v22 = vpop.f32.mrf.mxu2 }
 0x998   :  { %v4817_v61 = vsub.f32 1.0, %v4816_v6  ;;  %v5241_v10 = vmul.f32 %v10847_v50, %v4814_v36  ;;  %v11065_v50 = vld [vmem:[%s11489_s7] ss:$0 sm:$0xff]  ;;  %v4840_v5 = vand.u32 2147483648, %v3281_v1  ;;  %v4838_v52 = vand.u32 2147483647, %v3281_v1 }
 0x999   :  { %v11052_v4 = vpop.eup %7029  ;;  %v2931_v34 = vmul.f32 1.442695, %v2690_v37  ;;  %v11068_v56 = vadd.f32 %v11065_v50, %v2172_v20  ;;  %vm4825_vm15 = vcmp.eq.f32.partialorder %v4824_v48, 8.507059e+37  ;;  %vm4834_vm1 = vweird.f32 %v3281_v1 }
 0x99a   :  { %v3297_v11 = vsel %vm2192_vm3, %v11052_v4, 0.0  ;;  %v4818_v31 = vmul.f32 %v7028_v29, %v4817_v61  ;;  %5369 = vst.msk [vmem:[%s11491_s9 + $0x340] sm:$0xff] %vm2192_vm3, %v5241_v10  ;;  %6549 = vmatmul.msk.f32.gmra.mxu3 %vm2192_vm3, %v5241_v10  ;;  %v4841_v30 = vor.u32 1.1754944e-38, %v4840_v5  ;;  %vm4839_vm5 = vcmp.eq.f32.partialorder %v4838_v52, 8.507059e+37 }
 0x99b   :  { %3298 = vadd.xlane.f32.xlu0 %v3297_v11  ;;  %7033 = vpow2.f32 %v2931_v34  ;;  %v2553_v26 = vsel %vm2192_vm3, %v11068_v56, -inf  ;;  %v11097_v41 = vadd.f32 %v11065_v50, %v2174_v17  ;;  %v11123_v37 = vadd.f32 %v11065_v50, %v2177_v38 }
 0x99c   :  { %v4819_v32 = vadd.f32 %v7028_v29, %v4818_v31 }
 0x99d   :  { %v7032_v15 = vpop.eup %7031  ;;  %v6087_v13 = vpop.f32.mrf.mxu3 }
 0x99e   :  { %v4830_v8 = vmul.f32 %v7032_v15, %v3281_v1  ;;  %v2537_v7 = vpop.xlane.xlu0 %2536  ;;  %v11074_v33 = vpop.xlane.xlu2 %3283  ;;  %v4823_v2 = vsel %vm11070_vm14, %v7028_v29, %v4819_v32  ;;  %6278 = vst.msk [vmem:[%s11492_s8 + $0x308] sm:$0xff] %vm6180_vm9, %v6087_v13  ;;  %vm4835_vm0 = vweird.f32 %v7032_v15 }
 0x99f   :  { %v2691_v55 = vsub.f32 %v10918_v0, %v2537_v7  ;;  %7035 = vrcp.f32 %v11074_v33  ;;  %v4828_v43 = vsel %vm4825_vm15, %v4827_v58, %v4823_v2  ;;  %vm4836_vm4 = vmor %vm4834_vm1, %vm4835_vm0  ;;  %v4854_v17 = vand.u32 2147483648, %v11074_v33 }
 0x9a0   :  { %v4831_v59 = vsub.f32 1.0, %v4830_v8  ;;  %v5242_v3 = vmul.f32 %v10878_v47, %v4828_v43  ;;  %v4852_v6 = vand.u32 2147483647, %v11074_v33  ;;  %vm4848_vm7 = vweird.f32 %v11074_v33 }
 0x9a1   :  { %v2933_v63 = vmul.f32 1.442695, %v2691_v55  ;;  %v11086_v0 = vpop.eup %7033  ;;  %v4855_v10 = vor.u32 1.1754944e-38, %v4854_v17  ;;  %v2559_v7 = vsel %vm2192_vm3, %v11123_v37, -inf }
 0x9a2   :  { %v4832_v49 = vmul.f32 %v7032_v15, %v4831_v59  ;;  %v3300_v62 = vsel %vm2192_vm3, %v11086_v0, 0.0  ;;  %5370 = vst.msk [vmem:[%s11491_s9 + $0x348] sm:$0xff] %vm2192_vm3, %v5242_v3  ;;  %6550 = vmatmul.msk.f32.gmra.mxu3 %vm2192_vm3, %v5242_v3  ;;  %vm4853_vm10 = vcmp.eq.f32.partialorder %v4852_v6, 8.507059e+37 }
 0x9a3   :  { %7037 = vpow2.f32 %v2933_v63  ;;  %2554 = vmax.xlane.f32.xlu0 %v2553_v26  ;;  %3301 = vadd.xlane.f32.xlu2 %v3300_v62  ;;  %v11151_v63 = vadd.f32 %v11065_v50, %v2179_v22 }
 0x9a4   :  { %v4833_v20 = vadd.f32 %v7032_v15, %v4832_v49 }
 0x9a5   :  { %v7036_v45 = vpop.eup %7035  ;;  %v6090_v35 = vpop.f32.mrf.mxu3 }
 0x9a6   :  { %v4837_v47 = vsel %vm4836_vm4, %v7032_v15, %v4833_v20  ;;  %v4844_v23 = vmul.f32 %v7036_v45, %v11074_v33  ;;  %v2540_v53 = vpop.xlane.xlu2 %2539  ;;  %6279 = vst.msk [vmem:[%s11492_s8 + $0x310] sm:$0xff] %vm6180_vm9, %v6090_v35  ;;  %v11105_v51 = vpop.xlane.xlu1 %3286  ;;  %vm4849_vm6 = vweird.f32 %v7036_v45 }
 0x9a7   :  { %v4842_v46 = vsel %vm4839_vm5, %v4841_v30, %v4837_v47  ;;  %v2692_v54 = vsub.f32 %v10946_v39, %v2540_v53  ;;  %7039 = vrcp.f32 %v11105_v51  ;;  %vm4850_vm8 = vmor %vm4848_vm7, %vm4849_vm6  ;;  %v4868_v55 = vand.u32 2147483648, %v11105_v51 }
 0x9a8   :  { %v5243_v28 = vmul.f32 %v10903_v42, %v4842_v46  ;;  %v4845_v60 = vsub.f32 1.0, %v4844_v23  ;;  %v2556_v42 = vsel %vm2192_vm3, %v11097_v41, -inf  ;;  %v4866_v2 = vand.u32 2147483647, %v11105_v51 }
 0x9a9   :  { %v11108_v29 = vpop.eup %7037  ;;  %v2935_v44 = vmul.f32 1.442695, %v2692_v54  ;;  %vm4862_vm12 = vweird.f32 %v11105_v51  ;;  %v4869_v49 = vor.u32 1.1754944e-38, %v4868_v55  ;;  %v2562_v53 = vsel %vm2192_vm3, %v11151_v63, -inf }
 0x9aa   :  { %5371 = vst.msk [vmem:[%s11491_s9 + $0x350] sm:$0xff] %vm2192_vm3, %v5243_v28  ;;  %v3303_v1 = vsel %vm2192_vm3, %v11108_v29, 0.0  ;;  %v4846_v39 = vmul.f32 %v7036_v45, %v4845_v60  ;;  %6551 = vmatmul.msk.f32.gmra.mxu3 %vm2192_vm3, %v5243_v28  ;;  %vm4867_vm13 = vcmp.eq.f32.partialorder %v4866_v2, 8.507059e+37 }
 0x9ab   :  { %3304 = vadd.xlane.f32.xlu1 %v3303_v1  ;;  %7041 = vpow2.f32 %v2935_v44  ;;  %2557 = vmax.xlane.f32.xlu2 %v2556_v42 }
 0x9ac   :  { %v4847_v16 = vadd.f32 %v7036_v45, %v4846_v39 }
 0x9ad   :  { %v7040_v61 = vpop.eup %7039  ;;  %v6093_v34 = vpop.f32.mrf.mxu3 }
 0x9ae   :  { %v11126_v36 = vpop.xlane.xlu0 %3289  ;;  %v4858_v11 = vmul.f32 %v7040_v61, %v11105_v51  ;;  %6280 = vst.msk [vmem:[%s11492_s8 + $0x318] sm:$0xff] %vm6180_vm9, %v6093_v34  ;;  %v2543_v31 = vpop.xlane.xlu1 %2542  ;;  %v4851_v18 = vsel %vm4850_vm8, %v7036_v45, %v4847_v16  ;;  %vm4863_vm11 = vweird.f32 %v7040_v61 }
 0x9af   :  { %7043 = vrcp.f32 %v11126_v36  ;;  %v2693_v48 = vsub.f32 %v10980_v9, %v2543_v31  ;;  %v4856_v15 = vsel %vm4853_vm10, %v4855_v10, %v4851_v18  ;;  %v2182_v9 = vpop.f32.mrf.mxu2  ;;  %vm4864_vm2 = vmor %vm4862_vm12, %vm4863_vm11  ;;  %v4882_v45 = vand.u32 2147483648, %v11126_v36 }
 0x9b0   :  { %v4859_v21 = vsub.f32 1.0, %v4858_v11  ;;  %v5244_v8 = vmul.f32 %v10930_v12, %v4856_v15  ;;  %v4880_v23 = vand.u32 2147483647, %v11126_v36  ;;  %vm4876_vm15 = vweird.f32 %v11126_v36 }
 0x9b1   :  { %v11135_v32 = vpop.eup %7041  ;;  %v2937_v58 = vmul.f32 1.442695, %v2693_v48  ;;  %v4883_v28 = vor.u32 1.1754944e-38, %v4882_v45  ;;  %v11185_v17 = vadd.f32 %v11065_v50, %v2182_v9 }
 0x9b2   :  { %v3306_v13 = vsel %vm2192_vm3, %v11135_v32, 0.0  ;;  %v4860_v33 = vmul.f32 %v7040_v61, %v4859_v21  ;;  %5372 = vst.msk [vmem:[%s11491_s9 + $0x358] sm:$0xff] %vm2192_vm3, %v5244_v8  ;;  %6552 = vmatmul.msk.f32.gmra.mxu3 %vm2192_vm3, %v5244_v8  ;;  %vm4881_vm1 = vcmp.eq.f32.partialorder %v4880_v23, 8.507059e+37 }
 0x9b3   :  { %2560 = vmax.xlane.f32.xlu1 %v2559_v7  ;;  %3307 = vadd.xlane.f32.xlu0 %v3306_v13  ;;  %7045 = vpow2.f32 %v2937_v58 }
 0x9b4   :  { %v4861_v59 = vadd.f32 %v7040_v61, %v4860_v33 }
 0x9b5   :  { %v7044_v12 = vpop.eup %7043  ;;  %v6096_v3 = vpop.f32.mrf.mxu3 }
 0x9b6   :  { %v4872_v38 = vmul.f32 %v7044_v12, %v11126_v36  ;;  %v2546_v5 = vpop.xlane.xlu0 %2545  ;;  %v11154_v43 = vpop.xlane.xlu2 %3292  ;;  %6281 = vst.msk [vmem:[%s11492_s8 + $0x320] sm:$0xff] %vm6180_vm9, %v6096_v3  ;;  %v4865_v20 = vsel %vm4864_vm2, %v7040_v61, %v4861_v59  ;;  %vm4877_vm14 = vweird.f32 %v7044_v12 }
 0x9b7   :  { %v2694_v26 = vsub.f32 %v11003_v27, %v2546_v5  ;;  %7047 = vrcp.f32 %v11154_v43  ;;  %v4870_v47 = vsel %vm4867_vm13, %v4869_v49, %v4865_v20  ;;  %vm11172_vm0 = vmor %vm4876_vm15, %vm4877_vm14  ;;  %v2184_v1 = vpop.f32.mrf.mxu2  ;;  %v4896_v34 = vand.u32 2147483648, %v11154_v43 }
 0x9b8   :  { %v4873_v52 = vsub.f32 1.0, %v4872_v38  ;;  %v5245_v35 = vmul.f32 %v10958_v14, %v4870_v47  ;;  %vm4890_vm5 = vweird.f32 %v11154_v43  ;;  %v11208_v21 = vadd.f32 %v11065_v50, %v2184_v1 }
 0x9b9   :  { %v2939_v62 = vmul.f32 1.442695, %v2694_v26  ;;  %v11163_v27 = vpop.eup %7045  ;;  %v4897_v8 = vor.u32 1.1754944e-38, %v4896_v34 }
 0x9ba   :  { %v4874_v30 = vmul.f32 %v7044_v12, %v4873_v52  ;;  %v3309_v54 = vsel %vm2192_vm3, %v11163_v27, 0.0  ;;  %5373 = vst.msk [vmem:[%s11491_s9 + $0x360] sm:$0xff] %vm2192_vm3, %v5245_v35  ;;  %6553 = vmatmul.msk.f32.gmra.mxu3 %vm2192_vm3, %v5245_v35 }
 0x9bb   :  { %7049 = vpow2.f32 %v2939_v62  ;;  %2563 = vmax.xlane.f32.xlu0 %v2562_v53  ;;  %3310 = vadd.xlane.f32.xlu2 %v3309_v54 }
 0x9bc   :  { %v4875_v46 = vadd.f32 %v7044_v12, %v4874_v30 }
 0x9bd   :  { %v7048_v14 = vpop.eup %7047  ;;  %v6099_v42 = vpop.f32.mrf.mxu3 }
 0x9be   :  { %v3296_v60 = vpop.xlane.xlu1 %3295  ;;  %v4879_v44 = vsel %vm11172_vm0, %v7044_v12, %v4875_v46  ;;  %v4886_v22 = vmul.f32 %v7048_v14, %v11154_v43  ;;  %v2549_v39 = vpop.xlane.xlu2 %2548  ;;  %6282 = vst.msk [vmem:[%s11492_s8 + $0x328] sm:$0xff] %vm6180_vm9, %v6099_v42  ;;  %vm4891_vm4 = vweird.f32 %v7048_v14 }
 0x9bf   :  { %7051 = vrcp.f32 %v3296_v60  ;;  %v2695_v6 = vsub.f32 %v11023_v25, %v2549_v39  ;;  %v4884_v16 = vsel %vm4881_vm1, %v4883_v28, %v4879_v44  ;;  %v4894_v25 = vand.u32 2147483647, %v11154_v43  ;;  %vm4892_vm6 = vmor %vm4890_vm5, %vm4891_vm4  ;;  %v2187_v2 = vpop.f32.mrf.mxu2 }
 0x9c0   :  { %v4887_v61 = vsub.f32 1.0, %v4886_v22  ;;  %v5246_v10 = vmul.f32 %v10983_v19, %v4884_v16  ;;  %v2565_v19 = vsel %vm2192_vm3, %v11185_v17, -inf  ;;  %v4910_v59 = vand.u32 2147483648, %v3296_v60 }
 0x9c1   :  { %v11188_v36 = vpop.eup %7049  ;;  %v2941_v11 = vmul.f32 1.442695, %v2695_v6  ;;  %vm4895_vm7 = vcmp.eq.f32.partialorder %v4894_v25, 8.507059e+37  ;;  %v4908_v49 = vand.u32 2147483647, %v3296_v60  ;;  %vm4904_vm10 = vweird.f32 %v3296_v60 }
 0x9c2   :  { %v3312_v31 = vsel %vm2192_vm3, %v11188_v36, 0.0  ;;  %v4888_v18 = vmul.f32 %v7048_v14, %v4887_v61  ;;  %5374 = vst.msk [vmem:[%s11491_s9 + $0x368] sm:$0xff] %vm2192_vm3, %v5246_v10  ;;  %6554 = vmatmul.msk.f32.gmra.mxu3 %vm2192_vm3, %v5246_v10  ;;  %v11228_v20 = vadd.f32 %v11065_v50, %v2187_v2 }
 0x9c3   :  { %3313 = vadd.xlane.f32.xlu1 %v3312_v31  ;;  %7053 = vpow2.f32 %v2941_v11  ;;  %2566 = vmax.xlane.f32.xlu2 %v2565_v19  ;;  %vm4909_vm12 = vcmp.eq.f32.partialorder %v4908_v49, 8.507059e+37 }
 0x9c4   :  { %v4889_v15 = vadd.f32 %v7048_v14, %v4888_v18  ;;  %v2571_v46 = vsel %vm2192_vm3, %v11228_v20, -inf }
 0x9c5   :  { %v7052_v48 = vpop.eup %7051  ;;  %v6102_v12 = vpop.f32.mrf.mxu3 }
 0x9c6   :  { %v4900_v7 = vmul.f32 %v7052_v48, %v3296_v60  ;;  %v2552_v58 = vpop.xlane.xlu1 %2551  ;;  %v4893_v33 = vsel %vm4892_vm6, %v7048_v14, %v4889_v15  ;;  %6283 = vst.msk [vmem:[%s11492_s8 + $0x330] sm:$0xff] %vm6180_vm9, %v6102_v12  ;;  %vm4905_vm8 = vweird.f32 %v7052_v48 }
 0x9c7   :  { %v2696_v13 = vsub.f32 %v11042_v57, %v2552_v58  ;;  %v4898_v9 = vsel %vm4895_vm7, %v4897_v8, %v4893_v33  ;;  %v2568_v57 = vsel %vm2192_vm3, %v11208_v21, -inf  ;;  %vm4906_vm11 = vmor %vm4904_vm10, %vm4905_vm8  ;;  %v2189_v53 = vpop.f32.mrf.mxu2 }
 0x9c8   :  { %v4901_v55 = vsub.f32 1.0, %v4900_v7  ;;  %v5247_v5 = vmul.f32 %v11011_v40, %v4898_v9  ;;  %v4911_v40 = vor.u32 1.1754944e-38, %v4910_v59 }
 0x9c9   :  { %v2943_v38 = vmul.f32 1.442695, %v2696_v13  ;;  %v11216_v43 = vpop.eup %7053 }
 0x9ca   :  { %v4902_v26 = vmul.f32 %v7052_v48, %v4901_v55  ;;  %5375 = vst.msk [vmem:[%s11491_s9 + $0x370] sm:$0xff] %vm2192_vm3, %v5247_v5  ;;  %v3315_v52 = vsel %vm2192_vm3, %v11216_v43, 0.0  ;;  %6555 = vmatmul.msk.f32.gmra.mxu3 %vm2192_vm3, %v5247_v5 }
 0x9cb   :  { %7055 = vpow2.f32 %v2943_v38  ;;  %2569 = vmax.xlane.f32.xlu1 %v2568_v57  ;;  %3316 = vadd.xlane.f32.xlu0 %v3315_v52 }
 0x9cc   :  { %v4903_v3 = vadd.f32 %v7052_v48, %v4902_v26 }
 0x9cd   :  { %v6105_v45 = vpop.f32.mrf.mxu3 }
 0x9ce   :  { %v4907_v62 = vsel %vm4906_vm11, %v7052_v48, %v4903_v3  ;;  %6284 = vst.msk [vmem:[%s11492_s8 + $0x338] sm:$0xff] %vm6180_vm9, %v6105_v45 }
 0x9cf   :  { %v4912_v30 = vsel %vm4909_vm12, %v4911_v40, %v4907_v62 }
 0x9d0   :  { %v5248_v47 = vmul.f32 %v11026_v24, %v4912_v30  ;;  %v11247_v24 = vadd.f32 %v11065_v50, %v2189_v53 }
 0x9d1   :  { %v11231_v23 = vpop.eup %7055 }
 0x9d2   :  { %5376 = vst.msk [vmem:[%s11491_s9 + $0x378] sm:$0xff] %vm2192_vm3, %v5248_v47  ;;  %v3318_v35 = vsel %vm2192_vm3, %v11231_v23, 0.0  ;;  %6556 = vmatmul.msk.f32.gmra.mxu3 %vm2192_vm3, %v5248_v47  ;;  %v2574_v54 = vsel %vm2192_vm3, %v11247_v24, -inf }
 0x9d3   :  { %3319 = vadd.xlane.f32.xlu2 %v3318_v35  ;;  %2572 = vmax.xlane.f32.xlu0 %v2571_v46 }
 0x9db   :  { %2575 = vmax.xlane.f32.xlu2 %v2574_v54 }
 0xa0e   :  { %v3299_v51 = vpop.xlane.xlu0 %3298 }
 0xa0f   :  { %7057 = vrcp.f32 %v3299_v51  ;;  %v4924_v6 = vand.u32 2147483648, %v3299_v51  ;;  %v4922_v50 = vand.u32 2147483647, %v3299_v51  ;;  %vm4918_vm13 = vweird.f32 %v3299_v51 }
 0xa11   :  { %v4925_v10 = vor.u32 1.1754944e-38, %v4924_v6  ;;  %vm4923_vm15 = vcmp.eq.f32.partialorder %v4922_v50, 8.507059e+37 }
 0xa15   :  { %v7058_v14 = vpop.eup %7057 }
 0xa16   :  { %v4914_v28 = vmul.f32 %v7058_v14, %v3299_v51  ;;  %v2555_v60 = vpop.xlane.xlu0 %2554  ;;  %v3302_v44 = vpop.xlane.xlu2 %3301  ;;  %vm4919_vm2 = vweird.f32 %v7058_v14 }
 0xa17   :  { %v2697_v1 = vsub.f32 %v11068_v56, %v2555_v60  ;;  %7059 = vrcp.f32 %v3302_v44  ;;  %vm4920_vm14 = vmor %vm4918_vm13, %vm4919_vm2  ;;  %v4938_v33 = vand.u32 2147483648, %v3302_v44  ;;  %vm4932_vm1 = vweird.f32 %v3302_v44 }
 0xa18   :  { %v4915_v22 = vsub.f32 1.0, %v4914_v28 }
 0xa19   :  { %v2945_v39 = vmul.f32 1.442695, %v2697_v1  ;;  %v4939_v2 = vor.u32 1.1754944e-38, %v4938_v33 }
 0xa1a   :  { %v4916_v42 = vmul.f32 %v7058_v14, %v4915_v22 }
 0xa1b   :  { %7061 = vpow2.f32 %v2945_v39 }
 0xa1c   :  { %v4917_v16 = vadd.f32 %v7058_v14, %v4916_v42 }
 0xa1d   :  { %v7060_v61 = vpop.eup %7059  ;;  %v6108_v34 = vpop.f32.mrf.mxu3 }
 0xa1e   :  { %v3305_v11 = vpop.xlane.xlu1 %3304  ;;  %v4921_v31 = vsel %vm4920_vm14, %v7058_v14, %v4917_v16  ;;  %v4928_v18 = vmul.f32 %v7060_v61, %v3302_v44  ;;  %6285 = vst.msk [vmem:[%s11492_s8 + $0x340] sm:$0xff] %vm6180_vm9, %v6108_v34  ;;  %v2558_v56 = vpop.xlane.xlu2 %2557  ;;  %vm4933_vm0 = vweird.f32 %v7060_v61 }
 0xa1f   :  { %7063 = vrcp.f32 %v3305_v11  ;;  %v2698_v25 = vsub.f32 %v11097_v41, %v2558_v56  ;;  %v4926_v19 = vsel %vm4923_vm15, %v4925_v10, %v4921_v31  ;;  %v4936_v41 = vand.u32 2147483647, %v3302_v44  ;;  %vm4934_vm4 = vmor %vm4932_vm1, %vm4933_vm0 }
 0xa20   :  { %v4929_v15 = vsub.f32 1.0, %v4928_v18  ;;  %v5249_v8 = vmul.f32 %v11052_v4, %v4926_v19  ;;  %v4952_v57 = vand.u32 2147483648, %v3305_v11  ;;  %v4950_v30 = vand.u32 2147483647, %v3305_v11 }
 0xa21   :  { %v11257_v48 = vpop.eup %7061  ;;  %v2947_v7 = vmul.f32 1.442695, %v2698_v25  ;;  %vm4937_vm5 = vcmp.eq.f32.partialorder %v4936_v41, 8.507059e+37  ;;  %vm4946_vm7 = vweird.f32 %v3305_v11 }
 0xa22   :  { %v3321_v58 = vsel %vm2192_vm3, %v11257_v48, 0.0  ;;  %v4930_v13 = vmul.f32 %v7060_v61, %v4929_v15  ;;  %5377 = vst.msk [vmem:[%s11491_s9 + $0x380] sm:$0xff] %vm2192_vm3, %v5249_v8  ;;  %6557 = vmatmul.msk.f32.gmra.mxu3 %vm2192_vm3, %v5249_v8  ;;  %v4953_v35 = vor.u32 1.1754944e-38, %v4952_v57  ;;  %vm4951_vm10 = vcmp.eq.f32.partialorder %v4950_v30, 8.507059e+37 }
 0xa23   :  { %3322 = vadd.xlane.f32.xlu1 %v3321_v58  ;;  %7065 = vpow2.f32 %v2947_v7 }
 0xa24   :  { %v4931_v12 = vadd.f32 %v7060_v61, %v4930_v13 }
 0xa25   :  { %v7064_v55 = vpop.eup %7063  ;;  %v6111_v59 = vpop.f32.mrf.mxu3 }
 0xa26   :  { %v4942_v4 = vmul.f32 %v7064_v55, %v3305_v11  ;;  %v2561_v9 = vpop.xlane.xlu1 %2560  ;;  %v3308_v5 = vpop.xlane.xlu0 %3307  ;;  %v4935_v26 = vsel %vm4934_vm4, %v7060_v61, %v4931_v12  ;;  %6286 = vst.msk [vmem:[%s11492_s8 + $0x348] sm:$0xff] %vm6180_vm9, %v6111_v59  ;;  %vm4947_vm6 = vweird.f32 %v7064_v55 }
 0xa27   :  { %v2699_v38 = vsub.f32 %v11123_v37, %v2561_v9  ;;  %7067 = vrcp.f32 %v3308_v5  ;;  %v4940_v3 = vsel %vm4937_vm5, %v4939_v2, %v4935_v26  ;;  %vm4948_vm8 = vmor %vm4946_vm7, %vm4947_vm6  ;;  %v4966_v50 = vand.u32 2147483648, %v3308_v5 }
 0xa28   :  { %v4943_v49 = vsub.f32 1.0, %v4942_v4  ;;  %v5250_v37 = vmul.f32 %v11086_v0, %v4940_v3  ;;  %vm4960_vm12 = vweird.f32 %v3308_v5 }
 0xa29   :  { %v2949_v52 = vmul.f32 1.442695, %v2699_v38  ;;  %v11272_v40 = vpop.eup %7065  ;;  %v4967_v10 = vor.u32 1.1754944e-38, %v4966_v50 }
 0xa2a   :  { %v4944_v62 = vmul.f32 %v7064_v55, %v4943_v49  ;;  %v3324_v45 = vsel %vm2192_vm3, %v11272_v40, 0.0  ;;  %5378 = vst.msk [vmem:[%s11491_s9 + $0x388] sm:$0xff] %vm2192_vm3, %v5250_v37  ;;  %6558 = vmatmul.msk.f32.gmra.mxu3 %vm2192_vm3, %v5250_v37 }
 0xa2b   :  { %7069 = vpow2.f32 %v2949_v52  ;;  %3325 = vadd.xlane.f32.xlu0 %v3324_v45 }
 0xa2c   :  { %v4945_v47 = vadd.f32 %v7064_v55, %v4944_v62 }
 0xa2d   :  { %v7068_v53 = vpop.eup %7067  ;;  %v6114_v54 = vpop.f32.mrf.mxu3 }
 0xa2e   :  { %v4949_v46 = vsel %vm4948_vm8, %v7064_v55, %v4945_v47  ;;  %v4956_v0 = vmul.f32 %v7068_v53, %v3308_v5  ;;  %v2564_v51 = vpop.xlane.xlu0 %2563  ;;  %6287 = vst.msk [vmem:[%s11492_s8 + $0x350] sm:$0xff] %vm6180_vm9, %v6114_v54  ;;  %v3311_v28 = vpop.xlane.xlu2 %3310  ;;  %vm4961_vm11 = vweird.f32 %v7068_v53 }
 0xa2f   :  { %v4954_v14 = vsel %vm4951_vm10, %v4953_v35, %v4949_v46  ;;  %v2700_v60 = vsub.f32 %v11151_v63, %v2564_v51  ;;  %7071 = vrcp.f32 %v3311_v28  ;;  %v4964_v63 = vand.u32 2147483647, %v3308_v5  ;;  %vm4962_vm2 = vmor %vm4960_vm12, %vm4961_vm11 }
 0xa30   :  { %v5251_v44 = vmul.f32 %v11108_v29, %v4954_v14  ;;  %v4957_v22 = vsub.f32 1.0, %v4956_v0  ;;  %v4980_v33 = vand.u32 2147483648, %v3311_v28  ;;  %v4978_v41 = vand.u32 2147483647, %v3311_v28 }
 0xa31   :  { %v11288_v1 = vpop.eup %7069  ;;  %v2951_v39 = vmul.f32 1.442695, %v2700_v60  ;;  %vm4965_vm13 = vcmp.eq.f32.partialorder %v4964_v63, 8.507059e+37  ;;  %vm4974_vm15 = vweird.f32 %v3311_v28 }
 0xa32   :  { %5379 = vst.msk [vmem:[%s11491_s9 + $0x390] sm:$0xff] %vm2192_vm3, %v5251_v44  ;;  %v3327_v42 = vsel %vm2192_vm3, %v11288_v1, 0.0  ;;  %v4958_v6 = vmul.f32 %v7068_v53, %v4957_v22  ;;  %6559 = vmatmul.msk.f32.gmra.mxu3 %vm2192_vm3, %v5251_v44  ;;  %v4981_v2 = vor.u32 1.1754944e-38, %v4980_v33  ;;  %vm4979_vm1 = vcmp.eq.f32.partialorder %v4978_v41, 8.507059e+37 }
 0xa33   :  { %3328 = vadd.xlane.f32.xlu1 %v3327_v42  ;;  %7073 = vpow2.f32 %v2951_v39 }
 0xa34   :  { %v4959_v29 = vadd.f32 %v7068_v53, %v4958_v6 }
 0xa35   :  { %v7072_v61 = vpop.eup %7071  ;;  %v6117_v34 = vpop.f32.mrf.mxu3 }
 0xa36   :  { %v3314_v16 = vpop.xlane.xlu1 %3313  ;;  %v4970_v11 = vmul.f32 %v7072_v61, %v3311_v28  ;;  %6288 = vst.msk [vmem:[%s11492_s8 + $0x358] sm:$0xff] %vm6180_vm9, %v6117_v34  ;;  %v2567_v31 = vpop.xlane.xlu2 %2566  ;;  %v4963_v18 = vsel %vm4962_vm2, %v7068_v53, %v4959_v29  ;;  %vm4975_vm14 = vweird.f32 %v7072_v61 }
 0xa37   :  { %7075 = vrcp.f32 %v3314_v16  ;;  %v2701_v56 = vsub.f32 %v11185_v17, %v2567_v31  ;;  %v4968_v25 = vsel %vm4965_vm13, %v4967_v10, %v4963_v18  ;;  %vm4976_vm0 = vmor %vm4974_vm15, %vm4975_vm14  ;;  %v4994_v57 = vand.u32 2147483648, %v3314_v16 }
 0xa38   :  { %v4971_v15 = vsub.f32 1.0, %v4970_v11  ;;  %v5252_v8 = vmul.f32 %v11135_v32, %v4968_v25  ;;  %vm4988_vm5 = vweird.f32 %v3314_v16 }
 0xa39   :  { %v11302_v19 = vpop.eup %7073  ;;  %v2953_v7 = vmul.f32 1.442695, %v2701_v56  ;;  %v4995_v47 = vor.u32 1.1754944e-38, %v4994_v57 }
 0xa3a   :  { %v3330_v58 = vsel %vm2192_vm3, %v11302_v19, 0.0  ;;  %v4972_v13 = vmul.f32 %v7072_v61, %v4971_v15  ;;  %5380 = vst.msk [vmem:[%s11491_s9 + $0x398] sm:$0xff] %vm2192_vm3, %v5252_v8  ;;  %6560 = vmatmul.msk.f32.gmra.mxu3 %vm2192_vm3, %v5252_v8 }
 0xa3b   :  { %3331 = vadd.xlane.f32.xlu2 %v3330_v58  ;;  %7077 = vpow2.f32 %v2953_v7 }
 0xa3c   :  { %v4973_v55 = vadd.f32 %v7072_v61, %v4972_v13 }
 0xa3d   :  { %v7076_v17 = vpop.eup %7075  ;;  %v6120_v38 = vpop.f32.mrf.mxu3 }
 0xa3e   :  { %v4984_v32 = vmul.f32 %v7076_v17, %v3314_v16  ;;  %v2570_v12 = vpop.xlane.xlu1 %2569  ;;  %v3317_v9 = vpop.xlane.xlu0 %3316  ;;  %6289 = vst.msk [vmem:[%s11492_s8 + $0x360] sm:$0xff] %vm6180_vm9, %v6120_v38  ;;  %v4977_v26 = vsel %vm4976_vm0, %v7072_v61, %v4973_v55  ;;  %vm4989_vm4 = vweird.f32 %v7076_v17 }
 0xa3f   :  { %v2702_v4 = vsub.f32 %v11208_v21, %v2570_v12  ;;  %7079 = vrcp.f32 %v3317_v9  ;;  %v4982_v52 = vsel %vm4979_vm1, %v4981_v2, %v4977_v26  ;;  %v4992_v21 = vand.u32 2147483647, %v3314_v16  ;;  %vm4990_vm6 = vmor %vm4988_vm5, %vm4989_vm4 }
 0xa40   :  { %v4985_v59 = vsub.f32 1.0, %v4984_v32  ;;  %v5253_v62 = vmul.f32 %v11163_v27, %v4982_v52  ;;  %v5008_v44 = vand.u32 2147483648, %v3317_v9  ;;  %v5006_v6 = vand.u32 2147483647, %v3317_v9 }
 0xa41   :  { %v2955_v5 = vmul.f32 1.442695, %v2702_v4  ;;  %v11317_v3 = vpop.eup %7077  ;;  %vm4993_vm7 = vcmp.eq.f32.partialorder %v4992_v21, 8.507059e+37  ;;  %vm5002_vm10 = vweird.f32 %v3317_v9 }
 0xa42   :  { %v4986_v49 = vmul.f32 %v7076_v17, %v4985_v59  ;;  %v3333_v37 = vsel %vm2192_vm3, %v11317_v3, 0.0  ;;  %5381 = vst.msk [vmem:[%s11491_s9 + $0x3a0] sm:$0xff] %vm2192_vm3, %v5253_v62  ;;  %6561 = vmatmul.msk.f32.gmra.mxu3 %vm2192_vm3, %v5253_v62  ;;  %vm5007_vm12 = vcmp.eq.f32.partialorder %v5006_v6, 8.507059e+37 }
 0xa43   :  { %7081 = vpow2.f32 %v2955_v5  ;;  %3334 = vadd.xlane.f32.xlu0 %v3333_v37 }
 0xa44   :  { %v4987_v30 = vadd.f32 %v7076_v17, %v4986_v49 }
 0xa45   :  { %v7080_v45 = vpop.eup %7079  ;;  %v6123_v0 = vpop.f32.mrf.mxu3 }
 0xa46   :  { %v3320_v35 = vpop.xlane.xlu2 %3319  ;;  %v4991_v53 = vsel %vm4990_vm6, %v7076_v17, %v4987_v30  ;;  %v4998_v27 = vmul.f32 %v7080_v45, %v3317_v9  ;;  %v2573_v46 = vpop.xlane.xlu0 %2572  ;;  %6290 = vst.msk [vmem:[%s11492_s8 + $0x368] sm:$0xff] %vm6180_vm9, %v6123_v0  ;;  %vm5003_vm8 = vweird.f32 %v7080_v45 }
 0xa47   :  { %7083 = vrcp.f32 %v3320_v35  ;;  %v2703_v54 = vsub.f32 %v11228_v20, %v2573_v46  ;;  %v4996_v51 = vsel %vm4993_vm7, %v4995_v47, %v4991_v53  ;;  %vm5004_vm11 = vmor %vm5002_vm10, %vm5003_vm8  ;;  %v5022_v31 = vand.u32 2147483648, %v3320_v35 }
 0xa48   :  { %v4999_v28 = vsub.f32 1.0, %v4998_v27  ;;  %v5254_v60 = vmul.f32 %v11188_v36, %v4996_v51  ;;  %v5009_v36 = vor.u32 1.1754944e-38, %v5008_v44  ;;  %v5020_v8 = vand.u32 2147483647, %v3320_v35 }
 0xa49   :  { %v11328_v14 = vpop.eup %7081  ;;  %v2957_v22 = vmul.f32 1.442695, %v2703_v54  ;;  %vm5016_vm13 = vweird.f32 %v3320_v35  ;;  %v5023_v58 = vor.u32 1.1754944e-38, %v5022_v31 }
 0xa4a   :  { %v3336_v39 = vsel %vm2192_vm3, %v11328_v14, 0.0  ;;  %v5000_v42 = vmul.f32 %v7080_v45, %v4999_v28  ;;  %5382 = vst.msk [vmem:[%s11491_s9 + $0x3a8] sm:$0xff] %vm2192_vm3, %v5254_v60  ;;  %6562 = vmatmul.msk.f32.gmra.mxu3 %vm2192_vm3, %v5254_v60  ;;  %vm5021_vm15 = vcmp.eq.f32.partialorder %v5020_v8, 8.507059e+37 }
 0xa4b   :  { %3337 = vadd.xlane.f32.xlu1 %v3336_v39  ;;  %7085 = vpow2.f32 %v2957_v22 }
 0xa4c   :  { %v5001_v50 = vadd.f32 %v7080_v45, %v5000_v42 }
 0xa4d   :  { %v7084_v20 = vpop.eup %7083  ;;  %v6126_v34 = vpop.f32.mrf.mxu3 }
 0xa4e   :  { %v5012_v63 = vmul.f32 %v7084_v20, %v3320_v35  ;;  %v2576_v29 = vpop.xlane.xlu2 %2575  ;;  %v5005_v61 = vsel %vm5004_vm11, %v7080_v45, %v5001_v50  ;;  %6291 = vst.msk [vmem:[%s11492_s8 + $0x370] sm:$0xff] %vm6180_vm9, %v6126_v34  ;;  %vm5017_vm2 = vweird.f32 %v7084_v20 }
 0xa4f   :  { %v2704_v16 = vsub.f32 %v11247_v24, %v2576_v29  ;;  %v5010_v11 = vsel %vm5007_vm12, %v5009_v36, %v5005_v61  ;;  %vm5018_vm14 = vmor %vm5016_vm13, %vm5017_vm2 }
 0xa50   :  { %v5013_v10 = vsub.f32 1.0, %v5012_v63  ;;  %v5255_v56 = vmul.f32 %v11216_v43, %v5010_v11 }
 0xa51   :  { %v2959_v18 = vmul.f32 1.442695, %v2704_v16  ;;  %v11348_v25 = vpop.eup %7085 }
 0xa52   :  { %v5014_v15 = vmul.f32 %v7084_v20, %v5013_v10  ;;  %5383 = vst.msk [vmem:[%s11491_s9 + $0x3b0] sm:$0xff] %vm2192_vm3, %v5255_v56  ;;  %v3339_v24 = vsel %vm2192_vm3, %v11348_v25, 0.0  ;;  %6563 = vmatmul.msk.f32.gmra.mxu3 %vm2192_vm3, %v5255_v56 }
 0xa53   :  { %7087 = vpow2.f32 %v2959_v18  ;;  %3340 = vadd.xlane.f32.xlu2 %v3339_v24 }
 0xa54   :  { %v5015_v7 = vadd.f32 %v7084_v20, %v5014_v15 }
 0xa55   :  { %v6129_v33 = vpop.f32.mrf.mxu3 }
 0xa56   :  { %v5019_v43 = vsel %vm5018_vm14, %v7084_v20, %v5015_v7  ;;  %6292 = vst.msk [vmem:[%s11492_s8 + $0x378] sm:$0xff] %vm6180_vm9, %v6129_v33 }
 0xa57   :  { %v5024_v13 = vsel %vm5021_vm15, %v5023_v58, %v5019_v43 }
 0xa58   :  { %v5256_v17 = vmul.f32 %v11231_v23, %v5024_v13 }
 0xa59   :  { %v11358_v41 = vpop.eup %7087 }
 0xa5a   :  { %5384 = vst.msk [vmem:[%s11491_s9 + $0x3b8] sm:$0xff] %vm2192_vm3, %v5256_v17  ;;  %v3342_v55 = vsel %vm2192_vm3, %v11358_v41, 0.0  ;;  %6564 = vmatmul.msk.f32.gmra.mxu3 %vm2192_vm3, %v5256_v17 }
 0xa5b   :  { %3343 = vadd.xlane.f32.xlu0 %v3342_v55 }
 0xa96   :  { %v3323_v32 = vpop.xlane.xlu1 %3322 }
 0xa97   :  { %7089 = vrcp.f32 %v3323_v32  ;;  %v5036_v59 = vand.u32 2147483648, %v3323_v32  ;;  %v5034_v38 = vand.u32 2147483647, %v3323_v32  ;;  %vm5030_vm1 = vweird.f32 %v3323_v32 }
 0xa99   :  { %v5037_v49 = vor.u32 1.1754944e-38, %v5036_v59  ;;  %vm5035_vm5 = vcmp.eq.f32.partialorder %v5034_v38, 8.507059e+37 }
 0xa9d   :  { %v7090_v23 = vpop.eup %7089 }
 0xa9e   :  { %v5026_v12 = vmul.f32 %v7090_v23, %v3323_v32  ;;  %v3326_v4 = vpop.xlane.xlu0 %3325  ;;  %vm5031_vm0 = vweird.f32 %v7090_v23 }
 0xa9f   :  { %7091 = vrcp.f32 %v3326_v4  ;;  %vm5032_vm4 = vmor %vm5030_vm1, %vm5031_vm0  ;;  %v5050_v35 = vand.u32 2147483648, %v3326_v4  ;;  %v5048_v53 = vand.u32 2147483647, %v3326_v4  ;;  %vm5044_vm7 = vweird.f32 %v3326_v4 }
 0xaa0   :  { %v5027_v9 = vsub.f32 1.0, %v5026_v12 }
 0xaa1   :  { %v5051_v54 = vor.u32 1.1754944e-38, %v5050_v35  ;;  %vm5049_vm10 = vcmp.eq.f32.partialorder %v5048_v53, 8.507059e+37 }
 0xaa2   :  { %v5028_v2 = vmul.f32 %v7090_v23, %v5027_v9 }
 0xaa4   :  { %v5029_v5 = vadd.f32 %v7090_v23, %v5028_v2 }
 0xaa5   :  { %v7092_v26 = vpop.eup %7091  ;;  %v6132_v57 = vpop.f32.mrf.mxu3 }
 0xaa6   :  { %v3329_v52 = vpop.xlane.xlu1 %3328  ;;  %v5033_v21 = vsel %vm5032_vm4, %v7090_v23, %v5029_v5  ;;  %v5040_v62 = vmul.f32 %v7092_v26, %v3326_v4  ;;  %6293 = vst.msk [vmem:[%s11492_s8 + $0x380] sm:$0xff] %vm6180_vm9, %v6132_v57  ;;  %vm5045_vm6 = vweird.f32 %v7092_v26 }
 0xaa7   :  { %7093 = vrcp.f32 %v3329_v52  ;;  %v5038_v30 = vsel %vm5035_vm5, %v5037_v49, %v5033_v21  ;;  %vm5046_vm8 = vmor %vm5044_vm7, %vm5045_vm6  ;;  %v5064_v44 = vand.u32 2147483648, %v3329_v52  ;;  %v5062_v42 = vand.u32 2147483647, %v3329_v52 }
 0xaa8   :  { %v5041_v37 = vsub.f32 1.0, %v5040_v62  ;;  %v5257_v45 = vmul.f32 %v11257_v48, %v5038_v30  ;;  %vm5058_vm12 = vweird.f32 %v3329_v52 }
 0xaa9   :  { %v5065_v50 = vor.u32 1.1754944e-38, %v5064_v44  ;;  %vm5063_vm13 = vcmp.eq.f32.partialorder %v5062_v42, 8.507059e+37 }
 0xaaa   :  { %v5042_v47 = vmul.f32 %v7092_v26, %v5041_v37  ;;  %5385 = vst.msk [vmem:[%s11491_s9 + $0x3c0] sm:$0xff] %vm2192_vm3, %v5257_v45  ;;  %6565 = vmatmul.msk.f32.gmra.mxu3 %vm2192_vm3, %v5257_v45 }
 0xaac   :  { %v5043_v46 = vadd.f32 %v7092_v26, %v5042_v47 }
 0xaad   :  { %v7094_v27 = vpop.eup %7093  ;;  %v6135_v51 = vpop.f32.mrf.mxu3 }
 0xaae   :  { %v5054_v0 = vmul.f32 %v7094_v27, %v3329_v52  ;;  %v3332_v28 = vpop.xlane.xlu2 %3331  ;;  %v5047_v48 = vsel %vm5046_vm8, %v7092_v26, %v5043_v46  ;;  %6294 = vst.msk [vmem:[%s11492_s8 + $0x388] sm:$0xff] %vm6180_vm9, %v6135_v51  ;;  %vm5059_vm11 = vweird.f32 %v7094_v27 }
 0xaaf   :  { %7095 = vrcp.f32 %v3332_v28  ;;  %v5052_v22 = vsel %vm5049_vm10, %v5051_v54, %v5047_v48  ;;  %vm5060_vm2 = vmor %vm5058_vm12, %vm5059_vm11  ;;  %v5078_v31 = vand.u32 2147483648, %v3332_v28  ;;  %v5076_v18 = vand.u32 2147483647, %v3332_v28 }
 0xab0   :  { %v5055_v60 = vsub.f32 1.0, %v5054_v0  ;;  %v5258_v6 = vmul.f32 %v11272_v40, %v5052_v22  ;;  %vm5072_vm15 = vweird.f32 %v3332_v28 }
 0xab1   :  { %v5079_v24 = vor.u32 1.1754944e-38, %v5078_v31  ;;  %vm5077_vm1 = vcmp.eq.f32.partialorder %v5076_v18, 8.507059e+37 }
 0xab2   :  { %v5056_v39 = vmul.f32 %v7094_v27, %v5055_v60  ;;  %5386 = vst.msk [vmem:[%s11491_s9 + $0x3c8] sm:$0xff] %vm2192_vm3, %v5258_v6  ;;  %6566 = vmatmul.msk.f32.gmra.mxu3 %vm2192_vm3, %v5258_v6 }
 0xab4   :  { %v5057_v20 = vadd.f32 %v7094_v27, %v5056_v39 }
 0xab5   :  { %v7096_v36 = vpop.eup %7095  ;;  %v6138_v16 = vpop.f32.mrf.mxu3 }
 0xab6   :  { %v5061_v63 = vsel %vm5060_vm2, %v7094_v27, %v5057_v20  ;;  %v5068_v29 = vmul.f32 %v7096_v36, %v3332_v28  ;;  %6295 = vst.msk [vmem:[%s11492_s8 + $0x390] sm:$0xff] %vm6180_vm9, %v6138_v16  ;;  %v3335_v40 = vpop.xlane.xlu0 %3334  ;;  %vm5073_vm14 = vweird.f32 %v7096_v36 }
 0xab7   :  { %v5066_v61 = vsel %vm5063_vm13, %v5065_v50, %v5061_v63  ;;  %7097 = vrcp.f32 %v3335_v40  ;;  %vm5074_vm0 = vmor %vm5072_vm15, %vm5073_vm14  ;;  %v5092_v55 = vand.u32 2147483648, %v3335_v40  ;;  %v5090_v23 = vand.u32 2147483647, %v3335_v40 }
 0xab8   :  { %v5259_v10 = vmul.f32 %v11288_v1, %v5066_v61  ;;  %v5069_v34 = vsub.f32 1.0, %v5068_v29  ;;  %vm5086_vm5 = vweird.f32 %v3335_v40 }
 0xab9   :  { %v5093_v2 = vor.u32 1.1754944e-38, %v5092_v55  ;;  %vm5091_vm7 = vcmp.eq.f32.partialorder %v5090_v23, 8.507059e+37 }
 0xaba   :  { %5387 = vst.msk [vmem:[%s11491_s9 + $0x3d0] sm:$0xff] %vm2192_vm3, %v5259_v10  ;;  %v5070_v11 = vmul.f32 %v7096_v36, %v5069_v34  ;;  %6567 = vmatmul.msk.f32.gmra.mxu3 %vm2192_vm3, %v5259_v10 }
 0xabc   :  { %v5071_v56 = vadd.f32 %v7096_v36, %v5070_v11 }
 0xabd   :  { %v7098_v8 = vpop.eup %7097  ;;  %v6141_v1 = vpop.f32.mrf.mxu3 }
 0xabe   :  { %v3338_v15 = vpop.xlane.xlu1 %3337  ;;  %v5082_v7 = vmul.f32 %v7098_v8, %v3335_v40  ;;  %6296 = vst.msk [vmem:[%s11492_s8 + $0x398] sm:$0xff] %vm6180_vm9, %v6141_v1  ;;  %v5075_v58 = vsel %vm5074_vm0, %v7096_v36, %v5071_v56  ;;  %vm5087_vm4 = vweird.f32 %v7098_v8 }
 0xabf   :  { %7099 = vrcp.f32 %v3338_v15  ;;  %v5080_v43 = vsel %vm5077_vm1, %v5079_v24, %v5075_v58  ;;  %vm5088_vm6 = vmor %vm5086_vm5, %vm5087_vm4  ;;  %v5106_v26 = vand.u32 2147483648, %v3338_v15  ;;  %v5104_v57 = vand.u32 2147483647, %v3338_v15 }
 0xac0   :  { %v5083_v13 = vsub.f32 1.0, %v5082_v7  ;;  %v5260_v33 = vmul.f32 %v11302_v19, %v5080_v43  ;;  %vm5100_vm10 = vweird.f32 %v3338_v15 }
 0xac1   :  { %v5107_v37 = vor.u32 1.1754944e-38, %v5106_v26  ;;  %vm5105_vm12 = vcmp.eq.f32.partialorder %v5104_v57, 8.507059e+37 }
 0xac2   :  { %v5084_v17 = vmul.f32 %v7098_v8, %v5083_v13  ;;  %5388 = vst.msk [vmem:[%s11491_s9 + $0x3d8] sm:$0xff] %vm2192_vm3, %v5260_v33  ;;  %6568 = vmatmul.msk.f32.gmra.mxu3 %vm2192_vm3, %v5260_v33 }
 0xac4   :  { %v5085_v12 = vadd.f32 %v7098_v8, %v5084_v17 }
 0xac5   :  { %v7100_v32 = vpop.eup %7099  ;;  %v6144_v19 = vpop.f32.mrf.mxu3 }
 0xac6   :  { %v5096_v4 = vmul.f32 %v7100_v32, %v3338_v15  ;;  %v3341_v9 = vpop.xlane.xlu2 %3340  ;;  %6297 = vst.msk [vmem:[%s11492_s8 + $0x3a0] sm:$0xff] %vm6180_vm9, %v6144_v19  ;;  %v5089_v38 = vsel %vm5088_vm6, %v7098_v8, %v5085_v12  ;;  %vm5101_vm8 = vweird.f32 %v7100_v32 }
 0xac7   :  { %7101 = vrcp.f32 %v3341_v9  ;;  %v5094_v49 = vsel %vm5091_vm7, %v5093_v2, %v5089_v38  ;;  %vm5102_vm11 = vmor %vm5100_vm10, %vm5101_vm8  ;;  %v5120_v46 = vand.u32 2147483648, %v3341_v9  ;;  %v5118_v54 = vand.u32 2147483647, %v3341_v9 }
 0xac8   :  { %v5097_v59 = vsub.f32 1.0, %v5096_v4  ;;  %v5261_v52 = vmul.f32 %v11317_v3, %v5094_v49  ;;  %vm5114_vm13 = vweird.f32 %v3341_v9 }
 0xac9   :  { %v5121_v48 = vor.u32 1.1754944e-38, %v5120_v46  ;;  %vm5119_vm15 = vcmp.eq.f32.partialorder %v5118_v54, 8.507059e+37 }
 0xaca   :  { %v5098_v5 = vmul.f32 %v7100_v32, %v5097_v59  ;;  %5389 = vst.msk [vmem:[%s11491_s9 + $0x3e0] sm:$0xff] %vm2192_vm3, %v5261_v52  ;;  %6569 = vmatmul.msk.f32.gmra.mxu3 %vm2192_vm3, %v5261_v52 }
 0xacc   :  { %v5099_v21 = vadd.f32 %v7100_v32, %v5098_v5 }
 0xacd   :  { %v7102_v62 = vpop.eup %7101  ;;  %v6147_v35 = vpop.f32.mrf.mxu3 }
 0xace   :  { %v5103_v30 = vsel %vm5102_vm11, %v7100_v32, %v5099_v21  ;;  %v3344_v45 = vpop.xlane.xlu0 %3343  ;;  %v5110_v47 = vmul.f32 %v7102_v62, %v3341_v9  ;;  %6298 = vst.msk [vmem:[%s11492_s8 + $0x3a8] sm:$0xff] %vm6180_vm9, %v6147_v35  ;;  %vm5115_vm2 = vweird.f32 %v7102_v62 }
 0xacf   :  { %7103 = vrcp.f32 %v3344_v45  ;;  %v5108_v53 = vsel %vm5105_vm12, %v5107_v37, %v5103_v30  ;;  %vm5116_vm14 = vmor %vm5114_vm13, %vm5115_vm2  ;;  %v5134_v42 = vand.u32 2147483648, %v3344_v45  ;;  %v5132_v50 = vand.u32 2147483647, %v3344_v45 }
 0xad0   :  { %v5111_v3 = vsub.f32 1.0, %v5110_v47  ;;  %v5262_v27 = vmul.f32 %v11328_v14, %v5108_v53  ;;  %vm5128_vm1 = vweird.f32 %v3344_v45 }
 0xad1   :  { %v5135_v63 = vor.u32 1.1754944e-38, %v5134_v42  ;;  %vm5133_vm5 = vcmp.eq.f32.partialorder %v5132_v50, 8.507059e+37 }
 0xad2   :  { %v5112_v0 = vmul.f32 %v7102_v62, %v5111_v3  ;;  %5390 = vst.msk [vmem:[%s11491_s9 + $0x3e8] sm:$0xff] %vm2192_vm3, %v5262_v27  ;;  %6570 = vmatmul.msk.f32.gmra.mxu3 %vm2192_vm3, %v5262_v27 }
 0xad4   :  { %v5113_v28 = vadd.f32 %v7102_v62, %v5112_v0 }
 0xad5   :  { %v7104_v51 = vpop.eup %7103  ;;  %v6150_v22 = vpop.f32.mrf.mxu3 }
 0xad6   :  { %v5124_v60 = vmul.f32 %v7104_v51, %v3344_v45  ;;  %v5117_v44 = vsel %vm5116_vm14, %v7102_v62, %v5113_v28  ;;  %6299 = vst.msk [vmem:[%s11492_s8 + $0x3b0] sm:$0xff] %vm6180_vm9, %v6150_v22  ;;  %vm5129_vm0 = vweird.f32 %v7104_v51 }
 0xad7   :  { %v5122_v39 = vsel %vm5119_vm15, %v5121_v48, %v5117_v44  ;;  %vm5130_vm4 = vmor %vm5128_vm1, %vm5129_vm0 }
 0xad8   :  { %v5125_v14 = vsub.f32 1.0, %v5124_v60  ;;  %v5263_v6 = vmul.f32 %v11348_v25, %v5122_v39 }
 0xada   :  { %v5126_v20 = vmul.f32 %v7104_v51, %v5125_v14  ;;  %5391 = vst.msk [vmem:[%s11491_s9 + $0x3f0] sm:$0xff] %vm2192_vm3, %v5263_v6  ;;  %6571 = vmatmul.msk.f32.gmra.mxu3 %vm2192_vm3, %v5263_v6 }
 0xadc   :  { %v5127_v36 = vadd.f32 %v7104_v51, %v5126_v20 }
 0xadd   :  { %v6153_v61 = vpop.f32.mrf.mxu3 }
 0xade   :  { %v5131_v29 = vsel %vm5130_vm4, %v7104_v51, %v5127_v36  ;;  %6300 = vst.msk [vmem:[%s11492_s8 + $0x3b8] sm:$0xff] %vm6180_vm9, %v6153_v61 }
 0xadf   :  { %v5136_v16 = vsel %vm5133_vm5, %v5135_v63, %v5131_v29 }
 0xae0   :  { %v5264_v25 = vmul.f32 %v11358_v41, %v5136_v16 }
 0xae2   :  { %5392 = vst.msk [vmem:[%s11491_s9 + $0x3f8] sm:$0xff] %vm2192_vm3, %v5264_v25  ;;  %6572 = vmatmul.msk.f32.gmra.mxu3 %vm2192_vm3, %v5264_v25 }
 0xb2d   :  { %v6156_v40 = vpop.f32.mrf.mxu3 }
 0xb2e   :  { %6301 = vst.msk [vmem:[%s11492_s8 + $0x3c0] sm:$0xff] %vm6180_vm9, %v6156_v40 }
 0xb35   :  { %v6159_v10 = vpop.f32.mrf.mxu3 }
 0xb36   :  { %6302 = vst.msk [vmem:[%s11492_s8 + $0x3c8] sm:$0xff] %vm6180_vm9, %v6159_v10 }
 0xb3d   :  { %v6162_v41 = vpop.f32.mrf.mxu3 }
 0xb3e   :  { %6303 = vst.msk [vmem:[%s11492_s8 + $0x3d0] sm:$0xff] %vm6180_vm9, %v6162_v41 }
 0xb45   :  { %v6165_v34 = vpop.f32.mrf.mxu3 }
 0xb46   :  { %6304 = vst.msk [vmem:[%s11492_s8 + $0x3d8] sm:$0xff] %vm6180_vm9, %v6165_v34 }
 0xb4d   :  { %v6168_v11 = vpop.f32.mrf.mxu3 }
 0xb4e   :  { %6305 = vst.msk [vmem:[%s11492_s8 + $0x3e0] sm:$0xff] %vm6180_vm9, %v6168_v11 }
 0xb55   :  { %v6171_v31 = vpop.f32.mrf.mxu3 }
 0xb56   :  { %6306 = vst.msk [vmem:[%s11492_s8 + $0x3e8] sm:$0xff] %vm6180_vm9, %v6171_v31 }
 0xb5d   :  { %v6174_v18 = vpop.f32.mrf.mxu3 }
 0xb5e   :  { %6307 = vst.msk [vmem:[%s11492_s8 + $0x3f0] sm:$0xff] %vm6180_vm9, %v6174_v18 }
 0xb65   :  { %v6177_v56 = vpop.f32.mrf.mxu3 }
 0xb66   :  { %6308 = vst.msk [vmem:[%s11492_s8 + $0x3f8] sm:$0xff] %vm6180_vm9, %v6177_v56 }

</bundles_post_ra>
